<compile_context>
chip_gen: v7x
topology: tpu7x:2x2x1
jax: 0.10.0
libtpu: 0.0.40
codegen_flags: <defaults>
</compile_context>

<pallas_src>
import functools
import math

import jax
import jax.numpy as jnp
from jax.experimental import pallas as pl
from jax.experimental.pallas import tpu as pltpu

EPS = 1e-5  # torch.nn.LayerNorm default


def _round_up(x, m):
    return ((x + m - 1) // m) * m


@functools.lru_cache(maxsize=1)
def _vmem_limit():
    # Per-generation VMEM budget: 75% of physical capacity, capped at 100 MiB.
    cap = 64 * 1024 * 1024
    try:
        cap = int(pltpu.get_tpu_info().vmem_capacity_bytes)
    except Exception:
        pass
    return int(min(100 * 1024 * 1024, (cap * 3) // 4))


def _gelu_tanh(x):
    c = math.sqrt(2.0 / math.pi)
    return 0.5 * x * (1.0 + jnp.tanh(c * (x + 0.044715 * x * x * x)))


def _layernorm_f32(x, gamma, beta):
    """Returns (normalized*gamma+beta, x cast to f32). All stats in f32 (biased var)."""
    x32 = x.astype(jnp.float32)
    mean = jnp.mean(x32, axis=-1, keepdims=True)
    xc = x32 - mean
    var = jnp.mean(xc * xc, axis=-1, keepdims=True)
    y = xc * jax.lax.rsqrt(var + EPS)
    y = y * gamma.astype(jnp.float32) + beta.astype(jnp.float32)
    return y, x32


# ---------------------------------------------------------------------------
# Kernel 1: fused PreNorm + Attention + output projection + residual
# ---------------------------------------------------------------------------
def attn_block_kernel(x_ref, g_ref, b_ref, wqkv_ref, wout_ref, bout_ref, o_ref,
                      *, heads, dim_head, scale):
    # x tile: (N, D) -- one batch item per grid step (batch dim squeezed).
    y, x32 = _layernorm_f32(x_ref[...], g_ref[...], b_ref[...])
    mxu_dt = wqkv_ref.dtype
    qkv = jnp.dot(y.astype(mxu_dt), wqkv_ref[...],
                  preferred_element_type=jnp.float32)            # (N, 3*inner)
    inner = heads * dim_head
    outs = []
    for h in range(heads):                                       # static unroll
        lo = h * dim_head
        q = qkv[:, lo:lo + dim_head].astype(mxu_dt)
        k = qkv[:, inner + lo:inner + lo + dim_head].astype(mxu_dt)
        v = qkv[:, 2 * inner + lo:2 * inner + lo + dim_head].astype(mxu_dt)
        dots = jax.lax.dot_general(q, k, (((1,), (1,)), ((), ())),
                                   preferred_element_type=jnp.float32) * scale  # (N, N)
        m = jnp.max(dots, axis=-1, keepdims=True)
        p = jnp.exp(dots - m)
        attn = p * pl.reciprocal(jnp.sum(p, axis=-1, keepdims=True), approx=False)
        outs.append(jnp.dot(attn.astype(mxu_dt), v,
                            preferred_element_type=jnp.float32))  # (N, dim_head)
    o = jnp.concatenate(outs, axis=-1)                            # (N, inner)
    out = jnp.dot(o.astype(wout_ref.dtype), wout_ref[...],
                  preferred_element_type=jnp.float32)
    out = out + bout_ref[...].astype(jnp.float32) + x32
    o_ref[...] = out.astype(o_ref.dtype)


def attention_block(x, gamma, beta, w_qkv, w_out, b_out, *, heads, dim_head):
    B, N, D = x.shape
    inner = heads * dim_head
    scale = dim_head ** (-0.5)
    kern = functools.partial(attn_block_kernel, heads=heads, dim_head=dim_head,
                             scale=scale)
    # TODO(synk): when B is large and N tiny, block several batch items per grid step
    #             (TB*N >= 256 rows) to keep each MXU push full.
    return pl.pallas_call(
        kern,
        out_shape=jax.ShapeDtypeStruct((B, N, D), x.dtype),
        grid_spec=pltpu.PrefetchScalarGridSpec(
            num_scalar_prefetch=0,
            grid=(B,),
            in_specs=[
                pl.BlockSpec((None, N, D), lambda i: (i, 0, 0)),   # x (one batch)
                pl.BlockSpec((1, D), lambda i: (0, 0)),            # LN gamma
                pl.BlockSpec((1, D), lambda i: (0, 0)),            # LN beta
                pl.BlockSpec((D, 3 * inner), lambda i: (0, 0)),    # W_qkv (no bias)
                pl.BlockSpec((inner, D), lambda i: (0, 0)),        # W_out
                pl.BlockSpec((1, D), lambda i: (0, 0)),            # b_out
            ],
            out_specs=pl.BlockSpec((None, N, D), lambda i: (i, 0, 0)),
        ),
        compiler_params=pltpu.CompilerParams(
            dimension_semantics=("parallel",),
            vmem_limit_bytes=_vmem_limit()),
    )(x, gamma.reshape(1, D), beta.reshape(1, D), w_qkv, w_out, b_out.reshape(1, D))


# ---------------------------------------------------------------------------
# Kernel 2: fused PreNorm + FeedForward (FF1 + GELU + FF2) + residual
# ---------------------------------------------------------------------------
def mlp_block_kernel(x_ref, g_ref, b_ref, w1_ref, b1_ref, w2_ref, b2_ref, o_ref):
    y, x32 = _layernorm_f32(x_ref[...], g_ref[...], b_ref[...])   # (tile_rows, D)
    h = jnp.dot(y.astype(w1_ref.dtype), w1_ref[...],
                preferred_element_type=jnp.float32)               # (tile_rows, H)
    h = _gelu_tanh(h + b1_ref[...].astype(jnp.float32))
    out = jnp.dot(h.astype(w2_ref.dtype), w2_ref[...],
                  preferred_element_type=jnp.float32)             # (tile_rows, D)
    out = out + b2_ref[...].astype(jnp.float32) + x32
    o_ref[...] = out.astype(o_ref.dtype)


def _pick_tile_rows(rows, want=256):
    t = min(_round_up(want, 8), _round_up(rows, 8))
    # keep >= 2 grid steps when possible so v7x's second TensorCore gets work
    if rows > 8 and pl.cdiv(rows, t) < 2:
        t = max(8, _round_up(pl.cdiv(rows, 2), 8))
    return t


def mlp_block(x, gamma, beta, w1, b1, w2, b2, *, tile_rows=256):
    B, N, D = x.shape
    H = w1.shape[1]
    rows = B * N
    t = _pick_tile_rows(rows, tile_rows)
    xf = x.reshape(rows, D)   # contiguous reshape (no copy); no pad / trailing slice
    # TODO(synk): for very large D/H tile W_ff1/W_ff2 over their output dims (second
    #             parallel grid axis) instead of keeping both whole in VMEM.
    out = pl.pallas_call(
        mlp_block_kernel,
        out_shape=jax.ShapeDtypeStruct((rows, D), x.dtype),
        grid_spec=pltpu.PrefetchScalarGridSpec(
            num_scalar_prefetch=0,
            grid=(pl.cdiv(rows, t),),
            in_specs=[
                pl.BlockSpec((t, D), lambda i: (i, 0)),            # x rows tile
                pl.BlockSpec((1, D), lambda i: (0, 0)),            # LN gamma
                pl.BlockSpec((1, D), lambda i: (0, 0)),            # LN beta
                pl.BlockSpec((D, H), lambda i: (0, 0)),            # W_ff1
                pl.BlockSpec((1, H), lambda i: (0, 0)),            # b_ff1
                pl.BlockSpec((H, D), lambda i: (0, 0)),            # W_ff2
                pl.BlockSpec((1, D), lambda i: (0, 0)),            # b_ff2
            ],
            out_specs=pl.BlockSpec((t, D), lambda i: (i, 0)),
        ),
        compiler_params=pltpu.CompilerParams(
            dimension_semantics=("parallel",),
            vmem_limit_bytes=_vmem_limit()),
    )(xf, gamma.reshape(1, D), beta.reshape(1, D), w1, b1.reshape(1, H), w2,
      b2.reshape(1, D))
    return out.reshape(B, N, D)


# ---------------------------------------------------------------------------
# Full Transformer forward built from the two fused kernels
# ---------------------------------------------------------------------------
def transformer_forward(x, params, *, heads, dim_head):
    for p in params:
        x = attention_block(x, p["ln1_g"], p["ln1_b"], p["w_qkv"], p["w_out"],
                            p["b_out"], heads=heads, dim_head=dim_head)
        x = mlp_block(x, p["ln2_g"], p["ln2_b"], p["w_ff1"], p["b_ff1"],
                      p["w_ff2"], p["b_ff2"])
    return x


# ---------------------------------------------------------------------------
# Pure-JAX reference (mirrors the PyTorch module; tanh-GELU as in the kernel)
# ---------------------------------------------------------------------------
def transformer_ref(x, params, *, heads, dim_head):
    B, N, D = x.shape
    inner = heads * dim_head
    scale = dim_head ** (-0.5)

    def ln(t, g, b):
        t = t.astype(jnp.float32)
        mu = jnp.mean(t, axis=-1, keepdims=True)
        var = jnp.mean((t - mu) ** 2, axis=-1, keepdims=True)
        return (t - mu) * jax.lax.rsqrt(var + EPS) * g + b

    def sh(t):
        return t.reshape(B, N, heads, dim_head).transpose(0, 2, 1, 3)

    for p in params:
        y = ln(x, p["ln1_g"], p["ln1_b"])
        qkv = y @ p["w_qkv"]
        q, k, v = map(sh, jnp.split(qkv, 3, axis=-1))
        dots = jnp.einsum("bhnd,bhmd->bhnm", q, k) * scale
        attn = jax.nn.softmax(dots, axis=-1)
        o = jnp.einsum("bhnm,bhmd->bhnd", attn, v)
        o = o.transpose(0, 2, 1, 3).reshape(B, N, inner)
        x = o @ p["w_out"] + p["b_out"] + x
        y = ln(x, p["ln2_g"], p["ln2_b"])
        h = _gelu_tanh(y @ p["w_ff1"] + p["b_ff1"])
        x = h @ p["w_ff2"] + p["b_ff2"] + x
    return x


if __name__ == "__main__":
    # Keep XLA-side reference matmuls in full f32 so they match the in-kernel
    # f32-accumulated MXU matmuls.
    jax.config.update("jax_default_matmul_precision", "float32")

    # Small but lane-dense (multiple-of-128) transformer dims.
    B, N = 2, 8
    DIM, DEPTH, HEADS, DIM_HEAD, MLP_DIM = 128, 2, 2, 64, 256
    INNER = HEADS * DIM_HEAD

    key = jax.random.PRNGKey(0)
    key, kx = jax.random.split(key)
    x = jax.random.normal(kx, (B, N, DIM), dtype=jnp.float32)

    params = []
    for _ in range(DEPTH):
        key, *ks = jax.random.split(key, 12)
        params.append(dict(
            ln1_g=1.0 + 0.1 * jax.random.normal(ks[0], (DIM,), jnp.float32),
            ln1_b=0.1 * jax.random.normal(ks[1], (DIM,), jnp.float32),
            w_qkv=0.02 * jax.random.normal(ks[2], (DIM, 3 * INNER), jnp.float32),
            w_out=0.02 * jax.random.normal(ks[3], (INNER, DIM), jnp.float32),
            b_out=0.01 * jax.random.normal(ks[4], (DIM,), jnp.float32),
            ln2_g=1.0 + 0.1 * jax.random.normal(ks[5], (DIM,), jnp.float32),
            ln2_b=0.1 * jax.random.normal(ks[6], (DIM,), jnp.float32),
            w_ff1=0.02 * jax.random.normal(ks[7], (DIM, MLP_DIM), jnp.float32),
            b_ff1=0.01 * jax.random.normal(ks[8], (MLP_DIM,), jnp.float32),
            w_ff2=0.02 * jax.random.normal(ks[9], (MLP_DIM, DIM), jnp.float32),
            b_ff2=0.01 * jax.random.normal(ks[10], (DIM,), jnp.float32),
        ))

    fwd = jax.jit(functools.partial(transformer_forward, heads=HEADS,
                                    dim_head=DIM_HEAD))
    out = jax.block_until_ready(fwd(x, params))

    ref = transformer_ref(x, params, heads=HEADS, dim_head=DIM_HEAD)
    assert out.shape == (B, N, DIM)
    err = float(jnp.max(jnp.abs(out - ref)))
    assert jnp.allclose(out, ref, atol=1e-3, rtol=1e-3), f"max abs err {err}"

    print("KERNEL_OK")
</pallas_src>

<mosaic_0001>
module attributes {stable_mosaic.version = 11 : i64} {
  func.func @mlp_block_kernel(%arg0: i32, %arg1: memref<8x128xf32, #tpu.memory_space<vmem>>, %arg2: memref<1x128xf32, #tpu.memory_space<vmem>>, %arg3: memref<1x128xf32, #tpu.memory_space<vmem>>, %arg4: memref<128x256xf32, #tpu.memory_space<vmem>>, %arg5: memref<1x256xf32, #tpu.memory_space<vmem>>, %arg6: memref<256x128xf32, #tpu.memory_space<vmem>>, %arg7: memref<1x128xf32, #tpu.memory_space<vmem>>, %arg8: memref<8x128xf32, #tpu.memory_space<vmem>>) attributes {dimension_semantics = [#tpu.dimension_semantics<parallel>], iteration_bounds = array<i64: 2>, scalar_prefetch = 0 : i64, scratch_operands = 0 : i64, tpu.core_type = #tpu.core_type<tc>, window_params = [{transform_indices = @transform_0, window_bounds = array<i64: 8, 128>}, {pipeline_mode = #tpu.pipeline_mode<synchronous>, transform_indices = @transform_1, window_bounds = array<i64: 1, 128>}, {pipeline_mode = #tpu.pipeline_mode<synchronous>, transform_indices = @transform_2, window_bounds = array<i64: 1, 128>}, {pipeline_mode = #tpu.pipeline_mode<synchronous>, transform_indices = @transform_3, window_bounds = array<i64: 128, 256>}, {pipeline_mode = #tpu.pipeline_mode<synchronous>, transform_indices = @transform_4, window_bounds = array<i64: 1, 256>}, {pipeline_mode = #tpu.pipeline_mode<synchronous>, transform_indices = @transform_5, window_bounds = array<i64: 256, 128>}, {pipeline_mode = #tpu.pipeline_mode<synchronous>, transform_indices = @transform_6, window_bounds = array<i64: 1, 128>}, {transform_indices = @transform_7, window_bounds = array<i64: 8, 128>}]} {
    %c0 = arith.constant 0 : index
    %c0_0 = arith.constant 0 : index
    %0 = vector.load %arg1[%c0, %c0_0] : memref<8x128xf32, #tpu.memory_space<vmem>>, vector<8x128xf32>
    %c0_1 = arith.constant 0 : index
    %c0_2 = arith.constant 0 : index
    %1 = vector.load %arg2[%c0_1, %c0_2] : memref<1x128xf32, #tpu.memory_space<vmem>>, vector<1x128xf32>
    %c0_3 = arith.constant 0 : index
    %c0_4 = arith.constant 0 : index
    %2 = vector.load %arg3[%c0_3, %c0_4] : memref<1x128xf32, #tpu.memory_space<vmem>>, vector<1x128xf32>
    %cst = arith.constant dense<0.000000e+00> : vector<8xf32>
    %3 = vector.multi_reduction <add>, %0, %cst [1] : vector<8x128xf32> to vector<8xf32>
    %4 = vector.shape_cast %3 : vector<8xf32> to vector<8x1xf32>
    %cst_5 = arith.constant 1.280000e+02 : f32
    %5 = vector.broadcast %cst_5 : f32 to vector<8x1xf32>
    %6 = arith.divf %4, %5 : vector<8x1xf32>
    %7 = vector.broadcast %6 : vector<8x1xf32> to vector<8x128xf32>
    %8 = arith.subf %0, %7 : vector<8x128xf32>
    %9 = arith.mulf %8, %8 : vector<8x128xf32>
    %cst_6 = arith.constant dense<0.000000e+00> : vector<8xf32>
    %10 = vector.multi_reduction <add>, %9, %cst_6 [1] : vector<8x128xf32> to vector<8xf32>
    %11 = vector.shape_cast %10 : vector<8xf32> to vector<8x1xf32>
    %cst_7 = arith.constant 1.280000e+02 : f32
    %12 = vector.broadcast %cst_7 : f32 to vector<8x1xf32>
    %13 = arith.divf %11, %12 : vector<8x1xf32>
    %cst_8 = arith.constant 9.99999974E-6 : f32
    %14 = vector.broadcast %cst_8 : f32 to vector<8x1xf32>
    %15 = arith.addf %13, %14 : vector<8x1xf32>
    %16 = math.rsqrt %15 : vector<8x1xf32>
    %17 = vector.broadcast %16 : vector<8x1xf32> to vector<8x128xf32>
    %18 = arith.mulf %8, %17 : vector<8x128xf32>
    %19 = vector.broadcast %1 : vector<1x128xf32> to vector<8x128xf32>
    %20 = arith.mulf %18, %19 : vector<8x128xf32>
    %21 = vector.broadcast %2 : vector<1x128xf32> to vector<8x128xf32>
    %22 = arith.addf %20, %21 : vector<8x128xf32>
    %c0_9 = arith.constant 0 : index
    %c0_10 = arith.constant 0 : index
    %23 = vector.load %arg4[%c0_9, %c0_10] : memref<128x256xf32, #tpu.memory_space<vmem>>, vector<128x256xf32>
    %cst_11 = arith.constant dense<0.000000e+00> : vector<8x256xf32>
    %24 = tpu.matmul %22, %23, %cst_11 {dimension_numbers = #tpu.dot_dimension_numbers<[1], [0], [0], [1], [0, 0, 1, 1], [], []>, precision = #tpu.contract_precision<fp32>} : vector<8x128xf32>, vector<128x256xf32>, vector<8x256xf32> -> vector<8x256xf32>
    %c0_12 = arith.constant 0 : index
    %c0_13 = arith.constant 0 : index
    %25 = vector.load %arg5[%c0_12, %c0_13] : memref<1x256xf32, #tpu.memory_space<vmem>>, vector<1x256xf32>
    %26 = vector.broadcast %25 : vector<1x256xf32> to vector<8x256xf32>
    %27 = arith.addf %24, %26 : vector<8x256xf32>
    %cst_14 = arith.constant 5.000000e-01 : f32
    %28 = vector.broadcast %cst_14 : f32 to vector<8x256xf32>
    %29 = arith.mulf %28, %27 : vector<8x256xf32>
    %cst_15 = arith.constant 4.471500e-02 : f32
    %30 = vector.broadcast %cst_15 : f32 to vector<8x256xf32>
    %31 = arith.mulf %30, %27 : vector<8x256xf32>
    %32 = arith.mulf %31, %27 : vector<8x256xf32>
    %33 = arith.mulf %32, %27 : vector<8x256xf32>
    %34 = arith.addf %27, %33 : vector<8x256xf32>
    %cst_16 = arith.constant 0.797884583 : f32
    %35 = vector.broadcast %cst_16 : f32 to vector<8x256xf32>
    %36 = arith.mulf %35, %34 : vector<8x256xf32>
    %37 = math.tanh %36 : vector<8x256xf32>
    %cst_17 = arith.constant 1.000000e+00 : f32
    %38 = vector.broadcast %cst_17 : f32 to vector<8x256xf32>
    %39 = arith.addf %38, %37 : vector<8x256xf32>
    %40 = arith.mulf %29, %39 : vector<8x256xf32>
    %c0_18 = arith.constant 0 : index
    %c0_19 = arith.constant 0 : index
    %41 = vector.load %arg6[%c0_18, %c0_19] : memref<256x128xf32, #tpu.memory_space<vmem>>, vector<256x128xf32>
    %cst_20 = arith.constant dense<0.000000e+00> : vector<8x128xf32>
    %42 = tpu.matmul %40, %41, %cst_20 {dimension_numbers = #tpu.dot_dimension_numbers<[1], [0], [0], [1], [0, 0, 1, 1], [], []>, precision = #tpu.contract_precision<fp32>} : vector<8x256xf32>, vector<256x128xf32>, vector<8x128xf32> -> vector<8x128xf32>
    %c0_21 = arith.constant 0 : index
    %c0_22 = arith.constant 0 : index
    %43 = vector.load %arg7[%c0_21, %c0_22] : memref<1x128xf32, #tpu.memory_space<vmem>>, vector<1x128xf32>
    %44 = vector.broadcast %43 : vector<1x128xf32> to vector<8x128xf32>
    %45 = arith.addf %42, %44 : vector<8x128xf32>
    %46 = arith.addf %45, %0 : vector<8x128xf32>
    %c0_23 = arith.constant 0 : index
    %c0_24 = arith.constant 0 : index
    %47 = vector.load %arg8[%c0_23, %c0_24] : memref<8x128xf32, #tpu.memory_space<vmem>>, vector<8x128xf32>
    tpu.vector_store %arg8[%c0_23, %c0_24], %46 {strides = array<i32>} : memref<8x128xf32, #tpu.memory_space<vmem>>, vector<8x128xf32>,
    return
  }
  func.func @transform_0(%arg0: i32) -> (i32, i32) {
    %c0_i32 = arith.constant 0 : i32
    %c0_i32_0 = arith.constant 0 : i32
    return %arg0, %c0_i32 : i32, i32
  }
  func.func @transform_1(%arg0: i32) -> (i32, i32) {
    %c0_i32 = arith.constant 0 : i32
    %c0_i32_0 = arith.constant 0 : i32
    %c0_i32_1 = arith.constant 0 : i32
    return %c0_i32, %c0_i32_0 : i32, i32
  }
  func.func @transform_2(%arg0: i32) -> (i32, i32) {
    %c0_i32 = arith.constant 0 : i32
    %c0_i32_0 = arith.constant 0 : i32
    %c0_i32_1 = arith.constant 0 : i32
    return %c0_i32, %c0_i32_0 : i32, i32
  }
  func.func @transform_3(%arg0: i32) -> (i32, i32) {
    %c0_i32 = arith.constant 0 : i32
    %c0_i32_0 = arith.constant 0 : i32
    %c0_i32_1 = arith.constant 0 : i32
    return %c0_i32, %c0_i32_0 : i32, i32
  }
  func.func @transform_4(%arg0: i32) -> (i32, i32) {
    %c0_i32 = arith.constant 0 : i32
    %c0_i32_0 = arith.constant 0 : i32
    %c0_i32_1 = arith.constant 0 : i32
    return %c0_i32, %c0_i32_0 : i32, i32
  }
  func.func @transform_5(%arg0: i32) -> (i32, i32) {
    %c0_i32 = arith.constant 0 : i32
    %c0_i32_0 = arith.constant 0 : i32
    %c0_i32_1 = arith.constant 0 : i32
    return %c0_i32, %c0_i32_0 : i32, i32
  }
  func.func @transform_6(%arg0: i32) -> (i32, i32) {
    %c0_i32 = arith.constant 0 : i32
    %c0_i32_0 = arith.constant 0 : i32
    %c0_i32_1 = arith.constant 0 : i32
    return %c0_i32, %c0_i32_0 : i32, i32
  }
  func.func @transform_7(%arg0: i32) -> (i32, i32) {
    %c0_i32 = arith.constant 0 : i32
    %c0_i32_0 = arith.constant 0 : i32
    return %arg0, %c0_i32 : i32, i32
  }
}

module attributes {stable_mosaic.version = 11 : i64} {
  func.func @attn_block_kernel(%arg0: i32, %arg1: memref<1x8x128xf32, #tpu.memory_space<vmem>>, %arg2: memref<1x128xf32, #tpu.memory_space<vmem>>, %arg3: memref<1x128xf32, #tpu.memory_space<vmem>>, %arg4: memref<128x384xf32, #tpu.memory_space<vmem>>, %arg5: memref<128x128xf32, #tpu.memory_space<vmem>>, %arg6: memref<1x128xf32, #tpu.memory_space<vmem>>, %arg7: memref<1x8x128xf32, #tpu.memory_space<vmem>>) attributes {dimension_semantics = [#tpu.dimension_semantics<parallel>], iteration_bounds = array<i64: 2>, scalar_prefetch = 0 : i64, scratch_operands = 0 : i64, tpu.core_type = #tpu.core_type<tc>, window_params = [{transform_indices = @transform_0, window_bounds = array<i64: 1, 8, 128>}, {pipeline_mode = #tpu.pipeline_mode<synchronous>, transform_indices = @transform_1, window_bounds = array<i64: 1, 128>}, {pipeline_mode = #tpu.pipeline_mode<synchronous>, transform_indices = @transform_2, window_bounds = array<i64: 1, 128>}, {pipeline_mode = #tpu.pipeline_mode<synchronous>, transform_indices = @transform_3, window_bounds = array<i64: 128, 384>}, {pipeline_mode = #tpu.pipeline_mode<synchronous>, transform_indices = @transform_4, window_bounds = array<i64: 128, 128>}, {pipeline_mode = #tpu.pipeline_mode<synchronous>, transform_indices = @transform_5, window_bounds = array<i64: 1, 128>}, {transform_indices = @transform_6, window_bounds = array<i64: 1, 8, 128>}]} {
    %c0 = arith.constant 0 : index
    %c0_0 = arith.constant 0 : index
    %c0_1 = arith.constant 0 : index
    %0 = vector.load %arg1[%c0, %c0_0, %c0_1] : memref<1x8x128xf32, #tpu.memory_space<vmem>>, vector<1x8x128xf32>
    %1 = vector.shape_cast %0 : vector<1x8x128xf32> to vector<8x128xf32>
    %c0_2 = arith.constant 0 : index
    %c0_3 = arith.constant 0 : index
    %2 = vector.load %arg2[%c0_2, %c0_3] : memref<1x128xf32, #tpu.memory_space<vmem>>, vector<1x128xf32>
    %c0_4 = arith.constant 0 : index
    %c0_5 = arith.constant 0 : index
    %3 = vector.load %arg3[%c0_4, %c0_5] : memref<1x128xf32, #tpu.memory_space<vmem>>, vector<1x128xf32>
    %cst = arith.constant dense<0.000000e+00> : vector<8xf32>
    %4 = vector.multi_reduction <add>, %1, %cst [1] : vector<8x128xf32> to vector<8xf32>
    %5 = vector.shape_cast %4 : vector<8xf32> to vector<8x1xf32>
    %cst_6 = arith.constant 1.280000e+02 : f32
    %6 = vector.broadcast %cst_6 : f32 to vector<8x1xf32>
    %7 = arith.divf %5, %6 : vector<8x1xf32>
    %8 = vector.broadcast %7 : vector<8x1xf32> to vector<8x128xf32>
    %9 = arith.subf %1, %8 : vector<8x128xf32>
    %10 = arith.mulf %9, %9 : vector<8x128xf32>
    %cst_7 = arith.constant dense<0.000000e+00> : vector<8xf32>
    %11 = vector.multi_reduction <add>, %10, %cst_7 [1] : vector<8x128xf32> to vector<8xf32>
    %12 = vector.shape_cast %11 : vector<8xf32> to vector<8x1xf32>
    %cst_8 = arith.constant 1.280000e+02 : f32
    %13 = vector.broadcast %cst_8 : f32 to vector<8x1xf32>
    %14 = arith.divf %12, %13 : vector<8x1xf32>
    %cst_9 = arith.constant 9.99999974E-6 : f32
    %15 = vector.broadcast %cst_9 : f32 to vector<8x1xf32>
    %16 = arith.addf %14, %15 : vector<8x1xf32>
    %17 = math.rsqrt %16 : vector<8x1xf32>
    %18 = vector.broadcast %17 : vector<8x1xf32> to vector<8x128xf32>
    %19 = arith.mulf %9, %18 : vector<8x128xf32>
    %20 = vector.broadcast %2 : vector<1x128xf32> to vector<8x128xf32>
    %21 = arith.mulf %19, %20 : vector<8x128xf32>
    %22 = vector.broadcast %3 : vector<1x128xf32> to vector<8x128xf32>
    %23 = arith.addf %21, %22 : vector<8x128xf32>
    %c0_10 = arith.constant 0 : index
    %c0_11 = arith.constant 0 : index
    %24 = vector.load %arg4[%c0_10, %c0_11] : memref<128x384xf32, #tpu.memory_space<vmem>>, vector<128x384xf32>
    %cst_12 = arith.constant dense<0.000000e+00> : vector<8x384xf32>
    %25 = tpu.matmul %23, %24, %cst_12 {dimension_numbers = #tpu.dot_dimension_numbers<[1], [0], [0], [1], [0, 0, 1, 1], [], []>, precision = #tpu.contract_precision<fp32>} : vector<8x128xf32>, vector<128x384xf32>, vector<8x384xf32> -> vector<8x384xf32>
    %26 = vector.extract_strided_slice %25 {offsets = [0, 0], sizes = [8, 64], strides = [1, 1]} : vector<8x384xf32> to vector<8x64xf32>
    %27 = vector.extract_strided_slice %25 {offsets = [0, 128], sizes = [8, 64], strides = [1, 1]} : vector<8x384xf32> to vector<8x64xf32>
    %28 = vector.extract_strided_slice %25 {offsets = [0, 256], sizes = [8, 64], strides = [1, 1]} : vector<8x384xf32> to vector<8x64xf32>
    %cst_13 = arith.constant dense<0.000000e+00> : vector<8x8xf32>
    %29 = tpu.matmul %26, %27, %cst_13 {dimension_numbers = #tpu.dot_dimension_numbers<[1], [1], [0], [0], [0, 0, 1, 0], [], []>, precision = #tpu.contract_precision<fp32>} : vector<8x64xf32>, vector<8x64xf32>, vector<8x8xf32> -> vector<8x8xf32>
    %cst_14 = arith.constant 1.250000e-01 : f32
    %30 = vector.broadcast %cst_14 : f32 to vector<8x8xf32>
    %31 = arith.mulf %29, %30 : vector<8x8xf32>
    %cst_15 = arith.constant dense<0xFF800000> : vector<8xf32>
    %32 = vector.multi_reduction <maximumf>, %31, %cst_15 [1] : vector<8x8xf32> to vector<8xf32>
    %33 = vector.shape_cast %32 : vector<8xf32> to vector<8x1xf32>
    %34 = vector.broadcast %33 : vector<8x1xf32> to vector<8x8xf32>
    %35 = arith.subf %31, %34 : vector<8x8xf32>
    %36 = math.exp %35 : vector<8x8xf32>
    %cst_16 = arith.constant dense<0.000000e+00> : vector<8xf32>
    %37 = vector.multi_reduction <add>, %36, %cst_16 [1] : vector<8x8xf32> to vector<8xf32>
    %38 = vector.shape_cast %37 : vector<8xf32> to vector<8x1xf32>
    %39 = tpu.reciprocal %38 : vector<8x1xf32> -> vector<8x1xf32>
    %40 = vector.broadcast %39 : vector<8x1xf32> to vector<8x8xf32>
    %41 = arith.mulf %36, %40 : vector<8x8xf32>
    %cst_17 = arith.constant dense<0.000000e+00> : vector<8x64xf32>
    %42 = tpu.matmul %41, %28, %cst_17 {dimension_numbers = #tpu.dot_dimension_numbers<[1], [0], [0], [1], [0, 0, 1, 1], [], []>, precision = #tpu.contract_precision<fp32>} : vector<8x8xf32>, vector<8x64xf32>, vector<8x64xf32> -> vector<8x64xf32>
    %43 = vector.extract_strided_slice %25 {offsets = [0, 64], sizes = [8, 64], strides = [1, 1]} : vector<8x384xf32> to vector<8x64xf32>
    %44 = vector.extract_strided_slice %25 {offsets = [0, 192], sizes = [8, 64], strides = [1, 1]} : vector<8x384xf32> to vector<8x64xf32>
    %45 = vector.extract_strided_slice %25 {offsets = [0, 320], sizes = [8, 64], strides = [1, 1]} : vector<8x384xf32> to vector<8x64xf32>
    %cst_18 = arith.constant dense<0.000000e+00> : vector<8x8xf32>
    %46 = tpu.matmul %43, %44, %cst_18 {dimension_numbers = #tpu.dot_dimension_numbers<[1], [1], [0], [0], [0, 0, 1, 0], [], []>, precision = #tpu.contract_precision<fp32>} : vector<8x64xf32>, vector<8x64xf32>, vector<8x8xf32> -> vector<8x8xf32>
    %cst_19 = arith.constant 1.250000e-01 : f32
    %47 = vector.broadcast %cst_19 : f32 to vector<8x8xf32>
    %48 = arith.mulf %46, %47 : vector<8x8xf32>
    %cst_20 = arith.constant dense<0xFF800000> : vector<8xf32>
    %49 = vector.multi_reduction <maximumf>, %48, %cst_20 [1] : vector<8x8xf32> to vector<8xf32>
    %50 = vector.shape_cast %49 : vector<8xf32> to vector<8x1xf32>
    %51 = vector.broadcast %50 : vector<8x1xf32> to vector<8x8xf32>
    %52 = arith.subf %48, %51 : vector<8x8xf32>
    %53 = math.exp %52 : vector<8x8xf32>
    %cst_21 = arith.constant dense<0.000000e+00> : vector<8xf32>
    %54 = vector.multi_reduction <add>, %53, %cst_21 [1] : vector<8x8xf32> to vector<8xf32>
    %55 = vector.shape_cast %54 : vector<8xf32> to vector<8x1xf32>
    %56 = tpu.reciprocal %55 : vector<8x1xf32> -> vector<8x1xf32>
    %57 = vector.broadcast %56 : vector<8x1xf32> to vector<8x8xf32>
    %58 = arith.mulf %53, %57 : vector<8x8xf32>
    %cst_22 = arith.constant dense<0.000000e+00> : vector<8x64xf32>
    %59 = tpu.matmul %58, %45, %cst_22 {dimension_numbers = #tpu.dot_dimension_numbers<[1], [0], [0], [1], [0, 0, 1, 1], [], []>, precision = #tpu.contract_precision<fp32>} : vector<8x8xf32>, vector<8x64xf32>, vector<8x64xf32> -> vector<8x64xf32>
    %60 = tpu.concatenate %42, %59 in 1 : vector<8x64xf32>, vector<8x64xf32> -> vector<8x128xf32>
    %c0_23 = arith.constant 0 : index
    %c0_24 = arith.constant 0 : index
    %61 = vector.load %arg5[%c0_23, %c0_24] : memref<128x128xf32, #tpu.memory_space<vmem>>, vector<128x128xf32>
    %cst_25 = arith.constant dense<0.000000e+00> : vector<8x128xf32>
    %62 = tpu.matmul %60, %61, %cst_25 {dimension_numbers = #tpu.dot_dimension_numbers<[1], [0], [0], [1], [0, 0, 1, 1], [], []>, precision = #tpu.contract_precision<fp32>} : vector<8x128xf32>, vector<128x128xf32>, vector<8x128xf32> -> vector<8x128xf32>
    %c0_26 = arith.constant 0 : index
    %c0_27 = arith.constant 0 : index
    %63 = vector.load %arg6[%c0_26, %c0_27] : memref<1x128xf32, #tpu.memory_space<vmem>>, vector<1x128xf32>
    %64 = vector.broadcast %63 : vector<1x128xf32> to vector<8x128xf32>
    %65 = arith.addf %62, %64 : vector<8x128xf32>
    %66 = arith.addf %65, %1 : vector<8x128xf32>
    %c0_28 = arith.constant 0 : index
    %c0_29 = arith.constant 0 : index
    %c0_30 = arith.constant 0 : index
    %67 = vector.load %arg7[%c0_28, %c0_29, %c0_30] : memref<1x8x128xf32, #tpu.memory_space<vmem>>, vector<1x8x128xf32>
    %68 = vector.shape_cast %67 : vector<1x8x128xf32> to vector<8x128xf32>
    %69 = vector.shape_cast %66 : vector<8x128xf32> to vector<1x8x128xf32>
    tpu.vector_store %arg7[%c0_28, %c0_29, %c0_30], %69 {strides = array<i32>} : memref<1x8x128xf32, #tpu.memory_space<vmem>>, vector<1x8x128xf32>,
    return
  }
  func.func @transform_0(%arg0: i32) -> (i32, i32, i32) {
    %c0_i32 = arith.constant 0 : i32
    %c0_i32_0 = arith.constant 0 : i32
    %c0_i32_1 = arith.constant 0 : i32
    return %arg0, %c0_i32, %c0_i32_0 : i32, i32, i32
  }
  func.func @transform_1(%arg0: i32) -> (i32, i32) {
    %c0_i32 = arith.constant 0 : i32
    %c0_i32_0 = arith.constant 0 : i32
    %c0_i32_1 = arith.constant 0 : i32
    return %c0_i32, %c0_i32_0 : i32, i32
  }
  func.func @transform_2(%arg0: i32) -> (i32, i32) {
    %c0_i32 = arith.constant 0 : i32
    %c0_i32_0 = arith.constant 0 : i32
    %c0_i32_1 = arith.constant 0 : i32
    return %c0_i32, %c0_i32_0 : i32, i32
  }
  func.func @transform_3(%arg0: i32) -> (i32, i32) {
    %c0_i32 = arith.constant 0 : i32
    %c0_i32_0 = arith.constant 0 : i32
    %c0_i32_1 = arith.constant 0 : i32
    return %c0_i32, %c0_i32_0 : i32, i32
  }
  func.func @transform_4(%arg0: i32) -> (i32, i32) {
    %c0_i32 = arith.constant 0 : i32
    %c0_i32_0 = arith.constant 0 : i32
    %c0_i32_1 = arith.constant 0 : i32
    return %c0_i32, %c0_i32_0 : i32, i32
  }
  func.func @transform_5(%arg0: i32) -> (i32, i32) {
    %c0_i32 = arith.constant 0 : i32
    %c0_i32_0 = arith.constant 0 : i32
    %c0_i32_1 = arith.constant 0 : i32
    return %c0_i32, %c0_i32_0 : i32, i32
  }
  func.func @transform_6(%arg0: i32) -> (i32, i32, i32) {
    %c0_i32 = arith.constant 0 : i32
    %c0_i32_0 = arith.constant 0 : i32
    %c0_i32_1 = arith.constant 0 : i32
    return %arg0, %c0_i32, %c0_i32_0 : i32, i32, i32
  }
}

module attributes {stable_mosaic.version = 11 : i64} {
  func.func @attn_block_kernel(%arg0: i32, %arg1: memref<1x8x128xf32, #tpu.memory_space<vmem>>, %arg2: memref<1x128xf32, #tpu.memory_space<vmem>>, %arg3: memref<1x128xf32, #tpu.memory_space<vmem>>, %arg4: memref<128x384xf32, #tpu.memory_space<vmem>>, %arg5: memref<128x128xf32, #tpu.memory_space<vmem>>, %arg6: memref<1x128xf32, #tpu.memory_space<vmem>>, %arg7: memref<1x8x128xf32, #tpu.memory_space<vmem>>) attributes {dimension_semantics = [#tpu.dimension_semantics<parallel>], iteration_bounds = array<i64: 2>, scalar_prefetch = 0 : i64, scratch_operands = 0 : i64, tpu.core_type = #tpu.core_type<tc>, window_params = [{transform_indices = @transform_0, window_bounds = array<i64: 1, 8, 128>}, {pipeline_mode = #tpu.pipeline_mode<synchronous>, transform_indices = @transform_1, window_bounds = array<i64: 1, 128>}, {pipeline_mode = #tpu.pipeline_mode<synchronous>, transform_indices = @transform_2, window_bounds = array<i64: 1, 128>}, {pipeline_mode = #tpu.pipeline_mode<synchronous>, transform_indices = @transform_3, window_bounds = array<i64: 128, 384>}, {pipeline_mode = #tpu.pipeline_mode<synchronous>, transform_indices = @transform_4, window_bounds = array<i64: 128, 128>}, {pipeline_mode = #tpu.pipeline_mode<synchronous>, transform_indices = @transform_5, window_bounds = array<i64: 1, 128>}, {transform_indices = @transform_6, window_bounds = array<i64: 1, 8, 128>}]} {
    %c0 = arith.constant 0 : index
    %c0_0 = arith.constant 0 : index
    %c0_1 = arith.constant 0 : index
    %0 = vector.load %arg1[%c0, %c0_0, %c0_1] : memref<1x8x128xf32, #tpu.memory_space<vmem>>, vector<1x8x128xf32>
    %1 = vector.shape_cast %0 : vector<1x8x128xf32> to vector<8x128xf32>
    %c0_2 = arith.constant 0 : index
    %c0_3 = arith.constant 0 : index
    %2 = vector.load %arg2[%c0_2, %c0_3] : memref<1x128xf32, #tpu.memory_space<vmem>>, vector<1x128xf32>
    %c0_4 = arith.constant 0 : index
    %c0_5 = arith.constant 0 : index
    %3 = vector.load %arg3[%c0_4, %c0_5] : memref<1x128xf32, #tpu.memory_space<vmem>>, vector<1x128xf32>
    %cst = arith.constant dense<0.000000e+00> : vector<8xf32>
    %4 = vector.multi_reduction <add>, %1, %cst [1] : vector<8x128xf32> to vector<8xf32>
    %5 = vector.shape_cast %4 : vector<8xf32> to vector<8x1xf32>
    %cst_6 = arith.constant 1.280000e+02 : f32
    %6 = vector.broadcast %cst_6 : f32 to vector<8x1xf32>
    %7 = arith.divf %5, %6 : vector<8x1xf32>
    %8 = vector.broadcast %7 : vector<8x1xf32> to vector<8x128xf32>
    %9 = arith.subf %1, %8 : vector<8x128xf32>
    %10 = arith.mulf %9, %9 : vector<8x128xf32>
    %cst_7 = arith.constant dense<0.000000e+00> : vector<8xf32>
    %11 = vector.multi_reduction <add>, %10, %cst_7 [1] : vector<8x128xf32> to vector<8xf32>
    %12 = vector.shape_cast %11 : vector<8xf32> to vector<8x1xf32>
    %cst_8 = arith.constant 1.280000e+02 : f32
    %13 = vector.broadcast %cst_8 : f32 to vector<8x1xf32>
    %14 = arith.divf %12, %13 : vector<8x1xf32>
    %cst_9 = arith.constant 9.99999974E-6 : f32
    %15 = vector.broadcast %cst_9 : f32 to vector<8x1xf32>
    %16 = arith.addf %14, %15 : vector<8x1xf32>
    %17 = math.rsqrt %16 : vector<8x1xf32>
    %18 = vector.broadcast %17 : vector<8x1xf32> to vector<8x128xf32>
    %19 = arith.mulf %9, %18 : vector<8x128xf32>
    %20 = vector.broadcast %2 : vector<1x128xf32> to vector<8x128xf32>
    %21 = arith.mulf %19, %20 : vector<8x128xf32>
    %22 = vector.broadcast %3 : vector<1x128xf32> to vector<8x128xf32>
    %23 = arith.addf %21, %22 : vector<8x128xf32>
    %c0_10 = arith.constant 0 : index
    %c0_11 = arith.constant 0 : index
    %24 = vector.load %arg4[%c0_10, %c0_11] : memref<128x384xf32, #tpu.memory_space<vmem>>, vector<128x384xf32>
    %cst_12 = arith.constant dense<0.000000e+00> : vector<8x384xf32>
    %25 = tpu.matmul %23, %24, %cst_12 {dimension_numbers = #tpu.dot_dimension_numbers<[1], [0], [0], [1], [0, 0, 1, 1], [], []>, precision = #tpu.contract_precision<fp32>} : vector<8x128xf32>, vector<128x384xf32>, vector<8x384xf32> -> vector<8x384xf32>
    %26 = vector.extract_strided_slice %25 {offsets = [0, 0], sizes = [8, 64], strides = [1, 1]} : vector<8x384xf32> to vector<8x64xf32>
    %27 = vector.extract_strided_slice %25 {offsets = [0, 128], sizes = [8, 64], strides = [1, 1]} : vector<8x384xf32> to vector<8x64xf32>
    %28 = vector.extract_strided_slice %25 {offsets = [0, 256], sizes = [8, 64], strides = [1, 1]} : vector<8x384xf32> to vector<8x64xf32>
    %cst_13 = arith.constant dense<0.000000e+00> : vector<8x8xf32>
    %29 = tpu.matmul %26, %27, %cst_13 {dimension_numbers = #tpu.dot_dimension_numbers<[1], [1], [0], [0], [0, 0, 1, 0], [], []>, precision = #tpu.contract_precision<fp32>} : vector<8x64xf32>, vector<8x64xf32>, vector<8x8xf32> -> vector<8x8xf32>
    %cst_14 = arith.constant 1.250000e-01 : f32
    %30 = vector.broadcast %cst_14 : f32 to vector<8x8xf32>
    %31 = arith.mulf %29, %30 : vector<8x8xf32>
    %cst_15 = arith.constant dense<0xFF800000> : vector<8xf32>
    %32 = vector.multi_reduction <maximumf>, %31, %cst_15 [1] : vector<8x8xf32> to vector<8xf32>
    %33 = vector.shape_cast %32 : vector<8xf32> to vector<8x1xf32>
    %34 = vector.broadcast %33 : vector<8x1xf32> to vector<8x8xf32>
    %35 = arith.subf %31, %34 : vector<8x8xf32>
    %36 = math.exp %35 : vector<8x8xf32>
    %cst_16 = arith.constant dense<0.000000e+00> : vector<8xf32>
    %37 = vector.multi_reduction <add>, %36, %cst_16 [1] : vector<8x8xf32> to vector<8xf32>
    %38 = vector.shape_cast %37 : vector<8xf32> to vector<8x1xf32>
    %39 = tpu.reciprocal %38 : vector<8x1xf32> -> vector<8x1xf32>
    %40 = vector.broadcast %39 : vector<8x1xf32> to vector<8x8xf32>
    %41 = arith.mulf %36, %40 : vector<8x8xf32>
    %cst_17 = arith.constant dense<0.000000e+00> : vector<8x64xf32>
    %42 = tpu.matmul %41, %28, %cst_17 {dimension_numbers = #tpu.dot_dimension_numbers<[1], [0], [0], [1], [0, 0, 1, 1], [], []>, precision = #tpu.contract_precision<fp32>} : vector<8x8xf32>, vector<8x64xf32>, vector<8x64xf32> -> vector<8x64xf32>
    %43 = vector.extract_strided_slice %25 {offsets = [0, 64], sizes = [8, 64], strides = [1, 1]} : vector<8x384xf32> to vector<8x64xf32>
    %44 = vector.extract_strided_slice %25 {offsets = [0, 192], sizes = [8, 64], strides = [1, 1]} : vector<8x384xf32> to vector<8x64xf32>
    %45 = vector.extract_strided_slice %25 {offsets = [0, 320], sizes = [8, 64], strides = [1, 1]} : vector<8x384xf32> to vector<8x64xf32>
    %cst_18 = arith.constant dense<0.000000e+00> : vector<8x8xf32>
    %46 = tpu.matmul %43, %44, %cst_18 {dimension_numbers = #tpu.dot_dimension_numbers<[1], [1], [0], [0], [0, 0, 1, 0], [], []>, precision = #tpu.contract_precision<fp32>} : vector<8x64xf32>, vector<8x64xf32>, vector<8x8xf32> -> vector<8x8xf32>
    %cst_19 = arith.constant 1.250000e-01 : f32
    %47 = vector.broadcast %cst_19 : f32 to vector<8x8xf32>
    %48 = arith.mulf %46, %47 : vector<8x8xf32>
    %cst_20 = arith.constant dense<0xFF800000> : vector<8xf32>
    %49 = vector.multi_reduction <maximumf>, %48, %cst_20 [1] : vector<8x8xf32> to vector<8xf32>
    %50 = vector.shape_cast %49 : vector<8xf32> to vector<8x1xf32>
    %51 = vector.broadcast %50 : vector<8x1xf32> to vector<8x8xf32>
    %52 = arith.subf %48, %51 : vector<8x8xf32>
    %53 = math.exp %52 : vector<8x8xf32>
    %cst_21 = arith.constant dense<0.000000e+00> : vector<8xf32>
    %54 = vector.multi_reduction <add>, %53, %cst_21 [1] : vector<8x8xf32> to vector<8xf32>
    %55 = vector.shape_cast %54 : vector<8xf32> to vector<8x1xf32>
    %56 = tpu.reciprocal %55 : vector<8x1xf32> -> vector<8x1xf32>
    %57 = vector.broadcast %56 : vector<8x1xf32> to vector<8x8xf32>
    %58 = arith.mulf %53, %57 : vector<8x8xf32>
    %cst_22 = arith.constant dense<0.000000e+00> : vector<8x64xf32>
    %59 = tpu.matmul %58, %45, %cst_22 {dimension_numbers = #tpu.dot_dimension_numbers<[1], [0], [0], [1], [0, 0, 1, 1], [], []>, precision = #tpu.contract_precision<fp32>} : vector<8x8xf32>, vector<8x64xf32>, vector<8x64xf32> -> vector<8x64xf32>
    %60 = tpu.concatenate %42, %59 in 1 : vector<8x64xf32>, vector<8x64xf32> -> vector<8x128xf32>
    %c0_23 = arith.constant 0 : index
    %c0_24 = arith.constant 0 : index
    %61 = vector.load %arg5[%c0_23, %c0_24] : memref<128x128xf32, #tpu.memory_space<vmem>>, vector<128x128xf32>
    %cst_25 = arith.constant dense<0.000000e+00> : vector<8x128xf32>
    %62 = tpu.matmul %60, %61, %cst_25 {dimension_numbers = #tpu.dot_dimension_numbers<[1], [0], [0], [1], [0, 0, 1, 1], [], []>, precision = #tpu.contract_precision<fp32>} : vector<8x128xf32>, vector<128x128xf32>, vector<8x128xf32> -> vector<8x128xf32>
    %c0_26 = arith.constant 0 : index
    %c0_27 = arith.constant 0 : index
    %63 = vector.load %arg6[%c0_26, %c0_27] : memref<1x128xf32, #tpu.memory_space<vmem>>, vector<1x128xf32>
    %64 = vector.broadcast %63 : vector<1x128xf32> to vector<8x128xf32>
    %65 = arith.addf %62, %64 : vector<8x128xf32>
    %66 = arith.addf %65, %1 : vector<8x128xf32>
    %c0_28 = arith.constant 0 : index
    %c0_29 = arith.constant 0 : index
    %c0_30 = arith.constant 0 : index
    %67 = vector.load %arg7[%c0_28, %c0_29, %c0_30] : memref<1x8x128xf32, #tpu.memory_space<vmem>>, vector<1x8x128xf32>
    %68 = vector.shape_cast %67 : vector<1x8x128xf32> to vector<8x128xf32>
    %69 = vector.shape_cast %66 : vector<8x128xf32> to vector<1x8x128xf32>
    tpu.vector_store %arg7[%c0_28, %c0_29, %c0_30], %69 {strides = array<i32>} : memref<1x8x128xf32, #tpu.memory_space<vmem>>, vector<1x8x128xf32>,
    return
  }
  func.func @transform_0(%arg0: i32) -> (i32, i32, i32) {
    %c0_i32 = arith.constant 0 : i32
    %c0_i32_0 = arith.constant 0 : i32
    %c0_i32_1 = arith.constant 0 : i32
    return %arg0, %c0_i32, %c0_i32_0 : i32, i32, i32
  }
  func.func @transform_1(%arg0: i32) -> (i32, i32) {
    %c0_i32 = arith.constant 0 : i32
    %c0_i32_0 = arith.constant 0 : i32
    %c0_i32_1 = arith.constant 0 : i32
    return %c0_i32, %c0_i32_0 : i32, i32
  }
  func.func @transform_2(%arg0: i32) -> (i32, i32) {
    %c0_i32 = arith.constant 0 : i32
    %c0_i32_0 = arith.constant 0 : i32
    %c0_i32_1 = arith.constant 0 : i32
    return %c0_i32, %c0_i32_0 : i32, i32
  }
  func.func @transform_3(%arg0: i32) -> (i32, i32) {
    %c0_i32 = arith.constant 0 : i32
    %c0_i32_0 = arith.constant 0 : i32
    %c0_i32_1 = arith.constant 0 : i32
    return %c0_i32, %c0_i32_0 : i32, i32
  }
  func.func @transform_4(%arg0: i32) -> (i32, i32) {
    %c0_i32 = arith.constant 0 : i32
    %c0_i32_0 = arith.constant 0 : i32
    %c0_i32_1 = arith.constant 0 : i32
    return %c0_i32, %c0_i32_0 : i32, i32
  }
  func.func @transform_5(%arg0: i32) -> (i32, i32) {
    %c0_i32 = arith.constant 0 : i32
    %c0_i32_0 = arith.constant 0 : i32
    %c0_i32_1 = arith.constant 0 : i32
    return %c0_i32, %c0_i32_0 : i32, i32
  }
  func.func @transform_6(%arg0: i32) -> (i32, i32, i32) {
    %c0_i32 = arith.constant 0 : i32
    %c0_i32_0 = arith.constant 0 : i32
    %c0_i32_1 = arith.constant 0 : i32
    return %arg0, %c0_i32, %c0_i32_0 : i32, i32, i32
  }
}

module attributes {stable_mosaic.version = 11 : i64} {
  func.func @mlp_block_kernel(%arg0: i32, %arg1: memref<8x128xf32, #tpu.memory_space<vmem>>, %arg2: memref<1x128xf32, #tpu.memory_space<vmem>>, %arg3: memref<1x128xf32, #tpu.memory_space<vmem>>, %arg4: memref<128x256xf32, #tpu.memory_space<vmem>>, %arg5: memref<1x256xf32, #tpu.memory_space<vmem>>, %arg6: memref<256x128xf32, #tpu.memory_space<vmem>>, %arg7: memref<1x128xf32, #tpu.memory_space<vmem>>, %arg8: memref<8x128xf32, #tpu.memory_space<vmem>>) attributes {dimension_semantics = [#tpu.dimension_semantics<parallel>], iteration_bounds = array<i64: 2>, scalar_prefetch = 0 : i64, scratch_operands = 0 : i64, tpu.core_type = #tpu.core_type<tc>, window_params = [{transform_indices = @transform_0, window_bounds = array<i64: 8, 128>}, {pipeline_mode = #tpu.pipeline_mode<synchronous>, transform_indices = @transform_1, window_bounds = array<i64: 1, 128>}, {pipeline_mode = #tpu.pipeline_mode<synchronous>, transform_indices = @transform_2, window_bounds = array<i64: 1, 128>}, {pipeline_mode = #tpu.pipeline_mode<synchronous>, transform_indices = @transform_3, window_bounds = array<i64: 128, 256>}, {pipeline_mode = #tpu.pipeline_mode<synchronous>, transform_indices = @transform_4, window_bounds = array<i64: 1, 256>}, {pipeline_mode = #tpu.pipeline_mode<synchronous>, transform_indices = @transform_5, window_bounds = array<i64: 256, 128>}, {pipeline_mode = #tpu.pipeline_mode<synchronous>, transform_indices = @transform_6, window_bounds = array<i64: 1, 128>}, {transform_indices = @transform_7, window_bounds = array<i64: 8, 128>}]} {
    %c0 = arith.constant 0 : index
    %c0_0 = arith.constant 0 : index
    %0 = vector.load %arg1[%c0, %c0_0] : memref<8x128xf32, #tpu.memory_space<vmem>>, vector<8x128xf32>
    %c0_1 = arith.constant 0 : index
    %c0_2 = arith.constant 0 : index
    %1 = vector.load %arg2[%c0_1, %c0_2] : memref<1x128xf32, #tpu.memory_space<vmem>>, vector<1x128xf32>
    %c0_3 = arith.constant 0 : index
    %c0_4 = arith.constant 0 : index
    %2 = vector.load %arg3[%c0_3, %c0_4] : memref<1x128xf32, #tpu.memory_space<vmem>>, vector<1x128xf32>
    %cst = arith.constant dense<0.000000e+00> : vector<8xf32>
    %3 = vector.multi_reduction <add>, %0, %cst [1] : vector<8x128xf32> to vector<8xf32>
    %4 = vector.shape_cast %3 : vector<8xf32> to vector<8x1xf32>
    %cst_5 = arith.constant 1.280000e+02 : f32
    %5 = vector.broadcast %cst_5 : f32 to vector<8x1xf32>
    %6 = arith.divf %4, %5 : vector<8x1xf32>
    %7 = vector.broadcast %6 : vector<8x1xf32> to vector<8x128xf32>
    %8 = arith.subf %0, %7 : vector<8x128xf32>
    %9 = arith.mulf %8, %8 : vector<8x128xf32>
    %cst_6 = arith.constant dense<0.000000e+00> : vector<8xf32>
    %10 = vector.multi_reduction <add>, %9, %cst_6 [1] : vector<8x128xf32> to vector<8xf32>
    %11 = vector.shape_cast %10 : vector<8xf32> to vector<8x1xf32>
    %cst_7 = arith.constant 1.280000e+02 : f32
    %12 = vector.broadcast %cst_7 : f32 to vector<8x1xf32>
    %13 = arith.divf %11, %12 : vector<8x1xf32>
    %cst_8 = arith.constant 9.99999974E-6 : f32
    %14 = vector.broadcast %cst_8 : f32 to vector<8x1xf32>
    %15 = arith.addf %13, %14 : vector<8x1xf32>
    %16 = math.rsqrt %15 : vector<8x1xf32>
    %17 = vector.broadcast %16 : vector<8x1xf32> to vector<8x128xf32>
    %18 = arith.mulf %8, %17 : vector<8x128xf32>
    %19 = vector.broadcast %1 : vector<1x128xf32> to vector<8x128xf32>
    %20 = arith.mulf %18, %19 : vector<8x128xf32>
    %21 = vector.broadcast %2 : vector<1x128xf32> to vector<8x128xf32>
    %22 = arith.addf %20, %21 : vector<8x128xf32>
    %c0_9 = arith.constant 0 : index
    %c0_10 = arith.constant 0 : index
    %23 = vector.load %arg4[%c0_9, %c0_10] : memref<128x256xf32, #tpu.memory_space<vmem>>, vector<128x256xf32>
    %cst_11 = arith.constant dense<0.000000e+00> : vector<8x256xf32>
    %24 = tpu.matmul %22, %23, %cst_11 {dimension_numbers = #tpu.dot_dimension_numbers<[1], [0], [0], [1], [0, 0, 1, 1], [], []>, precision = #tpu.contract_precision<fp32>} : vector<8x128xf32>, vector<128x256xf32>, vector<8x256xf32> -> vector<8x256xf32>
    %c0_12 = arith.constant 0 : index
    %c0_13 = arith.constant 0 : index
    %25 = vector.load %arg5[%c0_12, %c0_13] : memref<1x256xf32, #tpu.memory_space<vmem>>, vector<1x256xf32>
    %26 = vector.broadcast %25 : vector<1x256xf32> to vector<8x256xf32>
    %27 = arith.addf %24, %26 : vector<8x256xf32>
    %cst_14 = arith.constant 5.000000e-01 : f32
    %28 = vector.broadcast %cst_14 : f32 to vector<8x256xf32>
    %29 = arith.mulf %28, %27 : vector<8x256xf32>
    %cst_15 = arith.constant 4.471500e-02 : f32
    %30 = vector.broadcast %cst_15 : f32 to vector<8x256xf32>
    %31 = arith.mulf %30, %27 : vector<8x256xf32>
    %32 = arith.mulf %31, %27 : vector<8x256xf32>
    %33 = arith.mulf %32, %27 : vector<8x256xf32>
    %34 = arith.addf %27, %33 : vector<8x256xf32>
    %cst_16 = arith.constant 0.797884583 : f32
    %35 = vector.broadcast %cst_16 : f32 to vector<8x256xf32>
    %36 = arith.mulf %35, %34 : vector<8x256xf32>
    %37 = math.tanh %36 : vector<8x256xf32>
    %cst_17 = arith.constant 1.000000e+00 : f32
    %38 = vector.broadcast %cst_17 : f32 to vector<8x256xf32>
    %39 = arith.addf %38, %37 : vector<8x256xf32>
    %40 = arith.mulf %29, %39 : vector<8x256xf32>
    %c0_18 = arith.constant 0 : index
    %c0_19 = arith.constant 0 : index
    %41 = vector.load %arg6[%c0_18, %c0_19] : memref<256x128xf32, #tpu.memory_space<vmem>>, vector<256x128xf32>
    %cst_20 = arith.constant dense<0.000000e+00> : vector<8x128xf32>
    %42 = tpu.matmul %40, %41, %cst_20 {dimension_numbers = #tpu.dot_dimension_numbers<[1], [0], [0], [1], [0, 0, 1, 1], [], []>, precision = #tpu.contract_precision<fp32>} : vector<8x256xf32>, vector<256x128xf32>, vector<8x128xf32> -> vector<8x128xf32>
    %c0_21 = arith.constant 0 : index
    %c0_22 = arith.constant 0 : index
    %43 = vector.load %arg7[%c0_21, %c0_22] : memref<1x128xf32, #tpu.memory_space<vmem>>, vector<1x128xf32>
    %44 = vector.broadcast %43 : vector<1x128xf32> to vector<8x128xf32>
    %45 = arith.addf %42, %44 : vector<8x128xf32>
    %46 = arith.addf %45, %0 : vector<8x128xf32>
    %c0_23 = arith.constant 0 : index
    %c0_24 = arith.constant 0 : index
    %47 = vector.load %arg8[%c0_23, %c0_24] : memref<8x128xf32, #tpu.memory_space<vmem>>, vector<8x128xf32>
    tpu.vector_store %arg8[%c0_23, %c0_24], %46 {strides = array<i32>} : memref<8x128xf32, #tpu.memory_space<vmem>>, vector<8x128xf32>,
    return
  }
  func.func @transform_0(%arg0: i32) -> (i32, i32) {
    %c0_i32 = arith.constant 0 : i32
    %c0_i32_0 = arith.constant 0 : i32
    return %arg0, %c0_i32 : i32, i32
  }
  func.func @transform_1(%arg0: i32) -> (i32, i32) {
    %c0_i32 = arith.constant 0 : i32
    %c0_i32_0 = arith.constant 0 : i32
    %c0_i32_1 = arith.constant 0 : i32
    return %c0_i32, %c0_i32_0 : i32, i32
  }
  func.func @transform_2(%arg0: i32) -> (i32, i32) {
    %c0_i32 = arith.constant 0 : i32
    %c0_i32_0 = arith.constant 0 : i32
    %c0_i32_1 = arith.constant 0 : i32
    return %c0_i32, %c0_i32_0 : i32, i32
  }
  func.func @transform_3(%arg0: i32) -> (i32, i32) {
    %c0_i32 = arith.constant 0 : i32
    %c0_i32_0 = arith.constant 0 : i32
    %c0_i32_1 = arith.constant 0 : i32
    return %c0_i32, %c0_i32_0 : i32, i32
  }
  func.func @transform_4(%arg0: i32) -> (i32, i32) {
    %c0_i32 = arith.constant 0 : i32
    %c0_i32_0 = arith.constant 0 : i32
    %c0_i32_1 = arith.constant 0 : i32
    return %c0_i32, %c0_i32_0 : i32, i32
  }
  func.func @transform_5(%arg0: i32) -> (i32, i32) {
    %c0_i32 = arith.constant 0 : i32
    %c0_i32_0 = arith.constant 0 : i32
    %c0_i32_1 = arith.constant 0 : i32
    return %c0_i32, %c0_i32_0 : i32, i32
  }
  func.func @transform_6(%arg0: i32) -> (i32, i32) {
    %c0_i32 = arith.constant 0 : i32
    %c0_i32_0 = arith.constant 0 : i32
    %c0_i32_1 = arith.constant 0 : i32
    return %c0_i32, %c0_i32_0 : i32, i32
  }
  func.func @transform_7(%arg0: i32) -> (i32, i32) {
    %c0_i32 = arith.constant 0 : i32
    %c0_i32_0 = arith.constant 0 : i32
    return %arg0, %c0_i32 : i32, i32
  }
}

</mosaic_0001>

<bundles_post_ra>
// kernel: transformer_forward.5
= control target key start
LH: loop header
LB: loop body
LE: loop exit
PB: predicated region body
PF: predicated region fallthrough
CT: control target
= control target key end

     0   :  { %s2859_s24 = smov 0   ;;  %s4007_s0 = inlined_call_operand.vmem [shape: f32[16,128], index: 0, kind: input, shape index: {}]   ;;  %s4008_s1 = inlined_call_operand.vmem [shape: f32[1,128], index: 1, kind: input, shape index: {}]   ;;  %s4009_s2 = inlined_call_operand.vmem [shape: f32[1,128], index: 2, kind: input, shape index: {}]   ;;  %s4010_s3 = inlined_call_operand.vmem [shape: f32[128,256], index: 3, kind: input, shape index: {}]   ;;  %s4011_s4 = inlined_call_operand.vmem [shape: f32[1,256], index: 4, kind: input, shape index: {}]   ;;  %s4012_s5 = inlined_call_operand.vmem [shape: f32[256,128], index: 5, kind: input, shape index: {}]   ;;  %s4013_s6 = inlined_call_operand.vmem [shape: f32[1,128], index: 6, kind: input, shape index: {}]   ;;  %s4014_s7 = inlined_call_operand.vmem [shape: f32[16,128], index: 7, kind: output, shape index: {}]  }
   0x1 LB: > { %s2176_s25 = sadd.s32 4294967295, %s2816_s24   ;;  %p2180_p0 = scmp.ge.s32.totalorder %s2816_s24, 1  ;;  %s2816_s24 = sphi %s2859_s24, %s17_s24  }
   0x2   : > { %p236_p1 = scmp.lt.s32.totalorder %s2816_s24, 3 }
   0x4   : > { %p237_p2 = pnand %p2180_p0, %p236_p1 }
   0x6   : > { %240 = sbr.rel (%p237_p2) target bundleno = 1131 (0x46b), region = 48 }
   0xd   : > { %p266_p3 = scmp.lt.s32.totalorder %s2176_s25, 1  ;;  %v304_v1 = vld [vmem:[%s4010_s3 + $0x8] sm:$0xff]  ;;  %v306_v2 = vld [vmem:[%s4010_s3 + $0x18] sm:$0xff]  ;;  %v303_v3 = vld [vmem:[%s4010_s3] sm:$0xff] }
   0xe   : > { %v347_v4 = vand.u32 4294901760, %v304_v1  ;;  %v351_v5 = vand.u32 4294901760, %v306_v2  ;;  %v305_v6 = vld [vmem:[%s4010_s3 + $0x10] sm:$0xff]  ;;  %v349_v7 = vand.u32 4294901760, %v303_v3  ;;  %v308_v19 = vld [vmem:[%s4010_s3 + $0x28] sm:$0xff]  ;;  %v310_v20 = vld [vmem:[%s4010_s3 + $0x38] sm:$0xff] }
   0xf   : > { %s4341_s25 = smov (!%p266_p3, %s2176_s25), 1  ;;  %v353_v8 = vand.u32 4294901760, %v305_v6  ;;  %v355_v21 = vand.u32 4294901760, %v308_v19  ;;  %v359_v22 = vand.u32 4294901760, %v310_v20  ;;  %v307_v23 = vld [vmem:[%s4010_s3 + $0x20] sm:$0xff]  ;;  %v309_v24 = vld [vmem:[%s4010_s3 + $0x30] sm:$0xff] }
  0x10   : > { %s2181_s26 = sshll.u32 %s4341_s25, 3  ;;  %v2890_v9 = vpack.c.bf16 %v351_v5, %v347_v4  ;;  %v2892_v10 = vsub.f32 %v304_v1, %v347_v4  ;;  %v2894_v11 = vsub.f32 %v306_v2, %v351_v5  ;;  %v2896_v12 = vsub.f32 %v303_v3, %v349_v7  ;;  %v312_v29 = vld [vmem:[%s4010_s3 + $0x48] sm:$0xff]  ;;  %v314_v30 = vld [vmem:[%s4010_s3 + $0x58] sm:$0xff]  ;;  %v311_v33 = vld [vmem:[%s4010_s3 + $0x40] sm:$0xff] }
  0x11   : > { %s2875_s29 = scalar_lea.vmem %s4007_s0, %s2181_s26  ;;  %v2898_v13 = vpack.c.bf16 %v353_v8, %v349_v7  ;;  %v2900_v14 = vsub.f32 %v305_v6, %v353_v8  ;;  %v357_v25 = vand.u32 4294901760, %v307_v23  ;;  %v361_v26 = vand.u32 4294901760, %v309_v24  ;;  %v313_v34 = vld [vmem:[%s4010_s3 + $0x50] sm:$0xff]  ;;  %v316_v39 = vld [vmem:[%s4010_s3 + $0x68] sm:$0xff]  ;;  %v318_v40 = vld [vmem:[%s4010_s3 + $0x78] sm:$0xff]  ;;  %s273_s12 = scalar_lea.vmem %s4014_s7, %s2181_s26 }
  0x12   : > { %v274_v0 = vld [vmem:[%s2875_s29] sm:$0xff]  ;;  %2399 = vmatprep.subr.bf16.mxu0 %v2890_v9  ;;  %v2920_v27 = vpack.c.bf16 %v359_v22, %v355_v21  ;;  %v363_v31 = vand.u32 4294901760, %v312_v29  ;;  %v367_v32 = vand.u32 4294901760, %v314_v30  ;;  %v365_v35 = vand.u32 4294901760, %v311_v33  ;;  %v317_v44 = vld [vmem:[%s4010_s3 + $0x70] sm:$0xff]  ;;  %v320_v49 = vld [vmem:[%s4010_s3 + $0x88] sm:$0xff] }
  0x13   : > { %277 = vadd.xlane.f32.xlu0 %v274_v0  ;;  %2401 = vmatpush1.bf16.msra.mxu0 %v2898_v13  ;;  %v2922_v28 = vpack.c.bf16 %v361_v26, %v357_v25  ;;  %v369_v36 = vand.u32 4294901760, %v313_v34  ;;  %v371_v41 = vand.u32 4294901760, %v316_v39  ;;  %v375_v42 = vand.u32 4294901760, %v318_v40  ;;  %v315_v43 = vld [vmem:[%s4010_s3 + $0x60] sm:$0xff]  ;;  %v322_v50 = vld [vmem:[%s4010_s3 + $0x98] sm:$0xff]  ;;  %v321_v54 = vld [vmem:[%s4010_s3 + $0x90] sm:$0xff] }
  0x14   : > { %4163 = vst [vmem:[#allocation2_spill] sm:$0xff] %v2920_v27  ;;  %2403 = vmatprep.subr.bf16.mxu0 %v2920_v27  ;;  %v2938_v37 = vpack.c.bf16 %v367_v32, %v363_v31  ;;  %v373_v45 = vand.u32 4294901760, %v315_v43  ;;  %v377_v46 = vand.u32 4294901760, %v317_v44  ;;  %v379_v51 = vand.u32 4294901760, %v320_v49  ;;  %v319_v53 = vld [vmem:[%s4010_s3 + $0x80] sm:$0xff]  ;;  %v324_v59 = vld [vmem:[%s4010_s3 + $0xa8] sm:$0xff] }
  0x15   : > { %4164 = vst [vmem:[#allocation3_spill] sm:$0xff] %v2922_v28  ;;  %v2940_v38 = vpack.c.bf16 %v369_v36, %v365_v35  ;;  %v2956_v47 = vpack.c.bf16 %v375_v42, %v371_v41  ;;  %v383_v52 = vand.u32 4294901760, %v322_v50  ;;  %v381_v55 = vand.u32 4294901760, %v319_v53  ;;  %v326_v60 = vld [vmem:[%s4010_s3 + $0xb8] sm:$0xff]  ;;  %v323_v7 = vld [vmem:[%s4010_s3 + $0xa0] sm:$0xff]  ;;  %v325_v8 = vld [vmem:[%s4010_s3 + $0xb0] sm:$0xff] }
  0x16   : > { %4165 = vst [vmem:[#allocation4_spill] sm:$0xff] %v2938_v37  ;;  %v2958_v48 = vpack.c.bf16 %v377_v46, %v373_v45  ;;  %v385_v56 = vand.u32 4294901760, %v321_v54  ;;  %v387_v61 = vand.u32 4294901760, %v324_v59  ;;  %v391_v62 = vand.u32 4294901760, %v326_v60 }
  0x17   : > { %2405 = vmatpush1.bf16.msra.mxu0 %v2922_v28  ;;  %4166 = vst [vmem:[#allocation5_spill] sm:$0xff] %v2940_v38  ;;  %4167 = vst [vmem:[#allocation6_spill] sm:$0xff] %v2956_v47  ;;  %v2974_v57 = vpack.c.bf16 %v383_v52, %v379_v51  ;;  %v2985_v63 = vsub.f32 %v308_v19, %v355_v21  ;;  %v2989_v1 = vsub.f32 %v307_v23, %v357_v25  ;;  %v330_v21 = vld [vmem:[%s4010_s3 + $0xd8] sm:$0xff] }
  0x18   : > { %2407 = vmatprep.subr.bf16.mxu0 %v2938_v37  ;;  %4168 = vst [vmem:[#allocation7_spill] sm:$0xff] %v2958_v48  ;;  %v2976_v58 = vpack.c.bf16 %v385_v56, %v381_v55  ;;  %v2991_v2 = vsub.f32 %v309_v24, %v361_v26  ;;  %v2994_v3 = vsub.f32 %v312_v29, %v363_v31  ;;  %v329_v29 = vld [vmem:[%s4010_s3 + $0xd0] sm:$0xff]  ;;  %v334_v31 = vld [vmem:[%s4010_s3 + $0xf8] sm:$0xff] }
  0x19   : > { %4169 = vst [vmem:[#allocation8_spill] sm:$0xff] %v2974_v57  ;;  %v2996_v4 = vsub.f32 %v314_v30, %v367_v32  ;;  %v2998_v5 = vsub.f32 %v311_v33, %v365_v35  ;;  %v3000_v6 = vsub.f32 %v313_v34, %v369_v36  ;;  %v3014_v19 = vsub.f32 %v317_v44, %v377_v46  ;;  %v332_v30 = vld [vmem:[%s4010_s3 + $0xe8] sm:$0xff]  ;;  %v331_v46 = vld [vmem:[%s4010_s3 + $0xe0] sm:$0xff] }
  0x1a   : > { %4170 = vst [vmem:[#allocation9_spill] sm:$0xff] %v2976_v58  ;;  %v3025_v23 = vsub.f32 %v320_v49, %v379_v51  ;;  %v3027_v24 = vsub.f32 %v322_v50, %v383_v52  ;;  %v3029_v25 = vsub.f32 %v319_v53, %v381_v55  ;;  %v3031_v26 = vsub.f32 %v321_v54, %v385_v56  ;;  %v333_v53 = vld [vmem:[%s4010_s3 + $0xf0] sm:$0xff] }
  0x1b   : > { %2409 = vmatpush1.bf16.msra.mxu0 %v2940_v38  ;;  %4171 = vst [vmem:[#allocation10_spill] sm:$0xff] %v3014_v19  ;;  %v3042_v32 = vpack.c.bf16 %v391_v62, %v387_v61  ;;  %v3044_v33 = vsub.f32 %v324_v59, %v387_v61  ;;  %v3046_v34 = vsub.f32 %v326_v60, %v391_v62  ;;  %v389_v35 = vand.u32 4294901760, %v323_v7 }
  0x1c   : > { %2411 = vmatprep.subr.bf16.mxu0 %v2956_v47  ;;  %4172 = vst [vmem:[#allocation11_spill] sm:$0xff] %v3025_v23  ;;  %4173 = vst [vmem:[#allocation12_spill] sm:$0xff] %v3027_v24  ;;  %v393_v36 = vand.u32 4294901760, %v325_v8  ;;  %v403_v44 = vand.u32 4294901760, %v332_v30 }
  0x1d   : > { %4174 = vst [vmem:[#allocation13_spill] sm:$0xff] %v3029_v25  ;;  %4175 = vst [vmem:[#allocation14_spill] sm:$0xff] %v3031_v26 }
  0x1e   : > { %4176 = vst [vmem:[#allocation15_spill] sm:$0xff] %v3042_v32  ;;  %4177 = vst [vmem:[#allocation16_spill] sm:$0xff] %v3046_v34  ;;  %v3054_v49 = vpack.c.bf16 %v393_v36, %v389_v35  ;;  %v3056_v50 = vsub.f32 %v325_v8, %v393_v36  ;;  %v3076_v61 = vsub.f32 %v332_v30, %v403_v44  ;;  %v409_v8 = vand.u32 4294901760, %v333_v53 }
  0x1f   : > { %2413 = vmatpush1.bf16.msra.mxu0 %v2958_v48  ;;  %v4018_v30 = vand.u32 4294901760, %v2900_v14 }
  0x20   : > { %2415 = vmatprep.subr.bf16.mxu0 %v2974_v57  ;;  %4178 = vst [vmem:[#allocation17_spill] sm:$0xff] %v3054_v49  ;;  %4179 = vst [vmem:[#allocation18_spill] sm:$0xff] %v3056_v50  ;;  %v4073_v38 = vand.u32 4294901760, %v3076_v61 }
  0x21   : > { %4186 = vst [vmem:[#allocation25_spill] sm:$0xff] %v3076_v61 }
  0x23   : > { %2417 = vmatpush1.bf16.msra.mxu0 %v2976_v58  ;;  %v4052_v58 = vand.u32 4294901760, %v3044_v33 }
  0x24   : > { %2419 = vmatprep.subr.bf16.mxu0 %v3042_v32 }
  0x27   : > { %2421 = vmatpush1.bf16.msra.mxu0 %v3054_v49  ;;  %v4051_v49 = vand.u32 4294901760, %v3029_v25 }
  0xa0   : > { %v278_v15 = vpop.xlane.xlu0 %277 }
  0xa1   : > { %v280_v16 = vmul.f32 0.0078125, %v278_v15  ;;  %v3008_v15 = vsub.f32 %v316_v39, %v371_v41 }
  0xa3   : > { %v2904_v17 = vsub.f32 %v274_v0, %v280_v16  ;;  %v2987_v0 = vsub.f32 %v310_v20, %v359_v22  ;;  %v3010_v16 = vsub.f32 %v318_v40, %v375_v42  ;;  %v328_v20 = vld [vmem:[%s4010_s3 + $0xc8] sm:$0xff]  ;;  %v327_v22 = vld [vmem:[%s4010_s3 + $0xc0] sm:$0xff]  ;;  %v399_v40 = vand.u32 4294901760, %v330_v21 }
  0xa4   : > { %v395_v39 = vand.u32 4294901760, %v328_v20  ;;  %v397_v41 = vand.u32 4294901760, %v327_v22  ;;  %v3049_v42 = vsub.f32 %v323_v7, %v389_v35  ;;  %v405_v7 = vand.u32 4294901760, %v331_v46 }
  0xa5   : > { %v282_v18 = vmul.f32 %v2904_v17, %v2904_v17  ;;  %v3065_v54 = vsub.f32 %v330_v21, %v399_v40  ;;  %v4015_v21 = vand.u32 4294901760, %v2894_v11  ;;  %v4017_v35 = vand.u32 4294901760, %v2896_v12 }
  0xa6   : > { %v3058_v51 = vpack.c.bf16 %v399_v40, %v395_v39  ;;  %v3060_v52 = vsub.f32 %v328_v20, %v395_v39  ;;  %v3069_v56 = vsub.f32 %v327_v22, %v397_v41  ;;  %v4016_v20 = vand.u32 4294901760, %v2892_v10 }
  0xa7   : > { %283 = vadd.xlane.f32.xlu0 %v282_v18  ;;  %v3012_v18 = vsub.f32 %v315_v43, %v373_v45  ;;  %v401_v43 = vand.u32 4294901760, %v329_v29  ;;  %v407_v45 = vand.u32 4294901760, %v334_v31  ;;  %4181 = vst [vmem:[#allocation20_spill] sm:$0xff] %v3065_v54  ;;  %v3083_v22 = vsub.f32 %v331_v46, %v405_v7 }
  0xa8   : > { %4180 = vst [vmem:[#allocation19_spill] sm:$0xff] %v3058_v51  ;;  %4183 = vst [vmem:[#allocation22_spill] sm:$0xff] %v3069_v56  ;;  %2423 = vmatprep.subr.bf16.mxu0 %v3058_v51  ;;  %v3088_v36 = vpack.c.bf16 %v409_v8, %v405_v7  ;;  %v458_v39 = vsub.f32 %v2892_v10, %v4016_v20  ;;  %v470_v40 = vsub.f32 %v2894_v11, %v4015_v21 }
  0xa9   : > { %v3067_v55 = vpack.c.bf16 %v401_v43, %v397_v41  ;;  %v3071_v59 = vsub.f32 %v329_v29, %v401_v43  ;;  %v3074_v60 = vpack.c.bf16 %v407_v45, %v403_v44  ;;  %v3078_v62 = vsub.f32 %v334_v31, %v407_v45  ;;  %4188 = vst [vmem:[#allocation27_spill] sm:$0xff] %v3083_v22 }
  0xaa   : > { %v4019_v29 = vmov 0.0   ;;  %4189 = vst [vmem:[#allocation28_spill] sm:$0xff] %v3088_v36  ;;  %v3090_v31 = vsub.f32 %v333_v53, %v409_v8  ;;  %v464_v41 = vsub.f32 %v2896_v12, %v4017_v35  ;;  %v476_v43 = vsub.f32 %v2900_v14, %v4018_v30 }
  0xab   : > { %4182 = vst [vmem:[#allocation21_spill] sm:$0xff] %v3067_v55  ;;  %4184 = vst [vmem:[#allocation23_spill] sm:$0xff] %v3071_v59  ;;  %443 = vmatprep.mubr.f32.mxu0 %v4019_v29  ;;  %2425 = vmatpush1.bf16.msra.mxu0 %v3067_v55  ;;  %v4021_v44 = vand.u32 4294901760, %v2985_v63  ;;  %v4027_v45 = vand.u32 4294901760, %v2987_v0  ;;  %v459_v46 = vand.u32 4294901760, %v458_v39  ;;  %v471_v53 = vand.u32 4294901760, %v470_v40 }
  0xac   : > { %4185 = vst [vmem:[#allocation24_spill] sm:$0xff] %v3074_v60  ;;  %4187 = vst [vmem:[#allocation26_spill] sm:$0xff] %v3078_v62  ;;  %2427 = vmatprep.subr.bf16.mxu0 %v3074_v60  ;;  %v4026_v7 = vand.u32 4294901760, %v2989_v1  ;;  %v4028_v8 = vand.u32 4294901760, %v2991_v2  ;;  %v465_v21 = vand.u32 4294901760, %v464_v41  ;;  %v477_v20 = vand.u32 4294901760, %v476_v43 }
  0xad   : > { %4190 = vst [vmem:[#allocation29_spill] sm:$0xff] %v3090_v31  ;;  %v482_v35 = vsub.f32 %v2985_v63, %v4021_v44  ;;  %v494_v30 = vsub.f32 %v2987_v0, %v4027_v45  ;;  %v2430_v29 = vpack.c.bf16 %v471_v53, %v459_v46  ;;  %v4030_v41 = vand.u32 4294901760, %v2994_v3 }
  0xae   : > { %v488_v39 = vsub.f32 %v2989_v1, %v4026_v7  ;;  %v500_v40 = vsub.f32 %v2991_v2, %v4028_v8  ;;  %v3124_v43 = vpack.c.bf16 %v477_v20, %v465_v21  ;;  %v4029_v55 = vand.u32 4294901760, %v2996_v4 }
  0xaf   : > { %2429 = vmatpush1.bf16.msra.mxu0 %v3088_v36  ;;  %v483_v44 = vand.u32 4294901760, %v482_v35  ;;  %v495_v60 = vand.u32 4294901760, %v494_v30  ;;  %v506_v7 = vsub.f32 %v2994_v3, %v4030_v41  ;;  %v4031_v45 = vand.u32 4294901760, %v2998_v5 }
  0xb0   : > { %2431 = vmatprep.subr.bf16.mxu0 %v2430_v29  ;;  %v489_v46 = vand.u32 4294901760, %v488_v39  ;;  %v501_v53 = vand.u32 4294901760, %v500_v40  ;;  %v518_v20 = vsub.f32 %v2996_v4, %v4029_v55  ;;  %v4032_v21 = vand.u32 4294901760, %v3000_v6 }
  0xb1   : > { %v3131_v8 = vpack.c.bf16 %v495_v60, %v483_v44  ;;  %v507_v30 = vand.u32 4294901760, %v506_v7  ;;  %v512_v29 = vsub.f32 %v2998_v5, %v4031_v45  ;;  %v4035_v39 = vand.u32 4294901760, %v3008_v15 }
  0xb2   : > { %v3137_v35 = vpack.c.bf16 %v501_v53, %v489_v46  ;;  %v519_v40 = vand.u32 4294901760, %v518_v20  ;;  %v524_v60 = vsub.f32 %v3000_v6, %v4032_v21  ;;  %v4040_v44 = vand.u32 4294901760, %v3010_v16 }
  0xb3   : > { %v4041_v55 = vand.u32 4294901760, %v3012_v18  ;;  %v513_v41 = vand.u32 4294901760, %v512_v29  ;;  %v530_v7 = vsub.f32 %v3008_v15, %v4035_v39  ;;  %v4042_v46 = vand.u32 4294901760, %v3014_v19 }
  0xb4   : > { %v3152_v53 = vpack.c.bf16 %v519_v40, %v507_v30  ;;  %v525_v45 = vand.u32 4294901760, %v524_v60  ;;  %v542_v20 = vsub.f32 %v3010_v16, %v4040_v44  ;;  %v4045_v39 = vand.u32 4294901760, %v3025_v23 }
  0xb5   : > { %v536_v21 = vsub.f32 %v3012_v18, %v4041_v55  ;;  %v531_v36 = vand.u32 4294901760, %v530_v7  ;;  %v548_v29 = vsub.f32 %v3014_v19, %v4042_v46  ;;  %v4048_v51 = vand.u32 4294901760, %v3027_v24 }
  0xb6   : > { %v3165_v30 = vpack.c.bf16 %v525_v45, %v513_v41  ;;  %v543_v40 = vand.u32 4294901760, %v542_v20  ;;  %v554_v55 = vsub.f32 %v3025_v23, %v4045_v39  ;;  %v4053_v46 = vand.u32 4294901760, %v3031_v26 }
  0xb7   : > { %v537_v60 = vand.u32 4294901760, %v536_v21  ;;  %v549_v44 = vand.u32 4294901760, %v548_v29  ;;  %v566_v7 = vsub.f32 %v3027_v24, %v4048_v51  ;;  %v560_v45 = vsub.f32 %v3029_v25, %v4051_v49 }
  0xb8   : > { %v3175_v32 = vpack.c.bf16 %v543_v40, %v531_v36  ;;  %v555_v21 = vand.u32 4294901760, %v554_v55  ;;  %v572_v29 = vsub.f32 %v3031_v26, %v4053_v46  ;;  %v4056_v51 = vand.u32 4294901760, %v3046_v34 }
  0xb9   : > { %v3180_v41 = vpack.c.bf16 %v549_v44, %v537_v60  ;;  %v567_v20 = vand.u32 4294901760, %v566_v7  ;;  %v561_v39 = vand.u32 4294901760, %v560_v45  ;;  %v4057_v36 = vand.u32 4294901760, %v3049_v42 }
  0xba   : > { %v573_v57 = vand.u32 4294901760, %v572_v29  ;;  %v4058_v49 = vand.u32 4294901760, %v3056_v50  ;;  %v578_v55 = vsub.f32 %v3044_v33, %v4052_v58  ;;  %v590_v44 = vsub.f32 %v3046_v34, %v4056_v51 }
  0xbb   : > { %v3188_v40 = vpack.c.bf16 %v567_v20, %v555_v21  ;;  %v584_v60 = vsub.f32 %v3049_v42, %v4057_v36  ;;  %v4059_v21 = vand.u32 4294901760, %v3060_v52  ;;  %v4064_v20 = vand.u32 4294901760, %v3065_v54 }
  0xbc   : > { %v3200_v7 = vpack.c.bf16 %v573_v57, %v561_v39  ;;  %v596_v45 = vsub.f32 %v3056_v50, %v4058_v49  ;;  %v579_v29 = vand.u32 4294901760, %v578_v55  ;;  %v591_v58 = vand.u32 4294901760, %v590_v44 }
  0xbd   : > { %v585_v46 = vand.u32 4294901760, %v584_v60  ;;  %v4070_v48 = vand.u32 4294901760, %v3069_v56  ;;  %v602_v36 = vsub.f32 %v3060_v52, %v4059_v21  ;;  %v614_v57 = vsub.f32 %v3065_v54, %v4064_v20 }
  0xbe   : > { %v597_v51 = vand.u32 4294901760, %v596_v45  ;;  %v4069_v39 = vand.u32 4294901760, %v3071_v59  ;;  %v3215_v49 = vpack.c.bf16 %v591_v58, %v579_v29  ;;  %v4074_v20 = vand.u32 4294901760, %v3078_v62 }
  0xbf   : > { %v608_v55 = vsub.f32 %v3069_v56, %v4070_v48  ;;  %v603_v60 = vand.u32 4294901760, %v602_v36  ;;  %v615_v45 = vand.u32 4294901760, %v614_v57  ;;  %v4075_v58 = vand.u32 4294901760, %v3083_v22 }
  0xc0   : > { %v3220_v44 = vpack.c.bf16 %v597_v51, %v585_v46  ;;  %v620_v21 = vsub.f32 %v3071_v59, %v4069_v39  ;;  %v4076_v28 = vand.u32 4294901760, %v3090_v31  ;;  %v626_v51 = vsub.f32 %v3076_v61, %v4073_v38 }
  0xc1   : > { %v609_v47 = vand.u32 4294901760, %v608_v55  ;;  %v2454_v29 = vpack.c.bf16 %v615_v45, %v603_v60  ;;  %v638_v46 = vsub.f32 %v3078_v62, %v4074_v20  ;;  %v632_v36 = vsub.f32 %v3083_v22, %v4075_v58 }
  0xc2   : > { %v621_v37 = vand.u32 4294901760, %v620_v21  ;;  %v644_v55 = vsub.f32 %v3090_v31, %v4076_v28  ;;  %v627_v21 = vand.u32 4294901760, %v626_v51  ;;  %v2462_v38 = vpack.c.bf16 %v2894_v11, %v2892_v10 }
  0xc3   : > { %v639_v60 = vand.u32 4294901760, %v638_v46  ;;  %v633_v45 = vand.u32 4294901760, %v632_v36  ;;  %v2464_v20 = vpack.c.bf16 %v2900_v14, %v2896_v12  ;;  %v2466_v58 = vpack.c.bf16 %v2987_v0, %v2985_v63 }
  0xc4   : > { %v2456_v57 = vpack.c.bf16 %v621_v37, %v609_v47  ;;  %v645_v39 = vand.u32 4294901760, %v644_v55  ;;  %v2468_v37 = vpack.c.bf16 %v2991_v2, %v2989_v1  ;;  %v2470_v47 = vpack.c.bf16 %v2996_v4, %v2994_v3 }
  0xc5   : > { %v2458_v48 = vpack.c.bf16 %v639_v60, %v627_v21  ;;  %v2472_v51 = vpack.c.bf16 %v3000_v6, %v2998_v5  ;;  %v2476_v46 = vpack.c.bf16 %v3014_v19, %v3012_v18  ;;  %v2478_v36 = vpack.c.bf16 %v3027_v24, %v3025_v23 }
  0xc6   : > { %v2460_v27 = vpack.c.bf16 %v645_v39, %v633_v45  ;;  %v2474_v39 = vpack.c.bf16 %v3010_v16, %v3008_v15  ;;  %v2480_v55 = vpack.c.bf16 %v3031_v26, %v3029_v25  ;;  %v2482_v21 = vpack.c.bf16 %v3046_v34, %v3044_v33 }
  0xc7   : > { %v2484_v60 = vpack.c.bf16 %v3056_v50, %v3049_v42  ;;  %v2486_v45 = vpack.c.bf16 %v3065_v54, %v3060_v52  ;;  %v2488_v28 = vpack.c.bf16 %v3071_v59, %v3069_v56  ;;  %v2490_v19 = vpack.c.bf16 %v3078_v62, %v3076_v61  ;;  %v2183_v50 = vld [vmem:[%s4008_s1] ss:$0 sm:$0xff] }
  0xc8   : > { %v2492_v24 = vpack.c.bf16 %v3090_v31, %v3083_v22  ;;  %v2184_v59 = vld [vmem:[%s4009_s2] ss:$0 sm:$0xff]  ;;  %v4191_v22 = vmov 0.0  }
 0x134   : > { %v284_v23 = vpop.xlane.xlu0 %283 }
 0x135   : > { %v285_v26 = vmul.f32 0.0078125, %v284_v23 }
 0x137   : > { %v286_v25 = vadd.f32 1e-05, %v285_v26 }
 0x139   : > { %2803 = vrsqrt.f32 %v286_v25 }
 0x143   : > { %v2804_v34 = vpop.eup %2803 }
 0x144   : > { %v288_v54 = vmul.f32 %v2804_v34, %v2904_v17  ;;  %v4192_v17 = vld [vmem:[#allocation2_spill] sm:$0xff]  ;;  %v4200_v34 = vld [vmem:[#allocation15_spill] sm:$0xff] }
 0x146   : > { %v295_v56 = vmul.f32 %v2183_v50, %v288_v54  ;;  %v4202_v50 = vld [vmem:[#allocation19_spill] sm:$0xff]  ;;  %v4203_v54 = vld [vmem:[#allocation21_spill] sm:$0xff] }
 0x148   : > { %v302_v62 = vadd.f32 %v2184_v59, %v295_v56  ;;  %v4204_v56 = vld [vmem:[#allocation24_spill] sm:$0xff]  ;;  %v4205_v59 = vand.u32 4294901760, %v2892_v10  ;;  %v4212_v10 = vand.u32 4294901760, %v2989_v1  ;;  %v4218_v1 = vand.u32 4294901760, %v3008_v15 }
 0x14a   : > { %v3280_v61 = vand.u32 4294901760, %v302_v62 }
 0x14c   : > { %v445_v31 = vsub.f32 %v302_v62, %v3280_v61  ;;  %v4206_v62 = vand.u32 4294901760, %v2894_v11  ;;  %v4213_v11 = vand.u32 4294901760, %v2991_v2  ;;  %v4219_v2 = vand.u32 4294901760, %v3010_v16 }
 0x14d   : > { %v4231_v16 = vand.u32 4294901760, %v3044_v33 }
 0x14e   : > { %v446_v23 = vand.u32 4294901760, %v445_v31 }
 0x150   : > { %v447_v26 = vsub.f32 %v445_v31, %v446_v23 }
 0x152   : > { %v448_v25 = vand.u32 4294901760, %v447_v26 }
 0x154   : > { %449 = vmatmul.mubr.f32.vlgmr.msra.gmra.mrb[0].mxu0 %v448_v25 }
 0x155   : > { %2433 = vmatpush1.bf16.msra.mxu0 %v3124_v43  ;;  %679 = vmatprep.mubr.f32.mxu0 %v4191_v22  ;;  %v4208_v43 = vand.u32 4294901760, %v2896_v12  ;;  %v4214_v12 = vand.u32 4294901760, %v2994_v3 }
 0x156   : > { %2435 = vmatprep.subr.bf16.mxu0 %v3131_v8  ;;  %v4207_v8 = vld [vmem:[#allocation28_spill] sm:$0xff] }
 0x159   : > { %2437 = vmatpush1.bf16.msra.mxu0 %v3137_v35  ;;  %v4209_v35 = vand.u32 4294901760, %v2900_v14  ;;  %v4215_v14 = vand.u32 4294901760, %v2996_v4  ;;  %v4223_v4 = vld [vmem:[#allocation11_spill] sm:$0xff] }
 0x15a   : > { %2439 = vmatprep.subr.bf16.mxu0 %v3152_v53 }
 0x15b   : > { %v2528_v53 = vpack.c.bf16 %v4209_v35, %v4208_v43  ;;  %v4240_v35 = vld [vmem:[#allocation22_spill] sm:$0xff] }
 0x15d   : > { %2441 = vmatpush1.bf16.msra.mxu0 %v3165_v30  ;;  %v4210_v30 = vand.u32 4294901760, %v2985_v63  ;;  %v4216_v63 = vand.u32 4294901760, %v2998_v5 }
 0x15e   : > { %2443 = vmatprep.subr.bf16.mxu0 %v3175_v32  ;;  %v4196_v32 = vld [vmem:[#allocation6_spill] sm:$0xff] }
 0x161   : > { %2445 = vmatpush1.bf16.msra.mxu0 %v3180_v41  ;;  %v4211_v41 = vand.u32 4294901760, %v2987_v0  ;;  %v4217_v0 = vand.u32 4294901760, %v3000_v6  ;;  %v4227_v6 = vld [vmem:[#allocation13_spill] sm:$0xff] }
 0x162   : > { %2447 = vmatprep.subr.bf16.mxu0 %v3188_v40 }
 0x163   : > { %v2530_v40 = vpack.c.bf16 %v4211_v41, %v4210_v30  ;;  %v4242_v30 = vld [vmem:[#allocation23_spill] sm:$0xff] }
 0x164   : > { %v4243_v33 = vand.u32 4294901760, %v4242_v30 }
 0x165   : > { %2449 = vmatpush1.bf16.msra.mxu0 %v3200_v7  ;;  %v2532_v7 = vpack.c.bf16 %v4213_v11, %v4212_v10  ;;  %v4246_v11 = vld [vmem:[#allocation26_spill] sm:$0xff] }
 0x166   : > { %2451 = vmatprep.subr.bf16.mxu0 %v3215_v49  ;;  %v4201_v49 = vld [vmem:[#allocation17_spill] sm:$0xff] }
 0x169   : > { %2453 = vmatpush1.bf16.msra.mxu0 %v3220_v44  ;;  %v2536_v44 = vpack.c.bf16 %v4217_v0, %v4216_v63 }
 0x16a   : > { %2455 = vmatprep.subr.bf16.mxu0 %v2454_v29  ;;  %v4220_v29 = vand.u32 4294901760, %v3012_v18 }
 0x16d   : > { %2457 = vmatpush1.bf16.msra.mxu0 %v2456_v57  ;;  %v4221_v57 = vld [vmem:[#allocation10_spill] sm:$0xff] }
 0x16e   : > { %2459 = vmatprep.subr.bf16.mxu0 %v2458_v48  ;;  %v4195_v48 = vld [vmem:[#allocation5_spill] sm:$0xff]  ;;  %v4222_v3 = vand.u32 4294901760, %v4221_v57  ;;  %v1224_v57 = vld [vmem:[%s4012_s5 + $0x20] sm:$0xff] }
 0x171   : > { %2461 = vmatpush1.bf16.msra.mxu0 %v2460_v27  ;;  %v4193_v27 = vld [vmem:[#allocation3_spill] sm:$0xff] }
 0x172   : > { %2463 = vmatprep.subr.bf16.mxu0 %v2462_v38  ;;  %v4194_v38 = vld [vmem:[#allocation4_spill] sm:$0xff] }
 0x174   : > { %681 = vmatmul.mubr.f32.vlgmr.msra.gmra.mrb[0].mxu0 %v3280_v61 }
 0x175   : > { %2465 = vmatpush1.bf16.msra.mxu0 %v2464_v20  ;;  %815 = vmatprep.mubr.f32.mxu0 %v4191_v22  ;;  %v2534_v20 = vpack.c.bf16 %v4215_v14, %v4214_v12  ;;  %v4248_v12 = vld [vmem:[#allocation27_spill] sm:$0xff] }
 0x176   : > { %2467 = vmatprep.subr.bf16.mxu0 %v2466_v58  ;;  %v2538_v58 = vpack.c.bf16 %v4219_v2, %v4218_v1  ;;  %v4249_v14 = vand.u32 4294901760, %v4248_v12  ;;  %v1240_v1 = vld [vmem:[%s4012_s5 + $0xa0] sm:$0xff]  ;;  %v1241_v2 = vld [vmem:[%s4012_s5 + $0xa8] sm:$0xff]  ;;  %v1247_v12 = vld [vmem:[%s4012_s5 + $0xd8] sm:$0xff] }
 0x179   : > { %2469 = vmatpush1.bf16.msra.mxu0 %v2468_v37  ;;  %v2540_v37 = vpack.c.bf16 %v4222_v3, %v4220_v29  ;;  %v1323_v29 = vand.u32 4294901760, %v1241_v2  ;;  %v1225_v3 = vld [vmem:[%s4012_s5 + $0x28] sm:$0xff] }
 0x17a   : > { %2471 = vmatprep.subr.bf16.mxu0 %v2470_v47  ;;  %v4224_v47 = vand.u32 4294901760, %v4223_v4  ;;  %v1275_v4 = vand.u32 4294901760, %v1225_v3 }
 0x17d   : > { %2473 = vmatpush1.bf16.msra.mxu0 %v2472_v51  ;;  %v4225_v51 = vld [vmem:[#allocation12_spill] sm:$0xff] }
 0x17e   : > { %2475 = vmatprep.subr.bf16.mxu0 %v2474_v39  ;;  %v4226_v5 = vand.u32 4294901760, %v4225_v51 }
 0x180   : > { %v2542_v39 = vpack.c.bf16 %v4226_v5, %v4224_v47  ;;  %v1242_v5 = vld [vmem:[%s4012_s5 + $0xb0] sm:$0xff] }
 0x181   : > { %2477 = vmatpush1.bf16.msra.mxu0 %v2476_v46  ;;  %v4228_v46 = vand.u32 4294901760, %v4227_v6  ;;  %v1226_v6 = vld [vmem:[%s4012_s5 + $0x30] sm:$0xff] }
 0x182   : > { %2479 = vmatprep.subr.bf16.mxu0 %v2478_v36  ;;  %v4229_v36 = vld [vmem:[#allocation14_spill] sm:$0xff] }
 0x183   : > { %v4230_v15 = vand.u32 4294901760, %v4229_v36 }
 0x185   : > { %2481 = vmatpush1.bf16.msra.mxu0 %v2480_v55  ;;  %v2544_v55 = vpack.c.bf16 %v4230_v15, %v4228_v46 }
 0x186   : > { %2483 = vmatprep.subr.bf16.mxu0 %v2482_v21  ;;  %v4232_v21 = vld [vmem:[#allocation16_spill] sm:$0xff] }
 0x187   : > { %v4233_v18 = vand.u32 4294901760, %v4232_v21  ;;  %v1244_v21 = vld [vmem:[%s4012_s5 + $0xc0] sm:$0xff] }
 0x188   : > { %v1332_v30 = vand.u32 4294901760, %v1244_v21 }
 0x189   : > { %2485 = vmatpush1.bf16.msra.mxu0 %v2484_v60  ;;  %v2546_v60 = vpack.c.bf16 %v4233_v18, %v4231_v16  ;;  %v1227_v16 = vld [vmem:[%s4012_s5 + $0x38] sm:$0xff]  ;;  %v1245_v18 = vld [vmem:[%s4012_s5 + $0xc8] sm:$0xff] }
 0x18a   : > { %2487 = vmatprep.subr.bf16.mxu0 %v2486_v45  ;;  %v4234_v45 = vand.u32 4294901760, %v3049_v42  ;;  %v4247_v42 = vand.u32 4294901760, %v4246_v11 }
 0x18d   : > { %2489 = vmatpush1.bf16.msra.mxu0 %v2488_v28  ;;  %v4197_v28 = vld [vmem:[#allocation7_spill] sm:$0xff] }
 0x18e   : > { %2491 = vmatprep.subr.bf16.mxu0 %v2490_v19  ;;  %v4198_v19 = vld [vmem:[#allocation8_spill] sm:$0xff] }
 0x191   : > { %2493 = vmatpush1.bf16.msra.mxu0 %v2492_v24  ;;  %v4199_v24 = vld [vmem:[#allocation9_spill] sm:$0xff] }
 0x192   : > { %2495 = vmatprep.subr.bf16.mxu0 %v2890_v9 }
 0x194   : > { %818 = vmatmul.mubr.f32.vlgmr.msra.gmra.mrb[0].mxu0 %v445_v31  ;;  %v2526_v31 = vpack.c.bf16 %v4206_v62, %v4205_v59  ;;  %v4237_v59 = vand.u32 4294901760, %v3060_v52  ;;  %v4238_v62 = vld [vmem:[#allocation20_spill] sm:$0xff] }
 0x195   : > { %2497 = vmatpush1.bf16.msra.mxu0 %v2898_v13  ;;  %920 = vmatprep.mubr.f32.mxu0 %v4191_v22 }
 0x196   : > { %2499 = vmatprep.subr.bf16.mxu0 %v4192_v17 }
 0x199   : > { %2501 = vmatpush1.bf16.msra.mxu0 %v4193_v27 }
 0x19a   : > { %2503 = vmatprep.subr.bf16.mxu0 %v4194_v38 }
 0x19d   : > { %2505 = vmatpush1.bf16.msra.mxu0 %v4195_v48 }
 0x19e   : > { %2507 = vmatprep.subr.bf16.mxu0 %v4196_v32 }
 0x1a1   : > { %2509 = vmatpush1.bf16.msra.mxu0 %v4197_v28 }
 0x1a2   : > { %2511 = vmatprep.subr.bf16.mxu0 %v4198_v19 }
 0x1a5   : > { %2513 = vmatpush1.bf16.msra.mxu0 %v4199_v24 }
 0x1a6   : > { %2515 = vmatprep.subr.bf16.mxu0 %v4200_v34 }
 0x1a9   : > { %2517 = vmatpush1.bf16.msra.mxu0 %v4201_v49 }
 0x1aa   : > { %2519 = vmatprep.subr.bf16.mxu0 %v4202_v50 }
 0x1ad   : > { %2521 = vmatpush1.bf16.msra.mxu0 %v4203_v54 }
 0x1ae   : > { %2523 = vmatprep.subr.bf16.mxu0 %v4204_v56 }
 0x1b1   : > { %2525 = vmatpush1.bf16.msra.mxu0 %v4207_v8 }
 0x1b2   : > { %2527 = vmatprep.subr.bf16.mxu0 %v2526_v31  ;;  %v4239_v31 = vand.u32 4294901760, %v4238_v62  ;;  %v3499_v62 = vsub.f32 %v1225_v3, %v1275_v4  ;;  %v1233_v3 = vld [vmem:[%s4012_s5 + $0x68] sm:$0xff] }
 0x1b4   : > { %924 = vmatmul.mubr.f32.vlgmr.msra.gmra.mrb[0].mxu0 %v446_v23  ;;  %v4235_v23 = vld [vmem:[#allocation18_spill] sm:$0xff]  ;;  %v2550_v43 = vpack.c.bf16 %v4239_v31, %v4237_v59  ;;  %v1326_v31 = vand.u32 4294901760, %v1242_v5 }
 0x1b5   : > { %2529 = vmatpush1.bf16.msra.mxu0 %v2528_v53  ;;  %1090 = vmatprep.mubr.f32.mxu0 %v4191_v22  ;;  %v4236_v26 = vand.u32 4294901760, %v4235_v23  ;;  %v4241_v53 = vand.u32 4294901760, %v4240_v35  ;;  %v3490_v23 = vsub.f32 %v1241_v2, %v1323_v29  ;;  %v1278_v35 = vand.u32 4294901760, %v1226_v6 }
 0x1b6   : > { %2531 = vmatprep.subr.bf16.mxu0 %v2530_v40  ;;  %v4244_v40 = vld [vmem:[#allocation25_spill] sm:$0xff]  ;;  %v3511_v11 = vsub.f32 %v1242_v5, %v1326_v31 }
 0x1b7   : > { %v2548_v25 = vpack.c.bf16 %v4236_v26, %v4234_v45  ;;  %v2552_v41 = vpack.c.bf16 %v4243_v33, %v4241_v53  ;;  %v4245_v10 = vand.u32 4294901760, %v4244_v40  ;;  %v1281_v53 = vand.u32 4294901760, %v1227_v16  ;;  %v1246_v40 = vld [vmem:[%s4012_s5 + $0xd0] sm:$0xff] }
 0x1b8   : > { %v1335_v33 = vand.u32 4294901760, %v1245_v18 }
 0x1b9   : > { %2533 = vmatpush1.bf16.msra.mxu0 %v2532_v7  ;;  %v2554_v7 = vpack.c.bf16 %v4247_v42, %v4245_v10 }
 0x1ba   : > { %2535 = vmatprep.subr.bf16.mxu0 %v2534_v20  ;;  %v4250_v20 = vld [vmem:[#allocation29_spill] sm:$0xff] }
 0x1bb   : > { %v4251_v52 = vand.u32 4294901760, %v4250_v20  ;;  %v1231_v20 = vld [vmem:[%s4012_s5 + $0x58] sm:$0xff] }
 0x1bd   : > { %2537 = vmatpush1.bf16.msra.mxu0 %v2536_v44  ;;  %v2556_v63 = vpack.c.bf16 %v4251_v52, %v4249_v14  ;;  %v1230_v14 = vld [vmem:[%s4012_s5 + $0x50] sm:$0xff]  ;;  %v3524_v52 = vpack.c.bf16 %v1281_v53, %v1278_v35 }
 0x1be   : > { %2539 = vmatprep.subr.bf16.mxu0 %v2538_v58  ;;  %v1320_v58 = vand.u32 4294901760, %v1240_v1 }
 0x1bf   : > { %4259 = vst [vmem:[#allocation9_spill] sm:$0xff] %v3524_v52 }
 0x1c0   : > { %v3488_v45 = vsub.f32 %v1240_v1, %v1320_v58 }
 0x1c1   : > { %2541 = vmatpush1.bf16.msra.mxu0 %v2540_v37  ;;  %v1272_v37 = vand.u32 4294901760, %v1224_v57 }
 0x1c2   : > { %2543 = vmatprep.subr.bf16.mxu0 %v2542_v39  ;;  %v1243_v39 = vld [vmem:[%s4012_s5 + $0xb8] sm:$0xff] }
 0x1c3   : > { %v3492_v26 = vpack.c.bf16 %v1275_v4, %v1272_v37  ;;  %v3497_v59 = vsub.f32 %v1224_v57, %v1272_v37  ;;  %v1232_v57 = vld [vmem:[%s4012_s5 + $0x60] sm:$0xff]  ;;  %v1250_v37 = vld [vmem:[%s4012_s5 + $0xf0] sm:$0xff] }
 0x1c5   : > { %2545 = vmatpush1.bf16.msra.mxu0 %v2544_v55  ;;  %4257 = vst [vmem:[#allocation7_spill] sm:$0xff] %v3492_v26 }
 0x1c6   : > { %2547 = vmatprep.subr.bf16.mxu0 %v2546_v60  ;;  %v3486_v60 = vpack.c.bf16 %v1323_v29, %v1320_v58 }
 0x1c8   : > { %4256 = vst [vmem:[#allocation6_spill] sm:$0xff] %v3486_v60 }
 0x1c9   : > { %2549 = vmatpush1.bf16.msra.mxu0 %v2548_v25  ;;  %v1228_v25 = vld [vmem:[%s4012_s5 + $0x40] sm:$0xff] }
 0x1ca   : > { %2551 = vmatprep.subr.bf16.mxu0 %v2550_v43  ;;  %v1329_v43 = vand.u32 4294901760, %v1243_v39 }
 0x1cc   : > { %v3509_v10 = vpack.c.bf16 %v1329_v43, %v1326_v31  ;;  %v3513_v42 = vsub.f32 %v1243_v39, %v1329_v43  ;;  %v1235_v31 = vld [vmem:[%s4012_s5 + $0x78] sm:$0xff] }
 0x1cd   : > { %2553 = vmatpush1.bf16.msra.mxu0 %v2552_v41  ;;  %v1229_v41 = vld [vmem:[%s4012_s5 + $0x48] sm:$0xff] }
 0x1ce   : > { %2555 = vmatprep.subr.bf16.mxu0 %v2554_v7  ;;  %4258 = vst [vmem:[#allocation8_spill] sm:$0xff] %v3509_v10  ;;  %v1284_v7 = vand.u32 4294901760, %v1228_v25 }
 0x1d1   : > { %2557 = vmatpush1.bf16.msra.mxu0 %v2556_v63  ;;  %v3526_v63 = vsub.f32 %v1226_v6, %v1278_v35  ;;  %v1296_v35 = vand.u32 4294901760, %v1232_v57 }
 0x1d2   : > { %2559 = vmatprep.subr.bf16.mxu0 %v2890_v9  ;;  %v3401_v9 = vld [vmem:[%s4012_s5 + $0x80] sm:$0xff] }
 0x1d4   : > { %1092 = vmatmul.mubr.f32.vlgmr.msra.gmra.mrb[0].mxu0 %v3280_v61 }
 0x1d5   : > { %2561 = vmatpush1.bf16.msra.mxu0 %v2898_v13  ;;  %1194 = vmatprep.mubr.f32.mxu0 %v4191_v22  ;;  %v3406_v13 = vld [vmem:[%s4012_s5 + $0x88] sm:$0xff]  ;;  %v1308_v22 = vand.u32 4294901760, %v3401_v9 }
 0x1d6   : > { %2563 = vmatprep.subr.bf16.mxu0 %v4192_v17  ;;  %v1311_v17 = vand.u32 4294901760, %v3406_v13 }
 0x1d7   : > { %v3562_v4 = vsub.f32 %v3401_v9, %v1308_v22 }
 0x1d8   : > { %v3580_v9 = vsub.f32 %v3406_v13, %v1311_v17 }
 0x1d9   : > { %2565 = vmatpush1.bf16.msra.mxu0 %v4193_v27  ;;  %v1220_v27 = vld [vmem:[%s4012_s5] sm:$0xff] }
 0x1da   : > { %2567 = vmatprep.subr.bf16.mxu0 %v4194_v38  ;;  %v1260_v38 = vand.u32 4294901760, %v1220_v27 }
 0x1dc   : > { %v3456_v47 = vsub.f32 %v1220_v27, %v1260_v38  ;;  %v3528_v27 = vsub.f32 %v1227_v16, %v1281_v53  ;;  %v1251_v16 = vld [vmem:[%s4012_s5 + $0xf8] sm:$0xff]  ;;  %v1299_v53 = vand.u32 4294901760, %v1233_v3 }
 0x1dd   : > { %2569 = vmatpush1.bf16.msra.mxu0 %v4195_v48 }
 0x1de   : > { %2571 = vmatprep.subr.bf16.mxu0 %v4196_v32  ;;  %v3420_v32 = vpack.c.bf16 %v1311_v17, %v1308_v22  ;;  %v1353_v17 = vand.u32 4294901760, %v1251_v16 }
 0x1e0   : > { %4252 = vst [vmem:[#allocation2_spill] sm:$0xff] %v3420_v32  ;;  %2591 = vmatprep.subr.bf16.mxu1 %v3420_v32 }
 0x1e1   : > { %2573 = vmatpush1.bf16.msra.mxu0 %v4197_v28 }
 0x1e2   : > { %2575 = vmatprep.subr.bf16.mxu0 %v4198_v19  ;;  %v1238_v19 = vld [vmem:[%s4012_s5 + $0x90] sm:$0xff] }
 0x1e5   : > { %2577 = vmatpush1.bf16.msra.mxu0 %v4199_v24  ;;  %v1239_v24 = vld [vmem:[%s4012_s5 + $0x98] sm:$0xff] }
 0x1e6   : > { %2579 = vmatprep.subr.bf16.mxu0 %v4200_v34  ;;  %v1314_v34 = vand.u32 4294901760, %v1238_v19 }
 0x1e8   : > { %v3469_v46 = vsub.f32 %v1238_v19, %v1314_v34  ;;  %v3539_v19 = vsub.f32 %v1244_v21, %v1332_v30  ;;  %v1234_v21 = vld [vmem:[%s4012_s5 + $0x70] sm:$0xff] }
 0x1e9   : > { %2581 = vmatpush1.bf16.msra.mxu0 %v4201_v49  ;;  %v1317_v49 = vand.u32 4294901760, %v1239_v24 }
 0x1ea   : > { %2583 = vmatprep.subr.bf16.mxu0 %v4202_v50  ;;  %v1222_v50 = vld [vmem:[%s4012_s5 + $0x10] sm:$0xff] }
 0x1eb   : > { %v3438_v0 = vpack.c.bf16 %v1317_v49, %v1314_v34  ;;  %v3471_v36 = vsub.f32 %v1239_v24, %v1317_v49  ;;  %v3541_v24 = vsub.f32 %v1245_v18, %v1335_v33  ;;  %v1287_v34 = vand.u32 4294901760, %v1229_v41 }
 0x1ec   : > { %v3543_v49 = vsub.f32 %v1228_v25, %v1284_v7 }
 0x1ed   : > { %2585 = vmatpush1.bf16.msra.mxu0 %v4203_v54  ;;  %v1223_v54 = vld [vmem:[%s4012_s5 + $0x18] sm:$0xff]  ;;  %4254 = vst [vmem:[#allocation4_spill] sm:$0xff] %v3438_v0  ;;  %v3546_v1 = vpack.c.bf16 %v1287_v34, %v1284_v7  ;;  %v3548_v2 = vsub.f32 %v1229_v41, %v1287_v34  ;;  %v1302_v41 = vand.u32 4294901760, %v1234_v21  ;;  %v3601_v7 = vsub.f32 %v1233_v3, %v1299_v53 }
 0x1ee   : > { %2587 = vmatprep.subr.bf16.mxu0 %v4204_v56  ;;  %v1266_v56 = vand.u32 4294901760, %v1222_v50  ;;  %v3612_v34 = vpack.c.bf16 %v1299_v53, %v1296_v35 }
 0x1ef   : > { %4261 = vst [vmem:[#allocation17_spill] sm:$0xff] %v3546_v1 }
 0x1f0   : > { %v3473_v15 = vsub.f32 %v1222_v50, %v1266_v56  ;;  %v1338_v50 = vand.u32 4294901760, %v1246_v40  ;;  %4269 = vst [vmem:[#allocation13_spill] sm:$0xff] %v3612_v34 }
 0x1f1   : > { %2589 = vmatpush1.bf16.msra.mxu0 %v4207_v8  ;;  %v1269_v8 = vand.u32 4294901760, %v1223_v54 }
 0x1f2   : > { %v3567_v39 = vsub.f32 %v1246_v40, %v1338_v50  ;;  %v3599_v40 = vsub.f32 %v1232_v57, %v1296_v35 }
 0x1f3   : > { %v3440_v44 = vpack.c.bf16 %v1269_v8, %v1266_v56  ;;  %v3475_v55 = vsub.f32 %v1223_v54, %v1269_v8  ;;  %v1341_v54 = vand.u32 4294901760, %v1247_v12  ;;  %v1290_v56 = vand.u32 4294901760, %v1230_v14 }
 0x1f4   : > { %1196 = vmatmul.mubr.f32.vlgmr.msra.gmra.mrb[0].mxu0 %v3280_v61  ;;  %v1221_v61 = vld [vmem:[%s4012_s5 + $0x8] sm:$0xff]  ;;  %v1293_v8 = vand.u32 4294901760, %v1231_v20 }
 0x1f5   : > { %v1263_v48 = vand.u32 4294901760, %v1221_v61  ;;  %4255 = vst [vmem:[#allocation5_spill] sm:$0xff] %v3440_v44  ;;  %v3565_v5 = vpack.c.bf16 %v1341_v54, %v1338_v50  ;;  %v3569_v6 = vsub.f32 %v1247_v12, %v1341_v54  ;;  %v3582_v22 = vsub.f32 %v1230_v14, %v1290_v56 }
 0x1f6   : > { %v3584_v18 = vsub.f32 %v1231_v20, %v1293_v8  ;;  %v1305_v14 = vand.u32 4294901760, %v1235_v31  ;;  %v3605_v20 = vsub.f32 %v1251_v16, %v1353_v17  ;;  %v4095_v54 = vand.u32 4294901760, %v3562_v4 }
 0x1f7   : > { %v3422_v28 = vpack.c.bf16 %v1263_v48, %v1260_v38  ;;  %v3458_v51 = vsub.f32 %v1221_v61, %v1263_v48  ;;  %v3530_v61 = vpack.c.bf16 %v1335_v33, %v1332_v30  ;;  %v1248_v38 = vld [vmem:[%s4012_s5 + $0xe0] sm:$0xff]  ;;  %v1249_v48 = vld [vmem:[%s4012_s5 + $0xe8] sm:$0xff]  ;;  %4262 = vst [vmem:[#allocation19_spill] sm:$0xff] %v3565_v5  ;;  %v1350_v30 = vand.u32 4294901760, %v1250_v37 }
 0x1f8   : > { %v1344_v58 = vand.u32 4294901760, %v1248_v38  ;;  %v1347_v29 = vand.u32 4294901760, %v1249_v48  ;;  %v3594_v33 = vpack.c.bf16 %v1293_v8, %v1290_v56  ;;  %4266 = vst [vmem:[#allocation10_spill] sm:$0xff] %v3605_v20  ;;  %v4091_v56 = vand.u32 4294901760, %v3580_v9 }
 0x1f9   : > { %4253 = vst [vmem:[#allocation3_spill] sm:$0xff] %v3422_v28  ;;  %2593 = vmatpush3.bf16.msra.mxu1 %v3422_v28  ;;  %4260 = vst [vmem:[#allocation15_spill] sm:$0xff] %v3530_v61  ;;  %v3603_v12 = vsub.f32 %v1250_v37, %v1350_v30  ;;  %v3615_v50 = vpack.c.bf16 %v1353_v17, %v1350_v30  ;;  %v4092_v8 = vand.u32 4294901760, %v3456_v47  ;;  %v4093_v30 = vand.u32 4294901760, %v3469_v46 }
 0x1fa   : > { %2595 = vmatprep.subr.bf16.mxu1 %v3438_v0  ;;  %v3586_v25 = vsub.f32 %v1248_v38, %v1344_v58  ;;  %v3591_v43 = vsub.f32 %v1249_v48, %v1347_v29  ;;  %4263 = vst [vmem:[#allocation21_spill] sm:$0xff] %v3594_v33  ;;  %v3596_v13 = vpack.c.bf16 %v1347_v29, %v1344_v58  ;;  %v4094_v58 = vand.u32 4294901760, %v3458_v51 }
 0x1fb   : > { %4265 = vst [vmem:[#allocation28_spill] sm:$0xff] %v3603_v12  ;;  %v3607_v38 = vsub.f32 %v1234_v21, %v1302_v41  ;;  %v3609_v48 = vsub.f32 %v1235_v31, %v1305_v14  ;;  %4270 = vst [vmem:[#allocation14_spill] sm:$0xff] %v3615_v50  ;;  %v1487_v29 = vsub.f32 %v3562_v4, %v4095_v54  ;;  %v4096_v17 = vand.u32 4294901760, %v3471_v36 }
 0x1fc   : > { %4264 = vst [vmem:[#allocation24_spill] sm:$0xff] %v3596_v13  ;;  %v1494_v57 = vsub.f32 %v3580_v9, %v4091_v56  ;;  %v3628_v3 = vpack.c.bf16 %v1305_v14, %v1302_v41  ;;  %v1375_v37 = vsub.f32 %v3456_v47, %v4092_v8  ;;  %v1382_v16 = vsub.f32 %v3458_v51, %v4094_v58 }
 0x1fd   : > { %2597 = vmatpush3.bf16.msra.mxu1 %v3440_v44  ;;  %4267 = vst [vmem:[#allocation11_spill] sm:$0xff] %v3607_v38  ;;  %4268 = vst [vmem:[#allocation12_spill] sm:$0xff] %v3609_v48  ;;  %v1488_v21 = vand.u32 4294901760, %v1487_v29  ;;  %v4097_v14 = vand.u32 4294901760, %v3473_v15  ;;  %v4098_v56 = vand.u32 4294901760, %v3475_v55  ;;  %v1501_v29 = vsub.f32 %v3469_v46, %v4093_v30 }
 0x1fe   : > { %2599 = vmatprep.subr.bf16.mxu1 %v3486_v60  ;;  %4271 = vst [vmem:[#allocation16_spill] sm:$0xff] %v3628_v3  ;;  %v1495_v31 = vand.u32 4294901760, %v1494_v57  ;;  %v1376_v35 = vand.u32 4294901760, %v1375_v37  ;;  %v1383_v53 = vand.u32 4294901760, %v1382_v16  ;;  %v1508_v57 = vsub.f32 %v3471_v36, %v4096_v17 }
 0x1ff   : > { %v1389_v37 = vsub.f32 %v3473_v15, %v4097_v14  ;;  %v1396_v16 = vsub.f32 %v3475_v55, %v4098_v56  ;;  %v4105_v54 = vand.u32 4294901760, %v3497_v59  ;;  %v4107_v56 = vand.u32 4294901760, %v3511_v11 }
 0x200   : > { %v2622_v41 = vpack.c.bf16 %v1495_v31, %v1488_v21  ;;  %v3642_v8 = vpack.c.bf16 %v1383_v53, %v1376_v35  ;;  %v1502_v21 = vand.u32 4294901760, %v1501_v29  ;;  %v1509_v31 = vand.u32 4294901760, %v1508_v57 }
 0x201   : > { %2601 = vmatpush3.bf16.msra.mxu1 %v3492_v26  ;;  %v4099_v35 = vand.u32 4294901760, %v3488_v45  ;;  %v4104_v53 = vand.u32 4294901760, %v3490_v23  ;;  %v1390_v30 = vand.u32 4294901760, %v1389_v37  ;;  %v1397_v58 = vand.u32 4294901760, %v1396_v16 }
 0x202   : > { %2603 = vmatprep.subr.bf16.mxu1 %v3509_v10  ;;  %v3660_v17 = vpack.c.bf16 %v1509_v31, %v1502_v21  ;;  %v1403_v37 = vsub.f32 %v3497_v59, %v4105_v54  ;;  %v1529_v54 = vsub.f32 %v3511_v11, %v4107_v56  ;;  %v4120_v56 = vand.u32 4294901760, %v3541_v24 }
 0x203   : > { %v1515_v14 = vsub.f32 %v3488_v45, %v4099_v35  ;;  %v1522_v29 = vsub.f32 %v3490_v23, %v4104_v53  ;;  %v3668_v57 = vpack.c.bf16 %v1397_v58, %v1390_v30  ;;  %v4112_v35 = vand.u32 4294901760, %v3513_v42 }
 0x204   : > { %v4113_v53 = vand.u32 4294901760, %v3526_v63  ;;  %v4114_v58 = vand.u32 4294901760, %v3528_v27 }
 0x205   : > { %2605 = vmatpush3.bf16.msra.mxu1 %v3524_v52  ;;  %v1516_v21 = vand.u32 4294901760, %v1515_v14  ;;  %v1523_v31 = vand.u32 4294901760, %v1522_v29  ;;  %v1536_v14 = vsub.f32 %v3513_v42, %v4112_v35  ;;  %v4121_v35 = vand.u32 4294901760, %v3543_v49 }
 0x206   : > { %2607 = vmatprep.subr.bf16.mxu1 %v3530_v61 }
 0x207   : > { %v3680_v30 = vpack.c.bf16 %v1523_v31, %v1516_v21  ;;  %v1530_v21 = vand.u32 4294901760, %v1529_v54  ;;  %v1537_v31 = vand.u32 4294901760, %v1536_v14  ;;  %v1550_v54 = vsub.f32 %v3541_v24, %v4120_v56 }
 0x208   : > { %v4129_v56 = vand.u32 4294901760, %v3582_v22 }
 0x209   : > { %2609 = vmatpush3.bf16.msra.mxu1 %v3546_v1 }
 0x20a   : > { %2611 = vmatprep.subr.bf16.mxu1 %v3565_v5 }
 0x20d   : > { %2613 = vmatpush3.bf16.msra.mxu1 %v3594_v33 }
 0x20e   : > { %2615 = vmatprep.subr.bf16.mxu1 %v3596_v13 }
 0x211   : > { %2617 = vmatpush3.bf16.msra.mxu1 %v3612_v34 }
 0x212   : > { %2619 = vmatprep.subr.bf16.mxu1 %v3615_v50 }
 0x215   : > { %2621 = vmatpush3.bf16.msra.mxu1 %v3628_v3  ;;  %v1404_v3 = vand.u32 4294901760, %v1403_v37  ;;  %v1417_v37 = vsub.f32 %v3526_v63, %v4113_v53 }
 0x216   : > { %2623 = vmatprep.subr.bf16.mxu1 %v2622_v41  ;;  %v4106_v41 = vand.u32 4294901760, %v3499_v62 }
 0x217   : > { %v1418_v34 = vand.u32 4294901760, %v1417_v37  ;;  %v1431_v37 = vsub.f32 %v3543_v49, %v4121_v35 }
 0x218   : > { %v1410_v16 = vsub.f32 %v3499_v62, %v4106_v41  ;;  %v4115_v41 = vand.u32 4294901760, %v3539_v19 }
 0x219   : > { %v1432_v33 = vand.u32 4294901760, %v1431_v37  ;;  %v1445_v37 = vsub.f32 %v3582_v22, %v4129_v56 }
 0x21a   : > { %v1411_v50 = vand.u32 4294901760, %v1410_v16  ;;  %v1424_v16 = vsub.f32 %v3528_v27, %v4114_v58  ;;  %v1543_v53 = vsub.f32 %v3539_v19, %v4115_v41  ;;  %v4123_v58 = vand.u32 4294901760, %v3567_v39 }
 0x21b   : > { %v4128_v41 = vand.u32 4294901760, %v3569_v6  ;;  %v1446_v1 = vand.u32 4294901760, %v1445_v37 }
 0x21c   : > { %v3688_v29 = vpack.c.bf16 %v1411_v50, %v1404_v3  ;;  %v1425_v13 = vand.u32 4294901760, %v1424_v16  ;;  %v4122_v50 = vand.u32 4294901760, %v3548_v2  ;;  %v3700_v3 = vpack.c.bf16 %v1537_v31, %v1530_v21 }
 0x21d   : > { %v1544_v21 = vand.u32 4294901760, %v1543_v53  ;;  %v1551_v31 = vand.u32 4294901760, %v1550_v54  ;;  %v1557_v35 = vsub.f32 %v3567_v39, %v4123_v58  ;;  %v1564_v53 = vsub.f32 %v3569_v6, %v4128_v41 }
 0x21e   : > { %v3708_v14 = vpack.c.bf16 %v1425_v13, %v1418_v34  ;;  %v1438_v16 = vsub.f32 %v3548_v2, %v4122_v50  ;;  %v4130_v13 = vand.u32 4294901760, %v3584_v18  ;;  %v4131_v50 = vand.u32 4294901760, %v3586_v25 }
 0x21f   : > { %v3720_v34 = vpack.c.bf16 %v1551_v31, %v1544_v21  ;;  %v1558_v21 = vand.u32 4294901760, %v1557_v35  ;;  %v1565_v31 = vand.u32 4294901760, %v1564_v53  ;;  %v4136_v58 = vand.u32 4294901760, %v3591_v43 }
 0x220   : > { %v1439_v5 = vand.u32 4294901760, %v1438_v16  ;;  %v1452_v16 = vsub.f32 %v3584_v18, %v4130_v13  ;;  %v4137_v41 = vand.u32 4294901760, %v3599_v40  ;;  %v1571_v56 = vsub.f32 %v3586_v25, %v4131_v50 }
 0x221   : > { %v1578_v35 = vsub.f32 %v3591_v43, %v4136_v58  ;;  %v4143_v13 = vand.u32 4294901760, %v3603_v12  ;;  %v4146_v50 = vand.u32 4294901760, %v3605_v20  ;;  %v4144_v58 = vand.u32 4294901760, %v3607_v38 }
 0x222   : > { %v3728_v54 = vpack.c.bf16 %v1439_v5, %v1432_v33  ;;  %v1453_v61 = vand.u32 4294901760, %v1452_v16  ;;  %v4138_v5 = vand.u32 4294901760, %v3601_v7  ;;  %v3740_v33 = vpack.c.bf16 %v1565_v31, %v1558_v21 }
 0x223   : > { %v1459_v37 = vsub.f32 %v3599_v40, %v4137_v41  ;;  %v1572_v21 = vand.u32 4294901760, %v1571_v56  ;;  %v1579_v31 = vand.u32 4294901760, %v1578_v35  ;;  %v1585_v41 = vsub.f32 %v3603_v12, %v4143_v13 }
 0x224   : > { %v3748_v53 = vpack.c.bf16 %v1453_v61, %v1446_v1  ;;  %v1466_v16 = vsub.f32 %v3601_v7, %v4138_v5  ;;  %v4145_v61 = vand.u32 4294901760, %v3609_v48  ;;  %v1592_v56 = vsub.f32 %v3605_v20, %v4146_v50 }
 0x225   : > { %v1460_v52 = vand.u32 4294901760, %v1459_v37  ;;  %v3760_v1 = vpack.c.bf16 %v1579_v31, %v1572_v21  ;;  %v1473_v37 = vsub.f32 %v3607_v38, %v4144_v58  ;;  %v1586_v21 = vand.u32 4294901760, %v1585_v41 }
 0x226   : > { %v1467_v10 = vand.u32 4294901760, %v1466_v16  ;;  %v1480_v16 = vsub.f32 %v3609_v48, %v4145_v61  ;;  %v1593_v31 = vand.u32 4294901760, %v1592_v56  ;;  %v337_v56 = vlaneseq }
 0x227   : > { %v1474_v5 = vand.u32 4294901760, %v1473_v37 }
 0x228   : > { %v3768_v35 = vpack.c.bf16 %v1467_v10, %v1460_v52  ;;  %v1481_v26 = vand.u32 4294901760, %v1480_v16  ;;  %v3776_v60 = vpack.c.bf16 %v1593_v31, %v1586_v21  ;;  %v338_v16 = vshrl.u32 %v337_v56, 7  ;;  %v335_v21 = vld [vmem:[%s4011_s4] sm:$0x3] }
 0x22a   : > { %v3778_v13 = vpack.c.bf16 %v1481_v26, %v1474_v5  ;;  %v339_v41 = vsub.s32 0, %v338_v16  ;;  %v343_v31 = vsub.s32 1, %v338_v16 }
 0x22c   : > { %v340_v61 = vrot.slane %v335_v21, %v339_v41  ;;  %v344_v58 = vrot.slane %v335_v21, %v343_v31 }
 0x2c7   : > { %v1197_v50 = vpop.f32.mrb[0].mxu0 }
 0x2c8   : > { %v2782_v52 = vadd.f32 %v1197_v50, %v340_v61  ;;  %v1199_v10 = vpop.f32.mrb[1].mxu0 }
 0x2c9   : > { %v2783_v26 = vadd.f32 %v1199_v10, %v344_v58 }
 0x2ca   : > { %v1204_v44 = vmul.f32 0.044715, %v2782_v52  ;;  %v1202_v41 = vmul.f32 0.5, %v2782_v52 }
 0x2cb   : > { %v1205_v0 = vmul.f32 0.044715, %v2783_v26  ;;  %v1203_v31 = vmul.f32 0.5, %v2783_v26 }
 0x2cc   : > { %v1206_v5 = vmul.f32 %v2782_v52, %v1204_v44 }
 0x2cd   : > { %v1207_v28 = vmul.f32 %v2783_v26, %v1205_v0 }
 0x2ce   : > { %v1208_v32 = vmul.f32 %v2782_v52, %v1206_v5 }
 0x2cf   : > { %v1209_v37 = vmul.f32 %v2783_v26, %v1207_v28 }
 0x2d0   : > { %v1210_v38 = vadd.f32 %v2782_v52, %v1208_v32 }
 0x2d1   : > { %v1211_v56 = vadd.f32 %v2783_v26, %v1209_v37  ;;  %v4287_v26 = vld [vmem:[#allocation28_spill] sm:$0xff] }
 0x2d2   : > { %v1212_v48 = vmul.f32 0.7978846, %v1210_v38  ;;  %v4289_v37 = vld [vmem:[#allocation12_spill] sm:$0xff] }
 0x2d3   : > { %v1213_v12 = vmul.f32 0.7978846, %v1211_v56  ;;  %v4290_v56 = vld [vmem:[#allocation11_spill] sm:$0xff] }
 0x2d4   : > { %2805 = vtanh.f32 %v1212_v48 }
 0x2d5   : > { %2807 = vtanh.f32 %v1213_v12 }
 0x2de   : > { %v2806_v20 = vpop.eup %2805 }
 0x2df   : > { %v2808_v16 = vpop.eup %2807  ;;  %v1216_v21 = vadd.f32 1.0, %v2806_v20 }
 0x2e0   : > { %v1217_v50 = vadd.f32 1.0, %v2808_v16  ;;  %v4291_v16 = vpack.c.bf16 %v4289_v37, %v4290_v56 }
 0x2e1   : > { %v1218_v61 = vmul.f32 %v1216_v21, %v1202_v41  ;;  %v4292_v41 = vld [vmem:[#allocation2_spill] sm:$0xff]  ;;  %v4293_v21 = vld [vmem:[#allocation3_spill] sm:$0xff] }
 0x2e2   : > { %v1219_v58 = vmul.f32 %v1217_v50, %v1203_v31  ;;  %v4294_v31 = vld [vmem:[#allocation4_spill] sm:$0xff]  ;;  %v4295_v50 = vld [vmem:[#allocation5_spill] sm:$0xff] }
 0x2e3   : > { %v3815_v10 = vand.u32 4294901760, %v1218_v61 }
 0x2e4   : > { %v3817_v44 = vand.u32 4294901760, %v1219_v58 }
 0x2e5   : > { %v3820_v28 = vsub.f32 %v1218_v61, %v3815_v10  ;;  %v4296_v61 = vld [vmem:[#allocation6_spill] sm:$0xff] }
 0x2e6   : > { %v1356_v32 = vsub.f32 %v1219_v58, %v3817_v44  ;;  %v4297_v58 = vld [vmem:[#allocation7_spill] sm:$0xff] }
 0x2e7   : > { %v1363_v0 = vand.u32 4294901760, %v3820_v28 }
 0x2e8   : > { %v1357_v12 = vand.u32 4294901760, %v1356_v32 }
 0x2e9   : > { %v1364_v20 = vsub.f32 %v3820_v28, %v1363_v0 }
 0x2ea   : > { %v1358_v38 = vsub.f32 %v1356_v32, %v1357_v12 }
 0x2eb   : > { %v1365_v52 = vand.u32 4294901760, %v1364_v20  ;;  %v4299_v20 = vld [vmem:[#allocation9_spill] sm:$0xff] }
 0x2ec   : > { %v1359_v48 = vand.u32 4294901760, %v1358_v38  ;;  %v4300_v38 = vld [vmem:[#allocation15_spill] sm:$0xff] }
 0x2ee   : > { %1360 = vmatprep.mubr.f32.mxu1 %v1359_v48  ;;  %v4301_v48 = vld [vmem:[#allocation17_spill] sm:$0xff] }
 0x2ef   : > { %1366 = vmatmul.mubr.f32.vlgmr.msra.gmra.mrb[0].mxu1 %v1365_v52  ;;  %v4302_v52 = vld [vmem:[#allocation19_spill] sm:$0xff] }
 0x2f0   : > { %2625 = vmatpush3.bf16.msra.mxu1 %v3642_v8  ;;  %1596 = vmatprep.mubr.f32.mxu1 %v3817_v44  ;;  %v4272_v8 = vpack.c.bf16 %v3580_v9, %v3562_v4 }
 0x2f1   : > { %2627 = vmatprep.subr.bf16.mxu1 %v3660_v17  ;;  %v4273_v17 = vpack.c.bf16 %v3458_v51, %v3456_v47 }
 0x2f4   : > { %2629 = vmatpush3.bf16.msra.mxu1 %v3668_v57  ;;  %v4274_v57 = vpack.c.bf16 %v3471_v36, %v3469_v46 }
 0x2f5   : > { %2631 = vmatprep.subr.bf16.mxu1 %v3680_v30  ;;  %v4276_v30 = vpack.c.bf16 %v3490_v23, %v3488_v45 }
 0x2f8   : > { %2633 = vmatpush3.bf16.msra.mxu1 %v3688_v29  ;;  %v4277_v29 = vpack.c.bf16 %v3499_v62, %v3497_v59 }
 0x2f9   : > { %2635 = vmatprep.subr.bf16.mxu1 %v3700_v3  ;;  %v4278_v3 = vpack.c.bf16 %v3513_v42, %v3511_v11 }
 0x2fc   : > { %2637 = vmatpush3.bf16.msra.mxu1 %v3708_v14  ;;  %v4279_v14 = vpack.c.bf16 %v3528_v27, %v3526_v63 }
 0x2fd   : > { %2639 = vmatprep.subr.bf16.mxu1 %v3720_v34  ;;  %v4281_v34 = vpack.c.bf16 %v3548_v2, %v3543_v49 }
 0x300   : > { %2641 = vmatpush3.bf16.msra.mxu1 %v3728_v54  ;;  %v4282_v54 = vpack.c.bf16 %v3569_v6, %v3567_v39 }
 0x301   : > { %2643 = vmatprep.subr.bf16.mxu1 %v3740_v33  ;;  %v4283_v33 = vpack.c.bf16 %v3584_v18, %v3582_v22 }
 0x304   : > { %2645 = vmatpush3.bf16.msra.mxu1 %v3748_v53  ;;  %v4284_v53 = vpack.c.bf16 %v3591_v43, %v3586_v25 }
 0x305   : > { %2647 = vmatprep.subr.bf16.mxu1 %v3760_v1  ;;  %v4285_v1 = vpack.c.bf16 %v3601_v7, %v3599_v40 }
 0x308   : > { %2649 = vmatpush3.bf16.msra.mxu1 %v3768_v35  ;;  %v4286_v35 = vld [vmem:[#allocation10_spill] sm:$0xff] }
 0x309   : > { %2651 = vmatprep.subr.bf16.mxu1 %v3776_v60  ;;  %v4275_v60 = vpack.c.bf16 %v3475_v55, %v3473_v15  ;;  %v4288_v5 = vpack.c.bf16 %v4286_v35, %v4287_v26 }
 0x30c   : > { %2653 = vmatpush3.bf16.msra.mxu1 %v3778_v13  ;;  %v4280_v13 = vpack.c.bf16 %v3541_v24, %v3539_v19 }
 0x30d   : > { %2655 = vmatprep.subr.bf16.mxu1 %v4272_v8  ;;  %v4303_v8 = vld [vmem:[#allocation21_spill] sm:$0xff] }
 0x30f   : > { %1598 = vmatmul.mubr.f32.vlgmr.msra.gmra.mrb[2].mxu1 %v3815_v10 }
 0x310   : > { %2657 = vmatpush3.bf16.msra.mxu1 %v4273_v17  ;;  %1733 = vmatprep.mubr.f32.mxu1 %v1356_v32  ;;  %v4298_v32 = vld [vmem:[#allocation8_spill] sm:$0xff]  ;;  %v4305_v17 = vld [vmem:[#allocation13_spill] sm:$0xff] }
 0x311   : > { %2659 = vmatprep.subr.bf16.mxu1 %v4274_v57  ;;  %v4306_v57 = vld [vmem:[#allocation14_spill] sm:$0xff] }
 0x314   : > { %2661 = vmatpush3.bf16.msra.mxu1 %v4275_v60  ;;  %v4307_v60 = vand.u32 4294901760, %v3562_v4  ;;  %v4314_v4 = vand.u32 4294901760, %v3473_v15  ;;  %v4321_v15 = vand.u32 4294901760, %v3513_v42  ;;  %v4328_v42 = vand.u32 4294901760, %v3567_v39 }
 0x315   : > { %2663 = vmatprep.subr.bf16.mxu1 %v4276_v30  ;;  %v4308_v30 = vand.u32 4294901760, %v3580_v9  ;;  %v4315_v9 = vand.u32 4294901760, %v3475_v55  ;;  %v4322_v55 = vand.u32 4294901760, %v3526_v63  ;;  %v4329_v63 = vand.u32 4294901760, %v3569_v6 }
 0x316   : > { %v4335_v39 = vand.u32 4294901760, %v3601_v7  ;;  %v4336_v6 = vand.u32 4294901760, %v4287_v26 }
 0x318   : > { %2665 = vmatpush3.bf16.msra.mxu1 %v4277_v29  ;;  %v2718_v29 = vpack.c.bf16 %v4308_v30, %v4307_v60 }
 0x319   : > { %2667 = vmatprep.subr.bf16.mxu1 %v4278_v3  ;;  %v4309_v3 = vld [vmem:[#allocation16_spill] sm:$0xff] }
 0x31c   : > { %2669 = vmatpush3.bf16.msra.mxu1 %v4279_v14  ;;  %v4310_v14 = vand.u32 4294901760, %v3456_v47  ;;  %v2724_v47 = vpack.c.bf16 %v4315_v9, %v4314_v4  ;;  %v2809_v4 = vld [vmem:[%s2875_s29] sm:$0xff] }
 0x31d   : > { %2671 = vmatprep.subr.bf16.mxu1 %v4280_v13  ;;  %v4311_v13 = vand.u32 4294901760, %v3458_v51  ;;  %v4316_v51 = vand.u32 4294901760, %v3488_v45  ;;  %v4323_v45 = vand.u32 4294901760, %v3528_v27  ;;  %v4330_v27 = vand.u32 4294901760, %v3582_v22 }
 0x31e   : > { %v4337_v22 = vand.u32 4294901760, %v4286_v35 }
 0x31f   : > { %v2732_v60 = vpack.c.bf16 %v4323_v45, %v4322_v55 }
 0x320   : > { %2673 = vmatpush3.bf16.msra.mxu1 %v4281_v34  ;;  %v2720_v34 = vpack.c.bf16 %v4311_v13, %v4310_v14  ;;  %v2738_v14 = vpack.c.bf16 %v4329_v63, %v4328_v42 }
 0x321   : > { %2675 = vmatprep.subr.bf16.mxu1 %v4282_v54  ;;  %v4312_v54 = vand.u32 4294901760, %v3469_v46 }
 0x324   : > { %2677 = vmatpush3.bf16.msra.mxu1 %v4283_v33  ;;  %v4313_v33 = vand.u32 4294901760, %v3471_v36  ;;  %v4318_v36 = vand.u32 4294901760, %v3497_v59  ;;  %v4325_v59 = vand.u32 4294901760, %v3541_v24  ;;  %v4332_v24 = vand.u32 4294901760, %v3586_v25 }
 0x325   : > { %2679 = vmatprep.subr.bf16.mxu1 %v4284_v53  ;;  %v4339_v25 = vand.u32 4294901760, %v4289_v37 }
 0x326   : > { %v2722_v53 = vpack.c.bf16 %v4313_v33, %v4312_v54  ;;  %v2746_v33 = vpack.c.bf16 %v4337_v22, %v4336_v6 }
 0x328   : > { %2681 = vmatpush3.bf16.msra.mxu1 %v4285_v1  ;;  %v4317_v1 = vand.u32 4294901760, %v3490_v23  ;;  %v4324_v23 = vand.u32 4294901760, %v3539_v19  ;;  %v4331_v19 = vand.u32 4294901760, %v3584_v18  ;;  %v4338_v18 = vand.u32 4294901760, %v4290_v56 }
 0x329   : > { %2683 = vmatprep.subr.bf16.mxu1 %v4288_v5  ;;  %v4320_v5 = vand.u32 4294901760, %v3511_v11  ;;  %v4327_v11 = vand.u32 4294901760, %v3548_v2  ;;  %v4334_v2 = vand.u32 4294901760, %v3599_v40 }
 0x32a   : > { %v2726_v46 = vpack.c.bf16 %v4317_v1, %v4316_v51  ;;  %v2734_v30 = vpack.c.bf16 %v4325_v59, %v4324_v23  ;;  %v2740_v13 = vpack.c.bf16 %v4331_v19, %v4330_v27 }
 0x32b   : > { %v2744_v54 = vpack.c.bf16 %v4335_v39, %v4334_v2 }
 0x32c   : > { %2685 = vmatpush3.bf16.msra.mxu1 %v4291_v16  ;;  %v2730_v16 = vpack.c.bf16 %v4321_v15, %v4320_v5 }
 0x32d   : > { %2687 = vmatprep.subr.bf16.mxu1 %v4292_v41 }
 0x32f   : > { %1736 = vmatmul.mubr.f32.vlgmr.msra.gmra.mrb[4].mxu1 %v3820_v28  ;;  %v4319_v28 = vand.u32 4294901760, %v3499_v62  ;;  %v4326_v62 = vand.u32 4294901760, %v3543_v49  ;;  %v4333_v49 = vand.u32 4294901760, %v3591_v43 }
 0x330   : > { %2689 = vmatpush3.bf16.msra.mxu1 %v4293_v21  ;;  %1840 = vmatprep.mubr.f32.mxu1 %v1357_v12  ;;  %v4304_v12 = vld [vmem:[#allocation24_spill] sm:$0xff] }
 0x331   : > { %2691 = vmatprep.subr.bf16.mxu1 %v4294_v31 }
 0x334   : > { %2693 = vmatpush3.bf16.msra.mxu1 %v4295_v50 }
 0x335   : > { %2695 = vmatprep.subr.bf16.mxu1 %v4296_v61 }
 0x338   : > { %2697 = vmatpush3.bf16.msra.mxu1 %v4297_v58 }
 0x339   : > { %2699 = vmatprep.subr.bf16.mxu1 %v4298_v32 }
 0x33c   : > { %2701 = vmatpush3.bf16.msra.mxu1 %v4299_v20 }
 0x33d   : > { %2703 = vmatprep.subr.bf16.mxu1 %v4300_v38 }
 0x340   : > { %2705 = vmatpush3.bf16.msra.mxu1 %v4301_v48 }
 0x341   : > { %2707 = vmatprep.subr.bf16.mxu1 %v4302_v52 }
 0x344   : > { %2709 = vmatpush3.bf16.msra.mxu1 %v4303_v8 }
 0x345   : > { %2711 = vmatprep.subr.bf16.mxu1 %v4304_v12 }
 0x348   : > { %2713 = vmatpush3.bf16.msra.mxu1 %v4305_v17 }
 0x349   : > { %2715 = vmatprep.subr.bf16.mxu1 %v4306_v57 }
 0x34c   : > { %2717 = vmatpush3.bf16.msra.mxu1 %v4309_v3 }
 0x34d   : > { %2719 = vmatprep.subr.bf16.mxu1 %v2718_v29  ;;  %v2736_v29 = vpack.c.bf16 %v4327_v11, %v4326_v62 }
 0x34f   : > { %1844 = vmatmul.mubr.f32.vlgmr.msra.gmra.mrb[6].mxu1 %v1363_v0  ;;  %v2728_v0 = vpack.c.bf16 %v4319_v28, %v4318_v36 }
 0x350   : > { %2721 = vmatpush3.bf16.msra.mxu1 %v2720_v34  ;;  %2010 = vmatprep.mubr.f32.mxu1 %v3817_v44  ;;  %v2742_v34 = vpack.c.bf16 %v4333_v49, %v4332_v24 }
 0x351   : > { %2723 = vmatprep.subr.bf16.mxu1 %v2722_v53  ;;  %v2748_v53 = vpack.c.bf16 %v4339_v25, %v4338_v18 }
 0x354   : > { %2725 = vmatpush3.bf16.msra.mxu1 %v2724_v47 }
 0x355   : > { %2727 = vmatprep.subr.bf16.mxu1 %v2726_v46 }
 0x358   : > { %2729 = vmatpush3.bf16.msra.mxu1 %v2728_v0 }
 0x359   : > { %2731 = vmatprep.subr.bf16.mxu1 %v2730_v16 }
 0x35c   : > { %2733 = vmatpush3.bf16.msra.mxu1 %v2732_v60 }
 0x35d   : > { %2735 = vmatprep.subr.bf16.mxu1 %v2734_v30 }
 0x360   : > { %2737 = vmatpush3.bf16.msra.mxu1 %v2736_v29 }
 0x361   : > { %2739 = vmatprep.subr.bf16.mxu1 %v2738_v14 }
 0x364   : > { %2741 = vmatpush3.bf16.msra.mxu1 %v2740_v13 }
 0x365   : > { %2743 = vmatprep.subr.bf16.mxu1 %v2742_v34 }
 0x368   : > { %2745 = vmatpush3.bf16.msra.mxu1 %v2744_v54 }
 0x369   : > { %2747 = vmatprep.subr.bf16.mxu1 %v2746_v33 }
 0x36c   : > { %2749 = vmatpush3.bf16.msra.mxu1 %v2748_v53 }
 0x36d   : > { %2751 = vmatprep.subr.bf16.mxu1 %v4292_v41 }
 0x36f   : > { %2012 = vmatmul.mubr.f32.vlgmr.msra.gmra.mrb[8].mxu1 %v3815_v10 }
 0x370   : > { %2753 = vmatpush3.bf16.msra.mxu1 %v4293_v21  ;;  %2114 = vmatprep.mubr.f32.mxu1 %v3817_v44  ;;  %v2185_v44 = vld [vmem:[%s4013_s6] ss:$0 sm:$0xff] }
 0x371   : > { %2755 = vmatprep.subr.bf16.mxu1 %v4294_v31 }
 0x374   : > { %2757 = vmatpush3.bf16.msra.mxu1 %v4295_v50 }
 0x375   : > { %2759 = vmatprep.subr.bf16.mxu1 %v4296_v61 }
 0x378   : > { %2761 = vmatpush3.bf16.msra.mxu1 %v4297_v58 }
 0x379   : > { %2763 = vmatprep.subr.bf16.mxu1 %v4298_v32 }
 0x37c   : > { %2765 = vmatpush3.bf16.msra.mxu1 %v4299_v20 }
 0x37d   : > { %2767 = vmatprep.subr.bf16.mxu1 %v4300_v38 }
 0x380   : > { %2769 = vmatpush3.bf16.msra.mxu1 %v4301_v48 }
 0x381   : > { %2771 = vmatprep.subr.bf16.mxu1 %v4302_v52 }
 0x384   : > { %2773 = vmatpush3.bf16.msra.mxu1 %v4303_v8 }
 0x385   : > { %2775 = vmatprep.subr.bf16.mxu1 %v4304_v12 }
 0x388   : > { %2777 = vmatpush3.bf16.msra.mxu1 %v4305_v17 }
 0x389   : > { %2779 = vmatprep.subr.bf16.mxu1 %v4306_v57 }
 0x38c   : > { %2781 = vmatpush3.bf16.msra.mxu1 %v4309_v3 }
 0x38f   : > { %2116 = vmatmul.mubr.f32.vlgmr.msra.gmra.mrb[10].mxu1 %v3815_v10 }
 0x3c2   : > { %v2220_v43 = vpop.f32.mrb[0].mxu1 }
 0x3c3   : > { %v2221_v40 = vpop.f32.mrb[1].mxu1 }
 0x3c4   : > { %v2222_v7 = vadd.f32 %v2221_v40, %v2220_v43 }
 0x3c6   : > { %v1368_v37 = vadd.f32 %v2222_v7, %v2185_v44 }
 0x3e2   : > { %v2255_v35 = vpop.f32.mrb[2].mxu1 }
 0x3e3   : > { %v2256_v26 = vpop.f32.mrb[3].mxu1 }
 0x3e4   : > { %v2257_v56 = vadd.f32 %v2256_v26, %v2255_v35 }
 0x3e6   : > { %v1600_v41 = vadd.f32 %v2257_v56, %v1368_v37 }
 0x402   : > { %v2290_v21 = vpop.f32.mrb[4].mxu1 }
 0x403   : > { %v2291_v31 = vpop.f32.mrb[5].mxu1 }
 0x404   : > { %v2292_v50 = vadd.f32 %v2291_v31, %v2290_v21 }
 0x406   : > { %v1738_v61 = vadd.f32 %v2292_v50, %v1600_v41 }
 0x422   : > { %v2325_v58 = vpop.f32.mrb[6].mxu1 }
 0x423   : > { %v2326_v10 = vpop.f32.mrb[7].mxu1 }
 0x424   : > { %v2327_v32 = vadd.f32 %v2326_v10, %v2325_v58 }
 0x426   : > { %v1846_v20 = vadd.f32 %v2327_v32, %v1738_v61 }
 0x442   : > { %v2360_v38 = vpop.f32.mrb[8].mxu1 }
 0x443   : > { %v2361_v48 = vpop.f32.mrb[9].mxu1 }
 0x444   : > { %v2362_v52 = vadd.f32 %v2361_v48, %v2360_v38 }
 0x446   : > { %v2014_v8 = vadd.f32 %v2362_v52, %v1846_v20 }
 0x462   : > { %v2395_v12 = vpop.f32.mrb[10].mxu1 }
 0x463   : > { %v2396_v17 = vpop.f32.mrb[11].mxu1 }
 0x464   : > { %v2397_v57 = vadd.f32 %v2396_v17, %v2395_v12 }
 0x466   : > { %v2118_v3 = vadd.f32 %v2397_v57, %v2014_v8 }
 0x468   : > { %v2121_v9 = vadd.f32 %v2809_v4, %v2118_v3 }
 0x46a   : > { %2122 = vst [vmem:[%s273_s12] sm:$0xff] %v2121_v9 }
 0x46b PF: > { %s17_s24 = sadd.s32 1, %s2816_s24  }
 0x46c   : > { %p14_p4 = scmp.ge.s32.totalorder %s17_s24, 4  }
 0x46e   :  { %16 = sbr.rel (!%p14_p4) target bundleno = 1 (0x1), region = 78 }

// kernel: transformer_forward.7
= control target key start
LH: loop header
LB: loop body
LE: loop exit
PB: predicated region body
PF: predicated region fallthrough
CT: control target
= control target key end

     0   :  { %12 = vsyncpa [#allocation3], 0  ;;  %s4192_s0 = inlined_call_operand.vmem [shape: f32[16,128], index: 0, kind: input, shape index: {}]   ;;  %s4193_s1 = inlined_call_operand.vmem [shape: f32[1,128], index: 1, kind: input, shape index: {}]   ;;  %s4194_s2 = inlined_call_operand.vmem [shape: f32[1,128], index: 2, kind: input, shape index: {}]   ;;  %s4195_s3 = inlined_call_operand.vmem [shape: f32[128,256], index: 3, kind: input, shape index: {}]   ;;  %s4196_s4 = inlined_call_operand.vmem [shape: f32[1,256], index: 4, kind: input, shape index: {}]   ;;  %s4197_s5 = inlined_call_operand.vmem [shape: f32[256,128], index: 5, kind: input, shape index: {}]   ;;  %s4198_s6 = inlined_call_operand.vmem [shape: f32[1,128], index: 6, kind: input, shape index: {}]   ;;  %s4199_s7 = inlined_call_operand.hbm [shape: f32[16,128], index: 7, kind: output, shape index: {}]  }
   0x1   :  { %14 = vsyncpa [#allocation3 + $0x1], 0  ;;  %s2968_s24 = smov 0   ;;  %s2970_s25 = smov 0  }
   0x2   :  { %s2972_s26 = smov 0   ;;  %s2974_s27 = smov 0  }
   0x3 LB: > { %s2989_s28 = sadd.s32 4294967295, %s2924_s27   ;;  %s2196_s29 = sadd.s32 4294967294, %s2924_s27   ;;  %s2924_s27 = sphi %s2974_s27, %s4530_s27   ;;  %s2920_s26 = sphi %s2972_s26, %s4529_s26   ;;  %s2916_s25 = sphi %s2970_s25, %s4528_s25   ;;  %s2912_s24 = sphi %s2968_s24, %s4527_s24  }
   0x4   : > { %s2993_s30 = sadd.s32 1, %s2924_s27   ;;  %s179_s8 = sadd.s32 1, %s2920_s26 }
   0x5   : > { %s176_s9 = ssub.s32 %s2924_s27, %s2993_s30  ;;  %p189_p0 = scmp.ne.s32.totalorder %s2920_s26, %s2916_s25 }
   0x6   : > { %p177_p1 = scmp.eq.s32.totalorder %s176_s9, 0  ;;  %p190_p2 = scmp.eq.s32.totalorder %s2989_s28, 1 }
   0x7   : > { %p195_p3 = scmp.ne.s32.totalorder %s2916_s25, %s2912_s24  ;;  %p196_p4 = scmp.eq.s32.totalorder %s2196_s29, 1 }
   0x8   : > { %s3004_s10 = scalar_select %p177_p1, %s2920_s26, %s179_s8  }
   0x9   : > { %p3006_p5 = por %p190_p2, %p189_p0  ;;  %p3010_p6 = por %p196_p4, %p195_p3 }
   0xa   : > { %p2199_p7 = scmp.ge.s32.totalorder %s2924_s27, 1  ;;  %p239_p8 = scmp.lt.s32.totalorder %s2924_s27, 3 }
   0xc   : > { %p240_p9 = pnand %p2199_p7, %p239_p8 }
   0xe   : > { %243 = sbr.rel (%p240_p9) target bundleno = 1153 (0x481), region = 48 }
  0x15   : > { %p270_p10 = scmp.lt.s32.totalorder %s2989_s28, 1  ;;  %v304_v1 = vld [vmem:[%s4195_s3 + $0x8] sm:$0xff]  ;;  %v306_v2 = vld [vmem:[%s4195_s3 + $0x18] sm:$0xff]  ;;  %v303_v3 = vld [vmem:[%s4195_s3] sm:$0xff]  ;;  %s267_s29 = sand.u32 1, %s2916_s25  }
  0x16   : > { %v347_v4 = vand.u32 4294901760, %v304_v1  ;;  %v351_v5 = vand.u32 4294901760, %v306_v2  ;;  %v305_v6 = vld [vmem:[%s4195_s3 + $0x10] sm:$0xff]  ;;  %v349_v7 = vand.u32 4294901760, %v303_v3  ;;  %v308_v19 = vld [vmem:[%s4195_s3 + $0x28] sm:$0xff]  ;;  %v310_v20 = vld [vmem:[%s4195_s3 + $0x38] sm:$0xff] }
  0x17   : > { %s271_s13 = scalar_select %p270_p10, %s2989_s28, 1  ;;  %v353_v8 = vand.u32 4294901760, %v305_v6  ;;  %v355_v21 = vand.u32 4294901760, %v308_v19  ;;  %v359_v22 = vand.u32 4294901760, %v310_v20  ;;  %v307_v23 = vld [vmem:[%s4195_s3 + $0x20] sm:$0xff]  ;;  %v309_v24 = vld [vmem:[%s4195_s3 + $0x30] sm:$0xff] }
  0x18   : > { %v3036_v9 = vpack.c.bf16 %v351_v5, %v347_v4  ;;  %v3038_v10 = vsub.f32 %v304_v1, %v347_v4  ;;  %v3040_v11 = vsub.f32 %v306_v2, %v351_v5  ;;  %v3042_v12 = vsub.f32 %v303_v3, %v349_v7  ;;  %v312_v29 = vld [vmem:[%s4195_s3 + $0x48] sm:$0xff]  ;;  %v314_v30 = vld [vmem:[%s4195_s3 + $0x58] sm:$0xff]  ;;  %v311_v33 = vld [vmem:[%s4195_s3 + $0x40] sm:$0xff]  ;;  %s2200_s8 = sshll.u32 %s267_s29, 3  ;;  %s2206_s9 = sshll.u32 %s2989_s28, 7 }
  0x19   : > { %s2201_s14 = sshll.u32 %s271_s13, 3  ;;  %v3044_v13 = vpack.c.bf16 %v353_v8, %v349_v7  ;;  %v3046_v14 = vsub.f32 %v305_v6, %v353_v8  ;;  %v357_v25 = vand.u32 4294901760, %v307_v23  ;;  %v361_v26 = vand.u32 4294901760, %v309_v24  ;;  %v313_v34 = vld [vmem:[%s4195_s3 + $0x50] sm:$0xff]  ;;  %v316_v39 = vld [vmem:[%s4195_s3 + $0x68] sm:$0xff]  ;;  %v318_v40 = vld [vmem:[%s4195_s3 + $0x78] sm:$0xff]  ;;  %s4150_s18 = scalar_lea.hbm %s4199_s7, %s2206_s9 }
  0x1a   : > { %s3021_s17 = scalar_lea.vmem %s4192_s0, %s2201_s14  ;;  %2420 = vmatprep.subr.bf16.mxu0 %v3036_v9  ;;  %v3066_v27 = vpack.c.bf16 %v359_v22, %v355_v21  ;;  %v363_v31 = vand.u32 4294901760, %v312_v29  ;;  %v367_v32 = vand.u32 4294901760, %v314_v30  ;;  %v365_v35 = vand.u32 4294901760, %v311_v33  ;;  %v315_v43 = vld [vmem:[%s4195_s3 + $0x60] sm:$0xff]  ;;  %v317_v44 = vld [vmem:[%s4195_s3 + $0x70] sm:$0xff]  ;;  %v320_v49 = vld [vmem:[%s4195_s3 + $0x88] sm:$0xff] }
  0x1b   : > { %v274_v0 = vld [vmem:[%s3021_s17] sm:$0xff]  ;;  %2422 = vmatpush1.bf16.msra.mxu0 %v3044_v13  ;;  %v3068_v28 = vpack.c.bf16 %v361_v26, %v357_v25  ;;  %v369_v36 = vand.u32 4294901760, %v313_v34  ;;  %v371_v41 = vand.u32 4294901760, %v316_v39  ;;  %v375_v42 = vand.u32 4294901760, %v318_v40  ;;  %v322_v50 = vld [vmem:[%s4195_s3 + $0x98] sm:$0xff]  ;;  %v321_v54 = vld [vmem:[%s4195_s3 + $0x90] sm:$0xff] }
  0x1c   : > { %277 = vadd.xlane.f32.xlu0 %v274_v0  ;;  %4350 = vst [vmem:[#allocation5_spill] sm:$0xff] %v3066_v27  ;;  %2424 = vmatprep.subr.bf16.mxu0 %v3066_v27  ;;  %v3084_v37 = vpack.c.bf16 %v367_v32, %v363_v31  ;;  %v373_v45 = vand.u32 4294901760, %v315_v43  ;;  %v377_v46 = vand.u32 4294901760, %v317_v44  ;;  %v379_v51 = vand.u32 4294901760, %v320_v49  ;;  %v319_v53 = vld [vmem:[%s4195_s3 + $0x80] sm:$0xff]  ;;  %v324_v59 = vld [vmem:[%s4195_s3 + $0xa8] sm:$0xff] }
  0x1d   : > { %4351 = vst [vmem:[#allocation6_spill] sm:$0xff] %v3068_v28  ;;  %v3086_v38 = vpack.c.bf16 %v369_v36, %v365_v35  ;;  %v3102_v47 = vpack.c.bf16 %v375_v42, %v371_v41  ;;  %v383_v52 = vand.u32 4294901760, %v322_v50  ;;  %v381_v55 = vand.u32 4294901760, %v319_v53  ;;  %v326_v60 = vld [vmem:[%s4195_s3 + $0xb8] sm:$0xff]  ;;  %v323_v7 = vld [vmem:[%s4195_s3 + $0xa0] sm:$0xff]  ;;  %v325_v8 = vld [vmem:[%s4195_s3 + $0xb0] sm:$0xff] }
  0x1e   : > { %4352 = vst [vmem:[#allocation7_spill] sm:$0xff] %v3084_v37  ;;  %v3104_v48 = vpack.c.bf16 %v377_v46, %v373_v45  ;;  %v385_v56 = vand.u32 4294901760, %v321_v54  ;;  %v387_v61 = vand.u32 4294901760, %v324_v59  ;;  %v391_v62 = vand.u32 4294901760, %v326_v60  ;;  %s269_s13 = scalar_lea.vmem [#allocation2], %s2200_s8  ;;  %s2124_s19 = scalar_lea.sflag [#allocation3], %s267_s29 }
  0x1f   : > { %2426 = vmatpush1.bf16.msra.mxu0 %v3068_v28  ;;  %4353 = vst [vmem:[#allocation8_spill] sm:$0xff] %v3086_v38  ;;  %4354 = vst [vmem:[#allocation9_spill] sm:$0xff] %v3102_v47  ;;  %v3120_v57 = vpack.c.bf16 %v383_v52, %v379_v51  ;;  %v3131_v63 = vsub.f32 %v308_v19, %v355_v21  ;;  %v3135_v1 = vsub.f32 %v307_v23, %v357_v25  ;;  %v330_v21 = vld [vmem:[%s4195_s3 + $0xd8] sm:$0xff]  ;;  %s2137_s14 = sshll.u32 %s269_s13, 4  ;;  %s2927_s28 = smov [#allocation2]   ;;  %s4152_s14 = int_to_ptr.vmem [resolvable:$true] %s2137_s14 }
  0x20   : > { %2428 = vmatprep.subr.bf16.mxu0 %v3084_v37  ;;  %4355 = vst [vmem:[#allocation10_spill] sm:$0xff] %v3104_v48  ;;  %v3122_v58 = vpack.c.bf16 %v385_v56, %v381_v55  ;;  %v3137_v2 = vsub.f32 %v309_v24, %v361_v26  ;;  %v3140_v3 = vsub.f32 %v312_v29, %v363_v31  ;;  %v329_v29 = vld [vmem:[%s4195_s3 + $0xd0] sm:$0xff]  ;;  %v334_v31 = vld [vmem:[%s4195_s3 + $0xf8] sm:$0xff]  ;;  %s2862_s20 = scalar_lea.vmem %s4152_s14, 128 }
  0x21   : > { %4356 = vst [vmem:[#allocation11_spill] sm:$0xff] %v3120_v57  ;;  %v3142_v4 = vsub.f32 %v314_v30, %v367_v32  ;;  %v3144_v5 = vsub.f32 %v311_v33, %v365_v35  ;;  %v3146_v6 = vsub.f32 %v313_v34, %v369_v36  ;;  %v3160_v19 = vsub.f32 %v317_v44, %v377_v46  ;;  %v332_v30 = vld [vmem:[%s4195_s3 + $0xe8] sm:$0xff]  ;;  %v331_v46 = vld [vmem:[%s4195_s3 + $0xe0] sm:$0xff]  ;;  %p2863_p11 = scmp.ne.s32.totalorder %s4152_s14, %s2862_s20 }
  0x22   : > { %4357 = vst [vmem:[#allocation12_spill] sm:$0xff] %v3122_v58  ;;  %v3171_v23 = vsub.f32 %v320_v49, %v379_v51  ;;  %v3173_v24 = vsub.f32 %v322_v50, %v383_v52  ;;  %v3175_v25 = vsub.f32 %v319_v53, %v381_v55  ;;  %v3177_v26 = vsub.f32 %v321_v54, %v385_v56  ;;  %v333_v53 = vld [vmem:[%s4195_s3 + $0xf0] sm:$0xff] }
  0x23   : > { %2430 = vmatpush1.bf16.msra.mxu0 %v3086_v38  ;;  %4358 = vst [vmem:[#allocation13_spill] sm:$0xff] %v3160_v19  ;;  %v3188_v32 = vpack.c.bf16 %v391_v62, %v387_v61  ;;  %v3190_v33 = vsub.f32 %v324_v59, %v387_v61  ;;  %v3192_v34 = vsub.f32 %v326_v60, %v391_v62  ;;  %v389_v35 = vand.u32 4294901760, %v323_v7  ;;  %p2864_p12 = pnand %p2863_p11, %p3006_p5 }
  0x24   : > { %2432 = vmatprep.subr.bf16.mxu0 %v3102_v47  ;;  %4359 = vst [vmem:[#allocation14_spill] sm:$0xff] %v3171_v23  ;;  %4360 = vst [vmem:[#allocation15_spill] sm:$0xff] %v3173_v24  ;;  %v393_v36 = vand.u32 4294901760, %v325_v8  ;;  %v403_v44 = vand.u32 4294901760, %v332_v30 }
  0x25   : > { %4361 = vst [vmem:[#allocation16_spill] sm:$0xff] %v3175_v25  ;;  %4362 = vst [vmem:[#allocation17_spill] sm:$0xff] %v3177_v26  ;;  %p2865_p13 = pneg %p2864_p12 }
  0x26   : > { %4363 = vst [vmem:[#allocation18_spill] sm:$0xff] %v3188_v32  ;;  %4364 = vst [vmem:[#allocation19_spill] sm:$0xff] %v3192_v34  ;;  %v3200_v49 = vpack.c.bf16 %v393_v36, %v389_v35  ;;  %v3202_v50 = vsub.f32 %v325_v8, %v393_v36  ;;  %v3222_v61 = vsub.f32 %v332_v30, %v403_v44  ;;  %v409_v8 = vand.u32 4294901760, %v333_v53 }
  0x27   : > { %2434 = vmatpush1.bf16.msra.mxu0 %v3104_v48  ;;  %v4203_v30 = vand.u32 4294901760, %v3046_v14 }
  0x28   : > { %2436 = vmatprep.subr.bf16.mxu0 %v3120_v57  ;;  %4365 = vst [vmem:[#allocation20_spill] sm:$0xff] %v3200_v49  ;;  %4366 = vst [vmem:[#allocation21_spill] sm:$0xff] %v3202_v50  ;;  %v4258_v38 = vand.u32 4294901760, %v3222_v61 }
  0x29   : > { %4373 = vst [vmem:[#allocation28_spill] sm:$0xff] %v3222_v61 }
  0x2b   : > { %2438 = vmatpush1.bf16.msra.mxu0 %v3122_v58  ;;  %v4237_v58 = vand.u32 4294901760, %v3190_v33 }
  0x2c   : > { %2440 = vmatprep.subr.bf16.mxu0 %v3188_v32 }
  0x2f   : > { %2442 = vmatpush1.bf16.msra.mxu0 %v3200_v49  ;;  %v4236_v49 = vand.u32 4294901760, %v3175_v25 }
  0xa9   : > { %v278_v15 = vpop.xlane.xlu0 %277 }
  0xaa   : > { %v280_v16 = vmul.f32 0.0078125, %v278_v15  ;;  %v3154_v15 = vsub.f32 %v316_v39, %v371_v41 }
  0xac   : > { %v3050_v17 = vsub.f32 %v274_v0, %v280_v16  ;;  %v3133_v0 = vsub.f32 %v310_v20, %v359_v22  ;;  %v3156_v16 = vsub.f32 %v318_v40, %v375_v42  ;;  %v328_v20 = vld [vmem:[%s4195_s3 + $0xc8] sm:$0xff]  ;;  %v327_v22 = vld [vmem:[%s4195_s3 + $0xc0] sm:$0xff]  ;;  %v399_v40 = vand.u32 4294901760, %v330_v21 }
  0xad   : > { %v395_v39 = vand.u32 4294901760, %v328_v20  ;;  %v397_v41 = vand.u32 4294901760, %v327_v22  ;;  %v3195_v42 = vsub.f32 %v323_v7, %v389_v35  ;;  %v405_v7 = vand.u32 4294901760, %v331_v46 }
  0xae   : > { %v282_v18 = vmul.f32 %v3050_v17, %v3050_v17  ;;  %v3211_v54 = vsub.f32 %v330_v21, %v399_v40  ;;  %v4200_v21 = vand.u32 4294901760, %v3040_v11  ;;  %v4202_v35 = vand.u32 4294901760, %v3042_v12 }
  0xaf   : > { %v3204_v51 = vpack.c.bf16 %v399_v40, %v395_v39  ;;  %v3206_v52 = vsub.f32 %v328_v20, %v395_v39  ;;  %v3215_v56 = vsub.f32 %v327_v22, %v397_v41  ;;  %v4201_v20 = vand.u32 4294901760, %v3038_v10 }
  0xb0   : > { %283 = vadd.xlane.f32.xlu0 %v282_v18  ;;  %v3158_v18 = vsub.f32 %v315_v43, %v373_v45  ;;  %v401_v43 = vand.u32 4294901760, %v329_v29  ;;  %v407_v45 = vand.u32 4294901760, %v334_v31  ;;  %4368 = vst [vmem:[#allocation23_spill] sm:$0xff] %v3211_v54  ;;  %v3229_v22 = vsub.f32 %v331_v46, %v405_v7 }
  0xb1   : > { %4367 = vst [vmem:[#allocation22_spill] sm:$0xff] %v3204_v51  ;;  %4370 = vst [vmem:[#allocation25_spill] sm:$0xff] %v3215_v56  ;;  %2444 = vmatprep.subr.bf16.mxu0 %v3204_v51  ;;  %v3234_v36 = vpack.c.bf16 %v409_v8, %v405_v7  ;;  %v458_v39 = vsub.f32 %v3038_v10, %v4201_v20  ;;  %v470_v40 = vsub.f32 %v3040_v11, %v4200_v21 }
  0xb2   : > { %v3213_v55 = vpack.c.bf16 %v401_v43, %v397_v41  ;;  %v3217_v59 = vsub.f32 %v329_v29, %v401_v43  ;;  %v3220_v60 = vpack.c.bf16 %v407_v45, %v403_v44  ;;  %v3224_v62 = vsub.f32 %v334_v31, %v407_v45  ;;  %4375 = vst [vmem:[#allocation30_spill] sm:$0xff] %v3229_v22 }
  0xb3   : > { %v4204_v29 = vmov 0.0   ;;  %4376 = vst [vmem:[#allocation31_spill] sm:$0xff] %v3234_v36  ;;  %v3236_v31 = vsub.f32 %v333_v53, %v409_v8  ;;  %v464_v41 = vsub.f32 %v3042_v12, %v4202_v35  ;;  %v476_v43 = vsub.f32 %v3046_v14, %v4203_v30 }
  0xb4   : > { %4369 = vst [vmem:[#allocation24_spill] sm:$0xff] %v3213_v55  ;;  %4371 = vst [vmem:[#allocation26_spill] sm:$0xff] %v3217_v59  ;;  %443 = vmatprep.mubr.f32.mxu0 %v4204_v29  ;;  %2446 = vmatpush1.bf16.msra.mxu0 %v3213_v55  ;;  %v4206_v44 = vand.u32 4294901760, %v3131_v63  ;;  %v4212_v45 = vand.u32 4294901760, %v3133_v0  ;;  %v459_v46 = vand.u32 4294901760, %v458_v39  ;;  %v471_v53 = vand.u32 4294901760, %v470_v40 }
  0xb5   : > { %4372 = vst [vmem:[#allocation27_spill] sm:$0xff] %v3220_v60  ;;  %4374 = vst [vmem:[#allocation29_spill] sm:$0xff] %v3224_v62  ;;  %2448 = vmatprep.subr.bf16.mxu0 %v3220_v60  ;;  %v4211_v7 = vand.u32 4294901760, %v3135_v1  ;;  %v4213_v8 = vand.u32 4294901760, %v3137_v2  ;;  %v465_v21 = vand.u32 4294901760, %v464_v41  ;;  %v477_v20 = vand.u32 4294901760, %v476_v43 }
  0xb6   : > { %4377 = vst [vmem:[#allocation32_spill] sm:$0xff] %v3236_v31  ;;  %v482_v35 = vsub.f32 %v3131_v63, %v4206_v44  ;;  %v494_v30 = vsub.f32 %v3133_v0, %v4212_v45  ;;  %v2451_v29 = vpack.c.bf16 %v471_v53, %v459_v46  ;;  %v4215_v41 = vand.u32 4294901760, %v3140_v3 }
  0xb7   : > { %v488_v39 = vsub.f32 %v3135_v1, %v4211_v7  ;;  %v500_v40 = vsub.f32 %v3137_v2, %v4213_v8  ;;  %v3270_v43 = vpack.c.bf16 %v477_v20, %v465_v21  ;;  %v4214_v55 = vand.u32 4294901760, %v3142_v4 }
  0xb8   : > { %2450 = vmatpush1.bf16.msra.mxu0 %v3234_v36  ;;  %v483_v44 = vand.u32 4294901760, %v482_v35  ;;  %v495_v60 = vand.u32 4294901760, %v494_v30  ;;  %v506_v7 = vsub.f32 %v3140_v3, %v4215_v41  ;;  %v4216_v45 = vand.u32 4294901760, %v3144_v5 }
  0xb9   : > { %2452 = vmatprep.subr.bf16.mxu0 %v2451_v29  ;;  %v489_v46 = vand.u32 4294901760, %v488_v39  ;;  %v501_v53 = vand.u32 4294901760, %v500_v40  ;;  %v518_v20 = vsub.f32 %v3142_v4, %v4214_v55  ;;  %v4217_v21 = vand.u32 4294901760, %v3146_v6 }
  0xba   : > { %v3277_v8 = vpack.c.bf16 %v495_v60, %v483_v44  ;;  %v507_v30 = vand.u32 4294901760, %v506_v7  ;;  %v512_v29 = vsub.f32 %v3144_v5, %v4216_v45  ;;  %v4220_v39 = vand.u32 4294901760, %v3154_v15 }
  0xbb   : > { %v3283_v35 = vpack.c.bf16 %v501_v53, %v489_v46  ;;  %v519_v40 = vand.u32 4294901760, %v518_v20  ;;  %v524_v60 = vsub.f32 %v3146_v6, %v4217_v21  ;;  %v4225_v44 = vand.u32 4294901760, %v3156_v16 }
  0xbc   : > { %v4226_v55 = vand.u32 4294901760, %v3158_v18  ;;  %v513_v41 = vand.u32 4294901760, %v512_v29  ;;  %v530_v7 = vsub.f32 %v3154_v15, %v4220_v39  ;;  %v4227_v46 = vand.u32 4294901760, %v3160_v19 }
  0xbd   : > { %v3298_v53 = vpack.c.bf16 %v519_v40, %v507_v30  ;;  %v525_v45 = vand.u32 4294901760, %v524_v60  ;;  %v542_v20 = vsub.f32 %v3156_v16, %v4225_v44  ;;  %v4230_v39 = vand.u32 4294901760, %v3171_v23 }
  0xbe   : > { %v536_v21 = vsub.f32 %v3158_v18, %v4226_v55  ;;  %v531_v36 = vand.u32 4294901760, %v530_v7  ;;  %v548_v29 = vsub.f32 %v3160_v19, %v4227_v46  ;;  %v4233_v51 = vand.u32 4294901760, %v3173_v24 }
  0xbf   : > { %v3311_v30 = vpack.c.bf16 %v525_v45, %v513_v41  ;;  %v543_v40 = vand.u32 4294901760, %v542_v20  ;;  %v554_v55 = vsub.f32 %v3171_v23, %v4230_v39  ;;  %v4238_v46 = vand.u32 4294901760, %v3177_v26 }
  0xc0   : > { %v537_v60 = vand.u32 4294901760, %v536_v21  ;;  %v549_v44 = vand.u32 4294901760, %v548_v29  ;;  %v566_v7 = vsub.f32 %v3173_v24, %v4233_v51  ;;  %v560_v45 = vsub.f32 %v3175_v25, %v4236_v49 }
  0xc1   : > { %v3321_v32 = vpack.c.bf16 %v543_v40, %v531_v36  ;;  %v555_v21 = vand.u32 4294901760, %v554_v55  ;;  %v572_v29 = vsub.f32 %v3177_v26, %v4238_v46  ;;  %v4241_v51 = vand.u32 4294901760, %v3192_v34 }
  0xc2   : > { %v3326_v41 = vpack.c.bf16 %v549_v44, %v537_v60  ;;  %v567_v20 = vand.u32 4294901760, %v566_v7  ;;  %v561_v39 = vand.u32 4294901760, %v560_v45  ;;  %v4242_v36 = vand.u32 4294901760, %v3195_v42 }
  0xc3   : > { %v573_v57 = vand.u32 4294901760, %v572_v29  ;;  %v4243_v49 = vand.u32 4294901760, %v3202_v50  ;;  %v578_v55 = vsub.f32 %v3190_v33, %v4237_v58  ;;  %v590_v44 = vsub.f32 %v3192_v34, %v4241_v51 }
  0xc4   : > { %v3334_v40 = vpack.c.bf16 %v567_v20, %v555_v21  ;;  %v584_v60 = vsub.f32 %v3195_v42, %v4242_v36  ;;  %v4244_v21 = vand.u32 4294901760, %v3206_v52  ;;  %v4249_v20 = vand.u32 4294901760, %v3211_v54 }
  0xc5   : > { %v3346_v7 = vpack.c.bf16 %v573_v57, %v561_v39  ;;  %v596_v45 = vsub.f32 %v3202_v50, %v4243_v49  ;;  %v579_v29 = vand.u32 4294901760, %v578_v55  ;;  %v591_v58 = vand.u32 4294901760, %v590_v44 }
  0xc6   : > { %v585_v46 = vand.u32 4294901760, %v584_v60  ;;  %v4255_v48 = vand.u32 4294901760, %v3215_v56  ;;  %v602_v36 = vsub.f32 %v3206_v52, %v4244_v21  ;;  %v614_v57 = vsub.f32 %v3211_v54, %v4249_v20 }
  0xc7   : > { %v597_v51 = vand.u32 4294901760, %v596_v45  ;;  %v4254_v39 = vand.u32 4294901760, %v3217_v59  ;;  %v3361_v49 = vpack.c.bf16 %v591_v58, %v579_v29  ;;  %v4259_v20 = vand.u32 4294901760, %v3224_v62 }
  0xc8   : > { %v608_v55 = vsub.f32 %v3215_v56, %v4255_v48  ;;  %v603_v60 = vand.u32 4294901760, %v602_v36  ;;  %v615_v45 = vand.u32 4294901760, %v614_v57  ;;  %v4260_v58 = vand.u32 4294901760, %v3229_v22 }
  0xc9   : > { %v3366_v44 = vpack.c.bf16 %v597_v51, %v585_v46  ;;  %v620_v21 = vsub.f32 %v3217_v59, %v4254_v39  ;;  %v4261_v28 = vand.u32 4294901760, %v3236_v31  ;;  %v626_v51 = vsub.f32 %v3222_v61, %v4258_v38 }
  0xca   : > { %v609_v47 = vand.u32 4294901760, %v608_v55  ;;  %v2475_v29 = vpack.c.bf16 %v615_v45, %v603_v60  ;;  %v638_v46 = vsub.f32 %v3224_v62, %v4259_v20  ;;  %v632_v36 = vsub.f32 %v3229_v22, %v4260_v58 }
  0xcb   : > { %v621_v37 = vand.u32 4294901760, %v620_v21  ;;  %v644_v55 = vsub.f32 %v3236_v31, %v4261_v28  ;;  %v627_v21 = vand.u32 4294901760, %v626_v51  ;;  %v2483_v38 = vpack.c.bf16 %v3040_v11, %v3038_v10 }
  0xcc   : > { %v639_v60 = vand.u32 4294901760, %v638_v46  ;;  %v633_v45 = vand.u32 4294901760, %v632_v36  ;;  %v2485_v20 = vpack.c.bf16 %v3046_v14, %v3042_v12  ;;  %v2487_v58 = vpack.c.bf16 %v3133_v0, %v3131_v63 }
  0xcd   : > { %v2477_v57 = vpack.c.bf16 %v621_v37, %v609_v47  ;;  %v645_v39 = vand.u32 4294901760, %v644_v55  ;;  %v2489_v37 = vpack.c.bf16 %v3137_v2, %v3135_v1  ;;  %v2491_v47 = vpack.c.bf16 %v3142_v4, %v3140_v3 }
  0xce   : > { %v2479_v48 = vpack.c.bf16 %v639_v60, %v627_v21  ;;  %v2493_v51 = vpack.c.bf16 %v3146_v6, %v3144_v5  ;;  %v2497_v46 = vpack.c.bf16 %v3160_v19, %v3158_v18  ;;  %v2499_v36 = vpack.c.bf16 %v3173_v24, %v3171_v23 }
  0xcf   : > { %v2481_v27 = vpack.c.bf16 %v645_v39, %v633_v45  ;;  %v2495_v39 = vpack.c.bf16 %v3156_v16, %v3154_v15  ;;  %v2501_v55 = vpack.c.bf16 %v3177_v26, %v3175_v25  ;;  %v2503_v21 = vpack.c.bf16 %v3192_v34, %v3190_v33 }
  0xd0   : > { %v2505_v60 = vpack.c.bf16 %v3202_v50, %v3195_v42  ;;  %v2507_v45 = vpack.c.bf16 %v3211_v54, %v3206_v52  ;;  %v2509_v28 = vpack.c.bf16 %v3217_v59, %v3215_v56  ;;  %v2511_v19 = vpack.c.bf16 %v3224_v62, %v3222_v61  ;;  %v2202_v50 = vld [vmem:[%s4193_s1] ss:$0 sm:$0xff] }
  0xd1   : > { %v2513_v24 = vpack.c.bf16 %v3236_v31, %v3229_v22  ;;  %v2203_v59 = vld [vmem:[%s4194_s2] ss:$0 sm:$0xff]  ;;  %v4378_v22 = vmov 0.0  }
 0x13d   : > { %v284_v23 = vpop.xlane.xlu0 %283 }
 0x13e   : > { %v285_v26 = vmul.f32 0.0078125, %v284_v23 }
 0x140   : > { %v286_v25 = vadd.f32 1e-05, %v285_v26 }
 0x142   : > { %2855 = vrsqrt.f32 %v286_v25 }
 0x14c   : > { %v2856_v34 = vpop.eup %2855 }
 0x14d   : > { %v288_v54 = vmul.f32 %v2856_v34, %v3050_v17  ;;  %v4379_v17 = vld [vmem:[#allocation5_spill] sm:$0xff]  ;;  %v4387_v34 = vld [vmem:[#allocation18_spill] sm:$0xff] }
 0x14f   : > { %v295_v56 = vmul.f32 %v2202_v50, %v288_v54  ;;  %v4389_v50 = vld [vmem:[#allocation22_spill] sm:$0xff]  ;;  %v4390_v54 = vld [vmem:[#allocation24_spill] sm:$0xff] }
 0x151   : > { %v302_v62 = vadd.f32 %v2203_v59, %v295_v56  ;;  %v4391_v56 = vld [vmem:[#allocation27_spill] sm:$0xff]  ;;  %v4392_v59 = vand.u32 4294901760, %v3038_v10  ;;  %v4399_v10 = vand.u32 4294901760, %v3135_v1  ;;  %v4405_v1 = vand.u32 4294901760, %v3154_v15 }
 0x153   : > { %v3426_v61 = vand.u32 4294901760, %v302_v62 }
 0x155   : > { %v445_v31 = vsub.f32 %v302_v62, %v3426_v61  ;;  %v4393_v62 = vand.u32 4294901760, %v3040_v11  ;;  %v4400_v11 = vand.u32 4294901760, %v3137_v2  ;;  %v4406_v2 = vand.u32 4294901760, %v3156_v16 }
 0x156   : > { %v4418_v16 = vand.u32 4294901760, %v3190_v33 }
 0x157   : > { %v446_v23 = vand.u32 4294901760, %v445_v31 }
 0x159   : > { %v447_v26 = vsub.f32 %v445_v31, %v446_v23 }
 0x15b   : > { %v448_v25 = vand.u32 4294901760, %v447_v26 }
 0x15d   : > { %449 = vmatmul.mubr.f32.vlgmr.msra.gmra.mrb[0].mxu0 %v448_v25 }
 0x15e   : > { %2454 = vmatpush1.bf16.msra.mxu0 %v3270_v43  ;;  %679 = vmatprep.mubr.f32.mxu0 %v4378_v22  ;;  %v4395_v43 = vand.u32 4294901760, %v3042_v12  ;;  %v4401_v12 = vand.u32 4294901760, %v3140_v3 }
 0x15f   : > { %2456 = vmatprep.subr.bf16.mxu0 %v3277_v8  ;;  %v4394_v8 = vld [vmem:[#allocation31_spill] sm:$0xff] }
 0x162   : > { %2458 = vmatpush1.bf16.msra.mxu0 %v3283_v35  ;;  %v4396_v35 = vand.u32 4294901760, %v3046_v14  ;;  %v4402_v14 = vand.u32 4294901760, %v3142_v4  ;;  %v4410_v4 = vld [vmem:[#allocation14_spill] sm:$0xff] }
 0x163   : > { %2460 = vmatprep.subr.bf16.mxu0 %v3298_v53 }
 0x164   : > { %v2549_v53 = vpack.c.bf16 %v4396_v35, %v4395_v43  ;;  %v4427_v35 = vld [vmem:[#allocation25_spill] sm:$0xff] }
 0x166   : > { %2462 = vmatpush1.bf16.msra.mxu0 %v3311_v30  ;;  %v4397_v30 = vand.u32 4294901760, %v3131_v63  ;;  %v4403_v63 = vand.u32 4294901760, %v3144_v5 }
 0x167   : > { %2464 = vmatprep.subr.bf16.mxu0 %v3321_v32  ;;  %v4383_v32 = vld [vmem:[#allocation9_spill] sm:$0xff] }
 0x16a   : > { %2466 = vmatpush1.bf16.msra.mxu0 %v3326_v41  ;;  %v4398_v41 = vand.u32 4294901760, %v3133_v0  ;;  %v4404_v0 = vand.u32 4294901760, %v3146_v6  ;;  %v4414_v6 = vld [vmem:[#allocation16_spill] sm:$0xff] }
 0x16b   : > { %2468 = vmatprep.subr.bf16.mxu0 %v3334_v40 }
 0x16c   : > { %v2551_v40 = vpack.c.bf16 %v4398_v41, %v4397_v30  ;;  %v4429_v30 = vld [vmem:[#allocation26_spill] sm:$0xff] }
 0x16d   : > { %v4430_v33 = vand.u32 4294901760, %v4429_v30 }
 0x16e   : > { %2470 = vmatpush1.bf16.msra.mxu0 %v3346_v7  ;;  %v2553_v7 = vpack.c.bf16 %v4400_v11, %v4399_v10  ;;  %v4433_v11 = vld [vmem:[#allocation29_spill] sm:$0xff] }
 0x16f   : > { %2472 = vmatprep.subr.bf16.mxu0 %v3361_v49  ;;  %v4388_v49 = vld [vmem:[#allocation20_spill] sm:$0xff] }
 0x172   : > { %2474 = vmatpush1.bf16.msra.mxu0 %v3366_v44  ;;  %v2557_v44 = vpack.c.bf16 %v4404_v0, %v4403_v63 }
 0x173   : > { %2476 = vmatprep.subr.bf16.mxu0 %v2475_v29  ;;  %v4407_v29 = vand.u32 4294901760, %v3158_v18 }
 0x176   : > { %2478 = vmatpush1.bf16.msra.mxu0 %v2477_v57  ;;  %v4408_v57 = vld [vmem:[#allocation13_spill] sm:$0xff] }
 0x177   : > { %2480 = vmatprep.subr.bf16.mxu0 %v2479_v48  ;;  %v4382_v48 = vld [vmem:[#allocation8_spill] sm:$0xff]  ;;  %v4409_v3 = vand.u32 4294901760, %v4408_v57  ;;  %v1224_v57 = vld [vmem:[%s4197_s5 + $0x20] sm:$0xff] }
 0x17a   : > { %2482 = vmatpush1.bf16.msra.mxu0 %v2481_v27  ;;  %v4380_v27 = vld [vmem:[#allocation6_spill] sm:$0xff] }
 0x17b   : > { %2484 = vmatprep.subr.bf16.mxu0 %v2483_v38  ;;  %v4381_v38 = vld [vmem:[#allocation7_spill] sm:$0xff] }
 0x17d   : > { %681 = vmatmul.mubr.f32.vlgmr.msra.gmra.mrb[0].mxu0 %v3426_v61 }
 0x17e   : > { %2486 = vmatpush1.bf16.msra.mxu0 %v2485_v20  ;;  %815 = vmatprep.mubr.f32.mxu0 %v4378_v22  ;;  %v2555_v20 = vpack.c.bf16 %v4402_v14, %v4401_v12  ;;  %v4435_v12 = vld [vmem:[#allocation30_spill] sm:$0xff] }
 0x17f   : > { %2488 = vmatprep.subr.bf16.mxu0 %v2487_v58  ;;  %v2559_v58 = vpack.c.bf16 %v4406_v2, %v4405_v1  ;;  %v4436_v14 = vand.u32 4294901760, %v4435_v12  ;;  %v1240_v1 = vld [vmem:[%s4197_s5 + $0xa0] sm:$0xff]  ;;  %v1241_v2 = vld [vmem:[%s4197_s5 + $0xa8] sm:$0xff]  ;;  %v1247_v12 = vld [vmem:[%s4197_s5 + $0xd8] sm:$0xff] }
 0x182   : > { %2490 = vmatpush1.bf16.msra.mxu0 %v2489_v37  ;;  %v2561_v37 = vpack.c.bf16 %v4409_v3, %v4407_v29  ;;  %v1323_v29 = vand.u32 4294901760, %v1241_v2  ;;  %v1225_v3 = vld [vmem:[%s4197_s5 + $0x28] sm:$0xff] }
 0x183   : > { %2492 = vmatprep.subr.bf16.mxu0 %v2491_v47  ;;  %v4411_v47 = vand.u32 4294901760, %v4410_v4  ;;  %v1275_v4 = vand.u32 4294901760, %v1225_v3 }
 0x186   : > { %2494 = vmatpush1.bf16.msra.mxu0 %v2493_v51  ;;  %v4412_v51 = vld [vmem:[#allocation15_spill] sm:$0xff] }
 0x187   : > { %2496 = vmatprep.subr.bf16.mxu0 %v2495_v39  ;;  %v4413_v5 = vand.u32 4294901760, %v4412_v51 }
 0x189   : > { %v2563_v39 = vpack.c.bf16 %v4413_v5, %v4411_v47  ;;  %v1242_v5 = vld [vmem:[%s4197_s5 + $0xb0] sm:$0xff] }
 0x18a   : > { %2498 = vmatpush1.bf16.msra.mxu0 %v2497_v46  ;;  %v4415_v46 = vand.u32 4294901760, %v4414_v6  ;;  %v1226_v6 = vld [vmem:[%s4197_s5 + $0x30] sm:$0xff] }
 0x18b   : > { %2500 = vmatprep.subr.bf16.mxu0 %v2499_v36  ;;  %v4416_v36 = vld [vmem:[#allocation17_spill] sm:$0xff] }
 0x18c   : > { %v4417_v15 = vand.u32 4294901760, %v4416_v36 }
 0x18e   : > { %2502 = vmatpush1.bf16.msra.mxu0 %v2501_v55  ;;  %v2565_v55 = vpack.c.bf16 %v4417_v15, %v4415_v46 }
 0x18f   : > { %2504 = vmatprep.subr.bf16.mxu0 %v2503_v21  ;;  %v4419_v21 = vld [vmem:[#allocation19_spill] sm:$0xff] }
 0x190   : > { %v4420_v18 = vand.u32 4294901760, %v4419_v21  ;;  %v1244_v21 = vld [vmem:[%s4197_s5 + $0xc0] sm:$0xff] }
 0x191   : > { %v1332_v30 = vand.u32 4294901760, %v1244_v21 }
 0x192   : > { %2506 = vmatpush1.bf16.msra.mxu0 %v2505_v60  ;;  %v2567_v60 = vpack.c.bf16 %v4420_v18, %v4418_v16  ;;  %v1227_v16 = vld [vmem:[%s4197_s5 + $0x38] sm:$0xff]  ;;  %v1245_v18 = vld [vmem:[%s4197_s5 + $0xc8] sm:$0xff] }
 0x193   : > { %2508 = vmatprep.subr.bf16.mxu0 %v2507_v45  ;;  %v4421_v45 = vand.u32 4294901760, %v3195_v42  ;;  %v4434_v42 = vand.u32 4294901760, %v4433_v11 }
 0x196   : > { %2510 = vmatpush1.bf16.msra.mxu0 %v2509_v28  ;;  %v4384_v28 = vld [vmem:[#allocation10_spill] sm:$0xff] }
 0x197   : > { %2512 = vmatprep.subr.bf16.mxu0 %v2511_v19  ;;  %v4385_v19 = vld [vmem:[#allocation11_spill] sm:$0xff] }
 0x19a   : > { %2514 = vmatpush1.bf16.msra.mxu0 %v2513_v24  ;;  %v4386_v24 = vld [vmem:[#allocation12_spill] sm:$0xff] }
 0x19b   : > { %2516 = vmatprep.subr.bf16.mxu0 %v3036_v9 }
 0x19d   : > { %818 = vmatmul.mubr.f32.vlgmr.msra.gmra.mrb[0].mxu0 %v445_v31  ;;  %v2547_v31 = vpack.c.bf16 %v4393_v62, %v4392_v59  ;;  %v4424_v59 = vand.u32 4294901760, %v3206_v52  ;;  %v4425_v62 = vld [vmem:[#allocation23_spill] sm:$0xff] }
 0x19e   : > { %2518 = vmatpush1.bf16.msra.mxu0 %v3044_v13  ;;  %920 = vmatprep.mubr.f32.mxu0 %v4378_v22 }
 0x19f   : > { %2520 = vmatprep.subr.bf16.mxu0 %v4379_v17 }
 0x1a2   : > { %2522 = vmatpush1.bf16.msra.mxu0 %v4380_v27 }
 0x1a3   : > { %2524 = vmatprep.subr.bf16.mxu0 %v4381_v38 }
 0x1a6   : > { %2526 = vmatpush1.bf16.msra.mxu0 %v4382_v48 }
 0x1a7   : > { %2528 = vmatprep.subr.bf16.mxu0 %v4383_v32 }
 0x1aa   : > { %2530 = vmatpush1.bf16.msra.mxu0 %v4384_v28 }
 0x1ab   : > { %2532 = vmatprep.subr.bf16.mxu0 %v4385_v19 }
 0x1ae   : > { %2534 = vmatpush1.bf16.msra.mxu0 %v4386_v24 }
 0x1af   : > { %2536 = vmatprep.subr.bf16.mxu0 %v4387_v34 }
 0x1b2   : > { %2538 = vmatpush1.bf16.msra.mxu0 %v4388_v49 }
 0x1b3   : > { %2540 = vmatprep.subr.bf16.mxu0 %v4389_v50 }
 0x1b6   : > { %2542 = vmatpush1.bf16.msra.mxu0 %v4390_v54 }
 0x1b7   : > { %2544 = vmatprep.subr.bf16.mxu0 %v4391_v56 }
 0x1ba   : > { %2546 = vmatpush1.bf16.msra.mxu0 %v4394_v8 }
 0x1bb   : > { %2548 = vmatprep.subr.bf16.mxu0 %v2547_v31  ;;  %v4426_v31 = vand.u32 4294901760, %v4425_v62  ;;  %v3645_v62 = vsub.f32 %v1225_v3, %v1275_v4  ;;  %v1233_v3 = vld [vmem:[%s4197_s5 + $0x68] sm:$0xff] }
 0x1bd   : > { %924 = vmatmul.mubr.f32.vlgmr.msra.gmra.mrb[0].mxu0 %v446_v23  ;;  %v4422_v23 = vld [vmem:[#allocation21_spill] sm:$0xff]  ;;  %v2571_v43 = vpack.c.bf16 %v4426_v31, %v4424_v59  ;;  %v1326_v31 = vand.u32 4294901760, %v1242_v5 }
 0x1be   : > { %2550 = vmatpush1.bf16.msra.mxu0 %v2549_v53  ;;  %1090 = vmatprep.mubr.f32.mxu0 %v4378_v22  ;;  %v4423_v26 = vand.u32 4294901760, %v4422_v23  ;;  %v4428_v53 = vand.u32 4294901760, %v4427_v35  ;;  %v3636_v23 = vsub.f32 %v1241_v2, %v1323_v29  ;;  %v1278_v35 = vand.u32 4294901760, %v1226_v6 }
 0x1bf   : > { %2552 = vmatprep.subr.bf16.mxu0 %v2551_v40  ;;  %v4431_v40 = vld [vmem:[#allocation28_spill] sm:$0xff]  ;;  %v3657_v11 = vsub.f32 %v1242_v5, %v1326_v31 }
 0x1c0   : > { %v2569_v25 = vpack.c.bf16 %v4423_v26, %v4421_v45  ;;  %v2573_v41 = vpack.c.bf16 %v4430_v33, %v4428_v53  ;;  %v4432_v10 = vand.u32 4294901760, %v4431_v40  ;;  %v1281_v53 = vand.u32 4294901760, %v1227_v16  ;;  %v1246_v40 = vld [vmem:[%s4197_s5 + $0xd0] sm:$0xff] }
 0x1c1   : > { %v1335_v33 = vand.u32 4294901760, %v1245_v18 }
 0x1c2   : > { %2554 = vmatpush1.bf16.msra.mxu0 %v2553_v7  ;;  %v2575_v7 = vpack.c.bf16 %v4434_v42, %v4432_v10 }
 0x1c3   : > { %2556 = vmatprep.subr.bf16.mxu0 %v2555_v20  ;;  %v4437_v20 = vld [vmem:[#allocation32_spill] sm:$0xff] }
 0x1c4   : > { %v4438_v52 = vand.u32 4294901760, %v4437_v20  ;;  %v1231_v20 = vld [vmem:[%s4197_s5 + $0x58] sm:$0xff] }
 0x1c6   : > { %2558 = vmatpush1.bf16.msra.mxu0 %v2557_v44  ;;  %v2577_v63 = vpack.c.bf16 %v4438_v52, %v4436_v14  ;;  %v1230_v14 = vld [vmem:[%s4197_s5 + $0x50] sm:$0xff]  ;;  %v3670_v52 = vpack.c.bf16 %v1281_v53, %v1278_v35 }
 0x1c7   : > { %2560 = vmatprep.subr.bf16.mxu0 %v2559_v58  ;;  %v1320_v58 = vand.u32 4294901760, %v1240_v1 }
 0x1c8   : > { %4446 = vst [vmem:[#allocation12_spill] sm:$0xff] %v3670_v52 }
 0x1c9   : > { %v3634_v45 = vsub.f32 %v1240_v1, %v1320_v58 }
 0x1ca   : > { %2562 = vmatpush1.bf16.msra.mxu0 %v2561_v37  ;;  %v1272_v37 = vand.u32 4294901760, %v1224_v57 }
 0x1cb   : > { %2564 = vmatprep.subr.bf16.mxu0 %v2563_v39  ;;  %v1243_v39 = vld [vmem:[%s4197_s5 + $0xb8] sm:$0xff] }
 0x1cc   : > { %v3638_v26 = vpack.c.bf16 %v1275_v4, %v1272_v37  ;;  %v3643_v59 = vsub.f32 %v1224_v57, %v1272_v37  ;;  %v1232_v57 = vld [vmem:[%s4197_s5 + $0x60] sm:$0xff]  ;;  %v1250_v37 = vld [vmem:[%s4197_s5 + $0xf0] sm:$0xff] }
 0x1ce   : > { %2566 = vmatpush1.bf16.msra.mxu0 %v2565_v55  ;;  %4444 = vst [vmem:[#allocation10_spill] sm:$0xff] %v3638_v26 }
 0x1cf   : > { %2568 = vmatprep.subr.bf16.mxu0 %v2567_v60  ;;  %v3632_v60 = vpack.c.bf16 %v1323_v29, %v1320_v58 }
 0x1d1   : > { %4443 = vst [vmem:[#allocation9_spill] sm:$0xff] %v3632_v60 }
 0x1d2   : > { %2570 = vmatpush1.bf16.msra.mxu0 %v2569_v25  ;;  %v1228_v25 = vld [vmem:[%s4197_s5 + $0x40] sm:$0xff] }
 0x1d3   : > { %2572 = vmatprep.subr.bf16.mxu0 %v2571_v43  ;;  %v1329_v43 = vand.u32 4294901760, %v1243_v39 }
 0x1d5   : > { %v3655_v10 = vpack.c.bf16 %v1329_v43, %v1326_v31  ;;  %v3659_v42 = vsub.f32 %v1243_v39, %v1329_v43  ;;  %v1235_v31 = vld [vmem:[%s4197_s5 + $0x78] sm:$0xff] }
 0x1d6   : > { %2574 = vmatpush1.bf16.msra.mxu0 %v2573_v41  ;;  %v1229_v41 = vld [vmem:[%s4197_s5 + $0x48] sm:$0xff] }
 0x1d7   : > { %2576 = vmatprep.subr.bf16.mxu0 %v2575_v7  ;;  %4445 = vst [vmem:[#allocation11_spill] sm:$0xff] %v3655_v10  ;;  %v1284_v7 = vand.u32 4294901760, %v1228_v25 }
 0x1da   : > { %2578 = vmatpush1.bf16.msra.mxu0 %v2577_v63  ;;  %v3672_v63 = vsub.f32 %v1226_v6, %v1278_v35  ;;  %v1296_v35 = vand.u32 4294901760, %v1232_v57 }
 0x1db   : > { %2580 = vmatprep.subr.bf16.mxu0 %v3036_v9  ;;  %v3547_v9 = vld [vmem:[%s4197_s5 + $0x80] sm:$0xff] }
 0x1dd   : > { %1092 = vmatmul.mubr.f32.vlgmr.msra.gmra.mrb[0].mxu0 %v3426_v61 }
 0x1de   : > { %2582 = vmatpush1.bf16.msra.mxu0 %v3044_v13  ;;  %1194 = vmatprep.mubr.f32.mxu0 %v4378_v22  ;;  %v3552_v13 = vld [vmem:[%s4197_s5 + $0x88] sm:$0xff]  ;;  %v1308_v22 = vand.u32 4294901760, %v3547_v9 }
 0x1df   : > { %2584 = vmatprep.subr.bf16.mxu0 %v4379_v17  ;;  %v1311_v17 = vand.u32 4294901760, %v3552_v13 }
 0x1e0   : > { %v3708_v4 = vsub.f32 %v3547_v9, %v1308_v22 }
 0x1e1   : > { %v3726_v9 = vsub.f32 %v3552_v13, %v1311_v17 }
 0x1e2   : > { %2586 = vmatpush1.bf16.msra.mxu0 %v4380_v27  ;;  %v1220_v27 = vld [vmem:[%s4197_s5] sm:$0xff] }
 0x1e3   : > { %2588 = vmatprep.subr.bf16.mxu0 %v4381_v38  ;;  %v1260_v38 = vand.u32 4294901760, %v1220_v27 }
 0x1e5   : > { %v3602_v47 = vsub.f32 %v1220_v27, %v1260_v38  ;;  %v3674_v27 = vsub.f32 %v1227_v16, %v1281_v53  ;;  %v1251_v16 = vld [vmem:[%s4197_s5 + $0xf8] sm:$0xff]  ;;  %v1299_v53 = vand.u32 4294901760, %v1233_v3 }
 0x1e6   : > { %2590 = vmatpush1.bf16.msra.mxu0 %v4382_v48 }
 0x1e7   : > { %2592 = vmatprep.subr.bf16.mxu0 %v4383_v32  ;;  %v3566_v32 = vpack.c.bf16 %v1311_v17, %v1308_v22  ;;  %v1353_v17 = vand.u32 4294901760, %v1251_v16 }
 0x1e9   : > { %4439 = vst [vmem:[#allocation5_spill] sm:$0xff] %v3566_v32  ;;  %2612 = vmatprep.subr.bf16.mxu1 %v3566_v32 }
 0x1ea   : > { %2594 = vmatpush1.bf16.msra.mxu0 %v4384_v28 }
 0x1eb   : > { %2596 = vmatprep.subr.bf16.mxu0 %v4385_v19  ;;  %v1238_v19 = vld [vmem:[%s4197_s5 + $0x90] sm:$0xff] }
 0x1ee   : > { %2598 = vmatpush1.bf16.msra.mxu0 %v4386_v24  ;;  %v1239_v24 = vld [vmem:[%s4197_s5 + $0x98] sm:$0xff] }
 0x1ef   : > { %2600 = vmatprep.subr.bf16.mxu0 %v4387_v34  ;;  %v1314_v34 = vand.u32 4294901760, %v1238_v19 }
 0x1f1   : > { %v3615_v46 = vsub.f32 %v1238_v19, %v1314_v34  ;;  %v3685_v19 = vsub.f32 %v1244_v21, %v1332_v30  ;;  %v1234_v21 = vld [vmem:[%s4197_s5 + $0x70] sm:$0xff] }
 0x1f2   : > { %2602 = vmatpush1.bf16.msra.mxu0 %v4388_v49  ;;  %v1317_v49 = vand.u32 4294901760, %v1239_v24 }
 0x1f3   : > { %2604 = vmatprep.subr.bf16.mxu0 %v4389_v50  ;;  %v1222_v50 = vld [vmem:[%s4197_s5 + $0x10] sm:$0xff] }
 0x1f4   : > { %v3584_v0 = vpack.c.bf16 %v1317_v49, %v1314_v34  ;;  %v3617_v36 = vsub.f32 %v1239_v24, %v1317_v49  ;;  %v3687_v24 = vsub.f32 %v1245_v18, %v1335_v33  ;;  %v1287_v34 = vand.u32 4294901760, %v1229_v41 }
 0x1f5   : > { %v3689_v49 = vsub.f32 %v1228_v25, %v1284_v7 }
 0x1f6   : > { %2606 = vmatpush1.bf16.msra.mxu0 %v4390_v54  ;;  %v1223_v54 = vld [vmem:[%s4197_s5 + $0x18] sm:$0xff]  ;;  %4441 = vst [vmem:[#allocation7_spill] sm:$0xff] %v3584_v0  ;;  %v3692_v1 = vpack.c.bf16 %v1287_v34, %v1284_v7  ;;  %v3694_v2 = vsub.f32 %v1229_v41, %v1287_v34  ;;  %v1302_v41 = vand.u32 4294901760, %v1234_v21  ;;  %v3747_v7 = vsub.f32 %v1233_v3, %v1299_v53 }
 0x1f7   : > { %2608 = vmatprep.subr.bf16.mxu0 %v4391_v56  ;;  %v1266_v56 = vand.u32 4294901760, %v1222_v50  ;;  %v3758_v34 = vpack.c.bf16 %v1299_v53, %v1296_v35 }
 0x1f8   : > { %4448 = vst [vmem:[#allocation20_spill] sm:$0xff] %v3692_v1 }
 0x1f9   : > { %v3619_v15 = vsub.f32 %v1222_v50, %v1266_v56  ;;  %v1338_v50 = vand.u32 4294901760, %v1246_v40  ;;  %4456 = vst [vmem:[#allocation16_spill] sm:$0xff] %v3758_v34 }
 0x1fa   : > { %2610 = vmatpush1.bf16.msra.mxu0 %v4394_v8  ;;  %v1269_v8 = vand.u32 4294901760, %v1223_v54 }
 0x1fb   : > { %v3713_v39 = vsub.f32 %v1246_v40, %v1338_v50  ;;  %v3745_v40 = vsub.f32 %v1232_v57, %v1296_v35 }
 0x1fc   : > { %v3586_v44 = vpack.c.bf16 %v1269_v8, %v1266_v56  ;;  %v3621_v55 = vsub.f32 %v1223_v54, %v1269_v8  ;;  %v1341_v54 = vand.u32 4294901760, %v1247_v12  ;;  %v1290_v56 = vand.u32 4294901760, %v1230_v14 }
 0x1fd   : > { %1196 = vmatmul.mubr.f32.vlgmr.msra.gmra.mrb[0].mxu0 %v3426_v61  ;;  %v1221_v61 = vld [vmem:[%s4197_s5 + $0x8] sm:$0xff]  ;;  %v1293_v8 = vand.u32 4294901760, %v1231_v20 }
 0x1fe   : > { %v1263_v48 = vand.u32 4294901760, %v1221_v61  ;;  %4442 = vst [vmem:[#allocation8_spill] sm:$0xff] %v3586_v44  ;;  %v3711_v5 = vpack.c.bf16 %v1341_v54, %v1338_v50  ;;  %v3715_v6 = vsub.f32 %v1247_v12, %v1341_v54  ;;  %v3728_v22 = vsub.f32 %v1230_v14, %v1290_v56 }
 0x1ff   : > { %v3730_v18 = vsub.f32 %v1231_v20, %v1293_v8  ;;  %v1305_v14 = vand.u32 4294901760, %v1235_v31  ;;  %v3751_v20 = vsub.f32 %v1251_v16, %v1353_v17  ;;  %v4280_v54 = vand.u32 4294901760, %v3708_v4 }
 0x200   : > { %v3568_v28 = vpack.c.bf16 %v1263_v48, %v1260_v38  ;;  %v3604_v51 = vsub.f32 %v1221_v61, %v1263_v48  ;;  %v3676_v61 = vpack.c.bf16 %v1335_v33, %v1332_v30  ;;  %v1248_v38 = vld [vmem:[%s4197_s5 + $0xe0] sm:$0xff]  ;;  %v1249_v48 = vld [vmem:[%s4197_s5 + $0xe8] sm:$0xff]  ;;  %4449 = vst [vmem:[#allocation22_spill] sm:$0xff] %v3711_v5  ;;  %v1350_v30 = vand.u32 4294901760, %v1250_v37 }
 0x201   : > { %v1344_v58 = vand.u32 4294901760, %v1248_v38  ;;  %v1347_v29 = vand.u32 4294901760, %v1249_v48  ;;  %v3740_v33 = vpack.c.bf16 %v1293_v8, %v1290_v56  ;;  %4453 = vst [vmem:[#allocation13_spill] sm:$0xff] %v3751_v20  ;;  %v4276_v56 = vand.u32 4294901760, %v3726_v9 }
 0x202   : > { %4440 = vst [vmem:[#allocation6_spill] sm:$0xff] %v3568_v28  ;;  %2614 = vmatpush3.bf16.msra.mxu1 %v3568_v28  ;;  %4447 = vst [vmem:[#allocation18_spill] sm:$0xff] %v3676_v61  ;;  %v3749_v12 = vsub.f32 %v1250_v37, %v1350_v30  ;;  %v3761_v50 = vpack.c.bf16 %v1353_v17, %v1350_v30  ;;  %v4277_v8 = vand.u32 4294901760, %v3602_v47  ;;  %v4278_v30 = vand.u32 4294901760, %v3615_v46 }
 0x203   : > { %2616 = vmatprep.subr.bf16.mxu1 %v3584_v0  ;;  %v3732_v25 = vsub.f32 %v1248_v38, %v1344_v58  ;;  %v3737_v43 = vsub.f32 %v1249_v48, %v1347_v29  ;;  %4450 = vst [vmem:[#allocation24_spill] sm:$0xff] %v3740_v33  ;;  %v3742_v13 = vpack.c.bf16 %v1347_v29, %v1344_v58  ;;  %v4279_v58 = vand.u32 4294901760, %v3604_v51 }
 0x204   : > { %4452 = vst [vmem:[#allocation31_spill] sm:$0xff] %v3749_v12  ;;  %v3753_v38 = vsub.f32 %v1234_v21, %v1302_v41  ;;  %v3755_v48 = vsub.f32 %v1235_v31, %v1305_v14  ;;  %4457 = vst [vmem:[#allocation17_spill] sm:$0xff] %v3761_v50  ;;  %v1487_v29 = vsub.f32 %v3708_v4, %v4280_v54  ;;  %v4281_v17 = vand.u32 4294901760, %v3617_v36 }
 0x205   : > { %4451 = vst [vmem:[#allocation27_spill] sm:$0xff] %v3742_v13  ;;  %v1494_v57 = vsub.f32 %v3726_v9, %v4276_v56  ;;  %v3774_v3 = vpack.c.bf16 %v1305_v14, %v1302_v41  ;;  %v1375_v37 = vsub.f32 %v3602_v47, %v4277_v8  ;;  %v1382_v16 = vsub.f32 %v3604_v51, %v4279_v58 }
 0x206   : > { %2618 = vmatpush3.bf16.msra.mxu1 %v3586_v44  ;;  %4454 = vst [vmem:[#allocation14_spill] sm:$0xff] %v3753_v38  ;;  %4455 = vst [vmem:[#allocation15_spill] sm:$0xff] %v3755_v48  ;;  %v1488_v21 = vand.u32 4294901760, %v1487_v29  ;;  %v4282_v14 = vand.u32 4294901760, %v3619_v15  ;;  %v4283_v56 = vand.u32 4294901760, %v3621_v55  ;;  %v1501_v29 = vsub.f32 %v3615_v46, %v4278_v30 }
 0x207   : > { %2620 = vmatprep.subr.bf16.mxu1 %v3632_v60  ;;  %4458 = vst [vmem:[#allocation19_spill] sm:$0xff] %v3774_v3  ;;  %v1495_v31 = vand.u32 4294901760, %v1494_v57  ;;  %v1376_v35 = vand.u32 4294901760, %v1375_v37  ;;  %v1383_v53 = vand.u32 4294901760, %v1382_v16  ;;  %v1508_v57 = vsub.f32 %v3617_v36, %v4281_v17 }
 0x208   : > { %v1389_v37 = vsub.f32 %v3619_v15, %v4282_v14  ;;  %v1396_v16 = vsub.f32 %v3621_v55, %v4283_v56  ;;  %v4290_v54 = vand.u32 4294901760, %v3643_v59  ;;  %v4292_v56 = vand.u32 4294901760, %v3657_v11 }
 0x209   : > { %v2643_v41 = vpack.c.bf16 %v1495_v31, %v1488_v21  ;;  %v3788_v8 = vpack.c.bf16 %v1383_v53, %v1376_v35  ;;  %v1502_v21 = vand.u32 4294901760, %v1501_v29  ;;  %v1509_v31 = vand.u32 4294901760, %v1508_v57 }
 0x20a   : > { %2622 = vmatpush3.bf16.msra.mxu1 %v3638_v26  ;;  %v4284_v35 = vand.u32 4294901760, %v3634_v45  ;;  %v4289_v53 = vand.u32 4294901760, %v3636_v23  ;;  %v1390_v30 = vand.u32 4294901760, %v1389_v37  ;;  %v1397_v58 = vand.u32 4294901760, %v1396_v16 }
 0x20b   : > { %2624 = vmatprep.subr.bf16.mxu1 %v3655_v10  ;;  %v3806_v17 = vpack.c.bf16 %v1509_v31, %v1502_v21  ;;  %v1403_v37 = vsub.f32 %v3643_v59, %v4290_v54  ;;  %v1529_v54 = vsub.f32 %v3657_v11, %v4292_v56  ;;  %v4305_v56 = vand.u32 4294901760, %v3687_v24 }
 0x20c   : > { %v1515_v14 = vsub.f32 %v3634_v45, %v4284_v35  ;;  %v1522_v29 = vsub.f32 %v3636_v23, %v4289_v53  ;;  %v3814_v57 = vpack.c.bf16 %v1397_v58, %v1390_v30  ;;  %v4297_v35 = vand.u32 4294901760, %v3659_v42 }
 0x20d   : > { %v4298_v53 = vand.u32 4294901760, %v3672_v63  ;;  %v4299_v58 = vand.u32 4294901760, %v3674_v27 }
 0x20e   : > { %2626 = vmatpush3.bf16.msra.mxu1 %v3670_v52  ;;  %v1516_v21 = vand.u32 4294901760, %v1515_v14  ;;  %v1523_v31 = vand.u32 4294901760, %v1522_v29  ;;  %v1536_v14 = vsub.f32 %v3659_v42, %v4297_v35  ;;  %v4306_v35 = vand.u32 4294901760, %v3689_v49 }
 0x20f   : > { %2628 = vmatprep.subr.bf16.mxu1 %v3676_v61 }
 0x210   : > { %v3826_v30 = vpack.c.bf16 %v1523_v31, %v1516_v21  ;;  %v1530_v21 = vand.u32 4294901760, %v1529_v54  ;;  %v1537_v31 = vand.u32 4294901760, %v1536_v14  ;;  %v1550_v54 = vsub.f32 %v3687_v24, %v4305_v56 }
 0x211   : > { %v4314_v56 = vand.u32 4294901760, %v3728_v22 }
 0x212   : > { %2630 = vmatpush3.bf16.msra.mxu1 %v3692_v1 }
 0x213   : > { %2632 = vmatprep.subr.bf16.mxu1 %v3711_v5 }
 0x216   : > { %2634 = vmatpush3.bf16.msra.mxu1 %v3740_v33 }
 0x217   : > { %2636 = vmatprep.subr.bf16.mxu1 %v3742_v13 }
 0x21a   : > { %2638 = vmatpush3.bf16.msra.mxu1 %v3758_v34 }
 0x21b   : > { %2640 = vmatprep.subr.bf16.mxu1 %v3761_v50 }
 0x21e   : > { %2642 = vmatpush3.bf16.msra.mxu1 %v3774_v3  ;;  %v1404_v3 = vand.u32 4294901760, %v1403_v37  ;;  %v1417_v37 = vsub.f32 %v3672_v63, %v4298_v53 }
 0x21f   : > { %2644 = vmatprep.subr.bf16.mxu1 %v2643_v41  ;;  %v4291_v41 = vand.u32 4294901760, %v3645_v62 }
 0x220   : > { %v1418_v34 = vand.u32 4294901760, %v1417_v37  ;;  %v1431_v37 = vsub.f32 %v3689_v49, %v4306_v35 }
 0x221   : > { %v1410_v16 = vsub.f32 %v3645_v62, %v4291_v41  ;;  %v4300_v41 = vand.u32 4294901760, %v3685_v19 }
 0x222   : > { %v1432_v33 = vand.u32 4294901760, %v1431_v37  ;;  %v1445_v37 = vsub.f32 %v3728_v22, %v4314_v56 }
 0x223   : > { %v1411_v50 = vand.u32 4294901760, %v1410_v16  ;;  %v1424_v16 = vsub.f32 %v3674_v27, %v4299_v58  ;;  %v1543_v53 = vsub.f32 %v3685_v19, %v4300_v41  ;;  %v4308_v58 = vand.u32 4294901760, %v3713_v39 }
 0x224   : > { %v4313_v41 = vand.u32 4294901760, %v3715_v6  ;;  %v1446_v1 = vand.u32 4294901760, %v1445_v37 }
 0x225   : > { %v3834_v29 = vpack.c.bf16 %v1411_v50, %v1404_v3  ;;  %v1425_v13 = vand.u32 4294901760, %v1424_v16  ;;  %v4307_v50 = vand.u32 4294901760, %v3694_v2  ;;  %v3846_v3 = vpack.c.bf16 %v1537_v31, %v1530_v21 }
 0x226   : > { %v1544_v21 = vand.u32 4294901760, %v1543_v53  ;;  %v1551_v31 = vand.u32 4294901760, %v1550_v54  ;;  %v1557_v35 = vsub.f32 %v3713_v39, %v4308_v58  ;;  %v1564_v53 = vsub.f32 %v3715_v6, %v4313_v41 }
 0x227   : > { %v3854_v14 = vpack.c.bf16 %v1425_v13, %v1418_v34  ;;  %v1438_v16 = vsub.f32 %v3694_v2, %v4307_v50  ;;  %v4315_v13 = vand.u32 4294901760, %v3730_v18  ;;  %v4316_v50 = vand.u32 4294901760, %v3732_v25 }
 0x228   : > { %v3866_v34 = vpack.c.bf16 %v1551_v31, %v1544_v21  ;;  %v1558_v21 = vand.u32 4294901760, %v1557_v35  ;;  %v1565_v31 = vand.u32 4294901760, %v1564_v53  ;;  %v4321_v58 = vand.u32 4294901760, %v3737_v43 }
 0x229   : > { %v1439_v5 = vand.u32 4294901760, %v1438_v16  ;;  %v1452_v16 = vsub.f32 %v3730_v18, %v4315_v13  ;;  %v4322_v41 = vand.u32 4294901760, %v3745_v40  ;;  %v1571_v56 = vsub.f32 %v3732_v25, %v4316_v50 }
 0x22a   : > { %v1578_v35 = vsub.f32 %v3737_v43, %v4321_v58  ;;  %v4328_v13 = vand.u32 4294901760, %v3749_v12  ;;  %v4331_v50 = vand.u32 4294901760, %v3751_v20  ;;  %v4329_v58 = vand.u32 4294901760, %v3753_v38 }
 0x22b   : > { %v3874_v54 = vpack.c.bf16 %v1439_v5, %v1432_v33  ;;  %v1453_v61 = vand.u32 4294901760, %v1452_v16  ;;  %v4323_v5 = vand.u32 4294901760, %v3747_v7  ;;  %v3886_v33 = vpack.c.bf16 %v1565_v31, %v1558_v21 }
 0x22c   : > { %v1459_v37 = vsub.f32 %v3745_v40, %v4322_v41  ;;  %v1572_v21 = vand.u32 4294901760, %v1571_v56  ;;  %v1579_v31 = vand.u32 4294901760, %v1578_v35  ;;  %v1585_v41 = vsub.f32 %v3749_v12, %v4328_v13 }
 0x22d   : > { %v3894_v53 = vpack.c.bf16 %v1453_v61, %v1446_v1  ;;  %v1466_v16 = vsub.f32 %v3747_v7, %v4323_v5  ;;  %v4330_v61 = vand.u32 4294901760, %v3755_v48  ;;  %v1592_v56 = vsub.f32 %v3751_v20, %v4331_v50 }
 0x22e   : > { %v1460_v52 = vand.u32 4294901760, %v1459_v37  ;;  %v3906_v1 = vpack.c.bf16 %v1579_v31, %v1572_v21  ;;  %v1473_v37 = vsub.f32 %v3753_v38, %v4329_v58  ;;  %v1586_v21 = vand.u32 4294901760, %v1585_v41 }
 0x22f   : > { %v1467_v10 = vand.u32 4294901760, %v1466_v16  ;;  %v1480_v16 = vsub.f32 %v3755_v48, %v4330_v61  ;;  %v1593_v31 = vand.u32 4294901760, %v1592_v56  ;;  %v337_v56 = vlaneseq }
 0x230   : > { %v1474_v5 = vand.u32 4294901760, %v1473_v37 }
 0x231   : > { %v3914_v35 = vpack.c.bf16 %v1467_v10, %v1460_v52  ;;  %v1481_v26 = vand.u32 4294901760, %v1480_v16  ;;  %v3922_v60 = vpack.c.bf16 %v1593_v31, %v1586_v21  ;;  %v338_v16 = vshrl.u32 %v337_v56, 7  ;;  %v335_v21 = vld [vmem:[%s4196_s4] sm:$0x3] }
 0x233   : > { %v3924_v13 = vpack.c.bf16 %v1481_v26, %v1474_v5  ;;  %v339_v41 = vsub.s32 0, %v338_v16  ;;  %v343_v31 = vsub.s32 1, %v338_v16 }
 0x235   : > { %v340_v61 = vrot.slane %v335_v21, %v339_v41  ;;  %v344_v58 = vrot.slane %v335_v21, %v343_v31 }
 0x2d0   : > { %v1197_v50 = vpop.f32.mrb[0].mxu0 }
 0x2d1   : > { %v2803_v52 = vadd.f32 %v1197_v50, %v340_v61  ;;  %v1199_v10 = vpop.f32.mrb[1].mxu0 }
 0x2d2   : > { %v2804_v26 = vadd.f32 %v1199_v10, %v344_v58 }
 0x2d3   : > { %v1204_v44 = vmul.f32 0.044715, %v2803_v52  ;;  %v1202_v41 = vmul.f32 0.5, %v2803_v52 }
 0x2d4   : > { %v1205_v0 = vmul.f32 0.044715, %v2804_v26  ;;  %v1203_v31 = vmul.f32 0.5, %v2804_v26 }
 0x2d5   : > { %v1206_v5 = vmul.f32 %v2803_v52, %v1204_v44 }
 0x2d6   : > { %v1207_v28 = vmul.f32 %v2804_v26, %v1205_v0 }
 0x2d7   : > { %v1208_v32 = vmul.f32 %v2803_v52, %v1206_v5 }
 0x2d8   : > { %v1209_v37 = vmul.f32 %v2804_v26, %v1207_v28 }
 0x2d9   : > { %v1210_v38 = vadd.f32 %v2803_v52, %v1208_v32 }
 0x2da   : > { %v1211_v56 = vadd.f32 %v2804_v26, %v1209_v37  ;;  %v4474_v26 = vld [vmem:[#allocation31_spill] sm:$0xff] }
 0x2db   : > { %v1212_v48 = vmul.f32 0.7978846, %v1210_v38  ;;  %v4476_v37 = vld [vmem:[#allocation15_spill] sm:$0xff] }
 0x2dc   : > { %v1213_v12 = vmul.f32 0.7978846, %v1211_v56  ;;  %v4477_v56 = vld [vmem:[#allocation14_spill] sm:$0xff] }
 0x2dd   : > { %2857 = vtanh.f32 %v1212_v48 }
 0x2de   : > { %2859 = vtanh.f32 %v1213_v12 }
 0x2e7   : > { %v2858_v20 = vpop.eup %2857 }
 0x2e8   : > { %v2860_v16 = vpop.eup %2859  ;;  %v1216_v21 = vadd.f32 1.0, %v2858_v20 }
 0x2e9   : > { %v1217_v50 = vadd.f32 1.0, %v2860_v16  ;;  %v4478_v16 = vpack.c.bf16 %v4476_v37, %v4477_v56 }
 0x2ea   : > { %v1218_v61 = vmul.f32 %v1216_v21, %v1202_v41  ;;  %v4479_v41 = vld [vmem:[#allocation5_spill] sm:$0xff]  ;;  %v4480_v21 = vld [vmem:[#allocation6_spill] sm:$0xff] }
 0x2eb   : > { %v1219_v58 = vmul.f32 %v1217_v50, %v1203_v31  ;;  %v4481_v31 = vld [vmem:[#allocation7_spill] sm:$0xff]  ;;  %v4482_v50 = vld [vmem:[#allocation8_spill] sm:$0xff] }
 0x2ec   : > { %v3961_v10 = vand.u32 4294901760, %v1218_v61 }
 0x2ed   : > { %v3963_v44 = vand.u32 4294901760, %v1219_v58 }
 0x2ee   : > { %v3966_v28 = vsub.f32 %v1218_v61, %v3961_v10  ;;  %v4483_v61 = vld [vmem:[#allocation9_spill] sm:$0xff] }
 0x2ef   : > { %v1356_v32 = vsub.f32 %v1219_v58, %v3963_v44  ;;  %v4484_v58 = vld [vmem:[#allocation10_spill] sm:$0xff] }
 0x2f0   : > { %v1363_v0 = vand.u32 4294901760, %v3966_v28 }
 0x2f1   : > { %v1357_v12 = vand.u32 4294901760, %v1356_v32 }
 0x2f2   : > { %v1364_v20 = vsub.f32 %v3966_v28, %v1363_v0 }
 0x2f3   : > { %v1358_v38 = vsub.f32 %v1356_v32, %v1357_v12 }
 0x2f4   : > { %v1365_v52 = vand.u32 4294901760, %v1364_v20  ;;  %v4486_v20 = vld [vmem:[#allocation12_spill] sm:$0xff] }
 0x2f5   : > { %v1359_v48 = vand.u32 4294901760, %v1358_v38  ;;  %v4487_v38 = vld [vmem:[#allocation18_spill] sm:$0xff] }
 0x2f7   : > { %1360 = vmatprep.mubr.f32.mxu1 %v1359_v48  ;;  %v4488_v48 = vld [vmem:[#allocation20_spill] sm:$0xff] }
 0x2f8   : > { %1366 = vmatmul.mubr.f32.vlgmr.msra.gmra.mrb[0].mxu1 %v1365_v52  ;;  %v4489_v52 = vld [vmem:[#allocation22_spill] sm:$0xff] }
 0x2f9   : > { %2646 = vmatpush3.bf16.msra.mxu1 %v3788_v8  ;;  %1596 = vmatprep.mubr.f32.mxu1 %v3963_v44  ;;  %v4459_v8 = vpack.c.bf16 %v3726_v9, %v3708_v4 }
 0x2fa   : > { %2648 = vmatprep.subr.bf16.mxu1 %v3806_v17  ;;  %v4460_v17 = vpack.c.bf16 %v3604_v51, %v3602_v47 }
 0x2fd   : > { %2650 = vmatpush3.bf16.msra.mxu1 %v3814_v57  ;;  %v4461_v57 = vpack.c.bf16 %v3617_v36, %v3615_v46 }
 0x2fe   : > { %2652 = vmatprep.subr.bf16.mxu1 %v3826_v30  ;;  %v4463_v30 = vpack.c.bf16 %v3636_v23, %v3634_v45 }
 0x301   : > { %2654 = vmatpush3.bf16.msra.mxu1 %v3834_v29  ;;  %v4464_v29 = vpack.c.bf16 %v3645_v62, %v3643_v59 }
 0x302   : > { %2656 = vmatprep.subr.bf16.mxu1 %v3846_v3  ;;  %v4465_v3 = vpack.c.bf16 %v3659_v42, %v3657_v11 }
 0x305   : > { %2658 = vmatpush3.bf16.msra.mxu1 %v3854_v14  ;;  %v4466_v14 = vpack.c.bf16 %v3674_v27, %v3672_v63 }
 0x306   : > { %2660 = vmatprep.subr.bf16.mxu1 %v3866_v34  ;;  %v4468_v34 = vpack.c.bf16 %v3694_v2, %v3689_v49 }
 0x309   : > { %2662 = vmatpush3.bf16.msra.mxu1 %v3874_v54  ;;  %v4469_v54 = vpack.c.bf16 %v3715_v6, %v3713_v39 }
 0x30a   : > { %2664 = vmatprep.subr.bf16.mxu1 %v3886_v33  ;;  %v4470_v33 = vpack.c.bf16 %v3730_v18, %v3728_v22 }
 0x30d   : > { %2666 = vmatpush3.bf16.msra.mxu1 %v3894_v53  ;;  %v4471_v53 = vpack.c.bf16 %v3737_v43, %v3732_v25 }
 0x30e   : > { %2668 = vmatprep.subr.bf16.mxu1 %v3906_v1  ;;  %v4472_v1 = vpack.c.bf16 %v3747_v7, %v3745_v40 }
 0x311   : > { %2670 = vmatpush3.bf16.msra.mxu1 %v3914_v35  ;;  %v4473_v35 = vld [vmem:[#allocation13_spill] sm:$0xff] }
 0x312   : > { %2672 = vmatprep.subr.bf16.mxu1 %v3922_v60  ;;  %v4462_v60 = vpack.c.bf16 %v3621_v55, %v3619_v15  ;;  %v4475_v5 = vpack.c.bf16 %v4473_v35, %v4474_v26 }
 0x315   : > { %2674 = vmatpush3.bf16.msra.mxu1 %v3924_v13  ;;  %v4467_v13 = vpack.c.bf16 %v3687_v24, %v3685_v19 }
 0x316   : > { %2676 = vmatprep.subr.bf16.mxu1 %v4459_v8  ;;  %v4490_v8 = vld [vmem:[#allocation24_spill] sm:$0xff] }
 0x318   : > { %1598 = vmatmul.mubr.f32.vlgmr.msra.gmra.mrb[2].mxu1 %v3961_v10 }
 0x319   : > { %2678 = vmatpush3.bf16.msra.mxu1 %v4460_v17  ;;  %1733 = vmatprep.mubr.f32.mxu1 %v1356_v32  ;;  %v4485_v32 = vld [vmem:[#allocation11_spill] sm:$0xff]  ;;  %v4492_v17 = vld [vmem:[#allocation16_spill] sm:$0xff] }
 0x31a   : > { %2680 = vmatprep.subr.bf16.mxu1 %v4461_v57  ;;  %v4493_v57 = vld [vmem:[#allocation17_spill] sm:$0xff] }
 0x31d   : > { %2682 = vmatpush3.bf16.msra.mxu1 %v4462_v60  ;;  %v4494_v60 = vand.u32 4294901760, %v3708_v4  ;;  %v4501_v4 = vand.u32 4294901760, %v3619_v15  ;;  %v4508_v15 = vand.u32 4294901760, %v3659_v42  ;;  %v4515_v42 = vand.u32 4294901760, %v3713_v39 }
 0x31e   : > { %2684 = vmatprep.subr.bf16.mxu1 %v4463_v30  ;;  %v4495_v30 = vand.u32 4294901760, %v3726_v9  ;;  %v4502_v9 = vand.u32 4294901760, %v3621_v55  ;;  %v4509_v55 = vand.u32 4294901760, %v3672_v63  ;;  %v4516_v63 = vand.u32 4294901760, %v3715_v6 }
 0x31f   : > { %v4522_v39 = vand.u32 4294901760, %v3747_v7  ;;  %v4523_v6 = vand.u32 4294901760, %v4474_v26 }
 0x321   : > { %2686 = vmatpush3.bf16.msra.mxu1 %v4464_v29  ;;  %v2739_v29 = vpack.c.bf16 %v4495_v30, %v4494_v60 }
 0x322   : > { %2688 = vmatprep.subr.bf16.mxu1 %v4465_v3  ;;  %v4496_v3 = vld [vmem:[#allocation19_spill] sm:$0xff] }
 0x325   : > { %2690 = vmatpush3.bf16.msra.mxu1 %v4466_v14  ;;  %v4497_v14 = vand.u32 4294901760, %v3602_v47  ;;  %v2745_v47 = vpack.c.bf16 %v4502_v9, %v4501_v4  ;;  %v2861_v4 = vld [vmem:[%s3021_s17] sm:$0xff]  ;;  %s2866_s17 = sshll.u32 %s2927_s28, 4  ;;  %s2867_s17 = int_to_ptr.vmem [resolvable:$false] %s2866_s17 }
 0x326   : > { %2692 = vmatprep.subr.bf16.mxu1 %v4467_v13  ;;  %v4498_v13 = vand.u32 4294901760, %v3604_v51  ;;  %v4503_v51 = vand.u32 4294901760, %v3634_v45  ;;  %v4510_v45 = vand.u32 4294901760, %v3674_v27  ;;  %v4517_v27 = vand.u32 4294901760, %v3728_v22  ;;  %s2868_s21 = scalar_lea.vmem %s2867_s17, 256  ;;  %p2869_p0 = scmp.lt.s32.totalorder %s4152_s14, %s2867_s17 }
 0x327   : > { %v4524_v22 = vand.u32 4294901760, %v4473_v35  ;;  %p2870_p1 = scmp.lt.s32.totalorder %s2868_s21, %s2862_s20 }
 0x328   : > { %v2753_v60 = vpack.c.bf16 %v4510_v45, %v4509_v55 }
 0x329   : > { %2694 = vmatpush3.bf16.msra.mxu1 %v4468_v34  ;;  %v2741_v34 = vpack.c.bf16 %v4498_v13, %v4497_v14  ;;  %v2759_v14 = vpack.c.bf16 %v4516_v63, %v4515_v42  ;;  %p2871_p2 = por %p2870_p1, %p2869_p0 }
 0x32a   : > { %2696 = vmatprep.subr.bf16.mxu1 %v4469_v54  ;;  %v4499_v54 = vand.u32 4294901760, %v3615_v46 }
 0x32b   : > { %p2872_p3 = pnand %p2871_p2, %p2865_p13 }
 0x32d   : > { %2698 = vmatpush3.bf16.msra.mxu1 %v4470_v33  ;;  %v4500_v33 = vand.u32 4294901760, %v3617_v36  ;;  %v4505_v36 = vand.u32 4294901760, %v3643_v59  ;;  %v4512_v59 = vand.u32 4294901760, %v3687_v24  ;;  %v4519_v24 = vand.u32 4294901760, %v3732_v25 }
 0x32e   : > { %2700 = vmatprep.subr.bf16.mxu1 %v4471_v53  ;;  %v4526_v25 = vand.u32 4294901760, %v4476_v37 }
 0x32f   : > { %v2743_v53 = vpack.c.bf16 %v4500_v33, %v4499_v54  ;;  %v2767_v33 = vpack.c.bf16 %v4524_v22, %v4523_v6 }
 0x331   : > { %2702 = vmatpush3.bf16.msra.mxu1 %v4472_v1  ;;  %v4504_v1 = vand.u32 4294901760, %v3636_v23  ;;  %v4511_v23 = vand.u32 4294901760, %v3685_v19  ;;  %v4518_v19 = vand.u32 4294901760, %v3730_v18  ;;  %v4525_v18 = vand.u32 4294901760, %v4477_v56 }
 0x332   : > { %2704 = vmatprep.subr.bf16.mxu1 %v4475_v5  ;;  %v4507_v5 = vand.u32 4294901760, %v3657_v11  ;;  %v4514_v11 = vand.u32 4294901760, %v3694_v2  ;;  %v4521_v2 = vand.u32 4294901760, %v3745_v40 }
 0x333   : > { %v2747_v46 = vpack.c.bf16 %v4504_v1, %v4503_v51  ;;  %v2755_v30 = vpack.c.bf16 %v4512_v59, %v4511_v23  ;;  %v2761_v13 = vpack.c.bf16 %v4518_v19, %v4517_v27 }
 0x334   : > { %v2765_v54 = vpack.c.bf16 %v4522_v39, %v4521_v2 }
 0x335   : > { %2706 = vmatpush3.bf16.msra.mxu1 %v4478_v16  ;;  %v2751_v16 = vpack.c.bf16 %v4508_v15, %v4507_v5 }
 0x336   : > { %2708 = vmatprep.subr.bf16.mxu1 %v4479_v41 }
 0x338   : > { %1736 = vmatmul.mubr.f32.vlgmr.msra.gmra.mrb[4].mxu1 %v3966_v28  ;;  %v4506_v28 = vand.u32 4294901760, %v3645_v62  ;;  %v4513_v62 = vand.u32 4294901760, %v3689_v49  ;;  %v4520_v49 = vand.u32 4294901760, %v3737_v43 }
 0x339   : > { %2710 = vmatpush3.bf16.msra.mxu1 %v4480_v21  ;;  %1840 = vmatprep.mubr.f32.mxu1 %v1357_v12  ;;  %v4491_v12 = vld [vmem:[#allocation27_spill] sm:$0xff] }
 0x33a   : > { %2712 = vmatprep.subr.bf16.mxu1 %v4481_v31 }
 0x33d   : > { %2714 = vmatpush3.bf16.msra.mxu1 %v4482_v50 }
 0x33e   : > { %2716 = vmatprep.subr.bf16.mxu1 %v4483_v61 }
 0x341   : > { %2718 = vmatpush3.bf16.msra.mxu1 %v4484_v58 }
 0x342   : > { %2720 = vmatprep.subr.bf16.mxu1 %v4485_v32 }
 0x345   : > { %2722 = vmatpush3.bf16.msra.mxu1 %v4486_v20 }
 0x346   : > { %2724 = vmatprep.subr.bf16.mxu1 %v4487_v38 }
 0x349   : > { %2726 = vmatpush3.bf16.msra.mxu1 %v4488_v48 }
 0x34a   : > { %2728 = vmatprep.subr.bf16.mxu1 %v4489_v52 }
 0x34d   : > { %2730 = vmatpush3.bf16.msra.mxu1 %v4490_v8 }
 0x34e   : > { %2732 = vmatprep.subr.bf16.mxu1 %v4491_v12 }
 0x351   : > { %2734 = vmatpush3.bf16.msra.mxu1 %v4492_v17 }
 0x352   : > { %2736 = vmatprep.subr.bf16.mxu1 %v4493_v57 }
 0x355   : > { %2738 = vmatpush3.bf16.msra.mxu1 %v4496_v3 }
 0x356   : > { %2740 = vmatprep.subr.bf16.mxu1 %v2739_v29  ;;  %v2757_v29 = vpack.c.bf16 %v4514_v11, %v4513_v62 }
 0x358   : > { %1844 = vmatmul.mubr.f32.vlgmr.msra.gmra.mrb[6].mxu1 %v1363_v0  ;;  %v2749_v0 = vpack.c.bf16 %v4506_v28, %v4505_v36 }
 0x359   : > { %2742 = vmatpush3.bf16.msra.mxu1 %v2741_v34  ;;  %2010 = vmatprep.mubr.f32.mxu1 %v3963_v44  ;;  %v2763_v34 = vpack.c.bf16 %v4520_v49, %v4519_v24 }
 0x35a   : > { %2744 = vmatprep.subr.bf16.mxu1 %v2743_v53  ;;  %v2769_v53 = vpack.c.bf16 %v4526_v25, %v4525_v18 }
 0x35d   : > { %2746 = vmatpush3.bf16.msra.mxu1 %v2745_v47 }
 0x35e   : > { %2748 = vmatprep.subr.bf16.mxu1 %v2747_v46 }
 0x361   : > { %2750 = vmatpush3.bf16.msra.mxu1 %v2749_v0 }
 0x362   : > { %2752 = vmatprep.subr.bf16.mxu1 %v2751_v16 }
 0x365   : > { %2754 = vmatpush3.bf16.msra.mxu1 %v2753_v60 }
 0x366   : > { %2756 = vmatprep.subr.bf16.mxu1 %v2755_v30 }
 0x369   : > { %2758 = vmatpush3.bf16.msra.mxu1 %v2757_v29 }
 0x36a   : > { %2760 = vmatprep.subr.bf16.mxu1 %v2759_v14 }
 0x36d   : > { %2762 = vmatpush3.bf16.msra.mxu1 %v2761_v13 }
 0x36e   : > { %2764 = vmatprep.subr.bf16.mxu1 %v2763_v34 }
 0x371   : > { %2766 = vmatpush3.bf16.msra.mxu1 %v2765_v54 }
 0x372   : > { %2768 = vmatprep.subr.bf16.mxu1 %v2767_v33 }
 0x375   : > { %2770 = vmatpush3.bf16.msra.mxu1 %v2769_v53 }
 0x376   : > { %2772 = vmatprep.subr.bf16.mxu1 %v4479_v41 }
 0x378   : > { %2012 = vmatmul.mubr.f32.vlgmr.msra.gmra.mrb[8].mxu1 %v3961_v10 }
 0x379   : > { %2774 = vmatpush3.bf16.msra.mxu1 %v4480_v21  ;;  %2114 = vmatprep.mubr.f32.mxu1 %v3963_v44  ;;  %v2204_v44 = vld [vmem:[%s4198_s6] ss:$0 sm:$0xff] }
 0x37a   : > { %2776 = vmatprep.subr.bf16.mxu1 %v4481_v31 }
 0x37d   : > { %2778 = vmatpush3.bf16.msra.mxu1 %v4482_v50 }
 0x37e   : > { %2780 = vmatprep.subr.bf16.mxu1 %v4483_v61 }
 0x381   : > { %2782 = vmatpush3.bf16.msra.mxu1 %v4484_v58 }
 0x382   : > { %2784 = vmatprep.subr.bf16.mxu1 %v4485_v32 }
 0x385   : > { %2786 = vmatpush3.bf16.msra.mxu1 %v4486_v20 }
 0x386   : > { %2788 = vmatprep.subr.bf16.mxu1 %v4487_v38 }
 0x389   : > { %2790 = vmatpush3.bf16.msra.mxu1 %v4488_v48 }
 0x38a   : > { %2792 = vmatprep.subr.bf16.mxu1 %v4489_v52 }
 0x38d   : > { %2794 = vmatpush3.bf16.msra.mxu1 %v4490_v8 }
 0x38e   : > { %2796 = vmatprep.subr.bf16.mxu1 %v4491_v12 }
 0x391   : > { %2798 = vmatpush3.bf16.msra.mxu1 %v4492_v17 }
 0x392   : > { %2800 = vmatprep.subr.bf16.mxu1 %v4493_v57 }
 0x395   : > { %2802 = vmatpush3.bf16.msra.mxu1 %v4496_v3 }
 0x398   : > { %2116 = vmatmul.mubr.f32.vlgmr.msra.gmra.mrb[10].mxu1 %v3961_v10 }
 0x3cb   : > { %v2241_v43 = vpop.f32.mrb[0].mxu1 }
 0x3cc   : > { %v2242_v40 = vpop.f32.mrb[1].mxu1 }
 0x3cd   : > { %v2243_v7 = vadd.f32 %v2242_v40, %v2241_v43 }
 0x3cf   : > { %v1368_v37 = vadd.f32 %v2243_v7, %v2204_v44 }
 0x3eb   : > { %v2276_v35 = vpop.f32.mrb[2].mxu1 }
 0x3ec   : > { %v2277_v26 = vpop.f32.mrb[3].mxu1 }
 0x3ed   : > { %v2278_v56 = vadd.f32 %v2277_v26, %v2276_v35 }
 0x3ef   : > { %v1600_v41 = vadd.f32 %v2278_v56, %v1368_v37 }
 0x40b   : > { %v2311_v21 = vpop.f32.mrb[4].mxu1 }
 0x40c   : > { %v2312_v31 = vpop.f32.mrb[5].mxu1 }
 0x40d   : > { %v2313_v50 = vadd.f32 %v2312_v31, %v2311_v21 }
 0x40f   : > { %v1738_v61 = vadd.f32 %v2313_v50, %v1600_v41 }
 0x42b   : > { %v2346_v58 = vpop.f32.mrb[6].mxu1 }
 0x42c   : > { %v2347_v10 = vpop.f32.mrb[7].mxu1 }
 0x42d   : > { %v2348_v32 = vadd.f32 %v2347_v10, %v2346_v58 }
 0x42f   : > { %v1846_v20 = vadd.f32 %v2348_v32, %v1738_v61 }
 0x44b   : > { %v2381_v38 = vpop.f32.mrb[8].mxu1 }
 0x44c   : > { %v2382_v48 = vpop.f32.mrb[9].mxu1 }
 0x44d   : > { %v2383_v52 = vadd.f32 %v2382_v48, %v2381_v38 }
 0x44f   : > { %v2014_v8 = vadd.f32 %v2383_v52, %v1846_v20 }
 0x46b   : > { %v2416_v12 = vpop.f32.mrb[10].mxu1 }
 0x46c   : > { %v2417_v17 = vpop.f32.mrb[11].mxu1 }
 0x46d   : > { %v2418_v57 = vadd.f32 %v2417_v17, %v2416_v12 }
 0x46f   : > { %v2118_v3 = vadd.f32 %v2418_v57, %v2014_v8 }
 0x471   : > { %v2121_v9 = vadd.f32 %v2861_v4, %v2118_v3 }
 0x473   : > { %2122 = vst [vmem:[%s269_s13] sm:$0xff] %v2121_v9 }
 0x474   : > { %2875 = shalt.err (!%p2872_p3)
}
 0x475   : > { %s2876_s22 = scalar_lea.hbm %s4150_s18, 128  ;;  %s2880_s8 = scalar_lea.hbm %s4199_s7, 256 }
 0x476   : > { %p2877_p4 = scmp.ne.s32.totalorder %s4150_s18, %s2876_s22  ;;  %p2881_p9 = scmp.lt.u32.totalorder %s4150_s18, %s4199_s7 }
 0x477   : > { %p2882_p10 = scmp.lt.u32.totalorder %s2880_s8, %s2876_s22  ;;  %p2884_p12 = scmp.lt.u32.totalorder %s2876_s22, %s4150_s18 }
 0x478   : > { %p2878_p7 = pnand %p2877_p4, %p3006_p5 }
 0x479   : > { %p2883_p11 = por %p2882_p10, %p2881_p9 }
 0x47a   : > { %p2879_p8 = pneg %p2878_p7 }
 0x47b   : > { %p2885_p13 = por %p2884_p12, %p2883_p11 }
 0x47d   : > { %p2886_p0 = pnand %p2885_p13, %p2879_p8 }
 0x47f   : > { %2889 = shalt.err (!%p2886_p0)
}
 0x480   : > { %2815 = dma.vmem_to_hbm [thread:$0]  (%p3006_p5), %s4152_s14, 128, %s4150_s18, %s2124_s19  }
 0x481 PF: > { %p2821_p1 = scmp.ge.s32.totalorder %s2924_s27, 2  ;;  %s2149_s15 = sand.u32 1, %s2912_s24  }
 0x482   : > { %s2150_s16 = scalar_lea.sflag [#allocation3], %s2149_s15 }
 0x483   : > { %p2818_p2 = pnand %p2821_p1, %p3010_p6 }
 0x485   : > { %2907 = dma.done.wait (!%p2818_p2), %s2150_s16, 128  }
 0x486   : > { %2909 = vsyncadd (!%p2818_p2), %s2150_s16, 4294967168  ;;  %p17_p3 = scmp.ge.s32.totalorder %s2993_s30, 4   ;;  %s4527_s24 = smov %s2916_s25 }
 0x487   : > { %s4528_s25 = smov %s2920_s26  ;;  %s4529_s26 = smov %s3004_s10 }
 0x488   : > { %s4530_s27 = smov %s2993_s30  ;;  %19 = sbr.rel (!%p17_p3) target bundleno = 3 (0x3), region = 83 }
 0x48f   :  { %2155 = vsyncpa [#allocation3], 1 }
 0x490   :  { %2157 = vsyncpa [#allocation3 + $0x1], 1 }

// kernel: transformer_forward.4
= control target key start
LH: loop header
LB: loop body
LE: loop exit
PB: predicated region body
PF: predicated region fallthrough
CT: control target
= control target key end

     0   :  { %11 = vsyncpa [#allocation3], 0  ;;  %s7331_s0 = inlined_call_operand.vmem [shape: f32[2,8,128], index: 0, kind: input, shape index: {}]   ;;  %s7332_s1 = inlined_call_operand.vmem [shape: f32[1,128], index: 1, kind: input, shape index: {}]   ;;  %s7333_s2 = inlined_call_operand.vmem [shape: f32[1,128], index: 2, kind: input, shape index: {}]   ;;  %s7334_s3 = inlined_call_operand.hbm [shape: f32[128,384], index: 3, kind: input, shape index: {}]   ;;  %s7335_s4 = inlined_call_operand.hbm [shape: f32[128,128], index: 4, kind: input, shape index: {}]   ;;  %s7336_s5 = inlined_call_operand.vmem [shape: f32[1,128], index: 5, kind: input, shape index: {}]   ;;  %s7337_s6 = inlined_call_operand.vmem [shape: f32[2,8,128], index: 6, kind: output, shape index: {}]  }
   0x1   :  { %12 = vsyncpa [#allocation5], 0  ;;  %s5943_s21 = smov 0  }
   0x2 LB: > { %s5898_s22 = smov [#allocation2]   ;;  %s5949_s24 = sadd.s32 4294967295, %s5896_s21   ;;  %s5896_s21 = sphi %s5943_s21, %s18_s21  }
   0x3   : > { %s198_s23 = sshll.u32 %s5898_s22, 4  ;;  %p4432_p0 = scmp.ge.s32.totalorder %s5896_s21, 1  ;;  %s199_s23 = int_to_ptr.vmem [resolvable:$true] %s198_s23 }
   0x4   : > { %p180_p1 = scmp.lt.s32.totalorder %s5896_s21, 3  ;;  %p7338_p3 = scmp.eq.s32.totalorder %s5949_s24, 0 }
   0x5   : > { %s5899_s26 = smov [#allocation4]   ;;  %s5826_s7 = scalar_lea.hbm %s7334_s3, 6144 }
   0x6   : > { %p5953_p2 = pnand %p4432_p0, %p180_p1  ;;  %s211_s27 = sshll.u32 %s5899_s26, 4  ;;  %s5966_s27 = int_to_ptr.vmem [resolvable:$true] %s211_s27 }
   0x7   : > { %p5827_p6 = scmp.ne.s32.totalorder %s7334_s3, %s5826_s7  ;;  %p5833_p10 = scmp.lt.u32.totalorder %s5826_s7, %s7334_s3 }
   0x8   : > { %s7467_s25 = scalar_select %p5953_p2, 1, 0 }
   0x9   : > { %p5786_p4 = pneg %p5953_p2 }
   0xb   : > { %p5962_p5 = pnand %p7338_p3, %p5786_p4 }
   0xd   : > { %p5828_p7 = pneg %p5962_p5 }
   0xf   : > { %p5829_p8 = pnand %p5828_p7, %p5827_p6 }
  0x11   : > { %p5830_p9 = pneg %p5829_p8 }
  0x13   : > { %p5835_p11 = pnand %p5833_p10, %p5830_p9 }
  0x15   : > { %5838 = shalt.err (!%p5835_p11)
}
  0x16   : > { %s5839_s12 = scalar_lea.vmem %s199_s23, 6144  ;;  %p5847_p1 = scmp.lt.s32.totalorder %s199_s23, %s199_s23 }
  0x17   : > { %p5840_p12 = scmp.ne.s32.totalorder %s199_s23, %s5839_s12  ;;  %p5848_p4 = scmp.lt.s32.totalorder %s5839_s12, %s5839_s12 }
  0x19   : > { %p5842_p13 = pnand %p5840_p12, %p5828_p7  ;;  %p5849_p3 = por %p5848_p4, %p5847_p1 }
  0x1b   : > { %p5843_p0 = pneg %p5842_p13 }
  0x1d   : > { %p5850_p2 = pnand %p5849_p3, %p5843_p0 }
  0x1f   : > { %5853 = shalt.err (!%p5850_p2)
}
  0x20   : > { %s5900_s13 = smov 384   ;;  %s5901_s14 = smov 24  }
  0x21   : > { %5789 = dma.hbm_to_vmem [thread:$0]  (!%p5962_p5), %s7334_s3, 6144, %s199_s23, [#allocation3], %s5900_s13, %s5900_s13, %s5901_s14  }
  0x22   : > { %s5854_s19 = scalar_lea.hbm %s7335_s4, 2048 }
  0x23   : > { %p5855_p6 = scmp.ne.s32.totalorder %s7335_s4, %s5854_s19  ;;  %p5861_p8 = scmp.lt.u32.totalorder %s5854_s19, %s7335_s4 }
  0x25   : > { %p5857_p2 = pnand %p5855_p6, %p5828_p7 }
  0x27   : > { %p5858_p3 = pneg %p5857_p2 }
  0x29   : > { %p5863_p9 = pnand %p5861_p8, %p5858_p3 }
  0x2b   : > { %5866 = shalt.err (!%p5863_p9)
}
  0x2c   : > { %s5867_s23 = scalar_lea.vmem %s5966_s27, 2048  ;;  %p5875_p13 = scmp.lt.s32.totalorder %s5966_s27, %s5966_s27 }
  0x2d   : > { %p5868_p10 = scmp.ne.s32.totalorder %s5966_s27, %s5867_s23  ;;  %p5876_p0 = scmp.lt.s32.totalorder %s5867_s23, %s5867_s23 }
  0x2f   : > { %p5870_p11 = pnand %p5868_p10, %p5828_p7  ;;  %p5877_p1 = por %p5876_p0, %p5875_p13 }
  0x31   : > { %p5871_p12 = pneg %p5870_p11 }
  0x33   : > { %p5878_p4 = pnand %p5877_p1, %p5871_p12 }
  0x35   : > { %5881 = shalt.err (!%p5878_p4)
}
  0x36   : > { %s5902_s30 = smov 128   ;;  %s5903_s7 = smov 8  }
  0x37   : > { %5792 = dma.hbm_to_vmem [thread:$0]  (!%p5962_p5), %s7335_s4, 2048, %s5966_s27, [#allocation5], %s5902_s30, %s5902_s30, %s5903_s7  }
  0x38   : > { %p7469_p6 = scmp.ne.s32.totalorder %s7467_s25, 0 }
  0x3a   : > { %237 = sbr.rel (%p7469_p6) target bundleno = 2137 (0x859), region = 44 }
  0x41   : > { %p7470_p7 = scmp.eq.s32.totalorder %s5949_s24, 0 }
  0x43   : > { %5887 = dma.done.wait (%p7470_p7), [#allocation3], 6144   ;;  %p7471_p2 = pmov %p7470_p7 }
  0x45   : > { %5889 = vsyncadd (%p7471_p2), [#allocation3], 4294961152  ;;  %p7472_p3 = pmov %p7471_p2 }
  0x46   : > { %p7473_p8 = pmov %p7471_p2 }
  0x47   : > { %5891 = dma.done.wait (%p7472_p3), [#allocation5], 2048  }
  0x48   : > { %5893 = vsyncadd (%p7473_p8), [#allocation5], 4294965248  ;;  %p269_p9 = scmp.lt.s32.totalorder %s5949_s24, 1  ;;  %v307_v1 = vld [vmem:[#allocation2 + $0x8] sm:$0xff]  ;;  %v310_v2 = vld [vmem:[#allocation2 + $0x20] sm:$0xff]  ;;  %v7358_v6 = vmov 0.0|0.0  }
  0x49   : > { %v306_v3 = vld [vmem:[#allocation2] sm:$0xff]  ;;  %v354_v4 = vand.u32 4294901760, %v307_v1  ;;  %v358_v5 = vand.u32 4294901760, %v310_v2  ;;  %5430 = vmatprep.subr.bf16.mxu1 %v7358_v6  ;;  %v309_v7 = vld [vmem:[#allocation2 + $0x18] sm:$0xff]  ;;  %v308_v9 = vld [vmem:[#allocation2 + $0x10] sm:$0xff]  ;;  %vm5906_vm0 = vmmov 0  }
  0x4a   : > { %s7688_s24 = smov (!%p269_p9, %s5949_s24), 1  ;;  %v356_v8 = vand.u32 4294901760, %v306_v3  ;;  %v311_v10 = vld [vmem:[#allocation2 + $0x28] sm:$0xff]  ;;  %v360_v11 = vand.u32 4294901760, %v309_v7  ;;  %v1210_v12 = vand.u32 4294901760, %v308_v9  ;;  %v6065_v27 = vld [vmem:[#allocation2 + $0x38] sm:$0xff] }
  0x4b   : > { %s4439_s25 = sshll.u32 %s7688_s24, 3  ;;  %v1213_v13 = vand.u32 4294901760, %v311_v10  ;;  %v6039_v14 = vpack.c.bf16 %v358_v5, %v354_v4  ;;  %v6041_v15 = vsub.f32 %v307_v1, %v354_v4  ;;  %v6043_v16 = vsub.f32 %v310_v2, %v358_v5  ;;  %v6067_v28 = vld [vmem:[#allocation2 + $0x50] sm:$0xff]  ;;  %v6073_v32 = vld [vmem:[#allocation2 + $0x48] sm:$0xff]  ;;  %v6075_v33 = vld [vmem:[#allocation2 + $0x40] sm:$0xff]  ;;  %s5907_s15 = smov 64  }
  0x4c   : > { %s6035_s10 = scalar_lea.vmem %s7331_s0, %s4439_s25  ;;  %v6045_v17 = vsub.f32 %v306_v3, %v356_v8  ;;  %v6047_v18 = vpack.c.bf16 %v360_v11, %v356_v8  ;;  %v6049_v19 = vsub.f32 %v309_v7, %v360_v11  ;;  %v6053_v21 = vsub.f32 %v308_v9, %v1210_v12  ;;  %v6071_v31 = vld [vmem:[#allocation2 + $0x30] sm:$0xff]  ;;  %v6079_v36 = vld [vmem:[#allocation2 + $0x58] sm:$0xff]  ;;  %v6095_v41 = vld [vmem:[#allocation2 + $0x68] sm:$0xff]  ;;  %s276_s20 = scalar_lea.vmem %s7337_s6, %s4439_s25 }
  0x4d   : > { %v277_v0 = vld [vmem:[%s6035_s10] sm:$0xff]  ;;  %7474 = vst [vmem:[#allocation8_spill] sm:$0xff] %v6039_v14  ;;  %v6051_v20 = vpack.c.bf16 %v1213_v13, %v1210_v12  ;;  %5239 = vmatprep.subr.bf16.mxu0 %v6039_v14  ;;  %v6056_v22 = vsub.f32 %v311_v10, %v1213_v13  ;;  %v7353_v29 = vand.u32 4294901760, %v6065_v27  ;;  %v7352_v30 = vand.u32 4294901760, %v6067_v28  ;;  %v6110_v47 = vld [vmem:[#allocation2 + $0x78] sm:$0xff]  ;;  %v6112_v48 = vld [vmem:[#allocation2 + $0x70] sm:$0xff] }
  0x4e   : > { %280 = vadd.xlane.f32.xlu0 %v277_v0  ;;  %7475 = vst [vmem:[#allocation9_spill] sm:$0xff] %v6047_v18  ;;  %7476 = vst [vmem:[#allocation10_spill] sm:$0xff] %v6049_v19  ;;  %5241 = vmatpush1.bf16.msra.mxu0 %v6047_v18  ;;  %v7351_v34 = vand.u32 4294901760, %v6071_v31  ;;  %v7350_v35 = vand.u32 4294901760, %v6073_v32  ;;  %v7349_v37 = vand.u32 4294901760, %v6075_v33  ;;  %v7348_v39 = vand.u32 4294901760, %v6079_v36 }
  0x4f   : > { %7477 = vst [vmem:[#allocation11_spill] sm:$0xff] %v6051_v20  ;;  %7478 = vst [vmem:[#allocation12_spill] sm:$0xff] %v6053_v21  ;;  %5432 = vmatpush3.bf16.msra.mxu1 %v6051_v20  ;;  %v6086_v38 = vpack.c.bf16 %v7352_v30, %v7353_v29  ;;  %v6097_v42 = vld [vmem:[#allocation2 + $0x80] sm:$0xff]  ;;  %v7347_v44 = vand.u32 4294901760, %v6095_v41  ;;  %v7344_v50 = vand.u32 4294901760, %v6110_v47  ;;  %v6117_v51 = vld [vmem:[#allocation2 + $0x88] sm:$0xff] }
  0x50   : > { %5433 = vmatprep.subr.bf16.mxu1 %v7358_v6  ;;  %v6093_v40 = vpack.c.bf16 %v7350_v35, %v7351_v34  ;;  %v6104_v43 = vpack.c.bf16 %v7348_v39, %v7349_v37  ;;  %v7346_v45 = vand.u32 4294901760, %v6097_v42  ;;  %v6108_v46 = vld [vmem:[#allocation2 + $0x60] sm:$0xff]  ;;  %v7343_v52 = vand.u32 4294901760, %v6112_v48  ;;  %v6135_v56 = vld [vmem:[#allocation2 + $0x98] sm:$0xff]  ;;  %v6137_v57 = vld [vmem:[#allocation2 + $0xb0] sm:$0xff] }
  0x51   : > { %7480 = vst [vmem:[#allocation14_spill] sm:$0xff] %v6086_v38  ;;  %5243 = vmatprep.subr.bf16.mxu0 %v6086_v38  ;;  %v7345_v49 = vand.u32 4294901760, %v6108_v46  ;;  %v7342_v54 = vand.u32 4294901760, %v6117_v51  ;;  %v7341_v59 = vand.u32 4294901760, %v6135_v56  ;;  %v7340_v60 = vand.u32 4294901760, %v6137_v57  ;;  %v6148_v61 = vld [vmem:[#allocation2 + $0x90] sm:$0xff] }
  0x52   : > { %7481 = vst [vmem:[#allocation15_spill] sm:$0xff] %v6093_v40  ;;  %7482 = vst [vmem:[#allocation16_spill] sm:$0xff] %v6104_v43  ;;  %5245 = vmatpush1.bf16.msra.mxu0 %v6093_v40  ;;  %v6125_v53 = vpack.c.bf16 %v7346_v45, %v7347_v44  ;;  %v6150_v62 = vld [vmem:[#allocation2 + $0xa8] sm:$0xff]  ;;  %v6152_v63 = vld [vmem:[#allocation2 + $0xa0] sm:$0xff]  ;;  %v7497_v18 = vmov 0.0|0.0   ;;  %vm1850_vm1 = vcmask 523264  }
  0x53   : > { %5435 = vmatpush3.bf16.msra.mxu1 %v6104_v43  ;;  %v6133_v55 = vpack.c.bf16 %v7344_v50, %v7345_v49  ;;  %v6144_v58 = vpack.c.bf16 %v7342_v54, %v7343_v52  ;;  %v384_v1 = vand.u32 4294901760, %v6150_v62  ;;  %v329_v2 = vld [vmem:[#allocation2 + $0xb8] sm:$0xff]  ;;  %v1228_v3 = vand.u32 4294901760, %v6152_v63  ;;  %v331_v8 = vld [vmem:[#allocation2 + $0xc8] sm:$0xff]  ;;  %v334_v9 = vld [vmem:[#allocation2 + $0xe0] sm:$0xff] }
  0x54   : > { %7483 = vst [vmem:[#allocation17_spill] sm:$0xff] %v6125_v53  ;;  %5436 = vmatprep.subr.bf16.mxu1 %v7358_v6  ;;  %5247 = vmatprep.subr.bf16.mxu0 %v6125_v53  ;;  %v6163_v4 = vpack.c.bf16 %v7340_v60, %v7341_v59  ;;  %v1231_v5 = vand.u32 4294901760, %v329_v2  ;;  %v386_v11 = vand.u32 4294901760, %v331_v8  ;;  %v390_v12 = vand.u32 4294901760, %v334_v9  ;;  %v330_v13 = vld [vmem:[#allocation2 + $0xc0] sm:$0xff]  ;;  %v335_v59 = vld [vmem:[#allocation2 + $0xe8] sm:$0xff] }
  0x55   : > { %7484 = vst [vmem:[#allocation18_spill] sm:$0xff] %v6133_v55  ;;  %7485 = vst [vmem:[#allocation19_spill] sm:$0xff] %v6144_v58  ;;  %v1237_v50 = vand.u32 4294901760, %v335_v59  ;;  %v337_v45 = vld [vmem:[#allocation2 + $0xf8] sm:$0xff]  ;;  %v340_v44 = vld [vmem:[#allocation2 + $0x110] sm:$0xff]  ;;  %v7494_v43 = vand.u32 4294901760, %v6067_v28 }
  0x56   : > { %5249 = vmatpush1.bf16.msra.mxu0 %v6133_v55  ;;  %7486 = vst [vmem:[#allocation20_spill] sm:$0xff] %v6163_v4  ;;  %v6169_v10 = vpack.c.bf16 %v1231_v5, %v1228_v3  ;;  %v6173_v52 = vpack.c.bf16 %v390_v12, %v386_v11  ;;  %v394_v37 = vand.u32 4294901760, %v337_v45  ;;  %v398_v35 = vand.u32 4294901760, %v340_v44  ;;  %v336_v34 = vld [vmem:[#allocation2 + $0xf0] sm:$0xff]  ;;  %v339_v30 = vld [vmem:[#allocation2 + $0x108] sm:$0xff]  ;;  %v338_v29 = vld [vmem:[#allocation2 + $0x100] sm:$0xff] }
  0x57   : > { %5438 = vmatpush3.bf16.msra.mxu1 %v6144_v58  ;;  %5251 = vmatprep.subr.bf16.mxu0 %v6163_v4  ;;  %v400_v4 = vand.u32 4294901760, %v339_v30  ;;  %v1240_v58 = vand.u32 4294901760, %v338_v29  ;;  %v6193_v40 = vsub.f32 %v6067_v28, %v7494_v43  ;;  %v7499_v28 = vand.u32 4294901760, %v6079_v36  ;;  %v346_v14 = vld [vmem:[#allocation2 + $0x140] sm:$0xff] }
  0x58   : > { %5439 = vmatprep.subr.bf16.mxu1 %v7358_v6  ;;  %7488 = vst [vmem:[#allocation22_spill] sm:$0xff] %v6169_v10  ;;  %7489 = vst [vmem:[#allocation23_spill] sm:$0xff] %v6173_v52  ;;  %vm2304_vm2 = vcmask 64512  }
  0x59   : > { %v6214_v43 = vsub.f32 %v6079_v36, %v7499_v28  ;;  %v7504_v36 = vand.u32 4294901760, %v6110_v47 }
  0x5b   : > { %5441 = vmatpush3.bf16.msra.mxu1 %v6169_v10  ;;  %v396_v10 = vand.u32 4294901760, %v336_v34  ;;  %v6235_v28 = vsub.f32 %v6110_v47, %v7504_v36 }
  0x5c   : > { %5442 = vmatprep.subr.bf16.mxu1 %v7358_v6  ;;  %v6183_v6 = vpack.c.bf16 %v398_v35, %v394_v37 }
  0x5e   : > { %7492 = vst [vmem:[#allocation26_spill] sm:$0xff] %v6183_v6 }
  0xdb   : > { %v281_v23 = vpop.xlane.xlu0 %280 }
  0xdc   : > { %v283_v24 = vmul.f32 0.0078125, %v281_v23  ;;  %v333_v23 = vld [vmem:[#allocation2 + $0xd8] sm:$0xff] }
  0xdd   : > { %v392_v60 = vand.u32 4294901760, %v333_v23 }
  0xde   : > { %v6061_v25 = vsub.f32 %v277_v0, %v283_v24  ;;  %v380_v0 = vand.u32 4294901760, %v6148_v61  ;;  %v332_v24 = vld [vmem:[#allocation2 + $0xd0] sm:$0xff] }
  0xdf   : > { %v1234_v54 = vand.u32 4294901760, %v332_v24 }
  0xe0   : > { %7479 = vst [vmem:[#allocation13_spill] sm:$0xff] %v6061_v25  ;;  %v285_v26 = vmul.f32 %v6061_v25, %v6061_v25  ;;  %v6166_v7 = vpack.c.bf16 %v384_v1, %v380_v0  ;;  %v6258_v36 = vsub.f32 %v6148_v61, %v380_v0  ;;  %v6278_v0 = vsub.f32 %v335_v59, %v1237_v50 }
  0xe1   : > { %v6179_v39 = vpack.c.bf16 %v1237_v50, %v1234_v54  ;;  %v6276_v61 = vsub.f32 %v332_v24, %v1234_v54  ;;  %v6292_v50 = vsub.f32 %v338_v29, %v1240_v58 }
  0xe2   : > { %286 = vadd.xlane.f32.xlu0 %v285_v26  ;;  %7487 = vst [vmem:[#allocation21_spill] sm:$0xff] %v6166_v7  ;;  %5253 = vmatpush1.bf16.msra.mxu0 %v6166_v7  ;;  %v388_v26 = vand.u32 4294901760, %v330_v13  ;;  %v341_v7 = vld [vmem:[#allocation2 + $0x118] sm:$0xff] }
  0xe3   : > { %5255 = vmatprep.subr.bf16.mxu0 %v6173_v52  ;;  %7491 = vst [vmem:[#allocation25_spill] sm:$0xff] %v6179_v39  ;;  %5444 = vmatpush3.bf16.msra.mxu1 %v6179_v39  ;;  %v1243_v55 = vand.u32 4294901760, %v341_v7  ;;  %v7493_v52 = vand.u32 4294901760, %v6065_v27  ;;  %v7496_v39 = vand.u32 4294901760, %v6073_v32 }
  0xe4   : > { %v6176_v49 = vpack.c.bf16 %v392_v60, %v388_v26  ;;  %5445 = vmatprep.subr.bf16.mxu1 %v7497_v18  ;;  %v6272_v25 = vsub.f32 %v330_v13, %v388_v26  ;;  %v353_v26 = vld [vmem:[#allocation2 + $0x178] sm:$0xff] }
  0xe5   : > { %v6188_v53 = vsub.f32 %v6065_v27, %v7493_v52  ;;  %v6203_v20 = vsub.f32 %v6073_v32, %v7496_v39  ;;  %v7498_v27 = vand.u32 4294901760, %v6075_v33  ;;  %v7501_v32 = vand.u32 4294901760, %v6097_v42 }
  0xe6   : > { %7490 = vst [vmem:[#allocation24_spill] sm:$0xff] %v6176_v49  ;;  %5257 = vmatpush1.bf16.msra.mxu0 %v6176_v49  ;;  %v7495_v49 = vand.u32 4294901760, %v6071_v31  ;;  %v6290_v54 = vpack.c.bf16 %v1243_v55, %v1240_v58  ;;  %v6294_v59 = vsub.f32 %v341_v7, %v1243_v55  ;;  %v351_v58 = vld [vmem:[#allocation2 + $0x168] sm:$0xff]  ;;  %v350_v7 = vld [vmem:[#allocation2 + $0x160] sm:$0xff] }
  0xe7   : > { %v6209_v52 = vsub.f32 %v6075_v33, %v7498_v27  ;;  %v6224_v39 = vsub.f32 %v6097_v42, %v7501_v32  ;;  %5259 = vmatprep.subr.bf16.mxu0 %v6183_v6  ;;  %v7503_v33 = vand.u32 4294901760, %v6108_v46  ;;  %v7506_v42 = vand.u32 4294901760, %v6117_v51 }
  0xe8   : > { %v6198_v38 = vsub.f32 %v6071_v31, %v7495_v49  ;;  %v7500_v31 = vand.u32 4294901760, %v6095_v41  ;;  %v7507_v6 = vand.u32 4294901760, %v6135_v56  ;;  %7510 = vst [vmem:[#allocation29_spill] sm:$0xff] %v6290_v54  ;;  %7511 = vst [vmem:[#allocation30_spill] sm:$0xff] %v6294_v59  ;;  %5447 = vmatpush3.bf16.msra.mxu1 %v6290_v54 }
  0xe9   : > { %7502 = vst [vmem:[#allocation27_spill] sm:$0xff] %v6224_v39  ;;  %v6230_v27 = vsub.f32 %v6108_v46, %v7503_v33  ;;  %v6245_v32 = vsub.f32 %v6117_v51, %v7506_v42  ;;  %v7508_v33 = vand.u32 4294901760, %v6137_v57  ;;  %v6266_v51 = vsub.f32 %v329_v2, %v1231_v5  ;;  %5448 = vmatprep.subr.bf16.mxu1 %v7497_v18 }
  0xea   : > { %v6219_v49 = vsub.f32 %v6095_v41, %v7500_v31  ;;  %v7505_v41 = vand.u32 4294901760, %v6112_v48  ;;  %v6250_v46 = vsub.f32 %v6135_v56, %v7507_v6  ;;  %v6268_v42 = vsub.f32 %v331_v8, %v386_v11  ;;  %v343_v56 = vld [vmem:[#allocation2 + $0x128] sm:$0xff]  ;;  %v349_v11 = vld [vmem:[#allocation2 + $0x158] sm:$0xff] }
  0xeb   : > { %v6255_v47 = vsub.f32 %v6137_v57, %v7508_v33  ;;  %v6270_v6 = vsub.f32 %v334_v9, %v390_v12  ;;  %v6274_v57 = vsub.f32 %v333_v23, %v392_v60  ;;  %v6282_v2 = vsub.f32 %v340_v44, %v398_v35  ;;  %v347_v9 = vld [vmem:[#allocation2 + $0x148] sm:$0xff]  ;;  %v352_v12 = vld [vmem:[#allocation2 + $0x170] sm:$0xff] }
  0xec   : > { %v6240_v31 = vsub.f32 %v6112_v48, %v7505_v41  ;;  %v6261_v48 = vsub.f32 %v6150_v62, %v384_v1  ;;  %v6264_v41 = vsub.f32 %v6152_v63, %v1228_v3  ;;  %v342_v62 = vld [vmem:[#allocation2 + $0x120] sm:$0xff]  ;;  %v345_v1 = vld [vmem:[#allocation2 + $0x138] sm:$0xff]  ;;  %v344_v63 = vld [vmem:[#allocation2 + $0x130] sm:$0xff]  ;;  %v6280_v3 = vsub.f32 %v337_v45, %v394_v37 }
  0xed   : > { %v6284_v5 = vpack.c.bf16 %v400_v4, %v396_v10  ;;  %v6286_v8 = vsub.f32 %v336_v34, %v396_v10  ;;  %v6288_v60 = vsub.f32 %v339_v30, %v400_v4  ;;  %v402_v37 = vand.u32 4294901760, %v343_v56  ;;  %v348_v30 = vld [vmem:[#allocation2 + $0x150] sm:$0xff] }
  0xee   : > { %v406_v35 = vand.u32 4294901760, %v346_v14  ;;  %v404_v44 = vand.u32 4294901760, %v342_v62  ;;  %v408_v45 = vand.u32 4294901760, %v345_v1  ;;  %v1246_v34 = vand.u32 4294901760, %v344_v63 }
  0xef   : > { %7509 = vst [vmem:[#allocation28_spill] sm:$0xff] %v6284_v5  ;;  %5261 = vmatpush1.bf16.msra.mxu0 %v6284_v5  ;;  %v1249_v10 = vand.u32 4294901760, %v347_v9  ;;  %v410_v13 = vand.u32 4294901760, %v349_v11  ;;  %v414_v23 = vand.u32 4294901760, %v352_v12  ;;  %v6300_v24 = vsub.f32 %v343_v56, %v402_v37 }
  0xf0   : > { %v6298_v4 = vpack.c.bf16 %v406_v35, %v402_v37  ;;  %v6302_v29 = vsub.f32 %v346_v14, %v406_v35  ;;  %v6305_v55 = vpack.c.bf16 %v408_v45, %v404_v44  ;;  %v6307_v33 = vsub.f32 %v342_v62, %v404_v44 }
  0xf1   : > { %v6309_v54 = vsub.f32 %v345_v1, %v408_v45  ;;  %v6311_v5 = vpack.c.bf16 %v1249_v10, %v1246_v34  ;;  %v6313_v59 = vsub.f32 %v344_v63, %v1246_v34  ;;  %v6316_v56 = vsub.f32 %v347_v9, %v1249_v10 }
  0xf2   : > { %7512 = vst [vmem:[#allocation31_spill] sm:$0xff] %v6298_v4  ;;  %7513 = vst [vmem:[#allocation32_spill] sm:$0xff] %v6305_v55  ;;  %5263 = vmatprep.subr.bf16.mxu0 %v6298_v4  ;;  %v6318_v14 = vpack.c.bf16 %v414_v23, %v410_v13  ;;  %v6320_v37 = vsub.f32 %v349_v11, %v410_v13  ;;  %v6322_v35 = vsub.f32 %v352_v12, %v414_v23  ;;  %v7400_v13 = vmov 0.0  }
  0xf3   : > { %7514 = vst [vmem:[#allocation33_spill] sm:$0xff] %v6311_v5  ;;  %5265 = vmatpush1.bf16.msra.mxu0 %v6305_v55  ;;  %5450 = vmatpush3.bf16.msra.mxu1 %v6311_v5  ;;  %v412_v62 = vand.u32 4294901760, %v348_v30  ;;  %v416_v1 = vand.u32 4294901760, %v351_v58  ;;  %v1252_v44 = vand.u32 4294901760, %v350_v7  ;;  %v1255_v45 = vand.u32 4294901760, %v353_v26 }
  0xf4   : > { %7515 = vst [vmem:[#allocation34_spill] sm:$0xff] %v6318_v14  ;;  %5267 = vmatprep.subr.bf16.mxu0 %v6318_v14  ;;  %5451 = vmatprep.subr.bf16.mxu1 %v7497_v18  ;;  %v7399_v63 = vand.u32 4294901760, %v6041_v15  ;;  %v7398_v9 = vand.u32 4294901760, %v6043_v16  ;;  %v7422_v55 = vand.u32 4294901760, %v6198_v38 }
  0xf5   : > { %v6330_v11 = vpack.c.bf16 %v416_v1, %v412_v62  ;;  %v6332_v12 = vsub.f32 %v348_v30, %v412_v62  ;;  %v6334_v34 = vsub.f32 %v351_v58, %v416_v1  ;;  %v6336_v10 = vpack.c.bf16 %v1255_v45, %v1252_v44  ;;  %450 = vmatprep.mubr.f32.mxu0 %v7400_v13 }
  0xf6   : > { %v6339_v23 = vsub.f32 %v350_v7, %v1252_v44  ;;  %v6341_v14 = vsub.f32 %v353_v26, %v1255_v45  ;;  %v465_v5 = vsub.f32 %v6041_v15, %v7399_v63  ;;  %v477_v30 = vsub.f32 %v6043_v16, %v7398_v9  ;;  %4730 = vmatprep.mubr.msk.f32.mxu1 %vm5906_vm0, %v7400_v13 }
  0xf7   : > { %7516 = vst [vmem:[#allocation35_spill] sm:$0xff] %v6330_v11  ;;  %7517 = vst [vmem:[#allocation36_spill] sm:$0xff] %v6336_v10  ;;  %5269 = vmatpush1.bf16.msra.mxu0 %v6330_v11  ;;  %5453 = vmatpush3.bf16.msra.mxu1 %v6336_v10  ;;  %v7406_v58 = vand.u32 4294901760, %v6045_v17  ;;  %v7409_v7 = vand.u32 4294901760, %v6049_v19  ;;  %v7415_v26 = vand.u32 4294901760, %v6053_v21  ;;  %v7418_v45 = vand.u32 4294901760, %v6188_v53 }
  0xf8   : > { %7518 = vst [vmem:[#allocation37_spill] sm:$0xff] %v6339_v23  ;;  %v466_v1 = vand.u32 4294901760, %v465_v5  ;;  %v478_v44 = vand.u32 4294901760, %v477_v30  ;;  %5454 = vmatprep.subr.bf16.mxu1 %v7497_v18  ;;  %v7519_v5 = vand.u32 4294901760, %v6056_v22  ;;  %v7520_v11 = vand.u32 4294901760, %v6193_v40 }
  0xf9   : > { %v471_v63 = vsub.f32 %v6045_v17, %v7406_v58  ;;  %v483_v13 = vsub.f32 %v6049_v19, %v7409_v7  ;;  %v1304_v62 = vsub.f32 %v6053_v21, %v7415_v26  ;;  %v489_v9 = vsub.f32 %v6188_v53, %v7418_v45 }
  0xfa   : > { %v1311_v30 = vsub.f32 %v6056_v22, %v7519_v5  ;;  %v5270_v10 = vpack.c.bf16 %v478_v44, %v466_v1  ;;  %v501_v58 = vsub.f32 %v6193_v40, %v7520_v11  ;;  %v495_v1 = vsub.f32 %v6198_v38, %v7422_v55 }
  0xfb   : > { %v472_v7 = vand.u32 4294901760, %v471_v63  ;;  %v484_v4 = vand.u32 4294901760, %v483_v13  ;;  %v1305_v18 = vand.u32 4294901760, %v1304_v62  ;;  %v490_v26 = vand.u32 4294901760, %v489_v9 }
  0xfc   : > { %v1312_v19 = vand.u32 4294901760, %v1311_v30  ;;  %5271 = vmatprep.subr.bf16.mxu0 %v5270_v10  ;;  %v502_v21 = vand.u32 4294901760, %v501_v58  ;;  %v7419_v44 = vand.u32 4294901760, %v6203_v20  ;;  %v7420_v11 = vand.u32 4294901760, %v6209_v52 }
  0xfd   : > { %v6383_v5 = vpack.c.bf16 %v484_v4, %v472_v7  ;;  %v7421_v63 = vand.u32 4294901760, %v6214_v43  ;;  %v496_v62 = vand.u32 4294901760, %v495_v1  ;;  %v7423_v10 = vand.u32 4294901760, %v6219_v49 }
  0xfe   : > { %v6385_v45 = vpack.c.bf16 %v1312_v19, %v1305_v18  ;;  %v6389_v13 = vpack.c.bf16 %v502_v21, %v490_v26  ;;  %v507_v9 = vsub.f32 %v6203_v20, %v7419_v44  ;;  %v1318_v4 = vsub.f32 %v6209_v52, %v7420_v11 }
  0xff   : > { %7521 = vst [vmem:[#allocation38_spill] sm:$0xff] %v6383_v5  ;;  %v1325_v18 = vsub.f32 %v6214_v43, %v7421_v63  ;;  %v7424_v19 = vand.u32 4294901760, %v6224_v39  ;;  %v7432_v21 = vand.u32 4294901760, %v6230_v27  ;;  %v513_v7 = vsub.f32 %v6219_v49, %v7423_v10 }
 0x100   : > { %7522 = vst [vmem:[#allocation39_spill] sm:$0xff] %v6385_v45  ;;  %7523 = vst [vmem:[#allocation40_spill] sm:$0xff] %v6389_v13  ;;  %v508_v58 = vand.u32 4294901760, %v507_v9  ;;  %v7427_v26 = vand.u32 4294901760, %v6235_v28  ;;  %v7428_v30 = vand.u32 4294901760, %v6240_v31  ;;  %v1319_v1 = vand.u32 4294901760, %v1318_v4 }
 0x101   : > { %v1326_v44 = vand.u32 4294901760, %v1325_v18  ;;  %v525_v11 = vsub.f32 %v6224_v39, %v7424_v19  ;;  %v519_v63 = vsub.f32 %v6230_v27, %v7432_v21  ;;  %v514_v9 = vand.u32 4294901760, %v513_v7 }
 0x102   : > { %v6414_v55 = vpack.c.bf16 %v508_v58, %v496_v62  ;;  %v531_v10 = vsub.f32 %v6235_v28, %v7427_v26  ;;  %v1332_v4 = vsub.f32 %v6240_v31, %v7428_v30  ;;  %v7429_v19 = vand.u32 4294901760, %v6245_v32 }
 0x103   : > { %v6422_v18 = vpack.c.bf16 %v1326_v44, %v1319_v1  ;;  %v526_v13 = vand.u32 4294901760, %v525_v11  ;;  %v520_v45 = vand.u32 4294901760, %v519_v63  ;;  %v7430_v62 = vand.u32 4294901760, %v6250_v46 }
 0x104   : > { %7524 = vst [vmem:[#allocation41_spill] sm:$0xff] %v6414_v55  ;;  %v532_v5 = vand.u32 4294901760, %v531_v10  ;;  %v1333_v39 = vand.u32 4294901760, %v1332_v4  ;;  %v7431_v58 = vand.u32 4294901760, %v6255_v47  ;;  %v1339_v26 = vsub.f32 %v6245_v32, %v7429_v19 }
 0x105   : > { %7525 = vst [vmem:[#allocation42_spill] sm:$0xff] %v6422_v18  ;;  %v6427_v7 = vpack.c.bf16 %v526_v13, %v514_v9  ;;  %v7433_v30 = vand.u32 4294901760, %v6258_v36  ;;  %v7434_v44 = vand.u32 4294901760, %v6261_v48  ;;  %v537_v63 = vsub.f32 %v6250_v46, %v7430_v62 }
 0x106   : > { %v6434_v11 = vpack.c.bf16 %v532_v5, %v520_v45  ;;  %v549_v10 = vsub.f32 %v6255_v47, %v7431_v58  ;;  %v7435_v13 = vand.u32 4294901760, %v6264_v41  ;;  %v1340_v1 = vand.u32 4294901760, %v1339_v26 }
 0x107   : > { %7526 = vst [vmem:[#allocation43_spill] sm:$0xff] %v6427_v7  ;;  %v543_v9 = vsub.f32 %v6258_v36, %v7433_v30  ;;  %v555_v45 = vsub.f32 %v6261_v48, %v7434_v44  ;;  %v7438_v5 = vand.u32 4294901760, %v6266_v51  ;;  %v538_v4 = vand.u32 4294901760, %v537_v63 }
 0x108   : > { %7527 = vst [vmem:[#allocation44_spill] sm:$0xff] %v6434_v11  ;;  %v550_v19 = vand.u32 4294901760, %v549_v10  ;;  %v1346_v62 = vsub.f32 %v6264_v41, %v7435_v13  ;;  %v7437_v58 = vand.u32 4294901760, %v6268_v42  ;;  %v6454_v21 = vpack.c.bf16 %v1340_v1, %v1333_v39 }
 0x109   : > { %v544_v26 = vand.u32 4294901760, %v543_v9  ;;  %v556_v11 = vand.u32 4294901760, %v555_v45  ;;  %v1353_v30 = vsub.f32 %v6266_v51, %v7438_v5  ;;  %v7436_v10 = vand.u32 4294901760, %v6270_v6 }
 0x10a   : > { %7528 = vst [vmem:[#allocation45_spill] sm:$0xff] %v6454_v21  ;;  %v6459_v7 = vpack.c.bf16 %v550_v19, %v538_v4  ;;  %v1347_v44 = vand.u32 4294901760, %v1346_v62  ;;  %v561_v63 = vsub.f32 %v6268_v42, %v7437_v58  ;;  %v7439_v39 = vand.u32 4294901760, %v6272_v25 }
 0x10b   : > { %v6465_v13 = vpack.c.bf16 %v556_v11, %v544_v26  ;;  %v1354_v18 = vand.u32 4294901760, %v1353_v30  ;;  %v7440_v1 = vand.u32 4294901760, %v6274_v57  ;;  %v573_v19 = vsub.f32 %v6270_v6, %v7436_v10 }
 0x10c   : > { %7529 = vst [vmem:[#allocation46_spill] sm:$0xff] %v6459_v7  ;;  %v562_v9 = vand.u32 4294901760, %v561_v63  ;;  %v7441_v62 = vand.u32 4294901760, %v6276_v61  ;;  %v7442_v45 = vand.u32 4294901760, %v6278_v0  ;;  %v567_v11 = vsub.f32 %v6272_v25, %v7439_v39 }
 0x10d   : > { %7530 = vst [vmem:[#allocation47_spill] sm:$0xff] %v6465_v13  ;;  %v6474_v4 = vpack.c.bf16 %v1354_v18, %v1347_v44  ;;  %v579_v30 = vsub.f32 %v6274_v57, %v7440_v1  ;;  %v7443_v26 = vand.u32 4294901760, %v6280_v3  ;;  %v574_v63 = vand.u32 4294901760, %v573_v19 }
 0x10e   : > { %v1360_v10 = vsub.f32 %v6276_v61, %v7441_v62  ;;  %v1367_v18 = vsub.f32 %v6278_v0, %v7442_v45  ;;  %v7444_v44 = vand.u32 4294901760, %v6282_v2  ;;  %v568_v58 = vand.u32 4294901760, %v567_v11 }
 0x10f   : > { %7531 = vst [vmem:[#allocation48_spill] sm:$0xff] %v6474_v4  ;;  %v580_v5 = vand.u32 4294901760, %v579_v30  ;;  %v585_v39 = vsub.f32 %v6280_v3, %v7443_v26  ;;  %v7446_v1 = vand.u32 4294901760, %v6286_v8  ;;  %v6494_v4 = vpack.c.bf16 %v574_v63, %v562_v9 }
 0x110   : > { %v1361_v19 = vand.u32 4294901760, %v1360_v10  ;;  %v1368_v13 = vand.u32 4294901760, %v1367_v18  ;;  %v597_v62 = vsub.f32 %v6282_v2, %v7444_v44  ;;  %v7445_v30 = vand.u32 4294901760, %v6288_v60  ;;  %v7535_v10 = vld [vmem:[#allocation30_spill] sm:$0xff] }
 0x111   : > { %7532 = vst [vmem:[#allocation49_spill] sm:$0xff] %v6494_v4  ;;  %v6499_v7 = vpack.c.bf16 %v580_v5, %v568_v58  ;;  %v586_v45 = vand.u32 4294901760, %v585_v39  ;;  %v591_v11 = vsub.f32 %v6286_v8, %v7446_v1  ;;  %v7447_v9 = vand.u32 4294901760, %v6292_v50 }
 0x112   : > { %v6505_v26 = vpack.c.bf16 %v1368_v13, %v1361_v19  ;;  %v598_v21 = vand.u32 4294901760, %v597_v62  ;;  %v7448_v63 = vand.u32 4294901760, %v7535_v10  ;;  %v603_v58 = vsub.f32 %v6288_v60, %v7445_v30 }
 0x113   : > { %7533 = vst [vmem:[#allocation50_spill] sm:$0xff] %v6499_v7  ;;  %v592_v18 = vand.u32 4294901760, %v591_v11  ;;  %v7449_v5 = vand.u32 4294901760, %v6300_v24  ;;  %v7450_v39 = vand.u32 4294901760, %v6302_v29  ;;  %v1374_v13 = vsub.f32 %v6292_v50, %v7447_v9 }
 0x114   : > { %7534 = vst [vmem:[#allocation51_spill] sm:$0xff] %v6505_v26  ;;  %v6514_v44 = vpack.c.bf16 %v598_v21, %v586_v45  ;;  %v1381_v62 = vsub.f32 %v7535_v10, %v7448_v63  ;;  %v7451_v19 = vand.u32 4294901760, %v6307_v33  ;;  %v604_v11 = vand.u32 4294901760, %v603_v58 }
 0x115   : > { %v609_v30 = vsub.f32 %v6300_v24, %v7449_v5  ;;  %v621_v21 = vsub.f32 %v6302_v29, %v7450_v39  ;;  %v7454_v45 = vand.u32 4294901760, %v6309_v54  ;;  %v1375_v1 = vand.u32 4294901760, %v1374_v13 }
 0x116   : > { %7536 = vst [vmem:[#allocation30_spill] sm:$0xff] %v6514_v44  ;;  %v1382_v44 = vand.u32 4294901760, %v1381_v62  ;;  %v615_v9 = vsub.f32 %v6307_v33, %v7451_v19  ;;  %v7453_v63 = vand.u32 4294901760, %v6313_v59  ;;  %v6534_v26 = vpack.c.bf16 %v604_v11, %v592_v18 }
 0x117   : > { %v610_v58 = vand.u32 4294901760, %v609_v30  ;;  %v622_v7 = vand.u32 4294901760, %v621_v21  ;;  %v627_v5 = vsub.f32 %v6309_v54, %v7454_v45  ;;  %v7452_v62 = vand.u32 4294901760, %v6316_v56 }
 0x118   : > { %7537 = vst [vmem:[#allocation52_spill] sm:$0xff] %v6534_v26  ;;  %v6539_v4 = vpack.c.bf16 %v1382_v44, %v1375_v1  ;;  %v616_v39 = vand.u32 4294901760, %v615_v9  ;;  %v1388_v13 = vsub.f32 %v6313_v59, %v7453_v63  ;;  %v7455_v18 = vand.u32 4294901760, %v6320_v37  ;;  %v7542_v26 = vld [vmem:[#allocation12_spill] sm:$0xff] }
 0x119   : > { %v6545_v19 = vpack.c.bf16 %v622_v7, %v610_v58  ;;  %v628_v55 = vand.u32 4294901760, %v627_v5  ;;  %v7456_v30 = vand.u32 4294901760, %v6322_v35  ;;  %v1395_v1 = vsub.f32 %v6316_v56, %v7452_v62 }
 0x11a   : > { %7538 = vst [vmem:[#allocation53_spill] sm:$0xff] %v6539_v4  ;;  %v1389_v11 = vand.u32 4294901760, %v1388_v13  ;;  %v7457_v44 = vand.u32 4294901760, %v6332_v12  ;;  %v7458_v9 = vand.u32 4294901760, %v6334_v34  ;;  %v633_v7 = vsub.f32 %v6320_v37, %v7455_v18 }
 0x11b   : > { %7539 = vst [vmem:[#allocation54_spill] sm:$0xff] %v6545_v19  ;;  %v6554_v21 = vpack.c.bf16 %v628_v55, %v616_v39  ;;  %v645_v5 = vsub.f32 %v6322_v35, %v7456_v30  ;;  %v7459_v58 = vand.u32 4294901760, %v6339_v23  ;;  %v1396_v13 = vand.u32 4294901760, %v1395_v1 }
 0x11c   : > { %v639_v62 = vsub.f32 %v6332_v12, %v7457_v44  ;;  %v651_v55 = vsub.f32 %v6334_v34, %v7458_v9  ;;  %v7462_v39 = vand.u32 4294901760, %v6341_v14  ;;  %v634_v63 = vand.u32 4294901760, %v633_v7  ;;  %v7541_v7 = vld [vmem:[#allocation10_spill] sm:$0xff] }
 0x11d   : > { %7540 = vst [vmem:[#allocation55_spill] sm:$0xff] %v6554_v21  ;;  %v646_v45 = vand.u32 4294901760, %v645_v5  ;;  %v1402_v18 = vsub.f32 %v6339_v23, %v7459_v58  ;;  %v6575_v1 = vpack.c.bf16 %v1396_v13, %v1389_v11 }
 0x11e   : > { %v640_v21 = vand.u32 4294901760, %v639_v62  ;;  %v652_v19 = vand.u32 4294901760, %v651_v55  ;;  %v1409_v44 = vsub.f32 %v6341_v14, %v7462_v39  ;;  %v7545_v62 = vld [vmem:[#allocation13_spill] sm:$0xff] }
 0x11f   : > { %v6580_v9 = vpack.c.bf16 %v646_v45, %v634_v63  ;;  %v1403_v4 = vand.u32 4294901760, %v1402_v18  ;;  %v7543_v45 = vld [vmem:[#allocation27_spill] sm:$0xff]  ;;  %v4441_v18 = vld [vmem:[%s7332_s1] ss:$0 sm:$0xff] }
 0x120   : > { %v6586_v23 = vpack.c.bf16 %v652_v19, %v640_v21  ;;  %v1410_v30 = vand.u32 4294901760, %v1409_v44  ;;  %v7544_v44 = vld [vmem:[#allocation37_spill] sm:$0xff]  ;;  %v4442_v19 = vld [vmem:[%s7333_s2] ss:$0 sm:$0xff] }
 0x122   : > { %v6600_v21 = vpack.c.bf16 %v1410_v30, %v1403_v4 }
 0x16f   : > { %v287_v63 = vpop.xlane.xlu0 %286 }
 0x170   : > { %v288_v55 = vmul.f32 0.0078125, %v287_v63 }
 0x172   : > { %v289_v11 = vadd.f32 1e-05, %v288_v55 }
 0x174   : > { %5815 = vrsqrt.f32 %v289_v11 }
 0x17e   : > { %v5816_v39 = vpop.eup %5815 }
 0x17f   : > { %v291_v13 = vmul.f32 %v5816_v39, %v7545_v62  ;;  %v7548_v39 = vld [vmem:[#allocation38_spill] sm:$0xff]  ;;  %v7549_v62 = vld [vmem:[#allocation39_spill] sm:$0xff] }
 0x181   : > { %v298_v58 = vmul.f32 %v4441_v18, %v291_v13  ;;  %v7550_v18 = vld [vmem:[#allocation40_spill] sm:$0xff]  ;;  %v7552_v13 = vmov 0.0  }
 0x183   : > { %v305_v4 = vadd.f32 %v4442_v19, %v298_v58  ;;  %v7551_v58 = vmov 0.0|0.0   ;;  %v7553_v19 = vld [vmem:[#allocation41_spill] sm:$0xff] }
 0x185   : > { %v6639_v5 = vand.u32 4294901760, %v305_v4 }
 0x187   : > { %v6642_v30 = vsub.f32 %v305_v4, %v6639_v5  ;;  %v7554_v4 = vld [vmem:[#allocation42_spill] sm:$0xff] }
 0x189   : > { %7546 = vst [vmem:[#allocation10_spill] sm:$0xff] %v6642_v30  ;;  %v6645_v11 = vand.u32 4294901760, %v6642_v30 }
 0x18b   : > { %7547 = vst [vmem:[#allocation12_spill] sm:$0xff] %v6645_v11  ;;  %v454_v63 = vsub.f32 %v6642_v30, %v6645_v11  ;;  %v7560_v11 = vld [vmem:[#allocation48_spill] sm:$0xff]  ;;  %v7561_v30 = vld [vmem:[#allocation49_spill] sm:$0xff] }
 0x18d   : > { %v455_v55 = vand.u32 4294901760, %v454_v63  ;;  %v7555_v63 = vld [vmem:[#allocation43_spill] sm:$0xff] }
 0x18f   : > { %456 = vmatmul.mubr.f32.vlgmr.msra.gmra.mrb[0].mxu0 %v455_v55  ;;  %4731 = vmatmul.mubr.f32.vlgmr.msra.gmra.mrb[0].mxu1 %v455_v55  ;;  %v7556_v55 = vld [vmem:[#allocation44_spill] sm:$0xff] }
 0x190   : > { %5273 = vmatpush1.bf16.msra.mxu0 %v7548_v39  ;;  %5456 = vmatpush3.bf16.msra.mxu1 %v7549_v62  ;;  %v7557_v39 = vld [vmem:[#allocation45_spill] sm:$0xff]  ;;  %v7558_v62 = vld [vmem:[#allocation46_spill] sm:$0xff] }
 0x191   : > { %5275 = vmatprep.subr.bf16.mxu0 %v7550_v18  ;;  %5457 = vmatprep.subr.bf16.mxu1 %v7551_v58  ;;  %v7559_v18 = vld [vmem:[#allocation47_spill] sm:$0xff] }
 0x192   : > { %686 = vmatprep.mubr.f32.mxu0 %v7552_v13  ;;  %4765 = vmatprep.mubr.msk.f32.mxu1 %vm5906_vm0, %v7552_v13 }
 0x194   : > { %5277 = vmatpush1.bf16.msra.mxu0 %v7553_v19  ;;  %5459 = vmatpush3.bf16.msra.mxu1 %v7554_v4  ;;  %v7562_v19 = vld [vmem:[#allocation50_spill] sm:$0xff]  ;;  %v7563_v4 = vld [vmem:[#allocation51_spill] sm:$0xff] }
 0x195   : > { %5279 = vmatprep.subr.bf16.mxu0 %v7555_v63  ;;  %5460 = vmatprep.subr.bf16.mxu1 %v7551_v58  ;;  %v7564_v63 = vld [vmem:[#allocation30_spill] sm:$0xff] }
 0x198   : > { %5281 = vmatpush1.bf16.msra.mxu0 %v7556_v55  ;;  %5462 = vmatpush3.bf16.msra.mxu1 %v7557_v39  ;;  %v7565_v55 = vld [vmem:[#allocation52_spill] sm:$0xff]  ;;  %v7566_v39 = vld [vmem:[#allocation53_spill] sm:$0xff] }
 0x199   : > { %5283 = vmatprep.subr.bf16.mxu0 %v7558_v62  ;;  %5463 = vmatprep.subr.bf16.mxu1 %v7551_v58  ;;  %v7567_v62 = vld [vmem:[#allocation54_spill] sm:$0xff] }
 0x19c   : > { %5285 = vmatpush1.bf16.msra.mxu0 %v7559_v18  ;;  %5465 = vmatpush3.bf16.msra.mxu1 %v7560_v11  ;;  %v7568_v11 = vld [vmem:[#allocation55_spill] sm:$0xff]  ;;  %v7574_v18 = vpack.c.bf16 %v6214_v43, %v6209_v52 }
 0x19d   : > { %5287 = vmatprep.subr.bf16.mxu0 %v7561_v30  ;;  %5466 = vmatprep.subr.bf16.mxu1 %v7551_v58  ;;  %v7569_v30 = vpack.c.bf16 %v6043_v16, %v6041_v15 }
 0x1a0   : > { %5289 = vmatpush1.bf16.msra.mxu0 %v7562_v19  ;;  %5468 = vmatpush3.bf16.msra.mxu1 %v7563_v4  ;;  %v7575_v19 = vpack.c.bf16 %v7543_v45, %v6219_v49  ;;  %v7576_v4 = vpack.c.bf16 %v6235_v28, %v6230_v27 }
 0x1a1   : > { %5291 = vmatprep.subr.bf16.mxu0 %v7564_v63  ;;  %5469 = vmatprep.subr.bf16.mxu1 %v7551_v58  ;;  %v7577_v63 = vpack.c.bf16 %v6245_v32, %v6240_v31 }
 0x1a4   : > { %5293 = vmatpush1.bf16.msra.mxu0 %v7565_v55  ;;  %5471 = vmatpush3.bf16.msra.mxu1 %v7566_v39  ;;  %v7578_v55 = vpack.c.bf16 %v6255_v47, %v6250_v46  ;;  %v7579_v39 = vpack.c.bf16 %v6261_v48, %v6258_v36 }
 0x1a5   : > { %5295 = vmatprep.subr.bf16.mxu0 %v7567_v62  ;;  %5472 = vmatprep.subr.bf16.mxu1 %v7551_v58  ;;  %v7580_v62 = vpack.c.bf16 %v6266_v51, %v6264_v41 }
 0x1a8   : > { %5297 = vmatpush1.bf16.msra.mxu0 %v7568_v11  ;;  %5474 = vmatpush3.bf16.msra.mxu1 %v6575_v1  ;;  %v7570_v1 = vpack.c.bf16 %v7541_v7, %v6045_v17  ;;  %v7581_v11 = vpack.c.bf16 %v6270_v6, %v6268_v42 }
 0x1a9   : > { %5299 = vmatprep.subr.bf16.mxu0 %v6580_v9  ;;  %5475 = vmatprep.subr.bf16.mxu1 %v7551_v58  ;;  %v7571_v9 = vpack.c.bf16 %v6056_v22, %v7542_v26 }
 0x1ac   : > { %5301 = vmatpush1.bf16.msra.mxu0 %v6586_v23  ;;  %5477 = vmatpush3.bf16.msra.mxu1 %v6600_v21  ;;  %v7572_v23 = vpack.c.bf16 %v6193_v40, %v6188_v53  ;;  %v7573_v21 = vpack.c.bf16 %v6203_v20, %v6198_v38 }
 0x1ad   : > { %5303 = vmatprep.subr.bf16.mxu0 %v7569_v30  ;;  %5478 = vmatprep.subr.bf16.mxu1 %v7551_v58  ;;  %v7582_v30 = vpack.c.bf16 %v6274_v57, %v6272_v25 }
 0x1af   : > { %688 = vmatmul.mubr.f32.vlgmr.msra.gmra.mrb[0].mxu0 %v6639_v5  ;;  %4766 = vmatmul.mubr.f32.vlgmr.msra.gmra.mrb[0].mxu1 %v6639_v5 }
 0x1b0   : > { %5305 = vmatpush1.bf16.msra.mxu0 %v7570_v1  ;;  %5480 = vmatpush3.bf16.msra.mxu1 %v7571_v9  ;;  %v7583_v1 = vpack.c.bf16 %v6278_v0, %v6276_v61  ;;  %v7584_v9 = vpack.c.bf16 %v6282_v2, %v6280_v3 }
 0x1b1   : > { %5307 = vmatprep.subr.bf16.mxu0 %v7572_v23  ;;  %5481 = vmatprep.subr.bf16.mxu1 %v7551_v58  ;;  %v7585_v23 = vpack.c.bf16 %v6288_v60, %v6286_v8 }
 0x1b2   : > { %822 = vmatprep.mubr.f32.mxu0 %v7552_v13  ;;  %4800 = vmatprep.mubr.msk.f32.mxu1 %vm5906_vm0, %v7552_v13 }
 0x1b4   : > { %5309 = vmatpush1.bf16.msra.mxu0 %v7573_v21  ;;  %5483 = vmatpush3.bf16.msra.mxu1 %v7574_v18  ;;  %v7586_v21 = vpack.c.bf16 %v7535_v10, %v6292_v50  ;;  %v7587_v18 = vpack.c.bf16 %v6302_v29, %v6300_v24 }
 0x1b5   : > { %5311 = vmatprep.subr.bf16.mxu0 %v7575_v19  ;;  %5484 = vmatprep.subr.bf16.mxu1 %v7551_v58  ;;  %v7588_v19 = vpack.c.bf16 %v6309_v54, %v6307_v33 }
 0x1b8   : > { %5313 = vmatpush1.bf16.msra.mxu0 %v7576_v4  ;;  %5486 = vmatpush3.bf16.msra.mxu1 %v7577_v63  ;;  %v7589_v4 = vpack.c.bf16 %v6316_v56, %v6313_v59  ;;  %v7590_v63 = vpack.c.bf16 %v6322_v35, %v6320_v37 }
 0x1b9   : > { %5315 = vmatprep.subr.bf16.mxu0 %v7578_v55  ;;  %5487 = vmatprep.subr.bf16.mxu1 %v7551_v58  ;;  %v7591_v55 = vpack.c.bf16 %v6334_v34, %v6332_v12 }
 0x1bc   : > { %5317 = vmatpush1.bf16.msra.mxu0 %v7579_v39  ;;  %5489 = vmatpush3.bf16.msra.mxu1 %v7580_v62  ;;  %v7592_v39 = vpack.c.bf16 %v6341_v14, %v7544_v44  ;;  %v7593_v62 = vld [vmem:[#allocation8_spill] sm:$0xff] }
 0x1bd   : > { %5319 = vmatprep.subr.bf16.mxu0 %v7581_v11  ;;  %5490 = vmatprep.subr.bf16.mxu1 %v7551_v58  ;;  %v7594_v11 = vld [vmem:[#allocation10_spill] sm:$0xff] }
 0x1c0   : > { %5321 = vmatpush1.bf16.msra.mxu0 %v7582_v30  ;;  %5492 = vmatpush3.bf16.msra.mxu1 %v7583_v1  ;;  %v7595_v30 = vld [vmem:[#allocation9_spill] sm:$0xff]  ;;  %v7596_v1 = vld [vmem:[#allocation11_spill] sm:$0xff] }
 0x1c1   : > { %5323 = vmatprep.subr.bf16.mxu0 %v7584_v9  ;;  %5493 = vmatprep.subr.bf16.mxu1 %v7551_v58  ;;  %v7597_v9 = vld [vmem:[#allocation14_spill] sm:$0xff] }
 0x1c4   : > { %5325 = vmatpush1.bf16.msra.mxu0 %v7585_v23  ;;  %5495 = vmatpush3.bf16.msra.mxu1 %v7586_v21  ;;  %v7598_v23 = vld [vmem:[#allocation15_spill] sm:$0xff]  ;;  %v7599_v21 = vld [vmem:[#allocation16_spill] sm:$0xff] }
 0x1c5   : > { %5327 = vmatprep.subr.bf16.mxu0 %v7587_v18  ;;  %5496 = vmatprep.subr.bf16.mxu1 %v7551_v58  ;;  %v7600_v18 = vld [vmem:[#allocation17_spill] sm:$0xff] }
 0x1c8   : > { %5329 = vmatpush1.bf16.msra.mxu0 %v7588_v19  ;;  %5498 = vmatpush3.bf16.msra.mxu1 %v7589_v4  ;;  %v7601_v19 = vld [vmem:[#allocation18_spill] sm:$0xff]  ;;  %v7602_v4 = vld [vmem:[#allocation19_spill] sm:$0xff] }
 0x1c9   : > { %5331 = vmatprep.subr.bf16.mxu0 %v7590_v63  ;;  %5499 = vmatprep.subr.bf16.mxu1 %v7551_v58  ;;  %v7603_v63 = vld [vmem:[#allocation20_spill] sm:$0xff] }
 0x1cc   : > { %5333 = vmatpush1.bf16.msra.mxu0 %v7591_v55  ;;  %5501 = vmatpush3.bf16.msra.mxu1 %v7592_v39  ;;  %v7604_v55 = vld [vmem:[#allocation21_spill] sm:$0xff]  ;;  %v7605_v39 = vld [vmem:[#allocation22_spill] sm:$0xff] }
 0x1cd   : > { %5335 = vmatprep.subr.bf16.mxu0 %v7593_v62  ;;  %5502 = vmatprep.subr.bf16.mxu1 %v7551_v58 }
 0x1cf   : > { %825 = vmatmul.mubr.f32.vlgmr.msra.gmra.mrb[0].mxu0 %v7594_v11  ;;  %4801 = vmatmul.mubr.f32.vlgmr.msra.gmra.mrb[0].mxu1 %v7594_v11  ;;  %v7606_v11 = vld [vmem:[#allocation23_spill] sm:$0xff] }
 0x1d0   : > { %5337 = vmatpush1.bf16.msra.mxu0 %v7595_v30  ;;  %5504 = vmatpush3.bf16.msra.mxu1 %v7596_v1 }
 0x1d1   : > { %5339 = vmatprep.subr.bf16.mxu0 %v7597_v9  ;;  %5505 = vmatprep.subr.bf16.mxu1 %v7551_v58  ;;  %v7621_v9 = vand.u32 4294901760, %v7541_v7  ;;  %v7629_v7 = vand.u32 4294901760, %v6209_v52 }
 0x1d2   : > { %927 = vmatprep.mubr.f32.mxu0 %v7552_v13  ;;  %4835 = vmatprep.mubr.msk.f32.mxu1 %vm5906_vm0, %v7552_v13 }
 0x1d4   : > { %5341 = vmatpush1.bf16.msra.mxu0 %v7598_v23  ;;  %5507 = vmatpush3.bf16.msra.mxu1 %v7599_v21  ;;  %v7607_v21 = vld [vmem:[#allocation24_spill] sm:$0xff]  ;;  %v7609_v23 = vld [vmem:[#allocation26_spill] sm:$0xff] }
 0x1d5   : > { %5343 = vmatprep.subr.bf16.mxu0 %v7600_v18  ;;  %5508 = vmatprep.subr.bf16.mxu1 %v7551_v58  ;;  %v7608_v18 = vld [vmem:[#allocation25_spill] sm:$0xff] }
 0x1d8   : > { %5345 = vmatpush1.bf16.msra.mxu0 %v7601_v19  ;;  %5510 = vmatpush3.bf16.msra.mxu1 %v7602_v4  ;;  %v7610_v4 = vld [vmem:[#allocation28_spill] sm:$0xff]  ;;  %v7612_v19 = vld [vmem:[#allocation31_spill] sm:$0xff] }
 0x1d9   : > { %5347 = vmatprep.subr.bf16.mxu0 %v7603_v63  ;;  %5511 = vmatprep.subr.bf16.mxu1 %v7551_v58  ;;  %v7611_v63 = vld [vmem:[#allocation29_spill] sm:$0xff] }
 0x1dc   : > { %5349 = vmatpush1.bf16.msra.mxu0 %v7604_v55  ;;  %5513 = vmatpush3.bf16.msra.mxu1 %v7605_v39  ;;  %v7613_v39 = vld [vmem:[#allocation32_spill] sm:$0xff]  ;;  %v7615_v55 = vld [vmem:[#allocation34_spill] sm:$0xff] }
 0x1dd   : > { %5351 = vmatprep.subr.bf16.mxu0 %v7606_v11  ;;  %5514 = vmatprep.subr.bf16.mxu1 %v7551_v58  ;;  %v7614_v11 = vld [vmem:[#allocation33_spill] sm:$0xff] }
 0x1e0   : > { %5353 = vmatpush1.bf16.msra.mxu0 %v7607_v21  ;;  %5516 = vmatpush3.bf16.msra.mxu1 %v7608_v18  ;;  %v7617_v18 = vand.u32 4294901760, %v6043_v16  ;;  %v7625_v16 = vand.u32 4294901760, %v6193_v40  ;;  %v7631_v40 = vand.u32 4294901760, %v6219_v49 }
 0x1e1   : > { %5355 = vmatprep.subr.bf16.mxu0 %v7609_v23  ;;  %5517 = vmatprep.subr.bf16.mxu1 %v7551_v58  ;;  %v7616_v23 = vand.u32 4294901760, %v6041_v15  ;;  %v7624_v15 = vand.u32 4294901760, %v6188_v53  ;;  %v7632_v53 = vand.u32 4294901760, %v7543_v45  ;;  %v7637_v45 = vand.u32 4294901760, %v6250_v46 }
 0x1e2   : > { %v7643_v46 = vand.u32 4294901760, %v6268_v42  ;;  %v7649_v42 = vand.u32 4294901760, %v6280_v3  ;;  %v7655_v3 = vand.u32 4294901760, %v6300_v24  ;;  %v7661_v24 = vand.u32 4294901760, %v6320_v37  ;;  %v7667_v37 = vld [vmem:[#allocation11_spill] sm:$0xff] }
 0x1e3   : > { %v5366_v21 = vpack.c.bf16 %v7617_v18, %v7616_v23  ;;  %v5370_v23 = vpack.c.bf16 %v7625_v16, %v7624_v15  ;;  %v7626_v18 = vld [vmem:[#allocation12_spill] sm:$0xff] }
 0x1e4   : > { %5357 = vmatpush1.bf16.msra.mxu0 %v7610_v4  ;;  %5519 = vmatpush3.bf16.msra.mxu1 %v7611_v63  ;;  %v7618_v4 = vld [vmem:[#allocation35_spill] sm:$0xff]  ;;  %v7619_v63 = vld [vmem:[#allocation36_spill] sm:$0xff] }
 0x1e5   : > { %5359 = vmatprep.subr.bf16.mxu0 %v7612_v19  ;;  %5520 = vmatprep.subr.bf16.mxu1 %v7551_v58  ;;  %v7620_v19 = vand.u32 4294901760, %v6045_v17  ;;  %v7627_v17 = vand.u32 4294901760, %v6198_v38  ;;  %v7634_v38 = vand.u32 4294901760, %v6235_v28  ;;  %v7640_v28 = vand.u32 4294901760, %v6261_v48 }
 0x1e6   : > { %v7646_v48 = vand.u32 4294901760, %v6274_v57  ;;  %v7652_v57 = vand.u32 4294901760, %v6288_v60  ;;  %v7658_v60 = vand.u32 4294901760, %v6309_v54  ;;  %v7664_v54 = vand.u32 4294901760, %v6334_v34  ;;  %v7671_v34 = vld [vmem:[#allocation17_spill] sm:$0xff] }
 0x1e8   : > { %5361 = vmatpush1.bf16.msra.mxu0 %v7613_v39  ;;  %5522 = vmatpush3.bf16.msra.mxu1 %v7614_v11  ;;  %v5368_v39 = vpack.c.bf16 %v7621_v9, %v7620_v19  ;;  %v7622_v11 = vand.u32 4294901760, %v7542_v26  ;;  %v7628_v26 = vand.u32 4294901760, %v6203_v20  ;;  %v7630_v9 = vand.u32 4294901760, %v6214_v43 }
 0x1e9   : > { %5363 = vmatprep.subr.bf16.mxu0 %v7615_v55  ;;  %5523 = vmatprep.subr.bf16.mxu1 %v7551_v58  ;;  %v7623_v55 = vand.u32 4294901760, %v6056_v22  ;;  %v5374_v19 = vpack.c.bf16 %v7632_v53, %v7631_v40  ;;  %v7633_v20 = vand.u32 4294901760, %v6230_v27  ;;  %v7635_v43 = vand.u32 4294901760, %v6240_v31 }
 0x1ea   : > { %v5372_v22 = vpack.c.bf16 %v7628_v26, %v7627_v17  ;;  %v7639_v27 = vand.u32 4294901760, %v6258_v36  ;;  %v7641_v31 = vand.u32 4294901760, %v6264_v41  ;;  %v7645_v36 = vand.u32 4294901760, %v6272_v25 }
 0x1eb   : > { %v5527_v1 = vpack.c.bf16 %v7623_v55, %v7622_v11  ;;  %v5376_v52 = vpack.c.bf16 %v7634_v38, %v7633_v20  ;;  %v7638_v55 = vand.u32 4294901760, %v6255_v47  ;;  %v7644_v47 = vand.u32 4294901760, %v6270_v6  ;;  %v7675_v20 = vld [vmem:[#allocation21_spill] sm:$0xff]  ;;  %v7676_v38 = vld [vmem:[#allocation22_spill] sm:$0xff] }
 0x1ec   : > { %5365 = vmatpush1.bf16.msra.mxu0 %v7618_v4  ;;  %5525 = vmatpush3.bf16.msra.mxu1 %v7619_v63  ;;  %v5380_v11 = vpack.c.bf16 %v7640_v28, %v7639_v27  ;;  %v7647_v41 = vand.u32 4294901760, %v6276_v61  ;;  %v7650_v6 = vand.u32 4294901760, %v6282_v2  ;;  %v7651_v25 = vand.u32 4294901760, %v6286_v8  ;;  %v7684_v27 = vld [vmem:[#allocation32_spill] sm:$0xff]  ;;  %v7685_v28 = vld [vmem:[#allocation33_spill] sm:$0xff] }
 0x1ed   : > { %5367 = vmatprep.subr.bf16.mxu0 %v5366_v21  ;;  %5526 = vmatprep.subr.bf16.mxu1 %v7551_v58  ;;  %v5530_v21 = vpack.c.bf16 %v7630_v9, %v7629_v7  ;;  %v5382_v16 = vpack.c.bf16 %v7644_v47, %v7643_v46  ;;  %v7653_v61 = vand.u32 4294901760, %v6292_v50  ;;  %v7656_v2 = vand.u32 4294901760, %v6302_v29 }
 0x1ee   : > { %v5386_v17 = vpack.c.bf16 %v7650_v6, %v7649_v42  ;;  %v5388_v26 = vpack.c.bf16 %v7652_v57, %v7651_v25  ;;  %v7657_v8 = vand.u32 4294901760, %v6307_v33  ;;  %v7659_v50 = vand.u32 4294901760, %v6313_v59 }
 0x1ef   : > { %931 = vmatmul.mubr.f32.vlgmr.msra.gmra.mrb[0].mxu0 %v7626_v18  ;;  %4836 = vmatmul.mubr.f32.vlgmr.msra.gmra.mrb[0].mxu1 %v7626_v18  ;;  %v5390_v7 = vpack.c.bf16 %v7656_v2, %v7655_v3  ;;  %v7662_v29 = vand.u32 4294901760, %v6322_v35  ;;  %v7663_v33 = vand.u32 4294901760, %v6332_v12  ;;  %v7665_v59 = vand.u32 4294901760, %v7544_v44  ;;  %v7668_v35 = vld [vmem:[#allocation14_spill] sm:$0xff]  ;;  %v7670_v12 = vld [vmem:[#allocation16_spill] sm:$0xff] }
 0x1f0   : > { %5369 = vmatpush1.bf16.msra.mxu0 %v5368_v39  ;;  %5528 = vmatpush3.bf16.msra.mxu1 %v5527_v1  ;;  %v7636_v1 = vand.u32 4294901760, %v6245_v32  ;;  %v5378_v39 = vpack.c.bf16 %v7638_v55, %v7637_v45  ;;  %v7642_v32 = vand.u32 4294901760, %v6266_v51  ;;  %v7648_v51 = vand.u32 4294901760, %v6278_v0  ;;  %v7672_v44 = vld [vmem:[#allocation18_spill] sm:$0xff]  ;;  %v7681_v45 = vld [vmem:[#allocation28_spill] sm:$0xff]  ;;  %v7682_v55 = vld [vmem:[#allocation29_spill] sm:$0xff] }
 0x1f1   : > { %5371 = vmatprep.subr.bf16.mxu0 %v5370_v23  ;;  %5529 = vmatprep.subr.bf16.mxu1 %v7551_v58  ;;  %v5384_v23 = vpack.c.bf16 %v7646_v48, %v7645_v36  ;;  %v7654_v0 = vand.u32 4294901760, %v7535_v10  ;;  %v5392_v9 = vpack.c.bf16 %v7658_v60, %v7657_v8  ;;  %v7660_v10 = vand.u32 4294901760, %v6316_v56 }
 0x1f2   : > { %1097 = vmatprep.mubr.f32.mxu0 %v7552_v13  ;;  %4870 = vmatprep.mubr.msk.f32.mxu1 %vm5906_vm0, %v7552_v13  ;;  %v5533_v49 = vpack.c.bf16 %v7636_v1, %v7635_v43  ;;  %v5536_v15 = vpack.c.bf16 %v7642_v32, %v7641_v31  ;;  %v5539_v18 = vpack.c.bf16 %v7648_v51, %v7647_v41  ;;  %v7666_v56 = vand.u32 4294901760, %v6341_v14  ;;  %v7669_v14 = vld [vmem:[#allocation15_spill] sm:$0xff]  ;;  %v7678_v43 = vld [vmem:[#allocation24_spill] sm:$0xff]  ;;  %v7679_v1 = vld [vmem:[#allocation25_spill] sm:$0xff] }
 0x1f3   : > { %v5394_v40 = vpack.c.bf16 %v7662_v29, %v7661_v24  ;;  %v5396_v53 = vpack.c.bf16 %v7664_v54, %v7663_v33 }
 0x1f4   : > { %5373 = vmatpush1.bf16.msra.mxu0 %v5372_v22  ;;  %5531 = vmatpush3.bf16.msra.mxu1 %v5530_v21  ;;  %v5542_v22 = vpack.c.bf16 %v7654_v0, %v7653_v61  ;;  %v5545_v21 = vpack.c.bf16 %v7660_v10, %v7659_v50 }
 0x1f5   : > { %5375 = vmatprep.subr.bf16.mxu0 %v5374_v19  ;;  %5532 = vmatprep.subr.bf16.mxu1 %v7551_v58  ;;  %v5548_v19 = vpack.c.bf16 %v7666_v56, %v7665_v59 }
 0x1f8   : > { %5377 = vmatpush1.bf16.msra.mxu0 %v5376_v52  ;;  %5534 = vmatpush3.bf16.msra.mxu1 %v5533_v49  ;;  %v7677_v52 = vld [vmem:[#allocation23_spill] sm:$0xff]  ;;  %v7680_v49 = vld [vmem:[#allocation26_spill] sm:$0xff] }
 0x1f9   : > { %5379 = vmatprep.subr.bf16.mxu0 %v5378_v39  ;;  %5535 = vmatprep.subr.bf16.mxu1 %v7551_v58  ;;  %v7683_v39 = vld [vmem:[#allocation31_spill] sm:$0xff] }
 0x1fc   : > { %5381 = vmatpush1.bf16.msra.mxu0 %v5380_v11  ;;  %5537 = vmatpush3.bf16.msra.mxu1 %v5536_v15  ;;  %v7686_v11 = vld [vmem:[#allocation34_spill] sm:$0xff] }
 0x1fd   : > { %5383 = vmatprep.subr.bf16.mxu0 %v5382_v16  ;;  %5538 = vmatprep.subr.bf16.mxu1 %v7551_v58 }
 0x200   : > { %5385 = vmatpush1.bf16.msra.mxu0 %v5384_v23  ;;  %5540 = vmatpush3.bf16.msra.mxu1 %v5539_v18 }
 0x201   : > { %5387 = vmatprep.subr.bf16.mxu0 %v5386_v17  ;;  %5541 = vmatprep.subr.bf16.mxu1 %v7551_v58 }
 0x204   : > { %5389 = vmatpush1.bf16.msra.mxu0 %v5388_v26  ;;  %5543 = vmatpush3.bf16.msra.mxu1 %v5542_v22 }
 0x205   : > { %5391 = vmatprep.subr.bf16.mxu0 %v5390_v7  ;;  %5544 = vmatprep.subr.bf16.mxu1 %v7551_v58 }
 0x208   : > { %5393 = vmatpush1.bf16.msra.mxu0 %v5392_v9  ;;  %5546 = vmatpush3.bf16.msra.mxu1 %v5545_v21 }
 0x209   : > { %5395 = vmatprep.subr.bf16.mxu0 %v5394_v40  ;;  %5547 = vmatprep.subr.bf16.mxu1 %v7551_v58 }
 0x20c   : > { %5397 = vmatpush1.bf16.msra.mxu0 %v5396_v53  ;;  %5549 = vmatpush3.bf16.msra.mxu1 %v5548_v19 }
 0x20d   : > { %5399 = vmatprep.subr.bf16.mxu0 %v7593_v62  ;;  %5550 = vmatprep.subr.bf16.mxu1 %v7551_v58  ;;  %v7673_v62 = vld [vmem:[#allocation19_spill] sm:$0xff] }
 0x20f   : > { %1099 = vmatmul.mubr.f32.vlgmr.msra.gmra.mrb[0].mxu0 %v6639_v5  ;;  %4871 = vmatmul.mubr.f32.vlgmr.msra.gmra.mrb[0].mxu1 %v6639_v5 }
 0x210   : > { %5401 = vmatpush1.bf16.msra.mxu0 %v7595_v30  ;;  %5552 = vmatpush3.bf16.msra.mxu1 %v7667_v37  ;;  %v7674_v30 = vld [vmem:[#allocation20_spill] sm:$0xff] }
 0x211   : > { %5403 = vmatprep.subr.bf16.mxu0 %v7668_v35  ;;  %5553 = vmatprep.subr.bf16.mxu1 %v7551_v58 }
 0x212   : > { %1201 = vmatprep.mubr.f32.mxu0 %v7552_v13  ;;  %4905 = vmatprep.mubr.msk.f32.mxu1 %vm5906_vm0, %v7552_v13 }
 0x214   : > { %5405 = vmatpush1.bf16.msra.mxu0 %v7669_v14  ;;  %5555 = vmatpush3.bf16.msra.mxu1 %v7670_v12 }
 0x215   : > { %5407 = vmatprep.subr.bf16.mxu0 %v7671_v34  ;;  %5556 = vmatprep.subr.bf16.mxu1 %v7551_v58 }
 0x218   : > { %5409 = vmatpush1.bf16.msra.mxu0 %v7672_v44  ;;  %5558 = vmatpush3.bf16.msra.mxu1 %v7673_v62 }
 0x219   : > { %5411 = vmatprep.subr.bf16.mxu0 %v7674_v30  ;;  %5559 = vmatprep.subr.bf16.mxu1 %v7551_v58 }
 0x21c   : > { %5413 = vmatpush1.bf16.msra.mxu0 %v7675_v20  ;;  %5561 = vmatpush3.bf16.msra.mxu1 %v7676_v38 }
 0x21d   : > { %5415 = vmatprep.subr.bf16.mxu0 %v7677_v52  ;;  %5562 = vmatprep.subr.bf16.mxu1 %v7551_v58 }
 0x220   : > { %5417 = vmatpush1.bf16.msra.mxu0 %v7678_v43  ;;  %5564 = vmatpush3.bf16.msra.mxu1 %v7679_v1 }
 0x221   : > { %5419 = vmatprep.subr.bf16.mxu0 %v7680_v49  ;;  %5565 = vmatprep.subr.bf16.mxu1 %v7551_v58 }
 0x224   : > { %5421 = vmatpush1.bf16.msra.mxu0 %v7681_v45  ;;  %5567 = vmatpush3.bf16.msra.mxu1 %v7682_v55 }
 0x225   : > { %5423 = vmatprep.subr.bf16.mxu0 %v7683_v39  ;;  %5568 = vmatprep.subr.bf16.mxu1 %v7551_v58 }
 0x228   : > { %5425 = vmatpush1.bf16.msra.mxu0 %v7684_v27  ;;  %5570 = vmatpush3.bf16.msra.mxu1 %v7685_v28 }
 0x229   : > { %5427 = vmatprep.subr.bf16.mxu0 %v7686_v11  ;;  %5571 = vmatprep.subr.bf16.mxu1 %v7551_v58 }
 0x22c   : > { %5429 = vmatpush1.bf16.msra.mxu0 %v7618_v4  ;;  %5573 = vmatpush3.bf16.msra.mxu1 %v7619_v63 }
 0x22d   : > { %4938 = vmatprep.subr.mxu1 %v7552_v13  ;;  %4908 = vmatprep.subr.mxu0 %v7552_v13 }
 0x22f   : > { %1203 = vmatmul.mubr.f32.vlgmr.msra.gmra.mrb[0].mxu0 %v6639_v5  ;;  %4906 = vmatmul.mubr.f32.vlgmr.msra.gmra.mrb[0].mxu1 %v6639_v5 }
 0x230   : > { %4910 = vmatprep.mubr.msk.f32.mxu0 %vm5906_vm0, %v7552_v13  ;;  %4940 = vmatprep.mubr.msk.f32.mxu1 %vm5906_vm0, %v7552_v13 }
 0x302   : > { %v1204_v31 = vpop.f32.mrb[0].mxu0  ;;  %v6958_v32 = vpop.f32.mrb[0].mxu1 }
 0x303   : > { %v1852_v4 = vsel %vm1850_vm1, %v1204_v31, 0  ;;  %v6962_v63 = vand.u32 4294901760, %v6958_v32  ;;  %v4907_v15 = vpop.f32.mrb[1].mxu1  ;;  %2765 = vrot.lane.b32.xlu1 %v1204_v31, %s5907_s15  ;;  %v1206_v5 = vpop.f32.mrb[1].mxu0 }
 0x304   : > { %v1923_v46 = vand.u32 4294901760, %v1852_v4  ;;  %v1855_v47 = vsel %vm1850_vm1, %v1206_v5, 0 }
 0x305   : > { %v1858_v16 = vand.u32 4294901760, %v1855_v47  ;;  %4939 = vmatpush3.msra.mxu1 %v6962_v63  ;;  %v2397_v38 = vsub.f32 %v6958_v32, %v6962_v63 }
 0x306   : > { %v1924_v36 = vsub.f32 %v1852_v4, %v1923_v46  ;;  %4943 = vmatprep.subr.mxu1 %v7552_v13 }
 0x307   : > { %v1935_v48 = vsub.f32 %v1855_v47, %v1858_v16  ;;  %2767 = vrot.lane.b32.xlu1 %v1206_v5, %s5907_s15  ;;  %4909 = vmatpush3.xpose.msra.mxu0 %v1858_v16  ;;  %v2398_v49 = vand.u32 4294901760, %v2397_v38 }
 0x308   : > { %v1925_v23 = vand.u32 4294901760, %v1924_v36  ;;  %4913 = vmatprep.subr.mxu0 %v7552_v13 }
 0x309   : > { %v1936_v41 = vand.u32 4294901760, %v1935_v48  ;;  %v2399_v39 = vsub.f32 %v2397_v38, %v2398_v49 }
 0x30a   : > { %v1926_v51 = vsub.f32 %v1924_v36, %v1925_v23 }
 0x30b   : > { %v1937_v18 = vsub.f32 %v1935_v48, %v1936_v41  ;;  %v2400_v11 = vand.u32 4294901760, %v2399_v39  ;;  %v3698_v39 = vld [vmem:[#allocation4 + $0x48] sm:$0xff] }
 0x30c   : > { %v1927_v42 = vand.u32 4294901760, %v1926_v51 }
 0x30d   : > { %v1938_v6 = vand.u32 4294901760, %v1937_v18 }
 0x30e   : > { %4911 = vmatmul.mubr.f32.vlgmr.msra.gmra.mrb[2].mxu0 %v1927_v42  ;;  %v3689_v42 = vld [vmem:[#allocation4] sm:$0xff] }
 0x30f   : > { %4914 = vmatpush3.xpose.msra.mxu0 %v1938_v6  ;;  %4915 = vmatprep.mubr.msk.f32.mxu0 %vm5906_vm0, %v7552_v13  ;;  %v3690_v6 = vld [vmem:[#allocation4 + $0x8] sm:$0xff] }
 0x310   : > { %4918 = vmatprep.subr.mxu0 %v7552_v13 }
 0x316   : > { %4916 = vmatmul.mubr.f32.vlgmr.msra.gmra.mrb[2].mxu0 %v1923_v46 }
 0x317   : > { %4919 = vmatpush3.xpose.msra.mxu0 %v1935_v48  ;;  %4920 = vmatprep.mubr.msk.f32.mxu0 %vm5906_vm0, %v7552_v13 }
 0x318   : > { %4923 = vmatprep.subr.mxu0 %v7552_v13 }
 0x31e   : > { %4921 = vmatmul.mubr.f32.vlgmr.msra.gmra.mrb[2].mxu0 %v1924_v36 }
 0x31f   : > { %4924 = vmatpush3.xpose.msra.mxu0 %v1858_v16  ;;  %4925 = vmatprep.mubr.msk.f32.mxu0 %vm5906_vm0, %v7552_v13 }
 0x320   : > { %4928 = vmatprep.subr.mxu0 %v7552_v13 }
 0x326   : > { %4926 = vmatmul.mubr.f32.vlgmr.msra.gmra.mrb[2].mxu0 %v1925_v23 }
 0x327   : > { %4929 = vmatpush3.xpose.msra.mxu0 %v1936_v41  ;;  %4930 = vmatprep.mubr.msk.f32.mxu0 %vm5906_vm0, %v7552_v13 }
 0x328   : > { %4933 = vmatprep.subr.mxu0 %v7552_v13 }
 0x32e   : > { %4931 = vmatmul.mubr.f32.vlgmr.msra.gmra.mrb[2].mxu0 %v1923_v46 }
 0x32f   : > { %4934 = vmatpush3.xpose.msra.mxu0 %v1858_v16  ;;  %4935 = vmatprep.mubr.msk.f32.mxu0 %vm5906_vm0, %v7552_v13 }
 0x330   : > { %4968 = vmatprep.subr.mxu0 %v7552_v13 }
 0x336   : > { %4936 = vmatmul.mubr.f32.vlgmr.msra.gmra.mrb[2].mxu0 %v1923_v46 }
 0x337   : > { %4970 = vmatprep.mubr.msk.f32.mxu0 %vm5906_vm0, %v7552_v13 }
 0x375   : > { %v2766_v17 = vpop.permute.xlu1 %2765 }
 0x376   : > { %v2769_v25 = vsel %vm1850_vm1, %v2766_v17, 0  ;;  %v3691_v17 = vld [vmem:[#allocation4 + $0x10] sm:$0xff] }
 0x377   : > { %v2839_v57 = vand.u32 4294901760, %v2769_v25 }
 0x379   : > { %v2840_v26 = vsub.f32 %v2769_v25, %v2839_v57  ;;  %v2768_v61 = vpop.permute.xlu1 %2767  ;;  %v3713_v25 = vand.u32 4294901760, %v3689_v42 }
 0x37a   : > { %v2771_v0 = vsel %vm1850_vm1, %v2768_v61, 0  ;;  %v3719_v61 = vand.u32 4294901760, %v3691_v17 }
 0x37b   : > { %v2841_v22 = vand.u32 4294901760, %v2840_v26  ;;  %v2774_v3 = vand.u32 4294901760, %v2771_v0 }
 0x37d   : > { %v2842_v2 = vsub.f32 %v2840_v26, %v2841_v22  ;;  %v2851_v7 = vsub.f32 %v2771_v0, %v2774_v3  ;;  %4969 = vmatpush3.xpose.msra.mxu0 %v2774_v3  ;;  %v3693_v0 = vld [vmem:[#allocation4 + $0x20] sm:$0xff] }
 0x37e   : > { %4973 = vmatprep.subr.mxu0 %v7552_v13 }
 0x37f   : > { %v2843_v8 = vand.u32 4294901760, %v2842_v2  ;;  %v2852_v60 = vand.u32 4294901760, %v2851_v7  ;;  %v3725_v2 = vand.u32 4294901760, %v3693_v0 }
 0x381   : > { %v2853_v9 = vsub.f32 %v2851_v7, %v2852_v60  ;;  %4971 = vmatmul.mubr.f32.vlgmr.msra.gmra.mrb[4].mxu0 %v2843_v8  ;;  %v3695_v8 = vld [vmem:[#allocation4 + $0x30] sm:$0xff] }
 0x382   : > { %4975 = vmatprep.mubr.msk.f32.mxu0 %vm5906_vm0, %v7552_v13 }
 0x383   : > { %v2854_v50 = vand.u32 4294901760, %v2853_v9 }
 0x385   : > { %4974 = vmatpush3.xpose.msra.mxu0 %v2854_v50  ;;  %v7058_v50 = vsub.f32 %v3691_v17, %v3719_v61 }
 0x386   : > { %4978 = vmatprep.subr.mxu0 %v7552_v13 }
 0x389   : > { %4976 = vmatmul.mubr.f32.vlgmr.msra.gmra.mrb[4].mxu0 %v2839_v57 }
 0x38a   : > { %4979 = vmatpush3.xpose.msra.mxu0 %v2851_v7  ;;  %4980 = vmatprep.mubr.msk.f32.mxu0 %vm5906_vm0, %v7552_v13 }
 0x38b   : > { %4983 = vmatprep.subr.mxu0 %v7552_v13 }
 0x391   : > { %4981 = vmatmul.mubr.f32.vlgmr.msra.gmra.mrb[4].mxu0 %v2840_v26  ;;  %v3692_v26 = vld [vmem:[#allocation4 + $0x18] sm:$0xff] }
 0x392   : > { %4984 = vmatpush3.xpose.msra.mxu0 %v2774_v3  ;;  %4985 = vmatprep.mubr.msk.f32.mxu0 %vm5906_vm0, %v7552_v13 }
 0x393   : > { %4988 = vmatprep.subr.mxu0 %v7552_v13 }
 0x399   : > { %4986 = vmatmul.mubr.f32.vlgmr.msra.gmra.mrb[4].mxu0 %v2841_v22  ;;  %v3694_v22 = vld [vmem:[#allocation4 + $0x28] sm:$0xff] }
 0x39a   : > { %4989 = vmatpush3.xpose.msra.mxu0 %v2852_v60  ;;  %4990 = vmatprep.mubr.msk.f32.mxu0 %vm5906_vm0, %v7552_v13  ;;  %v3728_v7 = vand.u32 4294901760, %v3694_v22  ;;  %v7054_v60 = vsub.f32 %v3689_v42, %v3713_v25 }
 0x39b   : > { %4993 = vmatprep.subr.mxu0 %v7552_v13 }
 0x3a1   : > { %4991 = vmatmul.mubr.f32.vlgmr.msra.gmra.mrb[4].mxu0 %v2839_v57 }
 0x3a2   : > { %4994 = vmatpush3.xpose.msra.mxu0 %v2774_v3  ;;  %4995 = vmatprep.mubr.msk.f32.mxu0 %vm5906_vm0, %v7552_v13  ;;  %v3722_v3 = vand.u32 4294901760, %v3692_v26 }
 0x3a3   : > { %5574 = vmatprep.subr.bf16.mxu0 %v7551_v58 }
 0x3a9   : > { %4996 = vmatmul.mubr.f32.vlgmr.msra.gmra.mrb[4].mxu0 %v2839_v57  ;;  %v3716_v57 = vand.u32 4294901760, %v3690_v6 }
 0x3aa   : > { %5060 = vmatprep.mubr.msk.f32.mxu0 %vm5906_vm0, %v7552_v13 }
 0x3ab   : > { %v7056_v9 = vsub.f32 %v3690_v6, %v3716_v57 }
 0x409   : > { %v2299_v10 = vpop.f32.mrb[2].mxu0 }
 0x40a   : > { %v2303_v21 = vmul.f32 0.125, %v2299_v10  ;;  %v4937_v24 = vpop.f32.mrb[3].mxu0  ;;  %v7060_v10 = vpack.c.bf16 %v3716_v57, %v3713_v25 }
 0x40b   : > { %v7062_v24 = vsub.f32 %v3692_v26, %v3722_v3 }
 0x40c   : > { %v2305_v29 = vsel %vm2304_vm2, %v2303_v21, -inf  ;;  %5576 = vmatpush3.bf16.msra.mxu0 %v7060_v10 }
 0x40d   : > { %2306 = vmax.xlane.f32.xlu0 %v2305_v29  ;;  %v7064_v29 = vsub.f32 %v3693_v0, %v3725_v2  ;;  %5577 = vmatprep.subr.bf16.mxu0 %v7551_v58 }
 0x47c   : > { %v3215_v40 = vpop.f32.mrb[4].mxu0 }
 0x47d   : > { %v3219_v33 = vmul.f32 0.125, %v3215_v40  ;;  %v4997_v54 = vpop.f32.mrb[5].mxu0  ;;  %v7066_v40 = vsub.f32 %v3694_v22, %v3728_v7 }
 0x47e   : > { %v3806_v54 = vand.u32 4294901760, %v7054_v60 }
 0x47f   : > { %v3220_v53 = vsel %vm2304_vm2, %v3219_v33, -inf }
 0x480   : > { %3221 = vmax.xlane.f32.xlu1 %v3220_v53  ;;  %v3813_v53 = vand.u32 4294901760, %v7056_v9 }
 0x49a   : > { %v2307_v59 = vpop.xlane.xlu0 %2306 }
 0x49b   : > { %v2308_v56 = vsub.f32 %v2303_v21, %v2307_v59  ;;  %v3696_v21 = vld [vmem:[#allocation4 + $0x38] sm:$0xff]  ;;  %v3820_v59 = vand.u32 4294901760, %v7058_v50 }
 0x49d   : > { %v2309_v19 = vmul.f32 1.442695, %v2308_v56  ;;  %v3731_v56 = vand.u32 4294901760, %v3695_v8 }
 0x49f   : > { %5817 = vpow2.f32 %v2309_v19  ;;  %v3827_v19 = vand.u32 4294901760, %v7062_v24 }
 0x4a9   : > { %v5818_v37 = vpop.eup %5817 }
 0x4aa   : > { %v2311_v35 = vsel %vm2304_vm2, %v5818_v37, 0.0 }
 0x4ab   : > { %2312 = vadd.xlane.f32.xlu0 %v2311_v35  ;;  %v3841_v35 = vand.u32 4294901760, %v7066_v40 }
 0x50d   : > { %v3222_v14 = vpop.xlane.xlu1 %3221 }
 0x50e   : > { %v3223_v12 = vsub.f32 %v3219_v33, %v3222_v14  ;;  %v7068_v33 = vpack.c.bf16 %v3722_v3, %v3719_v61  ;;  %v3734_v14 = vand.u32 4294901760, %v3696_v21 }
 0x510   : > { %v3224_v34 = vmul.f32 1.442695, %v3223_v12  ;;  %v3807_v12 = vsub.f32 %v7054_v60, %v3806_v54  ;;  %5579 = vmatpush3.bf16.msra.mxu0 %v7068_v33  ;;  %v7121_v42 = vpack.c.bf16 %v3734_v14, %v3731_v56 }
 0x511   : > { %5580 = vmatprep.subr.bf16.mxu0 %v7551_v58 }
 0x512   : > { %5819 = vpow2.f32 %v3224_v34  ;;  %v3814_v34 = vsub.f32 %v7056_v9, %v3813_v53 }
 0x51c   : > { %v5820_v44 = vpop.eup %5819 }
 0x51d   : > { %v3226_v62 = vsel %vm2304_vm2, %v5820_v44, 0.0 }
 0x51e   : > { %3227 = vadd.xlane.f32.xlu0 %v3226_v62  ;;  %v7087_v62 = vsub.f32 %v3695_v8, %v3731_v56 }
 0x534   : > { %3232 = vrot.lane.b32.xlu0 %v6958_v32, %s5907_s15 }
 0x538   : > { %v2313_v30 = vpop.xlane.xlu0 %2312 }
 0x539   : > { %5821 = vrcp.f32 %v2313_v30  ;;  %v3828_v30 = vsub.f32 %v7062_v24, %v3827_v19 }
 0x543   : > { %v5822_v20 = vpop.eup %5821 }
 0x544   : > { %v2315_v52 = vmul.f32 %v5822_v20, %v5818_v37  ;;  %v3834_v37 = vand.u32 4294901760, %v7064_v29 }
 0x546   : > { %v2317_v43 = vsel %vm2304_vm2, %v2315_v52, 0  ;;  %v3835_v20 = vsub.f32 %v7064_v29, %v3834_v37  ;;  %v7098_v52 = vsub.f32 %v3696_v21, %v3734_v14 }
 0x547   : > { %v2385_v1 = vand.u32 4294901760, %v2317_v43 }
 0x549   : > { %v2386_v45 = vsub.f32 %v2317_v43, %v2385_v1  ;;  %v3697_v43 = vld [vmem:[#allocation4 + $0x40] sm:$0xff] }
 0x54b   : > { %v2387_v55 = vand.u32 4294901760, %v2386_v45 }
 0x54d   : > { %v2388_v27 = vsub.f32 %v2386_v45, %v2387_v55 }
 0x54f   : > { %v2389_v28 = vand.u32 4294901760, %v2388_v27  ;;  %v3829_v27 = vand.u32 4294901760, %v3828_v30 }
 0x551   : > { %4941 = vmatmul.mubr.f32.vlgmr.msra.gmra.mrb[2].mxu1 %v2389_v28  ;;  %v3855_v28 = vand.u32 4294901760, %v7098_v52 }
 0x552   : > { %4944 = vmatpush3.msra.mxu1 %v2400_v11  ;;  %4945 = vmatprep.mubr.msk.f32.mxu1 %vm5906_vm0, %v7552_v13  ;;  %v3699_v11 = vld [vmem:[#allocation4 + $0x50] sm:$0xff] }
 0x553   : > { %4948 = vmatprep.subr.mxu1 %v7552_v13  ;;  %v3743_v6 = vand.u32 4294901760, %v3699_v11 }
 0x555   : > { %v7128_v0 = vsub.f32 %v3699_v11, %v3743_v6 }
 0x559   : > { %4946 = vmatmul.mubr.f32.vlgmr.msra.gmra.mrb[2].mxu1 %v2385_v1 }
 0x55a   : > { %4949 = vmatpush3.msra.mxu1 %v2397_v38  ;;  %4950 = vmatprep.mubr.msk.f32.mxu1 %vm5906_vm0, %v7552_v13  ;;  %v3842_v38 = vsub.f32 %v7066_v40, %v3841_v35 }
 0x55b   : > { %4953 = vmatprep.subr.mxu1 %v7552_v13 }
 0x561   : > { %4951 = vmatmul.mubr.f32.vlgmr.msra.gmra.mrb[2].mxu1 %v2386_v45 }
 0x562   : > { %4954 = vmatpush3.msra.mxu1 %v6962_v63  ;;  %4955 = vmatprep.mubr.msk.f32.mxu1 %vm5906_vm0, %v7552_v13 }
 0x563   : > { %4958 = vmatprep.subr.mxu1 %v7552_v13 }
 0x569   : > { %4956 = vmatmul.mubr.f32.vlgmr.msra.gmra.mrb[2].mxu1 %v2387_v55  ;;  %v3848_v55 = vand.u32 4294901760, %v7087_v62 }
 0x56a   : > { %4959 = vmatpush3.msra.mxu1 %v2398_v49  ;;  %4960 = vmatprep.mubr.msk.f32.mxu1 %vm5906_vm0, %v7552_v13  ;;  %v3815_v49 = vand.u32 4294901760, %v3814_v34  ;;  %v3876_v34 = vand.u32 4294901760, %v7128_v0 }
 0x56b   : > { %4963 = vmatprep.subr.mxu1 %v7552_v13 }
 0x571   : > { %4961 = vmatmul.mubr.f32.vlgmr.msra.gmra.mrb[2].mxu1 %v2385_v1 }
 0x572   : > { %4964 = vmatpush3.msra.mxu1 %v6962_v63  ;;  %4965 = vmatprep.mubr.msk.f32.mxu1 %vm5906_vm0, %v7552_v13 }
 0x573   : > { %4998 = vmatprep.subr.mxu1 %v7552_v13 }
 0x579   : > { %4966 = vmatmul.mubr.f32.vlgmr.msra.gmra.mrb[2].mxu1 %v2385_v1  ;;  %v3808_v1 = vand.u32 4294901760, %v3807_v12 }
 0x57a   : > { %5000 = vmatprep.mubr.msk.f32.mxu1 %vm5906_vm0, %v7552_v13 }
 0x5ab   : > { %v3228_v31 = vpop.xlane.xlu0 %3227 }
 0x5ac   : > { %5823 = vrcp.f32 %v3228_v31  ;;  %v5599_v31 = vpack.c.bf16 %v3815_v49, %v3808_v1 }
 0x5af   : > { %v3233_v32 = vpop.permute.xlu0 %3232 }
 0x5b0   : > { %v3239_v4 = vand.u32 4294901760, %v3233_v32 }
 0x5b2   : > { %4999 = vmatpush3.msra.mxu1 %v3239_v4  ;;  %v3316_v46 = vsub.f32 %v3233_v32, %v3239_v4  ;;  %v3849_v32 = vsub.f32 %v7087_v62, %v3848_v55 }
 0x5b3   : > { %5003 = vmatprep.subr.mxu1 %v7552_v13 }
 0x5b4   : > { %v3317_v16 = vand.u32 4294901760, %v3316_v46  ;;  %v3850_v17 = vand.u32 4294901760, %v3849_v32 }
 0x5b6   : > { %v5824_v15 = vpop.eup %5823  ;;  %v3318_v23 = vsub.f32 %v3316_v46, %v3317_v16 }
 0x5b7   : > { %v3230_v5 = vmul.f32 %v5824_v15, %v5820_v44  ;;  %v3821_v44 = vsub.f32 %v7058_v50, %v3820_v59  ;;  %v3737_v15 = vand.u32 4294901760, %v3697_v43 }
 0x5b8   : > { %v3319_v18 = vand.u32 4294901760, %v3318_v23  ;;  %v7116_v23 = vld [vmem:[#allocation4 + $0x68] sm:$0xff] }
 0x5b9   : > { %v3236_v63 = vsel %vm2304_vm2, %v3230_v5, 0  ;;  %v3822_v45 = vand.u32 4294901760, %v3821_v44  ;;  %v3700_v5 = vld [vmem:[#allocation4 + $0x58] sm:$0xff]  ;;  %v3752_v3 = vand.u32 4294901760, %v7116_v23 }
 0x5ba   : > { %v3304_v47 = vand.u32 4294901760, %v3236_v63  ;;  %v3746_v26 = vand.u32 4294901760, %v3700_v5 }
 0x5bb   : > { %v7150_v30 = vsub.f32 %v7116_v23, %v3752_v3 }
 0x5bc   : > { %v3305_v36 = vsub.f32 %v3236_v63, %v3304_v47  ;;  %v3836_v63 = vand.u32 4294901760, %v3835_v20  ;;  %v7137_v56 = vsub.f32 %v3700_v5, %v3746_v26 }
 0x5be   : > { %v3306_v48 = vand.u32 4294901760, %v3305_v36 }
 0x5c0   : > { %v3307_v41 = vsub.f32 %v3305_v36, %v3306_v48 }
 0x5c2   : > { %v3308_v51 = vand.u32 4294901760, %v3307_v41 }
 0x5c4   : > { %5001 = vmatmul.mubr.f32.vlgmr.msra.gmra.mrb[4].mxu1 %v3308_v51  ;;  %v5602_v51 = vpack.c.bf16 %v3829_v27, %v3822_v45  ;;  %v7160_v45 = vpack.c.bf16 %v3746_v26, %v3743_v6  ;;  %v3877_v27 = vsub.f32 %v7128_v0, %v3876_v34 }
 0x5c5   : > { %5004 = vmatpush3.msra.mxu1 %v3319_v18  ;;  %5005 = vmatprep.mubr.msk.f32.mxu1 %vm5906_vm0, %v7552_v13  ;;  %v7119_v18 = vsub.f32 %v3697_v43, %v3737_v15 }
 0x5c6   : > { %5008 = vmatprep.subr.mxu1 %v7552_v13 }
 0x5c7   : > { %v3862_v61 = vand.u32 4294901760, %v7119_v18 }
 0x5c9   : > { %v3863_v12 = vsub.f32 %v7119_v18, %v3862_v61 }
 0x5cc   : > { %5006 = vmatmul.mubr.f32.vlgmr.msra.gmra.mrb[4].mxu1 %v3304_v47 }
 0x5cd   : > { %5009 = vmatpush3.msra.mxu1 %v3316_v46  ;;  %5010 = vmatprep.mubr.msk.f32.mxu1 %vm5906_vm0, %v7552_v13 }
 0x5ce   : > { %5013 = vmatprep.subr.mxu1 %v7552_v13 }
 0x5d4   : > { %5011 = vmatmul.mubr.f32.vlgmr.msra.gmra.mrb[4].mxu1 %v3305_v36  ;;  %v3740_v36 = vand.u32 4294901760, %v3698_v39 }
 0x5d5   : > { %5014 = vmatpush3.msra.mxu1 %v3239_v4  ;;  %5015 = vmatprep.mubr.msk.f32.mxu1 %vm5906_vm0, %v7552_v13 }
 0x5d6   : > { %5018 = vmatprep.subr.mxu1 %v7552_v13  ;;  %v7124_v57 = vsub.f32 %v3698_v39, %v3740_v36  ;;  %v7139_v14 = vpack.c.bf16 %v3740_v36, %v3737_v15  ;;  %v3864_v39 = vand.u32 4294901760, %v3863_v12 }
 0x5d8   : > { %v3869_v21 = vand.u32 4294901760, %v7124_v57 }
 0x5da   : > { %v3870_v20 = vsub.f32 %v7124_v57, %v3869_v21 }
 0x5dc   : > { %5016 = vmatmul.mubr.f32.vlgmr.msra.gmra.mrb[4].mxu1 %v3306_v48  ;;  %v7114_v48 = vld [vmem:[#allocation4 + $0x60] sm:$0xff]  ;;  %v3871_v32 = vand.u32 4294901760, %v3870_v20 }
 0x5dd   : > { %5019 = vmatpush3.msra.mxu1 %v3317_v16  ;;  %5020 = vmatprep.mubr.msk.f32.mxu1 %vm5906_vm0, %v7552_v13  ;;  %v3856_v16 = vsub.f32 %v7098_v52, %v3855_v28  ;;  %v3749_v22 = vand.u32 4294901760, %v7114_v48 }
 0x5de   : > { %5023 = vmatprep.subr.mxu1 %v7552_v13 }
 0x5df   : > { %v3857_v25 = vand.u32 4294901760, %v3856_v16  ;;  %v7147_v44 = vsub.f32 %v7114_v48, %v3749_v22  ;;  %v5611_v48 = vpack.c.bf16 %v3871_v32, %v3864_v39 }
 0x5e1   : > { %v5608_v49 = vpack.c.bf16 %v3857_v25, %v3850_v17  ;;  %v3890_v11 = vand.u32 4294901760, %v7147_v44 }
 0x5e3   : > { %v3891_v16 = vsub.f32 %v7147_v44, %v3890_v11 }
 0x5e4   : > { %5021 = vmatmul.mubr.f32.vlgmr.msra.gmra.mrb[4].mxu1 %v3304_v47 }
 0x5e5   : > { %5024 = vmatpush3.msra.mxu1 %v3239_v4  ;;  %5025 = vmatprep.mubr.msk.f32.mxu1 %vm5906_vm0, %v7552_v13  ;;  %v7107_v4 = vpack.c.bf16 %v3728_v7, %v3725_v2  ;;  %v7132_v2 = vld [vmem:[#allocation4 + $0x70] sm:$0xff]  ;;  %v7134_v7 = vld [vmem:[#allocation4 + $0x78] sm:$0xff]  ;;  %v3892_v6 = vand.u32 4294901760, %v3891_v16 }
 0x5e6   : > { %5598 = vmatprep.subr.bf16.mxu1 %v7551_v58  ;;  %v3755_v43 = vand.u32 4294901760, %v7132_v2  ;;  %v3758_v1 = vand.u32 4294901760, %v7134_v7 }
 0x5e7   : > { %5582 = vmatpush3.bf16.msra.mxu0 %v7107_v4 }
 0x5e8   : > { %5583 = vmatprep.subr.bf16.mxu0 %v7551_v58  ;;  %v7172_v5 = vsub.f32 %v7132_v2, %v3755_v43  ;;  %v7204_v39 = vpack.c.bf16 %v3758_v1, %v3755_v43 }
 0x5eb   : > { %5585 = vmatpush3.bf16.msra.mxu0 %v7121_v42 }
 0x5ec   : > { %5026 = vmatmul.mubr.f32.vlgmr.msra.gmra.mrb[4].mxu1 %v3304_v47  ;;  %v3843_v47 = vand.u32 4294901760, %v3842_v38  ;;  %v3883_v38 = vand.u32 4294901760, %v7137_v56  ;;  %5586 = vmatprep.subr.bf16.mxu0 %v7551_v58 }
 0x5ed   : > { %5095 = vmatprep.mubr.msk.f32.mxu1 %vm5906_vm0, %v7552_v13  ;;  %5600 = vmatpush3.bf16.msra.mxu1 %v5599_v31  ;;  %v3897_v31 = vand.u32 4294901760, %v7150_v30 }
 0x5ee   : > { %5601 = vmatprep.subr.bf16.mxu1 %v7551_v58  ;;  %v5605_v8 = vpack.c.bf16 %v3843_v47, %v3836_v63  ;;  %v3884_v15 = vsub.f32 %v7137_v56, %v3883_v38  ;;  %v7175_v63 = vsub.f32 %v7134_v7, %v3758_v1  ;;  %v3878_v47 = vand.u32 4294901760, %v3877_v27 }
 0x5ef   : > { %5588 = vmatpush3.bf16.msra.mxu0 %v7139_v14  ;;  %v3898_v36 = vsub.f32 %v7150_v30, %v3897_v31 }
 0x5f0   : > { %5589 = vmatprep.subr.bf16.mxu0 %v7551_v58  ;;  %v3885_v23 = vand.u32 4294901760, %v3884_v15 }
 0x5f1   : > { %5603 = vmatpush3.bf16.msra.mxu1 %v5602_v51  ;;  %v3911_v51 = vand.u32 4294901760, %v7175_v63  ;;  %v3899_v25 = vand.u32 4294901760, %v3898_v36  ;;  %v5626_v36 = vpack.c.bf16 %v7062_v24, %v7058_v50  ;;  %v5686_v50 = vpack.c.bf16 %v3883_v38, %v3876_v34 }
 0x5f2   : > { %5604 = vmatprep.subr.bf16.mxu1 %v7551_v58  ;;  %v5614_v17 = vpack.c.bf16 %v3885_v23, %v3878_v47  ;;  %v5632_v23 = vpack.c.bf16 %v7098_v52, %v7087_v62  ;;  %v5689_v24 = vpack.c.bf16 %v3897_v31, %v3890_v11 }
 0x5f3   : > { %5591 = vmatpush3.bf16.msra.mxu0 %v7160_v45  ;;  %v3912_v2 = vsub.f32 %v7175_v63, %v3911_v51  ;;  %v5617_v7 = vpack.c.bf16 %v3899_v25, %v3892_v6  ;;  %v5635_v6 = vpack.c.bf16 %v7124_v57, %v7119_v18  ;;  %v5641_v25 = vpack.c.bf16 %v7150_v30, %v7147_v44 }
 0x5f4   : > { %5592 = vmatprep.subr.bf16.mxu0 %v7551_v58 }
 0x5f5   : > { %5606 = vmatpush3.bf16.msra.mxu1 %v5605_v8  ;;  %v3913_v12 = vand.u32 4294901760, %v3912_v2  ;;  %v5671_v2 = vpack.c.bf16 %v3813_v53, %v3806_v54  ;;  %v4443_v54 = vld [vmem:[%s7336_s5] ss:$0 sm:$0xff] }
 0x5f6   : > { %5607 = vmatprep.subr.bf16.mxu1 %v7551_v58 }
 0x5f9   : > { %5609 = vmatpush3.bf16.msra.mxu1 %v5608_v49  ;;  %v7200_v49 = vpack.c.bf16 %v3752_v3, %v3749_v22 }
 0x5fa   : > { %5610 = vmatprep.subr.bf16.mxu1 %v7551_v58 }
 0x5fb   : > { %5594 = vmatpush3.bf16.msra.mxu0 %v7200_v49 }
 0x5fc   : > { %5595 = vmatprep.subr.bf16.mxu0 %v7551_v58 }
 0x5fd   : > { %5612 = vmatpush3.bf16.msra.mxu1 %v5611_v48  ;;  %v5629_v48 = vpack.c.bf16 %v7066_v40, %v7064_v29 }
 0x5fe   : > { %5613 = vmatprep.subr.bf16.mxu1 %v7551_v58 }
 0x5ff   : > { %5597 = vmatpush3.bf16.msra.mxu0 %v7204_v39 }
 0x600   : > { %5622 = vmatprep.subr.bf16.mxu0 %v7551_v58 }
 0x601   : > { %5615 = vmatpush3.bf16.msra.mxu1 %v5614_v17  ;;  %v5638_v17 = vpack.c.bf16 %v7137_v56, %v7128_v0 }
 0x602   : > { %5616 = vmatprep.subr.bf16.mxu1 %v7551_v58 }
 0x605   : > { %5618 = vmatpush3.bf16.msra.mxu1 %v5617_v7 }
 0x606   : > { %5619 = vmatprep.subr.bf16.mxu1 %v7551_v58 }
 0x64c   : > { %v7109_v46 = vpop.f32.mrb[2].mxu1 }
 0x64d   : > { %v4967_v41 = vpop.f32.mrb[3].mxu1 }
 0x64e   : > { %v3904_v41 = vand.u32 4294901760, %v7172_v5 }
 0x650   : > { %v3905_v26 = vsub.f32 %v7172_v5, %v3904_v41  ;;  %v5692_v29 = vpack.c.bf16 %v3911_v51, %v3904_v41 }
 0x652   : > { %v3906_v8 = vand.u32 4294901760, %v3905_v26  ;;  %v5644_v26 = vpack.c.bf16 %v7175_v63, %v7172_v5 }
 0x654   : > { %v5620_v20 = vpack.c.bf16 %v3913_v12, %v3906_v8 }
 0x656   : > { %5621 = vmatpush3.bf16.msra.mxu1 %v5620_v20 }
 0x657   : > { %5646 = vmatprep.subr.bf16.mxu1 %v7551_v58 }
 0x6bf   : > { %v3680_v27 = vpop.f32.mrb[4].mxu1 }
 0x6c0   : > { %3685 = vrot.lane.b32.xlu0 %v3680_v27, %s5907_s15  ;;  %v5027_v32 = vpop.f32.mrb[5].mxu1 }
 0x732   : > { %v3686_v15 = vpop.permute.xlu0 %3685 }
 0x733   : > { %v3688_v47 = vsel %vm1850_vm1, %v7109_v46, %v3686_v15  ;;  %v5623_v46 = vpack.c.bf16 %v7056_v9, %v7054_v60  ;;  %v5677_v60 = vpack.c.bf16 %v3841_v35, %v3834_v37  ;;  %v5683_v9 = vpack.c.bf16 %v3869_v21, %v3862_v61  ;;  %v5825_v21 = vld [vmem:[%s6035_s10] sm:$0xff] }
 0x734   : > { %v7211_v22 = vand.u32 4294901760, %v3688_v47 }
 0x736   : > { %v3794_v3 = vsub.f32 %v3688_v47, %v7211_v22  ;;  %5096 = vmatmul.mubr.f32.vlgmr.msra.gmra.mrb[6].mxu1 %v7211_v22 }
 0x737   : > { %5648 = vmatpush3.bf16.msra.mxu1 %v7060_v10  ;;  %5165 = vmatprep.mubr.msk.f32.mxu1 %vm5906_vm0, %v7552_v13 }
 0x738   : > { %v3795_v43 = vand.u32 4294901760, %v3794_v3  ;;  %5649 = vmatprep.subr.bf16.mxu1 %v7551_v58 }
 0x73a   : > { %v3796_v1 = vsub.f32 %v3794_v3, %v3795_v43 }
 0x73b   : > { %5651 = vmatpush3.bf16.msra.mxu1 %v7068_v33 }
 0x73c   : > { %5652 = vmatprep.subr.bf16.mxu1 %v7551_v58  ;;  %v3797_v16 = vand.u32 4294901760, %v3796_v1 }
 0x73e   : > { %5061 = vmatmul.mubr.f32.vlgmr.msra.gmra.mrb[6].mxu0 %v3797_v16 }
 0x73f   : > { %5624 = vmatpush3.bf16.msra.mxu0 %v5623_v46  ;;  %5654 = vmatpush3.bf16.msra.mxu1 %v7107_v4 }
 0x740   : > { %5625 = vmatprep.subr.bf16.mxu0 %v7551_v58  ;;  %5655 = vmatprep.subr.bf16.mxu1 %v7551_v58 }
 0x741   : > { %5130 = vmatprep.mubr.msk.f32.mxu0 %vm5906_vm0, %v7552_v13 }
 0x743   : > { %5627 = vmatpush3.bf16.msra.mxu0 %v5626_v36  ;;  %5657 = vmatpush3.bf16.msra.mxu1 %v7121_v42 }
 0x744   : > { %5628 = vmatprep.subr.bf16.mxu0 %v7551_v58  ;;  %5658 = vmatprep.subr.bf16.mxu1 %v7551_v58 }
 0x747   : > { %5630 = vmatpush3.bf16.msra.mxu0 %v5629_v48  ;;  %5660 = vmatpush3.bf16.msra.mxu1 %v7139_v14 }
 0x748   : > { %5631 = vmatprep.subr.bf16.mxu0 %v7551_v58  ;;  %5661 = vmatprep.subr.bf16.mxu1 %v7551_v58 }
 0x74b   : > { %5633 = vmatpush3.bf16.msra.mxu0 %v5632_v23  ;;  %5663 = vmatpush3.bf16.msra.mxu1 %v7160_v45 }
 0x74c   : > { %5634 = vmatprep.subr.bf16.mxu0 %v7551_v58  ;;  %5664 = vmatprep.subr.bf16.mxu1 %v7551_v58 }
 0x74f   : > { %5636 = vmatpush3.bf16.msra.mxu0 %v5635_v6  ;;  %5666 = vmatpush3.bf16.msra.mxu1 %v7200_v49 }
 0x750   : > { %5637 = vmatprep.subr.bf16.mxu0 %v7551_v58  ;;  %5667 = vmatprep.subr.bf16.mxu1 %v7551_v58 }
 0x753   : > { %5639 = vmatpush3.bf16.msra.mxu0 %v5638_v17  ;;  %5669 = vmatpush3.bf16.msra.mxu1 %v7204_v39 }
 0x754   : > { %5640 = vmatprep.subr.bf16.mxu0 %v7551_v58  ;;  %5694 = vmatprep.subr.bf16.mxu1 %v7551_v58 }
 0x756   : > { %5166 = vmatmul.mubr.f32.vlgmr.msra.gmra.mrb[8].mxu1 %v3795_v43 }
 0x757   : > { %5642 = vmatpush3.bf16.msra.mxu0 %v5641_v25  ;;  %5696 = vmatpush3.bf16.msra.mxu1 %v7060_v10  ;;  %v5674_v10 = vpack.c.bf16 %v3827_v19, %v3820_v59 }
 0x758   : > { %5643 = vmatprep.subr.bf16.mxu0 %v7551_v58  ;;  %5697 = vmatprep.subr.bf16.mxu1 %v7551_v58 }
 0x759   : > { %5235 = vmatprep.mubr.msk.f32.mxu1 %vm5906_vm0, %v7552_v13 }
 0x75b   : > { %5645 = vmatpush3.bf16.msra.mxu0 %v5644_v26  ;;  %5699 = vmatpush3.bf16.msra.mxu1 %v7068_v33 }
 0x75c   : > { %5670 = vmatprep.subr.bf16.mxu0 %v7551_v58  ;;  %5700 = vmatprep.subr.bf16.mxu1 %v7551_v58 }
 0x75e   : > { %5131 = vmatmul.mubr.f32.vlgmr.msra.gmra.mrb[8].mxu0 %v3794_v3 }
 0x75f   : > { %5672 = vmatpush3.bf16.msra.mxu0 %v5671_v2  ;;  %5702 = vmatpush3.bf16.msra.mxu1 %v7107_v4 }
 0x760   : > { %5673 = vmatprep.subr.bf16.mxu0 %v7551_v58  ;;  %5703 = vmatprep.subr.bf16.mxu1 %v7551_v58 }
 0x761   : > { %5200 = vmatprep.mubr.msk.f32.mxu0 %vm5906_vm0, %v7552_v13  ;;  %v5680_v13 = vpack.c.bf16 %v3855_v28, %v3848_v55 }
 0x763   : > { %5675 = vmatpush3.bf16.msra.mxu0 %v5674_v10  ;;  %5705 = vmatpush3.bf16.msra.mxu1 %v7121_v42 }
 0x764   : > { %5676 = vmatprep.subr.bf16.mxu0 %v7551_v58  ;;  %5706 = vmatprep.subr.bf16.mxu1 %v7551_v58 }
 0x767   : > { %5678 = vmatpush3.bf16.msra.mxu0 %v5677_v60  ;;  %5708 = vmatpush3.bf16.msra.mxu1 %v7139_v14 }
 0x768   : > { %5679 = vmatprep.subr.bf16.mxu0 %v7551_v58  ;;  %5709 = vmatprep.subr.bf16.mxu1 %v7551_v58 }
 0x76b   : > { %5681 = vmatpush3.bf16.msra.mxu0 %v5680_v13  ;;  %5711 = vmatpush3.bf16.msra.mxu1 %v7160_v45 }
 0x76c   : > { %5682 = vmatprep.subr.bf16.mxu0 %v7551_v58  ;;  %5712 = vmatprep.subr.bf16.mxu1 %v7551_v58 }
 0x76f   : > { %5684 = vmatpush3.bf16.msra.mxu0 %v5683_v9  ;;  %5714 = vmatpush3.bf16.msra.mxu1 %v7200_v49 }
 0x770   : > { %5685 = vmatprep.subr.bf16.mxu0 %v7551_v58  ;;  %5715 = vmatprep.subr.bf16.mxu1 %v7551_v58 }
 0x773   : > { %5687 = vmatpush3.bf16.msra.mxu0 %v5686_v50  ;;  %5717 = vmatpush3.bf16.msra.mxu1 %v7204_v39 }
 0x774   : > { %5688 = vmatprep.subr.bf16.mxu0 %v7551_v58 }
 0x776   : > { %5236 = vmatmul.mubr.f32.vlgmr.msra.gmra.mrb[10].mxu1 %v7211_v22 }
 0x777   : > { %5690 = vmatpush3.bf16.msra.mxu0 %v5689_v24 }
 0x778   : > { %5691 = vmatprep.subr.bf16.mxu0 %v7551_v58 }
 0x77b   : > { %5693 = vmatpush3.bf16.msra.mxu0 %v5692_v29 }
 0x77e   : > { %5201 = vmatmul.mubr.f32.vlgmr.msra.gmra.mrb[10].mxu0 %v7211_v22 }
 0x809   : > { %v3950_v40 = vpop.f32.mrb[6].mxu1 }
 0x80a   : > { %v5097_v33 = vpop.f32.mrb[7].mxu1 }
 0x811   : > { %v3799_v53 = vpop.f32.mrb[6].mxu0 }
 0x812   : > { %v3800_v59 = vadd.f32 %v4443_v54, %v3799_v53  ;;  %v5062_v19 = vpop.f32.mrb[7].mxu0 }
 0x814   : > { %v3951_v37 = vadd.f32 %v3950_v40, %v3800_v59 }
 0x829   : > { %v4143_v35 = vpop.f32.mrb[8].mxu1 }
 0x82a   : > { %v5167_v62 = vpop.f32.mrb[9].mxu1 }
 0x831   : > { %v4054_v52 = vpop.f32.mrb[8].mxu0 }
 0x832   : > { %v4055_v55 = vadd.f32 %v4054_v52, %v3951_v37  ;;  %v5132_v58 = vpop.f32.mrb[9].mxu0 }
 0x834   : > { %v4144_v28 = vadd.f32 %v4143_v35, %v4055_v55 }
 0x849   : > { %v4349_v4 = vpop.f32.mrb[10].mxu1 }
 0x84a   : > { %v5237_v18 = vpop.f32.mrb[11].mxu1 }
 0x851   : > { %v4262_v42 = vpop.f32.mrb[10].mxu0 }
 0x852   : > { %v4263_v57 = vadd.f32 %v4262_v42, %v4144_v28  ;;  %v5202_v61 = vpop.f32.mrb[11].mxu0 }
 0x854   : > { %v4350_v0 = vadd.f32 %v4349_v4, %v4263_v57 }
 0x856   : > { %v4353_v56 = vadd.f32 %v5825_v21, %v4350_v0 }
 0x858   : > { %4354 = vst [vmem:[%s276_s20] sm:$0xff] %v4353_v56 }
 0x859 PF: > { %s18_s21 = sadd.s32 1, %s5896_s21  }
 0x85a   : > { %p15_p5 = scmp.ge.s32.totalorder %s18_s21, 4  }
 0x85c   :  { %17 = sbr.rel (!%p15_p5) target bundleno = 2 (0x2), region = 83 }
 0x863   :  { %4374 = vsyncpa [#allocation3], 1 }
 0x864   :  { %4376 = vsyncpa [#allocation3 + $0x1], 1 }
 0x865   :  { %4377 = vsyncpa [#allocation5], 1 }

// kernel: transformer_forward.6
= control target key start
LH: loop header
LB: loop body
LE: loop exit
PB: predicated region body
PF: predicated region fallthrough
CT: control target
= control target key end

     0   :  { %s5792_s21 = smov 0   ;;  %s7296_s0 = inlined_call_operand.vmem [shape: f32[2,8,128], index: 0, kind: input, shape index: {}]   ;;  %s7297_s1 = inlined_call_operand.vmem [shape: f32[1,128], index: 1, kind: input, shape index: {}]   ;;  %s7298_s2 = inlined_call_operand.vmem [shape: f32[1,128], index: 2, kind: input, shape index: {}]   ;;  %s7299_s3 = inlined_call_operand.vmem [shape: f32[128,384], index: 3, kind: input, shape index: {}]   ;;  %s7300_s4 = inlined_call_operand.vmem [shape: f32[128,128], index: 4, kind: input, shape index: {}]   ;;  %s7301_s5 = inlined_call_operand.vmem [shape: f32[1,128], index: 5, kind: input, shape index: {}]   ;;  %s7302_s6 = inlined_call_operand.vmem [shape: f32[2,8,128], index: 6, kind: output, shape index: {}]  }
   0x1 LB: > { %s4378_s22 = sadd.s32 4294967295, %s5751_s21   ;;  %p4382_p0 = scmp.ge.s32.totalorder %s5751_s21, 1  ;;  %s5751_s21 = sphi %s5792_s21, %s16_s21  }
   0x2   : > { %p211_p1 = scmp.lt.s32.totalorder %s5751_s21, 3 }
   0x4   : > { %p212_p2 = pnand %p4382_p0, %p211_p1 }
   0x6   : > { %215 = sbr.rel (%p212_p2) target bundleno = 2078 (0x81e), region = 44 }
   0xd   : > { %p239_p3 = scmp.lt.s32.totalorder %s4378_s22, 1  ;;  %v277_v1 = vld [vmem:[%s7299_s3 + $0x8] sm:$0xff]  ;;  %v280_v2 = vld [vmem:[%s7299_s3 + $0x20] sm:$0xff]  ;;  %v7314_v6 = vmov 0.0|0.0   ;;  %v279_v7 = vld [vmem:[%s7299_s3 + $0x18] sm:$0xff]  ;;  %vm5755_vm0 = vmmov 0  }
   0xe   : > { %v276_v3 = vld [vmem:[%s7299_s3] sm:$0xff]  ;;  %v324_v4 = vand.u32 4294901760, %v277_v1  ;;  %v328_v5 = vand.u32 4294901760, %v280_v2  ;;  %5374 = vmatprep.subr.bf16.mxu1 %v7314_v6  ;;  %v278_v9 = vld [vmem:[%s7299_s3 + $0x10] sm:$0xff]  ;;  %v281_v10 = vld [vmem:[%s7299_s3 + $0x28] sm:$0xff]  ;;  %v330_v11 = vand.u32 4294901760, %v279_v7 }
   0xf   : > { %s7644_s22 = smov (!%p239_p3, %s4378_s22), 1  ;;  %v326_v8 = vand.u32 4294901760, %v276_v3  ;;  %v1180_v12 = vand.u32 4294901760, %v278_v9  ;;  %v1183_v13 = vand.u32 4294901760, %v281_v10  ;;  %v5859_v27 = vld [vmem:[%s7299_s3 + $0x38] sm:$0xff]  ;;  %v5864_v28 = vld [vmem:[%s7299_s3 + $0x50] sm:$0xff] }
  0x10   : > { %s4383_s23 = sshll.u32 %s7644_s22, 3  ;;  %v5830_v14 = vpack.c.bf16 %v328_v5, %v324_v4  ;;  %v5832_v15 = vsub.f32 %v277_v1, %v324_v4  ;;  %v5834_v16 = vsub.f32 %v280_v2, %v328_v5  ;;  %v5840_v19 = vsub.f32 %v279_v7, %v330_v11  ;;  %v5871_v31 = vld [vmem:[%s7299_s3 + $0x30] sm:$0xff]  ;;  %v5876_v32 = vld [vmem:[%s7299_s3 + $0x48] sm:$0xff]  ;;  %v5881_v33 = vld [vmem:[%s7299_s3 + $0x40] sm:$0xff]  ;;  %s5756_s27 = smov 64  }
  0x11   : > { %s5808_s26 = scalar_lea.vmem %s7296_s0, %s4383_s23  ;;  %v5836_v17 = vsub.f32 %v276_v3, %v326_v8  ;;  %v5838_v18 = vpack.c.bf16 %v330_v11, %v326_v8  ;;  %v5842_v20 = vpack.c.bf16 %v1183_v13, %v1180_v12  ;;  %v5844_v21 = vsub.f32 %v278_v9, %v1180_v12  ;;  %v5888_v36 = vld [vmem:[%s7299_s3 + $0x58] sm:$0xff]  ;;  %v5907_v41 = vld [vmem:[%s7299_s3 + $0x68] sm:$0xff]  ;;  %v5912_v42 = vld [vmem:[%s7299_s3 + $0x80] sm:$0xff]  ;;  %s246_s20 = scalar_lea.vmem %s7302_s6, %s4383_s23 }
  0x12   : > { %v247_v0 = vld [vmem:[%s5808_s26] sm:$0xff]  ;;  %7430 = vst [vmem:[#allocation2_spill] sm:$0xff] %v5830_v14  ;;  %7432 = vst [vmem:[#allocation4_spill] sm:$0xff] %v5840_v19  ;;  %5183 = vmatprep.subr.bf16.mxu0 %v5830_v14  ;;  %v5847_v22 = vsub.f32 %v281_v10, %v1183_v13  ;;  %v7318_v29 = vand.u32 4294901760, %v5859_v27  ;;  %v7317_v30 = vand.u32 4294901760, %v5864_v28  ;;  %v7316_v34 = vand.u32 4294901760, %v5871_v31 }
  0x13   : > { %250 = vadd.xlane.f32.xlu0 %v247_v0  ;;  %7431 = vst [vmem:[#allocation3_spill] sm:$0xff] %v5838_v18  ;;  %7433 = vst [vmem:[#allocation5_spill] sm:$0xff] %v5842_v20  ;;  %5185 = vmatpush1.bf16.msra.mxu0 %v5838_v18  ;;  %v7313_v35 = vand.u32 4294901760, %v5876_v32  ;;  %v7312_v37 = vand.u32 4294901760, %v5881_v33  ;;  %v7311_v39 = vand.u32 4294901760, %v5888_v36  ;;  %v7310_v44 = vand.u32 4294901760, %v5907_v41 }
  0x14   : > { %7434 = vst [vmem:[#allocation6_spill] sm:$0xff] %v5844_v21  ;;  %5376 = vmatpush3.bf16.msra.mxu1 %v5842_v20  ;;  %v5895_v38 = vpack.c.bf16 %v7317_v30, %v7318_v29  ;;  %v7309_v45 = vand.u32 4294901760, %v5912_v42  ;;  %v5926_v46 = vld [vmem:[%s7299_s3 + $0x60] sm:$0xff]  ;;  %v5931_v47 = vld [vmem:[%s7299_s3 + $0x78] sm:$0xff]  ;;  %v5936_v48 = vld [vmem:[%s7299_s3 + $0x70] sm:$0xff]  ;;  %v7453_v18 = vmov 0.0|0.0  }
  0x15   : > { %5377 = vmatprep.subr.bf16.mxu1 %v7314_v6  ;;  %v5902_v40 = vpack.c.bf16 %v7313_v35, %v7316_v34  ;;  %v5919_v43 = vpack.c.bf16 %v7311_v39, %v7312_v37  ;;  %v7308_v49 = vand.u32 4294901760, %v5926_v46  ;;  %v7307_v50 = vand.u32 4294901760, %v5931_v47  ;;  %v5944_v51 = vld [vmem:[%s7299_s3 + $0x88] sm:$0xff]  ;;  %v5965_v56 = vld [vmem:[%s7299_s3 + $0x98] sm:$0xff]  ;;  %v5970_v57 = vld [vmem:[%s7299_s3 + $0xb0] sm:$0xff] }
  0x16   : > { %7436 = vst [vmem:[#allocation8_spill] sm:$0xff] %v5895_v38  ;;  %5187 = vmatprep.subr.bf16.mxu0 %v5895_v38  ;;  %v7306_v52 = vand.u32 4294901760, %v5936_v48  ;;  %v5952_v53 = vpack.c.bf16 %v7309_v45, %v7310_v44  ;;  %v7305_v54 = vand.u32 4294901760, %v5944_v51  ;;  %v7304_v59 = vand.u32 4294901760, %v5965_v56  ;;  %v5984_v61 = vld [vmem:[%s7299_s3 + $0x90] sm:$0xff]  ;;  %v5989_v62 = vld [vmem:[%s7299_s3 + $0xa8] sm:$0xff] }
  0x17   : > { %7437 = vst [vmem:[#allocation9_spill] sm:$0xff] %v5902_v40  ;;  %7438 = vst [vmem:[#allocation10_spill] sm:$0xff] %v5919_v43  ;;  %5189 = vmatpush1.bf16.msra.mxu0 %v5902_v40  ;;  %v5960_v55 = vpack.c.bf16 %v7307_v50, %v7308_v49  ;;  %v7303_v60 = vand.u32 4294901760, %v5970_v57  ;;  %v5994_v63 = vld [vmem:[%s7299_s3 + $0xa0] sm:$0xff]  ;;  %v354_v1 = vand.u32 4294901760, %v5989_v62  ;;  %v299_v2 = vld [vmem:[%s7299_s3 + $0xb8] sm:$0xff] }
  0x18   : > { %5379 = vmatpush3.bf16.msra.mxu1 %v5919_v43  ;;  %7439 = vst [vmem:[#allocation11_spill] sm:$0xff] %v5952_v53  ;;  %5191 = vmatprep.subr.bf16.mxu0 %v5952_v53  ;;  %v5977_v58 = vpack.c.bf16 %v7305_v54, %v7306_v52  ;;  %v1198_v3 = vand.u32 4294901760, %v5994_v63  ;;  %v1201_v5 = vand.u32 4294901760, %v299_v2  ;;  %v301_v8 = vld [vmem:[%s7299_s3 + $0xc8] sm:$0xff]  ;;  %v304_v9 = vld [vmem:[%s7299_s3 + $0xe0] sm:$0xff]  ;;  %v307_v45 = vld [vmem:[%s7299_s3 + $0xf8] sm:$0xff] }
  0x19   : > { %5380 = vmatprep.subr.bf16.mxu1 %v7314_v6  ;;  %7440 = vst [vmem:[#allocation12_spill] sm:$0xff] %v5960_v55  ;;  %v6008_v4 = vpack.c.bf16 %v7303_v60, %v7304_v59  ;;  %v356_v11 = vand.u32 4294901760, %v301_v8  ;;  %v360_v12 = vand.u32 4294901760, %v304_v9  ;;  %v300_v13 = vld [vmem:[%s7299_s3 + $0xc0] sm:$0xff]  ;;  %v305_v59 = vld [vmem:[%s7299_s3 + $0xe8] sm:$0xff]  ;;  %v310_v44 = vld [vmem:[%s7299_s3 + $0x110] sm:$0xff] }
  0x1a   : > { %7441 = vst [vmem:[#allocation13_spill] sm:$0xff] %v5977_v58  ;;  %v6020_v10 = vpack.c.bf16 %v1201_v5, %v1198_v3  ;;  %v1207_v50 = vand.u32 4294901760, %v305_v59  ;;  %v364_v37 = vand.u32 4294901760, %v307_v45  ;;  %v368_v35 = vand.u32 4294901760, %v310_v44  ;;  %v309_v34 = vld [vmem:[%s7299_s3 + $0x108] sm:$0xff]  ;;  %v308_v30 = vld [vmem:[%s7299_s3 + $0x100] sm:$0xff] }
  0x1b   : > { %5193 = vmatpush1.bf16.msra.mxu0 %v5960_v55  ;;  %7442 = vst [vmem:[#allocation14_spill] sm:$0xff] %v6008_v4  ;;  %v6036_v52 = vpack.c.bf16 %v360_v12, %v356_v11  ;;  %v7449_v55 = vand.u32 4294901760, %v5859_v27  ;;  %v7450_v43 = vand.u32 4294901760, %v5864_v28  ;;  %v7451_v40 = vand.u32 4294901760, %v5871_v31 }
  0x1c   : > { %5382 = vmatpush3.bf16.msra.mxu1 %v5977_v58  ;;  %5195 = vmatprep.subr.bf16.mxu0 %v6008_v4  ;;  %7444 = vst [vmem:[#allocation16_spill] sm:$0xff] %v6020_v10  ;;  %v1210_v4 = vand.u32 4294901760, %v308_v30  ;;  %vm1820_vm1 = vcmask 523264   ;;  %vm2274_vm2 = vcmask 64512  }
  0x1d   : > { %5383 = vmatprep.subr.bf16.mxu1 %v7314_v6  ;;  %7445 = vst [vmem:[#allocation17_spill] sm:$0xff] %v6036_v52  ;;  %v6069_v53 = vsub.f32 %v5859_v27, %v7449_v55  ;;  %v6079_v38 = vsub.f32 %v5871_v31, %v7451_v40  ;;  %v7454_v27 = vand.u32 4294901760, %v5881_v33  ;;  %v7456_v31 = vand.u32 4294901760, %v5907_v41 }
  0x1f   : > { %v6090_v55 = vsub.f32 %v5881_v33, %v7454_v27  ;;  %v6100_v40 = vsub.f32 %v5907_v41, %v7456_v31  ;;  %v7459_v33 = vand.u32 4294901760, %v5926_v46  ;;  %v7461_v41 = vand.u32 4294901760, %v5936_v48 }
  0x20   : > { %5385 = vmatpush3.bf16.msra.mxu1 %v6020_v10  ;;  %v6064_v10 = vpack.c.bf16 %v368_v35, %v364_v37 }
  0x21   : > { %5386 = vmatprep.subr.bf16.mxu1 %v7314_v6  ;;  %v306_v6 = vld [vmem:[%s7299_s3 + $0xf0] sm:$0xff]  ;;  %v6111_v27 = vsub.f32 %v5926_v46, %v7459_v33  ;;  %v6121_v31 = vsub.f32 %v5936_v48, %v7461_v41  ;;  %v7464_v33 = vand.u32 4294901760, %v5970_v57  ;;  %v6142_v48 = vsub.f32 %v5989_v62, %v354_v1 }
  0x22   : > { %v366_v29 = vand.u32 4294901760, %v306_v6  ;;  %7448 = vst [vmem:[#allocation20_spill] sm:$0xff] %v6064_v10  ;;  %v6145_v41 = vsub.f32 %v5994_v63, %v1198_v3  ;;  %v315_v3 = vld [vmem:[%s7299_s3 + $0x138] sm:$0xff] }
  0xa0   : > { %v251_v23 = vpop.xlane.xlu0 %250 }
  0xa1   : > { %v253_v24 = vmul.f32 0.0078125, %v251_v23  ;;  %v303_v23 = vld [vmem:[%s7299_s3 + $0xd8] sm:$0xff] }
  0xa2   : > { %v362_v60 = vand.u32 4294901760, %v303_v23 }
  0xa3   : > { %v5852_v25 = vsub.f32 %v247_v0, %v253_v24  ;;  %v350_v0 = vand.u32 4294901760, %v5984_v61  ;;  %v302_v24 = vld [vmem:[%s7299_s3 + $0xd0] sm:$0xff] }
  0xa4   : > { %v1204_v54 = vand.u32 4294901760, %v302_v24  ;;  %v6161_v62 = vsub.f32 %v303_v23, %v362_v60 }
  0xa5   : > { %7435 = vst [vmem:[#allocation7_spill] sm:$0xff] %v5852_v25  ;;  %v255_v26 = vmul.f32 %v5852_v25, %v5852_v25  ;;  %v6011_v7 = vpack.c.bf16 %v354_v1, %v350_v0  ;;  %v6165_v1 = vsub.f32 %v305_v59, %v1207_v50  ;;  %v317_v59 = vld [vmem:[%s7299_s3 + $0x148] sm:$0xff] }
  0xa6   : > { %v6048_v39 = vpack.c.bf16 %v1207_v50, %v1204_v54  ;;  %v6163_v63 = vsub.f32 %v302_v24, %v1204_v54  ;;  %v6182_v50 = vsub.f32 %v306_v6, %v366_v29  ;;  %v1219_v23 = vand.u32 4294901760, %v317_v59 }
  0xa7   : > { %256 = vadd.xlane.f32.xlu0 %v255_v26  ;;  %7443 = vst [vmem:[#allocation15_spill] sm:$0xff] %v6011_v7  ;;  %5197 = vmatpush1.bf16.msra.mxu0 %v6011_v7  ;;  %v358_v26 = vand.u32 4294901760, %v300_v13  ;;  %v370_v7 = vand.u32 4294901760, %v309_v34 }
  0xa8   : > { %5199 = vmatprep.subr.bf16.mxu0 %v6036_v52  ;;  %7447 = vst [vmem:[#allocation19_spill] sm:$0xff] %v6048_v39  ;;  %v311_v52 = vld [vmem:[%s7299_s3 + $0x118] sm:$0xff]  ;;  %5388 = vmatpush3.bf16.msra.mxu1 %v6048_v39  ;;  %v7452_v39 = vand.u32 4294901760, %v5876_v32 }
  0xa9   : > { %v6039_v49 = vpack.c.bf16 %v362_v60, %v358_v26  ;;  %v1213_v58 = vand.u32 4294901760, %v311_v52  ;;  %5389 = vmatprep.subr.bf16.mxu1 %v7453_v18  ;;  %v6178_v60 = vsub.f32 %v310_v44, %v368_v35  ;;  %v6180_v54 = vpack.c.bf16 %v370_v7, %v366_v29 }
  0xaa   : > { %v6084_v20 = vsub.f32 %v5876_v32, %v7452_v39  ;;  %v7457_v32 = vand.u32 4294901760, %v5912_v42  ;;  %v6197_v44 = vsub.f32 %v308_v30, %v1210_v4 }
  0xab   : > { %7446 = vst [vmem:[#allocation18_spill] sm:$0xff] %v6039_v49  ;;  %5201 = vmatpush1.bf16.msra.mxu0 %v6039_v49  ;;  %v6074_v49 = vsub.f32 %v5864_v28, %v7450_v43  ;;  %v7455_v28 = vand.u32 4294901760, %v5888_v36  ;;  %7465 = vst [vmem:[#allocation22_spill] sm:$0xff] %v6180_v54  ;;  %v6195_v35 = vpack.c.bf16 %v1213_v58, %v1210_v4 }
  0xac   : > { %v6105_v39 = vsub.f32 %v5912_v42, %v7457_v32  ;;  %5203 = vmatprep.subr.bf16.mxu0 %v6064_v10  ;;  %v7462_v42 = vand.u32 4294901760, %v5944_v51  ;;  %v7463_v10 = vand.u32 4294901760, %v5965_v56  ;;  %v6199_v6 = vsub.f32 %v311_v52, %v1213_v58 }
  0xad   : > { %v6095_v43 = vsub.f32 %v5888_v36, %v7455_v28  ;;  %v7460_v36 = vand.u32 4294901760, %v5931_v47  ;;  %7466 = vst [vmem:[#allocation23_spill] sm:$0xff] %v6195_v35  ;;  %5391 = vmatpush3.bf16.msra.mxu1 %v6195_v35  ;;  %v323_v35 = vld [vmem:[%s7299_s3 + $0x178] sm:$0xff] }
  0xae   : > { %7458 = vst [vmem:[#allocation21_spill] sm:$0xff] %v6105_v39  ;;  %v6126_v32 = vsub.f32 %v5944_v51, %v7462_v42  ;;  %v6131_v46 = vsub.f32 %v5965_v56, %v7463_v10  ;;  %v6147_v51 = vsub.f32 %v299_v2, %v1201_v5  ;;  %v6149_v42 = vsub.f32 %v301_v8, %v356_v11  ;;  %v312_v2 = vld [vmem:[%s7299_s3 + $0x120] sm:$0xff]  ;;  %v314_v5 = vld [vmem:[%s7299_s3 + $0x130] sm:$0xff] }
  0xaf   : > { %v6116_v28 = vsub.f32 %v5931_v47, %v7460_v36  ;;  %v6136_v47 = vsub.f32 %v5970_v57, %v7464_v33  ;;  %v6139_v36 = vsub.f32 %v5984_v61, %v350_v0  ;;  %v6151_v56 = vsub.f32 %v304_v9, %v360_v12  ;;  %v313_v57 = vld [vmem:[%s7299_s3 + $0x128] sm:$0xff]  ;;  %v316_v61 = vld [vmem:[%s7299_s3 + $0x140] sm:$0xff]  ;;  %v319_v9 = vld [vmem:[%s7299_s3 + $0x158] sm:$0xff]  ;;  %5205 = vmatpush1.bf16.msra.mxu0 %v6180_v54 }
  0xb0   : > { %v6159_v0 = vsub.f32 %v300_v13, %v358_v26  ;;  %v6176_v8 = vsub.f32 %v307_v45, %v364_v37  ;;  %v322_v10 = vld [vmem:[%s7299_s3 + $0x170] sm:$0xff]  ;;  %v6193_v37 = vsub.f32 %v309_v34, %v370_v7  ;;  %v372_v29 = vand.u32 4294901760, %v313_v57  ;;  %5392 = vmatprep.subr.bf16.mxu1 %v7453_v18  ;;  %v321_v7 = vld [vmem:[%s7299_s3 + $0x168] sm:$0xff]  ;;  %v320_v33 = vld [vmem:[%s7299_s3 + $0x160] sm:$0xff] }
  0xb1   : > { %v376_v45 = vand.u32 4294901760, %v316_v61  ;;  %v374_v11 = vand.u32 4294901760, %v312_v2  ;;  %v378_v12 = vand.u32 4294901760, %v315_v3  ;;  %v1216_v13 = vand.u32 4294901760, %v314_v5  ;;  %v318_v34 = vld [vmem:[%s7299_s3 + $0x150] sm:$0xff] }
  0xb2   : > { %v380_v24 = vand.u32 4294901760, %v319_v9  ;;  %v384_v26 = vand.u32 4294901760, %v322_v10  ;;  %v6208_v52 = vsub.f32 %v313_v57, %v372_v29  ;;  %v6233_v54 = vsub.f32 %v317_v59, %v1219_v23 }
  0xb3   : > { %v6206_v30 = vpack.c.bf16 %v376_v45, %v372_v29  ;;  %v6210_v58 = vsub.f32 %v316_v61, %v376_v45  ;;  %v6213_v4 = vpack.c.bf16 %v378_v12, %v374_v11  ;;  %v6224_v57 = vsub.f32 %v312_v2, %v374_v11 }
  0xb4   : > { %v6226_v61 = vsub.f32 %v315_v3, %v378_v12  ;;  %v6228_v29 = vpack.c.bf16 %v1219_v23, %v1216_v13  ;;  %v6230_v45 = vsub.f32 %v314_v5, %v1216_v13  ;;  %v6235_v14 = vpack.c.bf16 %v384_v26, %v380_v24 }
  0xb5   : > { %7467 = vst [vmem:[#allocation24_spill] sm:$0xff] %v6206_v30  ;;  %7468 = vst [vmem:[#allocation25_spill] sm:$0xff] %v6210_v58  ;;  %5207 = vmatprep.subr.bf16.mxu0 %v6206_v30  ;;  %v6237_v25 = vsub.f32 %v319_v9, %v380_v24  ;;  %v6239_v58 = vsub.f32 %v322_v10, %v384_v26  ;;  %v382_v2 = vand.u32 4294901760, %v318_v34  ;;  %v386_v3 = vand.u32 4294901760, %v321_v7 }
  0xb6   : > { %7469 = vst [vmem:[#allocation26_spill] sm:$0xff] %v6213_v4  ;;  %7470 = vst [vmem:[#allocation27_spill] sm:$0xff] %v6228_v29  ;;  %5209 = vmatpush1.bf16.msra.mxu0 %v6213_v4  ;;  %5394 = vmatpush3.bf16.msra.mxu1 %v6228_v29  ;;  %v1222_v11 = vand.u32 4294901760, %v320_v33  ;;  %v1225_v12 = vand.u32 4294901760, %v323_v35  ;;  %v7362_v5 = vand.u32 4294901760, %v5832_v15  ;;  %v7361_v59 = vand.u32 4294901760, %v5834_v16 }
  0xb7   : > { %7471 = vst [vmem:[#allocation28_spill] sm:$0xff] %v6235_v14  ;;  %5211 = vmatprep.subr.bf16.mxu0 %v6235_v14  ;;  %5395 = vmatprep.subr.bf16.mxu1 %v7453_v18  ;;  %v6247_v9 = vpack.c.bf16 %v386_v3, %v382_v2  ;;  %v6249_v10 = vsub.f32 %v318_v34, %v382_v2  ;;  %v7363_v24 = vmov 0.0   ;;  %v7385_v4 = vand.u32 4294901760, %v6079_v38 }
  0xb8   : > { %v6251_v13 = vsub.f32 %v321_v7, %v386_v3  ;;  %v6253_v23 = vpack.c.bf16 %v1225_v12, %v1222_v11  ;;  %420 = vmatprep.mubr.f32.mxu0 %v7363_v24  ;;  %v6256_v26 = vsub.f32 %v320_v33, %v1222_v11  ;;  %v6258_v14 = vsub.f32 %v323_v35, %v1225_v12 }
  0xb9   : > { %7472 = vst [vmem:[#allocation29_spill] sm:$0xff] %v6247_v9  ;;  %v435_v29 = vsub.f32 %v5832_v15, %v7362_v5  ;;  %v447_v34 = vsub.f32 %v5834_v16, %v7361_v59  ;;  %4674 = vmatprep.mubr.msk.f32.mxu1 %vm5755_vm0, %v7363_v24  ;;  %v7369_v7 = vand.u32 4294901760, %v5836_v17  ;;  %v7372_v35 = vand.u32 4294901760, %v5840_v19 }
  0xba   : > { %7473 = vst [vmem:[#allocation30_spill] sm:$0xff] %v6253_v23  ;;  %7474 = vst [vmem:[#allocation31_spill] sm:$0xff] %v6256_v26  ;;  %5213 = vmatpush1.bf16.msra.mxu0 %v6247_v9  ;;  %5397 = vmatpush3.bf16.msra.mxu1 %v6253_v23  ;;  %v7378_v33 = vand.u32 4294901760, %v5844_v21  ;;  %v7381_v12 = vand.u32 4294901760, %v6069_v53  ;;  %v7476_v9 = vand.u32 4294901760, %v6074_v49 }
  0xbb   : > { %v436_v3 = vand.u32 4294901760, %v435_v29  ;;  %v448_v11 = vand.u32 4294901760, %v447_v34  ;;  %5398 = vmatprep.subr.bf16.mxu1 %v7453_v18  ;;  %v441_v5 = vsub.f32 %v5836_v17, %v7369_v7  ;;  %v453_v24 = vsub.f32 %v5840_v19, %v7372_v35 }
  0xbc   : > { %v1274_v2 = vsub.f32 %v5844_v21, %v7378_v33  ;;  %v7475_v29 = vand.u32 4294901760, %v5847_v22  ;;  %v459_v59 = vsub.f32 %v6069_v53, %v7381_v12  ;;  %v471_v7 = vsub.f32 %v6074_v49, %v7476_v9 }
  0xbd   : > { %v5214_v23 = vpack.c.bf16 %v448_v11, %v436_v3  ;;  %v442_v35 = vand.u32 4294901760, %v441_v5  ;;  %v454_v30 = vand.u32 4294901760, %v453_v24  ;;  %v465_v3 = vsub.f32 %v6079_v38, %v7385_v4 }
  0xbe   : > { %v1281_v34 = vsub.f32 %v5847_v22, %v7475_v29  ;;  %v1275_v18 = vand.u32 4294901760, %v1274_v2  ;;  %v460_v33 = vand.u32 4294901760, %v459_v59  ;;  %v472_v21 = vand.u32 4294901760, %v471_v7 }
  0xbf   : > { %5215 = vmatprep.subr.bf16.mxu0 %v5214_v23  ;;  %v7382_v11 = vand.u32 4294901760, %v6084_v20  ;;  %v6300_v29 = vpack.c.bf16 %v454_v30, %v442_v35  ;;  %v7383_v9 = vand.u32 4294901760, %v6090_v55  ;;  %v7384_v5 = vand.u32 4294901760, %v6095_v43 }
  0xc0   : > { %v1282_v19 = vand.u32 4294901760, %v1281_v34  ;;  %v6306_v24 = vpack.c.bf16 %v472_v21, %v460_v33  ;;  %v466_v2 = vand.u32 4294901760, %v465_v3  ;;  %v7386_v23 = vand.u32 4294901760, %v6100_v40 }
  0xc1   : > { %7477 = vst [vmem:[#allocation32_spill] sm:$0xff] %v6300_v29  ;;  %v477_v59 = vsub.f32 %v6084_v20, %v7382_v11  ;;  %v1288_v30 = vsub.f32 %v6090_v55, %v7383_v9  ;;  %v7395_v21 = vand.u32 4294901760, %v6111_v27  ;;  %v7390_v33 = vand.u32 4294901760, %v6116_v28 }
  0xc2   : > { %v6302_v12 = vpack.c.bf16 %v1282_v19, %v1275_v18  ;;  %7479 = vst [vmem:[#allocation34_spill] sm:$0xff] %v6306_v24  ;;  %v1295_v18 = vsub.f32 %v6095_v43, %v7384_v5  ;;  %v7387_v19 = vand.u32 4294901760, %v6105_v39  ;;  %v483_v35 = vsub.f32 %v6100_v40, %v7386_v23 }
  0xc3   : > { %v478_v7 = vand.u32 4294901760, %v477_v59  ;;  %v7391_v34 = vand.u32 4294901760, %v6121_v31  ;;  %v1289_v3 = vand.u32 4294901760, %v1288_v30  ;;  %v489_v5 = vsub.f32 %v6111_v27, %v7395_v21 }
  0xc4   : > { %7478 = vst [vmem:[#allocation33_spill] sm:$0xff] %v6302_v12  ;;  %v1296_v11 = vand.u32 4294901760, %v1295_v18  ;;  %v495_v9 = vsub.f32 %v6105_v39, %v7387_v19  ;;  %v484_v59 = vand.u32 4294901760, %v483_v35  ;;  %v501_v23 = vsub.f32 %v6116_v28, %v7390_v33 }
  0xc5   : > { %v6331_v4 = vpack.c.bf16 %v478_v7, %v466_v2  ;;  %v1302_v30 = vsub.f32 %v6121_v31, %v7391_v34  ;;  %v490_v12 = vand.u32 4294901760, %v489_v5  ;;  %v7392_v19 = vand.u32 4294901760, %v6126_v32 }
  0xc6   : > { %v6339_v18 = vpack.c.bf16 %v1296_v11, %v1289_v3  ;;  %v496_v24 = vand.u32 4294901760, %v495_v9  ;;  %v502_v29 = vand.u32 4294901760, %v501_v23  ;;  %v7393_v2 = vand.u32 4294901760, %v6131_v46 }
  0xc7   : > { %7480 = vst [vmem:[#allocation35_spill] sm:$0xff] %v6331_v4  ;;  %v1303_v39 = vand.u32 4294901760, %v1302_v30  ;;  %v7394_v7 = vand.u32 4294901760, %v6136_v47  ;;  %v1309_v33 = vsub.f32 %v6126_v32, %v7392_v19  ;;  %v7396_v34 = vand.u32 4294901760, %v6139_v36 }
  0xc8   : > { %7481 = vst [vmem:[#allocation36_spill] sm:$0xff] %v6339_v18  ;;  %v6344_v35 = vpack.c.bf16 %v496_v24, %v484_v59  ;;  %v7397_v11 = vand.u32 4294901760, %v6142_v48  ;;  %v6351_v9 = vpack.c.bf16 %v502_v29, %v490_v12  ;;  %v507_v5 = vsub.f32 %v6131_v46, %v7393_v2 }
  0xc9   : > { %v519_v23 = vsub.f32 %v6136_v47, %v7394_v7  ;;  %v7398_v24 = vand.u32 4294901760, %v6145_v41  ;;  %v1310_v3 = vand.u32 4294901760, %v1309_v33  ;;  %v513_v59 = vsub.f32 %v6139_v36, %v7396_v34 }
  0xca   : > { %7482 = vst [vmem:[#allocation37_spill] sm:$0xff] %v6344_v35  ;;  %7483 = vst [vmem:[#allocation38_spill] sm:$0xff] %v6351_v9  ;;  %v525_v12 = vsub.f32 %v6142_v48, %v7397_v11  ;;  %v7401_v29 = vand.u32 4294901760, %v6147_v51  ;;  %v508_v30 = vand.u32 4294901760, %v507_v5  ;;  %v7400_v7 = vand.u32 4294901760, %v6149_v42 }
  0xcb   : > { %v520_v19 = vand.u32 4294901760, %v519_v23  ;;  %v1316_v2 = vsub.f32 %v6145_v41, %v7398_v24  ;;  %v6371_v21 = vpack.c.bf16 %v1310_v3, %v1303_v39  ;;  %v514_v33 = vand.u32 4294901760, %v513_v59 }
  0xcc   : > { %v526_v9 = vand.u32 4294901760, %v525_v12  ;;  %v1323_v34 = vsub.f32 %v6147_v51, %v7401_v29  ;;  %v531_v5 = vsub.f32 %v6149_v42, %v7400_v7  ;;  %v7399_v23 = vand.u32 4294901760, %v6151_v56 }
  0xcd   : > { %7484 = vst [vmem:[#allocation39_spill] sm:$0xff] %v6371_v21  ;;  %v6376_v35 = vpack.c.bf16 %v520_v19, %v508_v30  ;;  %v1317_v11 = vand.u32 4294901760, %v1316_v2  ;;  %v7402_v39 = vand.u32 4294901760, %v6159_v0  ;;  %v7403_v3 = vand.u32 4294901760, %v6161_v62 }
  0xce   : > { %v6382_v24 = vpack.c.bf16 %v526_v9, %v514_v33  ;;  %v1324_v18 = vand.u32 4294901760, %v1323_v34  ;;  %v532_v59 = vand.u32 4294901760, %v531_v5  ;;  %v543_v19 = vsub.f32 %v6151_v56, %v7399_v23 }
  0xcf   : > { %7485 = vst [vmem:[#allocation40_spill] sm:$0xff] %v6376_v35  ;;  %v7404_v2 = vand.u32 4294901760, %v6163_v63  ;;  %v7405_v12 = vand.u32 4294901760, %v6165_v1  ;;  %v537_v9 = vsub.f32 %v6159_v0, %v7402_v39  ;;  %v549_v34 = vsub.f32 %v6161_v62, %v7403_v3 }
  0xd0   : > { %7486 = vst [vmem:[#allocation41_spill] sm:$0xff] %v6382_v24  ;;  %v6391_v30 = vpack.c.bf16 %v1324_v18, %v1317_v11  ;;  %v7406_v33 = vand.u32 4294901760, %v6176_v8  ;;  %v544_v5 = vand.u32 4294901760, %v543_v19  ;;  %v7407_v11 = vand.u32 4294901760, %v6178_v60 }
  0xd1   : > { %v1330_v23 = vsub.f32 %v6163_v63, %v7404_v2  ;;  %v1337_v18 = vsub.f32 %v6165_v1, %v7405_v12  ;;  %v538_v7 = vand.u32 4294901760, %v537_v9  ;;  %v550_v29 = vand.u32 4294901760, %v549_v34 }
  0xd2   : > { %7487 = vst [vmem:[#allocation42_spill] sm:$0xff] %v6391_v30  ;;  %v555_v39 = vsub.f32 %v6176_v8, %v7406_v33  ;;  %v7409_v3 = vand.u32 4294901760, %v6182_v50  ;;  %v6411_v30 = vpack.c.bf16 %v544_v5, %v532_v59  ;;  %v567_v2 = vsub.f32 %v6178_v60, %v7407_v11 }
  0xd3   : > { %v1331_v19 = vand.u32 4294901760, %v1330_v23  ;;  %v1338_v24 = vand.u32 4294901760, %v1337_v18  ;;  %v6416_v35 = vpack.c.bf16 %v550_v29, %v538_v7  ;;  %v7408_v34 = vand.u32 4294901760, %v6193_v37 }
  0xd4   : > { %7488 = vst [vmem:[#allocation43_spill] sm:$0xff] %v6411_v30  ;;  %v556_v12 = vand.u32 4294901760, %v555_v39  ;;  %v561_v9 = vsub.f32 %v6182_v50, %v7409_v3  ;;  %v568_v21 = vand.u32 4294901760, %v567_v2  ;;  %v7410_v59 = vand.u32 4294901760, %v6197_v44  ;;  %v7491_v39 = vld [vmem:[#allocation25_spill] sm:$0xff] }
  0xd5   : > { %7489 = vst [vmem:[#allocation44_spill] sm:$0xff] %v6416_v35  ;;  %v6422_v33 = vpack.c.bf16 %v1338_v24, %v1331_v19  ;;  %v7411_v23 = vand.u32 4294901760, %v6199_v6  ;;  %v573_v7 = vsub.f32 %v6193_v37, %v7408_v34  ;;  %v7412_v29 = vand.u32 4294901760, %v6208_v52 }
  0xd6   : > { %v562_v5 = vand.u32 4294901760, %v561_v9  ;;  %v7413_v18 = vand.u32 4294901760, %v7491_v39  ;;  %v6431_v11 = vpack.c.bf16 %v568_v21, %v556_v12  ;;  %v1344_v24 = vsub.f32 %v6197_v44, %v7410_v59 }
  0xd7   : > { %7490 = vst [vmem:[#allocation45_spill] sm:$0xff] %v6422_v33  ;;  %v1351_v2 = vsub.f32 %v6199_v6, %v7411_v23  ;;  %v7414_v19 = vand.u32 4294901760, %v6224_v57  ;;  %v574_v9 = vand.u32 4294901760, %v573_v7  ;;  %v579_v34 = vsub.f32 %v6208_v52, %v7412_v29 }
  0xd8   : > { %7492 = vst [vmem:[#allocation25_spill] sm:$0xff] %v6431_v11  ;;  %v591_v21 = vsub.f32 %v7491_v39, %v7413_v18  ;;  %v7417_v12 = vand.u32 4294901760, %v6226_v61  ;;  %v1345_v3 = vand.u32 4294901760, %v1344_v24  ;;  %v7416_v23 = vand.u32 4294901760, %v6230_v45 }
  0xd9   : > { %v1352_v11 = vand.u32 4294901760, %v1351_v2  ;;  %v585_v59 = vsub.f32 %v6224_v57, %v7414_v19  ;;  %v6451_v33 = vpack.c.bf16 %v574_v9, %v562_v5  ;;  %v580_v7 = vand.u32 4294901760, %v579_v34 }
  0xda   : > { %v592_v35 = vand.u32 4294901760, %v591_v21  ;;  %v597_v29 = vsub.f32 %v6226_v61, %v7417_v12  ;;  %v1358_v24 = vsub.f32 %v6230_v45, %v7416_v23  ;;  %v7415_v2 = vand.u32 4294901760, %v6233_v54 }
  0xdb   : > { %7493 = vst [vmem:[#allocation46_spill] sm:$0xff] %v6451_v33  ;;  %v6456_v30 = vpack.c.bf16 %v1352_v11, %v1345_v3  ;;  %v586_v18 = vand.u32 4294901760, %v585_v59  ;;  %v7418_v5 = vand.u32 4294901760, %v6237_v25  ;;  %v7419_v34 = vand.u32 4294901760, %v6239_v58  ;;  %v7498_v33 = vld [vmem:[#allocation6_spill] sm:$0xff] }
  0xdc   : > { %v6462_v19 = vpack.c.bf16 %v592_v35, %v580_v7  ;;  %v598_v4 = vand.u32 4294901760, %v597_v29  ;;  %v1359_v9 = vand.u32 4294901760, %v1358_v24  ;;  %v1365_v3 = vsub.f32 %v6233_v54, %v7415_v2 }
  0xdd   : > { %7494 = vst [vmem:[#allocation47_spill] sm:$0xff] %v6456_v30  ;;  %v7420_v11 = vand.u32 4294901760, %v6249_v10  ;;  %v7421_v59 = vand.u32 4294901760, %v6251_v13  ;;  %v603_v35 = vsub.f32 %v6237_v25, %v7418_v5  ;;  %v615_v29 = vsub.f32 %v6239_v58, %v7419_v34 }
  0xde   : > { %7495 = vst [vmem:[#allocation48_spill] sm:$0xff] %v6462_v19  ;;  %v6471_v21 = vpack.c.bf16 %v598_v4, %v586_v18  ;;  %v7422_v7 = vand.u32 4294901760, %v6256_v26  ;;  %v1366_v24 = vand.u32 4294901760, %v1365_v3  ;;  %v7425_v18 = vand.u32 4294901760, %v6258_v14 }
  0xdf   : > { %v609_v2 = vsub.f32 %v6249_v10, %v7420_v11  ;;  %v621_v4 = vsub.f32 %v6251_v13, %v7421_v59  ;;  %v604_v23 = vand.u32 4294901760, %v603_v35  ;;  %v616_v12 = vand.u32 4294901760, %v615_v29  ;;  %v7497_v35 = vld [vmem:[#allocation4_spill] sm:$0xff] }
  0xe0   : > { %7496 = vst [vmem:[#allocation49_spill] sm:$0xff] %v6471_v21  ;;  %v1372_v5 = vsub.f32 %v6256_v26, %v7422_v7  ;;  %v6492_v3 = vpack.c.bf16 %v1366_v24, %v1359_v9  ;;  %v1379_v11 = vsub.f32 %v6258_v14, %v7425_v18 }
  0xe1   : > { %v610_v21 = vand.u32 4294901760, %v609_v2  ;;  %v622_v19 = vand.u32 4294901760, %v621_v4  ;;  %v6497_v59 = vpack.c.bf16 %v616_v12, %v604_v23  ;;  %v7499_v12 = vld [vmem:[#allocation21_spill] sm:$0xff]  ;;  %v7501_v2 = vld [vmem:[#allocation7_spill] sm:$0xff] }
  0xe2   : > { %v1373_v30 = vand.u32 4294901760, %v1372_v5  ;;  %v1380_v34 = vand.u32 4294901760, %v1379_v11  ;;  %v7500_v11 = vld [vmem:[#allocation31_spill] sm:$0xff]  ;;  %v4385_v5 = vld [vmem:[%s7297_s1] ss:$0 sm:$0xff] }
  0xe3   : > { %v6503_v26 = vpack.c.bf16 %v622_v19, %v610_v21  ;;  %v4386_v19 = vld [vmem:[%s7298_s2] ss:$0 sm:$0xff] }
  0xe4   : > { %v6517_v21 = vpack.c.bf16 %v1380_v34, %v1373_v30 }
 0x134   : > { %v257_v23 = vpop.xlane.xlu0 %256 }
 0x135   : > { %v258_v4 = vmul.f32 0.0078125, %v257_v23 }
 0x137   : > { %v259_v9 = vadd.f32 1e-05, %v258_v4 }
 0x139   : > { %5734 = vrsqrt.f32 %v259_v9 }
 0x143   : > { %v5735_v18 = vpop.eup %5734 }
 0x144   : > { %v261_v24 = vmul.f32 %v5735_v18, %v7501_v2  ;;  %v7504_v18 = vld [vmem:[#allocation32_spill] sm:$0xff]  ;;  %v7505_v2 = vld [vmem:[#allocation33_spill] sm:$0xff] }
 0x146   : > { %v268_v7 = vmul.f32 %v4385_v5, %v261_v24  ;;  %v7506_v5 = vld [vmem:[#allocation34_spill] sm:$0xff]  ;;  %v7508_v24 = vmov 0.0  }
 0x148   : > { %v275_v30 = vadd.f32 %v4386_v19, %v268_v7  ;;  %v7507_v7 = vmov 0.0|0.0   ;;  %v7509_v19 = vld [vmem:[#allocation35_spill] sm:$0xff] }
 0x14a   : > { %v6556_v29 = vand.u32 4294901760, %v275_v30 }
 0x14c   : > { %v6559_v34 = vsub.f32 %v275_v30, %v6556_v29  ;;  %v7510_v30 = vld [vmem:[#allocation36_spill] sm:$0xff] }
 0x14e   : > { %7502 = vst [vmem:[#allocation4_spill] sm:$0xff] %v6559_v34  ;;  %v6562_v9 = vand.u32 4294901760, %v6559_v34 }
 0x150   : > { %7503 = vst [vmem:[#allocation6_spill] sm:$0xff] %v6562_v9  ;;  %v424_v23 = vsub.f32 %v6559_v34, %v6562_v9  ;;  %v7516_v9 = vld [vmem:[#allocation42_spill] sm:$0xff]  ;;  %v7517_v34 = vld [vmem:[#allocation43_spill] sm:$0xff] }
 0x152   : > { %v425_v4 = vand.u32 4294901760, %v424_v23  ;;  %v7511_v23 = vld [vmem:[#allocation37_spill] sm:$0xff] }
 0x154   : > { %426 = vmatmul.mubr.f32.vlgmr.msra.gmra.mrb[0].mxu0 %v425_v4  ;;  %4675 = vmatmul.mubr.f32.vlgmr.msra.gmra.mrb[0].mxu1 %v425_v4  ;;  %v7512_v4 = vld [vmem:[#allocation38_spill] sm:$0xff] }
 0x155   : > { %5217 = vmatpush1.bf16.msra.mxu0 %v7504_v18  ;;  %5400 = vmatpush3.bf16.msra.mxu1 %v7505_v2  ;;  %v7513_v18 = vld [vmem:[#allocation39_spill] sm:$0xff]  ;;  %v7514_v2 = vld [vmem:[#allocation40_spill] sm:$0xff] }
 0x156   : > { %5219 = vmatprep.subr.bf16.mxu0 %v7506_v5  ;;  %5401 = vmatprep.subr.bf16.mxu1 %v7507_v7  ;;  %v7515_v5 = vld [vmem:[#allocation41_spill] sm:$0xff] }
 0x157   : > { %656 = vmatprep.mubr.f32.mxu0 %v7508_v24  ;;  %4709 = vmatprep.mubr.msk.f32.mxu1 %vm5755_vm0, %v7508_v24 }
 0x159   : > { %5221 = vmatpush1.bf16.msra.mxu0 %v7509_v19  ;;  %5403 = vmatpush3.bf16.msra.mxu1 %v7510_v30  ;;  %v7518_v19 = vld [vmem:[#allocation44_spill] sm:$0xff]  ;;  %v7519_v30 = vld [vmem:[#allocation45_spill] sm:$0xff] }
 0x15a   : > { %5223 = vmatprep.subr.bf16.mxu0 %v7511_v23  ;;  %5404 = vmatprep.subr.bf16.mxu1 %v7507_v7  ;;  %v7520_v23 = vld [vmem:[#allocation25_spill] sm:$0xff] }
 0x15d   : > { %5225 = vmatpush1.bf16.msra.mxu0 %v7512_v4  ;;  %5406 = vmatpush3.bf16.msra.mxu1 %v7513_v18  ;;  %v7521_v4 = vld [vmem:[#allocation46_spill] sm:$0xff]  ;;  %v7522_v18 = vld [vmem:[#allocation47_spill] sm:$0xff] }
 0x15e   : > { %5227 = vmatprep.subr.bf16.mxu0 %v7514_v2  ;;  %5407 = vmatprep.subr.bf16.mxu1 %v7507_v7  ;;  %v7523_v2 = vld [vmem:[#allocation48_spill] sm:$0xff] }
 0x161   : > { %5229 = vmatpush1.bf16.msra.mxu0 %v7515_v5  ;;  %5409 = vmatpush3.bf16.msra.mxu1 %v7516_v9  ;;  %v7524_v9 = vld [vmem:[#allocation49_spill] sm:$0xff]  ;;  %v7530_v5 = vpack.c.bf16 %v6095_v43, %v6090_v55 }
 0x162   : > { %5231 = vmatprep.subr.bf16.mxu0 %v7517_v34  ;;  %5410 = vmatprep.subr.bf16.mxu1 %v7507_v7  ;;  %v7525_v34 = vpack.c.bf16 %v5834_v16, %v5832_v15 }
 0x165   : > { %5233 = vmatpush1.bf16.msra.mxu0 %v7518_v19  ;;  %5412 = vmatpush3.bf16.msra.mxu1 %v7519_v30  ;;  %v7531_v19 = vpack.c.bf16 %v7499_v12, %v6100_v40  ;;  %v7532_v30 = vpack.c.bf16 %v6116_v28, %v6111_v27 }
 0x166   : > { %5235 = vmatprep.subr.bf16.mxu0 %v7520_v23  ;;  %5413 = vmatprep.subr.bf16.mxu1 %v7507_v7  ;;  %v7533_v23 = vpack.c.bf16 %v6126_v32, %v6121_v31 }
 0x169   : > { %5237 = vmatpush1.bf16.msra.mxu0 %v7521_v4  ;;  %5415 = vmatpush3.bf16.msra.mxu1 %v7522_v18  ;;  %v7534_v4 = vpack.c.bf16 %v6136_v47, %v6131_v46  ;;  %v7535_v18 = vpack.c.bf16 %v6142_v48, %v6139_v36 }
 0x16a   : > { %5239 = vmatprep.subr.bf16.mxu0 %v7523_v2  ;;  %5416 = vmatprep.subr.bf16.mxu1 %v7507_v7  ;;  %v7536_v2 = vpack.c.bf16 %v6147_v51, %v6145_v41 }
 0x16d   : > { %5241 = vmatpush1.bf16.msra.mxu0 %v7524_v9  ;;  %5418 = vmatpush3.bf16.msra.mxu1 %v6492_v3  ;;  %v7526_v3 = vpack.c.bf16 %v7497_v35, %v5836_v17  ;;  %v7537_v9 = vpack.c.bf16 %v6151_v56, %v6149_v42 }
 0x16e   : > { %5243 = vmatprep.subr.bf16.mxu0 %v6497_v59  ;;  %5419 = vmatprep.subr.bf16.mxu1 %v7507_v7  ;;  %v7527_v59 = vpack.c.bf16 %v5847_v22, %v7498_v33 }
 0x171   : > { %5245 = vmatpush1.bf16.msra.mxu0 %v6503_v26  ;;  %5421 = vmatpush3.bf16.msra.mxu1 %v6517_v21  ;;  %v7528_v26 = vpack.c.bf16 %v6074_v49, %v6069_v53  ;;  %v7529_v21 = vpack.c.bf16 %v6084_v20, %v6079_v38 }
 0x172   : > { %5247 = vmatprep.subr.bf16.mxu0 %v7525_v34  ;;  %5422 = vmatprep.subr.bf16.mxu1 %v7507_v7  ;;  %v7538_v34 = vpack.c.bf16 %v6161_v62, %v6159_v0 }
 0x174   : > { %658 = vmatmul.mubr.f32.vlgmr.msra.gmra.mrb[0].mxu0 %v6556_v29  ;;  %4710 = vmatmul.mubr.f32.vlgmr.msra.gmra.mrb[0].mxu1 %v6556_v29 }
 0x175   : > { %5249 = vmatpush1.bf16.msra.mxu0 %v7526_v3  ;;  %5424 = vmatpush3.bf16.msra.mxu1 %v7527_v59  ;;  %v7539_v3 = vpack.c.bf16 %v6165_v1, %v6163_v63  ;;  %v7540_v59 = vpack.c.bf16 %v6178_v60, %v6176_v8 }
 0x176   : > { %5251 = vmatprep.subr.bf16.mxu0 %v7528_v26  ;;  %5425 = vmatprep.subr.bf16.mxu1 %v7507_v7  ;;  %v7541_v26 = vpack.c.bf16 %v6193_v37, %v6182_v50 }
 0x177   : > { %792 = vmatprep.mubr.f32.mxu0 %v7508_v24  ;;  %4744 = vmatprep.mubr.msk.f32.mxu1 %vm5755_vm0, %v7508_v24 }
 0x179   : > { %5253 = vmatpush1.bf16.msra.mxu0 %v7529_v21  ;;  %5427 = vmatpush3.bf16.msra.mxu1 %v7530_v5  ;;  %v7542_v21 = vpack.c.bf16 %v6199_v6, %v6197_v44  ;;  %v7543_v5 = vpack.c.bf16 %v7491_v39, %v6208_v52 }
 0x17a   : > { %5255 = vmatprep.subr.bf16.mxu0 %v7531_v19  ;;  %5428 = vmatprep.subr.bf16.mxu1 %v7507_v7  ;;  %v7544_v19 = vpack.c.bf16 %v6226_v61, %v6224_v57 }
 0x17d   : > { %5257 = vmatpush1.bf16.msra.mxu0 %v7532_v30  ;;  %5430 = vmatpush3.bf16.msra.mxu1 %v7533_v23  ;;  %v7545_v30 = vpack.c.bf16 %v6233_v54, %v6230_v45  ;;  %v7546_v23 = vpack.c.bf16 %v6239_v58, %v6237_v25 }
 0x17e   : > { %5259 = vmatprep.subr.bf16.mxu0 %v7534_v4  ;;  %5431 = vmatprep.subr.bf16.mxu1 %v7507_v7  ;;  %v7547_v4 = vpack.c.bf16 %v6251_v13, %v6249_v10 }
 0x181   : > { %5261 = vmatpush1.bf16.msra.mxu0 %v7535_v18  ;;  %5433 = vmatpush3.bf16.msra.mxu1 %v7536_v2  ;;  %v7548_v18 = vpack.c.bf16 %v6258_v14, %v7500_v11  ;;  %v7549_v2 = vld [vmem:[#allocation2_spill] sm:$0xff] }
 0x182   : > { %5263 = vmatprep.subr.bf16.mxu0 %v7537_v9  ;;  %5434 = vmatprep.subr.bf16.mxu1 %v7507_v7  ;;  %v7550_v9 = vld [vmem:[#allocation4_spill] sm:$0xff] }
 0x185   : > { %5265 = vmatpush1.bf16.msra.mxu0 %v7538_v34  ;;  %5436 = vmatpush3.bf16.msra.mxu1 %v7539_v3  ;;  %v7551_v34 = vld [vmem:[#allocation3_spill] sm:$0xff]  ;;  %v7552_v3 = vld [vmem:[#allocation5_spill] sm:$0xff] }
 0x186   : > { %5267 = vmatprep.subr.bf16.mxu0 %v7540_v59  ;;  %5437 = vmatprep.subr.bf16.mxu1 %v7507_v7  ;;  %v7553_v59 = vld [vmem:[#allocation8_spill] sm:$0xff] }
 0x189   : > { %5269 = vmatpush1.bf16.msra.mxu0 %v7541_v26  ;;  %5439 = vmatpush3.bf16.msra.mxu1 %v7542_v21  ;;  %v7554_v26 = vld [vmem:[#allocation9_spill] sm:$0xff]  ;;  %v7555_v21 = vld [vmem:[#allocation10_spill] sm:$0xff] }
 0x18a   : > { %5271 = vmatprep.subr.bf16.mxu0 %v7543_v5  ;;  %5440 = vmatprep.subr.bf16.mxu1 %v7507_v7  ;;  %v7556_v5 = vld [vmem:[#allocation11_spill] sm:$0xff] }
 0x18d   : > { %5273 = vmatpush1.bf16.msra.mxu0 %v7544_v19  ;;  %5442 = vmatpush3.bf16.msra.mxu1 %v7545_v30  ;;  %v7557_v19 = vld [vmem:[#allocation12_spill] sm:$0xff]  ;;  %v7558_v30 = vld [vmem:[#allocation13_spill] sm:$0xff] }
 0x18e   : > { %5275 = vmatprep.subr.bf16.mxu0 %v7546_v23  ;;  %5443 = vmatprep.subr.bf16.mxu1 %v7507_v7  ;;  %v7559_v23 = vld [vmem:[#allocation14_spill] sm:$0xff] }
 0x191   : > { %5277 = vmatpush1.bf16.msra.mxu0 %v7547_v4  ;;  %5445 = vmatpush3.bf16.msra.mxu1 %v7548_v18  ;;  %v7560_v4 = vld [vmem:[#allocation15_spill] sm:$0xff]  ;;  %v7561_v18 = vld [vmem:[#allocation16_spill] sm:$0xff] }
 0x192   : > { %5279 = vmatprep.subr.bf16.mxu0 %v7549_v2  ;;  %5446 = vmatprep.subr.bf16.mxu1 %v7507_v7 }
 0x194   : > { %795 = vmatmul.mubr.f32.vlgmr.msra.gmra.mrb[0].mxu0 %v7550_v9  ;;  %4745 = vmatmul.mubr.f32.vlgmr.msra.gmra.mrb[0].mxu1 %v7550_v9  ;;  %v7562_v9 = vld [vmem:[#allocation17_spill] sm:$0xff] }
 0x195   : > { %5281 = vmatpush1.bf16.msra.mxu0 %v7551_v34  ;;  %5448 = vmatpush3.bf16.msra.mxu1 %v7552_v3 }
 0x196   : > { %5283 = vmatprep.subr.bf16.mxu0 %v7553_v59  ;;  %5449 = vmatprep.subr.bf16.mxu1 %v7507_v7  ;;  %v7577_v59 = vand.u32 4294901760, %v7497_v35  ;;  %v7585_v35 = vand.u32 4294901760, %v6090_v55 }
 0x197   : > { %897 = vmatprep.mubr.f32.mxu0 %v7508_v24  ;;  %4779 = vmatprep.mubr.msk.f32.mxu1 %vm5755_vm0, %v7508_v24 }
 0x199   : > { %5285 = vmatpush1.bf16.msra.mxu0 %v7554_v26  ;;  %5451 = vmatpush3.bf16.msra.mxu1 %v7555_v21  ;;  %v7563_v21 = vld [vmem:[#allocation18_spill] sm:$0xff]  ;;  %v7565_v26 = vld [vmem:[#allocation20_spill] sm:$0xff] }
 0x19a   : > { %5287 = vmatprep.subr.bf16.mxu0 %v7556_v5  ;;  %5452 = vmatprep.subr.bf16.mxu1 %v7507_v7  ;;  %v7564_v5 = vld [vmem:[#allocation19_spill] sm:$0xff] }
 0x19d   : > { %5289 = vmatpush1.bf16.msra.mxu0 %v7557_v19  ;;  %5454 = vmatpush3.bf16.msra.mxu1 %v7558_v30  ;;  %v7566_v30 = vld [vmem:[#allocation22_spill] sm:$0xff]  ;;  %v7568_v19 = vld [vmem:[#allocation24_spill] sm:$0xff] }
 0x19e   : > { %5291 = vmatprep.subr.bf16.mxu0 %v7559_v23  ;;  %5455 = vmatprep.subr.bf16.mxu1 %v7507_v7  ;;  %v7567_v23 = vld [vmem:[#allocation23_spill] sm:$0xff] }
 0x1a1   : > { %5293 = vmatpush1.bf16.msra.mxu0 %v7560_v4  ;;  %5457 = vmatpush3.bf16.msra.mxu1 %v7561_v18  ;;  %v7569_v18 = vld [vmem:[#allocation26_spill] sm:$0xff]  ;;  %v7571_v4 = vld [vmem:[#allocation28_spill] sm:$0xff] }
 0x1a2   : > { %5295 = vmatprep.subr.bf16.mxu0 %v7562_v9  ;;  %5458 = vmatprep.subr.bf16.mxu1 %v7507_v7  ;;  %v7570_v9 = vld [vmem:[#allocation27_spill] sm:$0xff] }
 0x1a5   : > { %5297 = vmatpush1.bf16.msra.mxu0 %v7563_v21  ;;  %5460 = vmatpush3.bf16.msra.mxu1 %v7564_v5  ;;  %v7573_v5 = vand.u32 4294901760, %v5834_v16  ;;  %v7581_v16 = vand.u32 4294901760, %v6074_v49  ;;  %v7587_v49 = vand.u32 4294901760, %v6100_v40 }
 0x1a6   : > { %5299 = vmatprep.subr.bf16.mxu0 %v7565_v26  ;;  %5461 = vmatprep.subr.bf16.mxu1 %v7507_v7  ;;  %v7572_v26 = vand.u32 4294901760, %v5832_v15  ;;  %v7580_v15 = vand.u32 4294901760, %v6069_v53  ;;  %v7588_v53 = vand.u32 4294901760, %v7499_v12  ;;  %v7593_v12 = vand.u32 4294901760, %v6131_v46 }
 0x1a7   : > { %v7599_v46 = vand.u32 4294901760, %v6149_v42  ;;  %v7605_v42 = vand.u32 4294901760, %v6176_v8  ;;  %v7611_v8 = vand.u32 4294901760, %v6208_v52  ;;  %v7617_v52 = vand.u32 4294901760, %v6237_v25  ;;  %v7623_v25 = vld [vmem:[#allocation5_spill] sm:$0xff] }
 0x1a8   : > { %v5310_v21 = vpack.c.bf16 %v7573_v5, %v7572_v26  ;;  %v5314_v26 = vpack.c.bf16 %v7581_v16, %v7580_v15  ;;  %v7582_v5 = vld [vmem:[#allocation6_spill] sm:$0xff] }
 0x1a9   : > { %5301 = vmatpush1.bf16.msra.mxu0 %v7566_v30  ;;  %5463 = vmatpush3.bf16.msra.mxu1 %v7567_v23  ;;  %v7574_v30 = vld [vmem:[#allocation29_spill] sm:$0xff]  ;;  %v7575_v23 = vld [vmem:[#allocation30_spill] sm:$0xff] }
 0x1aa   : > { %5303 = vmatprep.subr.bf16.mxu0 %v7568_v19  ;;  %5464 = vmatprep.subr.bf16.mxu1 %v7507_v7  ;;  %v7576_v19 = vand.u32 4294901760, %v5836_v17  ;;  %v7583_v17 = vand.u32 4294901760, %v6079_v38  ;;  %v7590_v38 = vand.u32 4294901760, %v6116_v28  ;;  %v7596_v28 = vand.u32 4294901760, %v6142_v48 }
 0x1ab   : > { %v7602_v48 = vand.u32 4294901760, %v6161_v62  ;;  %v7608_v62 = vand.u32 4294901760, %v6193_v37  ;;  %v7614_v37 = vand.u32 4294901760, %v6226_v61  ;;  %v7620_v61 = vand.u32 4294901760, %v6251_v13  ;;  %v7627_v13 = vld [vmem:[#allocation11_spill] sm:$0xff] }
 0x1ad   : > { %5305 = vmatpush1.bf16.msra.mxu0 %v7569_v18  ;;  %5466 = vmatpush3.bf16.msra.mxu1 %v7570_v9  ;;  %v5312_v18 = vpack.c.bf16 %v7577_v59, %v7576_v19  ;;  %v7578_v9 = vand.u32 4294901760, %v7498_v33  ;;  %v7584_v33 = vand.u32 4294901760, %v6084_v20  ;;  %v7586_v59 = vand.u32 4294901760, %v6095_v43 }
 0x1ae   : > { %5307 = vmatprep.subr.bf16.mxu0 %v7571_v4  ;;  %5467 = vmatprep.subr.bf16.mxu1 %v7507_v7  ;;  %v7579_v4 = vand.u32 4294901760, %v5847_v22  ;;  %v5318_v19 = vpack.c.bf16 %v7588_v53, %v7587_v49  ;;  %v7589_v20 = vand.u32 4294901760, %v6111_v27  ;;  %v7591_v43 = vand.u32 4294901760, %v6121_v31 }
 0x1af   : > { %v5316_v22 = vpack.c.bf16 %v7584_v33, %v7583_v17  ;;  %v7595_v27 = vand.u32 4294901760, %v6139_v36  ;;  %v7597_v31 = vand.u32 4294901760, %v6145_v41  ;;  %v7601_v36 = vand.u32 4294901760, %v6159_v0 }
 0x1b0   : > { %v5471_v3 = vpack.c.bf16 %v7579_v4, %v7578_v9  ;;  %v5320_v55 = vpack.c.bf16 %v7590_v38, %v7589_v20  ;;  %v7594_v4 = vand.u32 4294901760, %v6136_v47  ;;  %v7600_v47 = vand.u32 4294901760, %v6151_v56  ;;  %v7631_v20 = vld [vmem:[#allocation15_spill] sm:$0xff]  ;;  %v7632_v38 = vld [vmem:[#allocation16_spill] sm:$0xff] }
 0x1b1   : > { %5309 = vmatpush1.bf16.msra.mxu0 %v7574_v30  ;;  %5469 = vmatpush3.bf16.msra.mxu1 %v7575_v23  ;;  %v5324_v9 = vpack.c.bf16 %v7596_v28, %v7595_v27  ;;  %v7603_v41 = vand.u32 4294901760, %v6163_v63  ;;  %v7606_v56 = vand.u32 4294901760, %v6178_v60  ;;  %v7607_v0 = vand.u32 4294901760, %v6182_v50  ;;  %v7640_v27 = vld [vmem:[#allocation26_spill] sm:$0xff]  ;;  %v7641_v28 = vld [vmem:[#allocation27_spill] sm:$0xff] }
 0x1b2   : > { %5311 = vmatprep.subr.bf16.mxu0 %v5310_v21  ;;  %5470 = vmatprep.subr.bf16.mxu1 %v7507_v7  ;;  %v5474_v21 = vpack.c.bf16 %v7586_v59, %v7585_v35  ;;  %v5326_v16 = vpack.c.bf16 %v7600_v47, %v7599_v46  ;;  %v7609_v63 = vand.u32 4294901760, %v6197_v44  ;;  %v7612_v60 = vand.u32 4294901760, %v7491_v39 }
 0x1b3   : > { %v5330_v17 = vpack.c.bf16 %v7606_v56, %v7605_v42  ;;  %v5332_v33 = vpack.c.bf16 %v7608_v62, %v7607_v0  ;;  %v7613_v50 = vand.u32 4294901760, %v6224_v57  ;;  %v7615_v44 = vand.u32 4294901760, %v6230_v45 }
 0x1b4   : > { %901 = vmatmul.mubr.f32.vlgmr.msra.gmra.mrb[0].mxu0 %v7582_v5  ;;  %4780 = vmatmul.mubr.f32.vlgmr.msra.gmra.mrb[0].mxu1 %v7582_v5  ;;  %v5334_v35 = vpack.c.bf16 %v7612_v60, %v7611_v8  ;;  %v7618_v39 = vand.u32 4294901760, %v6239_v58  ;;  %v7619_v57 = vand.u32 4294901760, %v6249_v10  ;;  %v7621_v45 = vand.u32 4294901760, %v7500_v11  ;;  %v7624_v58 = vld [vmem:[#allocation8_spill] sm:$0xff]  ;;  %v7626_v10 = vld [vmem:[#allocation10_spill] sm:$0xff] }
 0x1b5   : > { %5313 = vmatpush1.bf16.msra.mxu0 %v5312_v18  ;;  %5472 = vmatpush3.bf16.msra.mxu1 %v5471_v3  ;;  %v7592_v3 = vand.u32 4294901760, %v6126_v32  ;;  %v5322_v18 = vpack.c.bf16 %v7594_v4, %v7593_v12  ;;  %v7598_v32 = vand.u32 4294901760, %v6147_v51  ;;  %v7604_v51 = vand.u32 4294901760, %v6165_v1  ;;  %v7628_v11 = vld [vmem:[#allocation12_spill] sm:$0xff]  ;;  %v7637_v12 = vld [vmem:[#allocation22_spill] sm:$0xff]  ;;  %v7638_v4 = vld [vmem:[#allocation23_spill] sm:$0xff] }
 0x1b6   : > { %5315 = vmatprep.subr.bf16.mxu0 %v5314_v26  ;;  %5473 = vmatprep.subr.bf16.mxu1 %v7507_v7  ;;  %v5328_v26 = vpack.c.bf16 %v7602_v48, %v7601_v36  ;;  %v7610_v1 = vand.u32 4294901760, %v6199_v6  ;;  %v5336_v59 = vpack.c.bf16 %v7614_v37, %v7613_v50  ;;  %v7616_v6 = vand.u32 4294901760, %v6233_v54 }
 0x1b7   : > { %1067 = vmatprep.mubr.f32.mxu0 %v7508_v24  ;;  %4814 = vmatprep.mubr.msk.f32.mxu1 %vm5755_vm0, %v7508_v24  ;;  %v5477_v40 = vpack.c.bf16 %v7592_v3, %v7591_v43  ;;  %v5480_v15 = vpack.c.bf16 %v7598_v32, %v7597_v31  ;;  %v5483_v5 = vpack.c.bf16 %v7604_v51, %v7603_v41  ;;  %v7622_v54 = vand.u32 4294901760, %v6258_v14  ;;  %v7625_v14 = vld [vmem:[#allocation9_spill] sm:$0xff]  ;;  %v7634_v43 = vld [vmem:[#allocation18_spill] sm:$0xff]  ;;  %v7635_v3 = vld [vmem:[#allocation19_spill] sm:$0xff] }
 0x1b8   : > { %v5338_v49 = vpack.c.bf16 %v7618_v39, %v7617_v52  ;;  %v5340_v53 = vpack.c.bf16 %v7620_v61, %v7619_v57 }
 0x1b9   : > { %5317 = vmatpush1.bf16.msra.mxu0 %v5316_v22  ;;  %5475 = vmatpush3.bf16.msra.mxu1 %v5474_v21  ;;  %v5486_v22 = vpack.c.bf16 %v7610_v1, %v7609_v63  ;;  %v5489_v21 = vpack.c.bf16 %v7616_v6, %v7615_v44 }
 0x1ba   : > { %5319 = vmatprep.subr.bf16.mxu0 %v5318_v19  ;;  %5476 = vmatprep.subr.bf16.mxu1 %v7507_v7  ;;  %v5492_v19 = vpack.c.bf16 %v7622_v54, %v7621_v45 }
 0x1bd   : > { %5321 = vmatpush1.bf16.msra.mxu0 %v5320_v55  ;;  %5478 = vmatpush3.bf16.msra.mxu1 %v5477_v40  ;;  %v7633_v55 = vld [vmem:[#allocation17_spill] sm:$0xff]  ;;  %v7636_v40 = vld [vmem:[#allocation20_spill] sm:$0xff] }
 0x1be   : > { %5323 = vmatprep.subr.bf16.mxu0 %v5322_v18  ;;  %5479 = vmatprep.subr.bf16.mxu1 %v7507_v7  ;;  %v7639_v18 = vld [vmem:[#allocation24_spill] sm:$0xff] }
 0x1c1   : > { %5325 = vmatpush1.bf16.msra.mxu0 %v5324_v9  ;;  %5481 = vmatpush3.bf16.msra.mxu1 %v5480_v15  ;;  %v7642_v9 = vld [vmem:[#allocation28_spill] sm:$0xff] }
 0x1c2   : > { %5327 = vmatprep.subr.bf16.mxu0 %v5326_v16  ;;  %5482 = vmatprep.subr.bf16.mxu1 %v7507_v7 }
 0x1c5   : > { %5329 = vmatpush1.bf16.msra.mxu0 %v5328_v26  ;;  %5484 = vmatpush3.bf16.msra.mxu1 %v5483_v5 }
 0x1c6   : > { %5331 = vmatprep.subr.bf16.mxu0 %v5330_v17  ;;  %5485 = vmatprep.subr.bf16.mxu1 %v7507_v7 }
 0x1c9   : > { %5333 = vmatpush1.bf16.msra.mxu0 %v5332_v33  ;;  %5487 = vmatpush3.bf16.msra.mxu1 %v5486_v22 }
 0x1ca   : > { %5335 = vmatprep.subr.bf16.mxu0 %v5334_v35  ;;  %5488 = vmatprep.subr.bf16.mxu1 %v7507_v7 }
 0x1cd   : > { %5337 = vmatpush1.bf16.msra.mxu0 %v5336_v59  ;;  %5490 = vmatpush3.bf16.msra.mxu1 %v5489_v21 }
 0x1ce   : > { %5339 = vmatprep.subr.bf16.mxu0 %v5338_v49  ;;  %5491 = vmatprep.subr.bf16.mxu1 %v7507_v7 }
 0x1d1   : > { %5341 = vmatpush1.bf16.msra.mxu0 %v5340_v53  ;;  %5493 = vmatpush3.bf16.msra.mxu1 %v5492_v19 }
 0x1d2   : > { %5343 = vmatprep.subr.bf16.mxu0 %v7549_v2  ;;  %5494 = vmatprep.subr.bf16.mxu1 %v7507_v7  ;;  %v7629_v2 = vld [vmem:[#allocation13_spill] sm:$0xff] }
 0x1d4   : > { %1069 = vmatmul.mubr.f32.vlgmr.msra.gmra.mrb[0].mxu0 %v6556_v29  ;;  %4815 = vmatmul.mubr.f32.vlgmr.msra.gmra.mrb[0].mxu1 %v6556_v29 }
 0x1d5   : > { %5345 = vmatpush1.bf16.msra.mxu0 %v7551_v34  ;;  %5496 = vmatpush3.bf16.msra.mxu1 %v7623_v25  ;;  %v7630_v34 = vld [vmem:[#allocation14_spill] sm:$0xff] }
 0x1d6   : > { %5347 = vmatprep.subr.bf16.mxu0 %v7624_v58  ;;  %5497 = vmatprep.subr.bf16.mxu1 %v7507_v7 }
 0x1d7   : > { %1171 = vmatprep.mubr.f32.mxu0 %v7508_v24  ;;  %4849 = vmatprep.mubr.msk.f32.mxu1 %vm5755_vm0, %v7508_v24 }
 0x1d9   : > { %5349 = vmatpush1.bf16.msra.mxu0 %v7625_v14  ;;  %5499 = vmatpush3.bf16.msra.mxu1 %v7626_v10 }
 0x1da   : > { %5351 = vmatprep.subr.bf16.mxu0 %v7627_v13  ;;  %5500 = vmatprep.subr.bf16.mxu1 %v7507_v7 }
 0x1dd   : > { %5353 = vmatpush1.bf16.msra.mxu0 %v7628_v11  ;;  %5502 = vmatpush3.bf16.msra.mxu1 %v7629_v2 }
 0x1de   : > { %5355 = vmatprep.subr.bf16.mxu0 %v7630_v34  ;;  %5503 = vmatprep.subr.bf16.mxu1 %v7507_v7 }
 0x1e1   : > { %5357 = vmatpush1.bf16.msra.mxu0 %v7631_v20  ;;  %5505 = vmatpush3.bf16.msra.mxu1 %v7632_v38 }
 0x1e2   : > { %5359 = vmatprep.subr.bf16.mxu0 %v7633_v55  ;;  %5506 = vmatprep.subr.bf16.mxu1 %v7507_v7 }
 0x1e5   : > { %5361 = vmatpush1.bf16.msra.mxu0 %v7634_v43  ;;  %5508 = vmatpush3.bf16.msra.mxu1 %v7635_v3 }
 0x1e6   : > { %5363 = vmatprep.subr.bf16.mxu0 %v7636_v40  ;;  %5509 = vmatprep.subr.bf16.mxu1 %v7507_v7 }
 0x1e9   : > { %5365 = vmatpush1.bf16.msra.mxu0 %v7637_v12  ;;  %5511 = vmatpush3.bf16.msra.mxu1 %v7638_v4 }
 0x1ea   : > { %5367 = vmatprep.subr.bf16.mxu0 %v7639_v18  ;;  %5512 = vmatprep.subr.bf16.mxu1 %v7507_v7 }
 0x1ed   : > { %5369 = vmatpush1.bf16.msra.mxu0 %v7640_v27  ;;  %5514 = vmatpush3.bf16.msra.mxu1 %v7641_v28 }
 0x1ee   : > { %5371 = vmatprep.subr.bf16.mxu0 %v7642_v9  ;;  %5515 = vmatprep.subr.bf16.mxu1 %v7507_v7 }
 0x1f1   : > { %5373 = vmatpush1.bf16.msra.mxu0 %v7574_v30  ;;  %5517 = vmatpush3.bf16.msra.mxu1 %v7575_v23 }
 0x1f2   : > { %4882 = vmatprep.subr.mxu1 %v7508_v24  ;;  %4852 = vmatprep.subr.mxu0 %v7508_v24 }
 0x1f4   : > { %1173 = vmatmul.mubr.f32.vlgmr.msra.gmra.mrb[0].mxu0 %v6556_v29  ;;  %4850 = vmatmul.mubr.f32.vlgmr.msra.gmra.mrb[0].mxu1 %v6556_v29 }
 0x1f5   : > { %4854 = vmatprep.mubr.msk.f32.mxu0 %vm5755_vm0, %v7508_v24  ;;  %4884 = vmatprep.mubr.msk.f32.mxu1 %vm5755_vm0, %v7508_v24 }
 0x2c7   : > { %v1174_v31 = vpop.f32.mrb[0].mxu0  ;;  %v6875_v32 = vpop.f32.mrb[0].mxu1 }
 0x2c8   : > { %v1822_v30 = vsel %vm1820_vm1, %v1174_v31, 0  ;;  %v6879_v23 = vand.u32 4294901760, %v6875_v32  ;;  %v4851_v15 = vpop.f32.mrb[1].mxu1  ;;  %2735 = vrot.lane.b32.xlu1 %v1174_v31, %s5756_s27  ;;  %v1176_v29 = vpop.f32.mrb[1].mxu0 }
 0x2c9   : > { %v1893_v46 = vand.u32 4294901760, %v1822_v30  ;;  %v1825_v47 = vsel %vm1820_vm1, %v1176_v29, 0 }
 0x2ca   : > { %v1828_v16 = vand.u32 4294901760, %v1825_v47  ;;  %4883 = vmatpush3.msra.mxu1 %v6879_v23  ;;  %v2367_v38 = vsub.f32 %v6875_v32, %v6879_v23 }
 0x2cb   : > { %v1894_v36 = vsub.f32 %v1822_v30, %v1893_v46  ;;  %4887 = vmatprep.subr.mxu1 %v7508_v24 }
 0x2cc   : > { %v1905_v48 = vsub.f32 %v1825_v47, %v1828_v16  ;;  %2737 = vrot.lane.b32.xlu1 %v1176_v29, %s5756_s27  ;;  %4853 = vmatpush3.xpose.msra.mxu0 %v1828_v16  ;;  %v2368_v40 = vand.u32 4294901760, %v2367_v38 }
 0x2cd   : > { %v1895_v26 = vand.u32 4294901760, %v1894_v36  ;;  %4857 = vmatprep.subr.mxu0 %v7508_v24 }
 0x2ce   : > { %v1906_v41 = vand.u32 4294901760, %v1905_v48  ;;  %v2369_v18 = vsub.f32 %v2367_v38, %v2368_v40 }
 0x2cf   : > { %v1896_v51 = vsub.f32 %v1894_v36, %v1895_v26 }
 0x2d0   : > { %v1907_v5 = vsub.f32 %v1905_v48, %v1906_v41  ;;  %v2370_v9 = vand.u32 4294901760, %v2369_v18  ;;  %v3668_v18 = vld [vmem:[%s7300_s4 + $0x48] sm:$0xff] }
 0x2d1   : > { %v1897_v42 = vand.u32 4294901760, %v1896_v51 }
 0x2d2   : > { %v1908_v56 = vand.u32 4294901760, %v1907_v5 }
 0x2d3   : > { %4855 = vmatmul.mubr.f32.vlgmr.msra.gmra.mrb[2].mxu0 %v1897_v42  ;;  %v3659_v42 = vld [vmem:[%s7300_s4] sm:$0xff] }
 0x2d4   : > { %4858 = vmatpush3.xpose.msra.mxu0 %v1908_v56  ;;  %4859 = vmatprep.mubr.msk.f32.mxu0 %vm5755_vm0, %v7508_v24  ;;  %v3660_v56 = vld [vmem:[%s7300_s4 + $0x8] sm:$0xff] }
 0x2d5   : > { %4862 = vmatprep.subr.mxu0 %v7508_v24 }
 0x2db   : > { %4860 = vmatmul.mubr.f32.vlgmr.msra.gmra.mrb[2].mxu0 %v1893_v46 }
 0x2dc   : > { %4863 = vmatpush3.xpose.msra.mxu0 %v1905_v48  ;;  %4864 = vmatprep.mubr.msk.f32.mxu0 %vm5755_vm0, %v7508_v24 }
 0x2dd   : > { %4867 = vmatprep.subr.mxu0 %v7508_v24 }
 0x2e3   : > { %4865 = vmatmul.mubr.f32.vlgmr.msra.gmra.mrb[2].mxu0 %v1894_v36 }
 0x2e4   : > { %4868 = vmatpush3.xpose.msra.mxu0 %v1828_v16  ;;  %4869 = vmatprep.mubr.msk.f32.mxu0 %vm5755_vm0, %v7508_v24 }
 0x2e5   : > { %4872 = vmatprep.subr.mxu0 %v7508_v24 }
 0x2eb   : > { %4870 = vmatmul.mubr.f32.vlgmr.msra.gmra.mrb[2].mxu0 %v1895_v26 }
 0x2ec   : > { %4873 = vmatpush3.xpose.msra.mxu0 %v1906_v41  ;;  %4874 = vmatprep.mubr.msk.f32.mxu0 %vm5755_vm0, %v7508_v24 }
 0x2ed   : > { %4877 = vmatprep.subr.mxu0 %v7508_v24 }
 0x2f3   : > { %4875 = vmatmul.mubr.f32.vlgmr.msra.gmra.mrb[2].mxu0 %v1893_v46 }
 0x2f4   : > { %4878 = vmatpush3.xpose.msra.mxu0 %v1828_v16  ;;  %4879 = vmatprep.mubr.msk.f32.mxu0 %vm5755_vm0, %v7508_v24 }
 0x2f5   : > { %4912 = vmatprep.subr.mxu0 %v7508_v24 }
 0x2fb   : > { %4880 = vmatmul.mubr.f32.vlgmr.msra.gmra.mrb[2].mxu0 %v1893_v46 }
 0x2fc   : > { %4914 = vmatprep.mubr.msk.f32.mxu0 %vm5755_vm0, %v7508_v24 }
 0x33a   : > { %v2736_v17 = vpop.permute.xlu1 %2735 }
 0x33b   : > { %v2739_v0 = vsel %vm1820_vm1, %v2736_v17, 0  ;;  %v3661_v17 = vld [vmem:[%s7300_s4 + $0x10] sm:$0xff] }
 0x33c   : > { %v2809_v62 = vand.u32 4294901760, %v2739_v0 }
 0x33e   : > { %v2810_v33 = vsub.f32 %v2739_v0, %v2809_v62  ;;  %v2738_v63 = vpop.permute.xlu1 %2737  ;;  %v3683_v0 = vand.u32 4294901760, %v3659_v42 }
 0x33f   : > { %v2741_v1 = vsel %vm1820_vm1, %v2738_v63, 0  ;;  %v3689_v63 = vand.u32 4294901760, %v3661_v17 }
 0x340   : > { %v2811_v22 = vand.u32 4294901760, %v2810_v33  ;;  %v2744_v8 = vand.u32 4294901760, %v2741_v1 }
 0x342   : > { %v2812_v60 = vsub.f32 %v2810_v33, %v2811_v22  ;;  %v2821_v35 = vsub.f32 %v2741_v1, %v2744_v8  ;;  %4913 = vmatpush3.xpose.msra.mxu0 %v2744_v8  ;;  %v3663_v1 = vld [vmem:[%s7300_s4 + $0x20] sm:$0xff] }
 0x343   : > { %4917 = vmatprep.subr.mxu0 %v7508_v24 }
 0x344   : > { %v2813_v50 = vand.u32 4294901760, %v2812_v60  ;;  %v2822_v37 = vand.u32 4294901760, %v2821_v35  ;;  %v3695_v60 = vand.u32 4294901760, %v3663_v1 }
 0x346   : > { %v2823_v59 = vsub.f32 %v2821_v35, %v2822_v37  ;;  %4915 = vmatmul.mubr.f32.vlgmr.msra.gmra.mrb[4].mxu0 %v2813_v50  ;;  %v3665_v50 = vld [vmem:[%s7300_s4 + $0x30] sm:$0xff] }
 0x347   : > { %4919 = vmatprep.mubr.msk.f32.mxu0 %vm5755_vm0, %v7508_v24 }
 0x348   : > { %v2824_v44 = vand.u32 4294901760, %v2823_v59 }
 0x34a   : > { %4918 = vmatpush3.xpose.msra.mxu0 %v2824_v44  ;;  %v6996_v44 = vsub.f32 %v3661_v17, %v3689_v63 }
 0x34b   : > { %4922 = vmatprep.subr.mxu0 %v7508_v24 }
 0x34e   : > { %4920 = vmatmul.mubr.f32.vlgmr.msra.gmra.mrb[4].mxu0 %v2809_v62 }
 0x34f   : > { %4923 = vmatpush3.xpose.msra.mxu0 %v2821_v35  ;;  %4924 = vmatprep.mubr.msk.f32.mxu0 %vm5755_vm0, %v7508_v24 }
 0x350   : > { %4927 = vmatprep.subr.mxu0 %v7508_v24 }
 0x356   : > { %4925 = vmatmul.mubr.f32.vlgmr.msra.gmra.mrb[4].mxu0 %v2810_v33  ;;  %v3662_v33 = vld [vmem:[%s7300_s4 + $0x18] sm:$0xff] }
 0x357   : > { %4928 = vmatpush3.xpose.msra.mxu0 %v2744_v8  ;;  %4929 = vmatprep.mubr.msk.f32.mxu0 %vm5755_vm0, %v7508_v24 }
 0x358   : > { %4932 = vmatprep.subr.mxu0 %v7508_v24 }
 0x35e   : > { %4930 = vmatmul.mubr.f32.vlgmr.msra.gmra.mrb[4].mxu0 %v2811_v22  ;;  %v3664_v22 = vld [vmem:[%s7300_s4 + $0x28] sm:$0xff] }
 0x35f   : > { %4933 = vmatpush3.xpose.msra.mxu0 %v2822_v37  ;;  %4934 = vmatprep.mubr.msk.f32.mxu0 %vm5755_vm0, %v7508_v24  ;;  %v3698_v35 = vand.u32 4294901760, %v3664_v22  ;;  %v6992_v37 = vsub.f32 %v3659_v42, %v3683_v0 }
 0x360   : > { %4937 = vmatprep.subr.mxu0 %v7508_v24 }
 0x366   : > { %4935 = vmatmul.mubr.f32.vlgmr.msra.gmra.mrb[4].mxu0 %v2809_v62 }
 0x367   : > { %4938 = vmatpush3.xpose.msra.mxu0 %v2744_v8  ;;  %4939 = vmatprep.mubr.msk.f32.mxu0 %vm5755_vm0, %v7508_v24  ;;  %v3692_v8 = vand.u32 4294901760, %v3662_v33 }
 0x368   : > { %5518 = vmatprep.subr.bf16.mxu0 %v7507_v7 }
 0x36e   : > { %4940 = vmatmul.mubr.f32.vlgmr.msra.gmra.mrb[4].mxu0 %v2809_v62  ;;  %v3686_v62 = vand.u32 4294901760, %v3660_v56 }
 0x36f   : > { %5004 = vmatprep.mubr.msk.f32.mxu0 %vm5755_vm0, %v7508_v24 }
 0x370   : > { %v6994_v59 = vsub.f32 %v3660_v56, %v3686_v62 }
 0x3ce   : > { %v2269_v6 = vpop.f32.mrb[2].mxu0 }
 0x3cf   : > { %v2273_v21 = vmul.f32 0.125, %v2269_v6  ;;  %v4881_v52 = vpop.f32.mrb[3].mxu0  ;;  %v6998_v6 = vpack.c.bf16 %v3686_v62, %v3683_v0 }
 0x3d0   : > { %v7003_v52 = vsub.f32 %v3662_v33, %v3692_v8 }
 0x3d1   : > { %v2275_v39 = vsel %vm2274_vm2, %v2273_v21, -inf  ;;  %5520 = vmatpush3.bf16.msra.mxu0 %v6998_v6 }
 0x3d2   : > { %2276 = vmax.xlane.f32.xlu0 %v2275_v39  ;;  %v7005_v39 = vsub.f32 %v3663_v1, %v3695_v60  ;;  %5521 = vmatprep.subr.bf16.mxu0 %v7507_v7 }
 0x441   : > { %v3185_v49 = vpop.f32.mrb[4].mxu0 }
 0x442   : > { %v3189_v57 = vmul.f32 0.125, %v3185_v49  ;;  %v4941_v61 = vpop.f32.mrb[5].mxu0  ;;  %v7007_v49 = vsub.f32 %v3664_v22, %v3698_v35 }
 0x443   : > { %v3776_v61 = vand.u32 4294901760, %v6992_v37 }
 0x444   : > { %v3190_v53 = vsel %vm2274_vm2, %v3189_v57, -inf }
 0x445   : > { %3191 = vmax.xlane.f32.xlu1 %v3190_v53  ;;  %v3783_v53 = vand.u32 4294901760, %v6994_v59 }
 0x45f   : > { %v2277_v45 = vpop.xlane.xlu0 %2276 }
 0x460   : > { %v2278_v54 = vsub.f32 %v2273_v21, %v2277_v45  ;;  %v3666_v21 = vld [vmem:[%s7300_s4 + $0x38] sm:$0xff]  ;;  %v3790_v45 = vand.u32 4294901760, %v6996_v44 }
 0x462   : > { %v2279_v19 = vmul.f32 1.442695, %v2278_v54  ;;  %v3701_v54 = vand.u32 4294901760, %v3665_v50 }
 0x464   : > { %5736 = vpow2.f32 %v2279_v19  ;;  %v3797_v19 = vand.u32 4294901760, %v7003_v52 }
 0x46e   : > { %v5737_v25 = vpop.eup %5736 }
 0x46f   : > { %v2281_v58 = vsel %vm2274_vm2, %v5737_v25, 0.0 }
 0x470   : > { %2282 = vadd.xlane.f32.xlu0 %v2281_v58  ;;  %v3811_v58 = vand.u32 4294901760, %v7007_v49 }
 0x4d2   : > { %v3192_v14 = vpop.xlane.xlu1 %3191 }
 0x4d3   : > { %v3193_v10 = vsub.f32 %v3189_v57, %v3192_v14  ;;  %v7009_v57 = vpack.c.bf16 %v3692_v8, %v3689_v63  ;;  %v3704_v14 = vand.u32 4294901760, %v3666_v21 }
 0x4d5   : > { %v3194_v13 = vmul.f32 1.442695, %v3193_v10  ;;  %v3777_v10 = vsub.f32 %v6992_v37, %v3776_v61  ;;  %5523 = vmatpush3.bf16.msra.mxu0 %v7009_v57  ;;  %v7080_v42 = vpack.c.bf16 %v3704_v14, %v3701_v54 }
 0x4d6   : > { %5524 = vmatprep.subr.bf16.mxu0 %v7507_v7 }
 0x4d7   : > { %5738 = vpow2.f32 %v3194_v13  ;;  %v3784_v13 = vsub.f32 %v6994_v59, %v3783_v53 }
 0x4e1   : > { %v5739_v11 = vpop.eup %5738 }
 0x4e2   : > { %v3196_v2 = vsel %vm2274_vm2, %v5739_v11, 0.0 }
 0x4e3   : > { %3197 = vadd.xlane.f32.xlu0 %v3196_v2  ;;  %v7028_v2 = vsub.f32 %v3665_v50, %v3701_v54 }
 0x4f9   : > { %3202 = vrot.lane.b32.xlu0 %v6875_v32, %s5756_s27 }
 0x4fd   : > { %v2283_v34 = vpop.xlane.xlu0 %2282 }
 0x4fe   : > { %5740 = vrcp.f32 %v2283_v34  ;;  %v3798_v34 = vsub.f32 %v7003_v52, %v3797_v19 }
 0x508   : > { %v5741_v20 = vpop.eup %5740 }
 0x509   : > { %v2285_v55 = vmul.f32 %v5741_v20, %v5737_v25  ;;  %v3804_v25 = vand.u32 4294901760, %v7005_v39 }
 0x50b   : > { %v2287_v43 = vsel %vm2274_vm2, %v2285_v55, 0  ;;  %v3805_v20 = vsub.f32 %v7005_v39, %v3804_v25  ;;  %v7039_v55 = vsub.f32 %v3666_v21, %v3704_v14 }
 0x50c   : > { %v2355_v3 = vand.u32 4294901760, %v2287_v43 }
 0x50e   : > { %v2356_v12 = vsub.f32 %v2287_v43, %v2355_v3  ;;  %v3667_v43 = vld [vmem:[%s7300_s4 + $0x40] sm:$0xff] }
 0x510   : > { %v2357_v4 = vand.u32 4294901760, %v2356_v12 }
 0x512   : > { %v2358_v27 = vsub.f32 %v2356_v12, %v2357_v4 }
 0x514   : > { %v2359_v28 = vand.u32 4294901760, %v2358_v27  ;;  %v3799_v27 = vand.u32 4294901760, %v3798_v34 }
 0x516   : > { %4885 = vmatmul.mubr.f32.vlgmr.msra.gmra.mrb[2].mxu1 %v2359_v28  ;;  %v3825_v28 = vand.u32 4294901760, %v7039_v55 }
 0x517   : > { %4888 = vmatpush3.msra.mxu1 %v2370_v9  ;;  %4889 = vmatprep.mubr.msk.f32.mxu1 %vm5755_vm0, %v7508_v24  ;;  %v3669_v9 = vld [vmem:[%s7300_s4 + $0x50] sm:$0xff] }
 0x518   : > { %4892 = vmatprep.subr.mxu1 %v7508_v24  ;;  %v3713_v56 = vand.u32 4294901760, %v3669_v9 }
 0x51a   : > { %v7087_v1 = vsub.f32 %v3669_v9, %v3713_v56 }
 0x51e   : > { %4890 = vmatmul.mubr.f32.vlgmr.msra.gmra.mrb[2].mxu1 %v2355_v3 }
 0x51f   : > { %4893 = vmatpush3.msra.mxu1 %v2367_v38  ;;  %4894 = vmatprep.mubr.msk.f32.mxu1 %vm5755_vm0, %v7508_v24  ;;  %v3812_v38 = vsub.f32 %v7007_v49, %v3811_v58 }
 0x520   : > { %4897 = vmatprep.subr.mxu1 %v7508_v24 }
 0x526   : > { %4895 = vmatmul.mubr.f32.vlgmr.msra.gmra.mrb[2].mxu1 %v2356_v12 }
 0x527   : > { %4898 = vmatpush3.msra.mxu1 %v6879_v23  ;;  %4899 = vmatprep.mubr.msk.f32.mxu1 %vm5755_vm0, %v7508_v24 }
 0x528   : > { %4902 = vmatprep.subr.mxu1 %v7508_v24 }
 0x52e   : > { %4900 = vmatmul.mubr.f32.vlgmr.msra.gmra.mrb[2].mxu1 %v2357_v4  ;;  %v3818_v4 = vand.u32 4294901760, %v7028_v2 }
 0x52f   : > { %4903 = vmatpush3.msra.mxu1 %v2368_v40  ;;  %4904 = vmatprep.mubr.msk.f32.mxu1 %vm5755_vm0, %v7508_v24  ;;  %v3785_v40 = vand.u32 4294901760, %v3784_v13  ;;  %v3846_v13 = vand.u32 4294901760, %v7087_v1 }
 0x530   : > { %4907 = vmatprep.subr.mxu1 %v7508_v24 }
 0x536   : > { %4905 = vmatmul.mubr.f32.vlgmr.msra.gmra.mrb[2].mxu1 %v2355_v3 }
 0x537   : > { %4908 = vmatpush3.msra.mxu1 %v6879_v23  ;;  %4909 = vmatprep.mubr.msk.f32.mxu1 %vm5755_vm0, %v7508_v24 }
 0x538   : > { %4942 = vmatprep.subr.mxu1 %v7508_v24 }
 0x53e   : > { %4910 = vmatmul.mubr.f32.vlgmr.msra.gmra.mrb[2].mxu1 %v2355_v3  ;;  %v3778_v3 = vand.u32 4294901760, %v3777_v10 }
 0x53f   : > { %4944 = vmatprep.mubr.msk.f32.mxu1 %vm5755_vm0, %v7508_v24 }
 0x570   : > { %v3198_v31 = vpop.xlane.xlu0 %3197 }
 0x571   : > { %5742 = vrcp.f32 %v3198_v31  ;;  %v5543_v31 = vpack.c.bf16 %v3785_v40, %v3778_v3 }
 0x574   : > { %v3203_v32 = vpop.permute.xlu0 %3202 }
 0x575   : > { %v3209_v30 = vand.u32 4294901760, %v3203_v32 }
 0x577   : > { %4943 = vmatpush3.msra.mxu1 %v3209_v30  ;;  %v3286_v46 = vsub.f32 %v3203_v32, %v3209_v30  ;;  %v3819_v32 = vsub.f32 %v7028_v2, %v3818_v4 }
 0x578   : > { %4947 = vmatprep.subr.mxu1 %v7508_v24 }
 0x579   : > { %v3287_v16 = vand.u32 4294901760, %v3286_v46  ;;  %v3820_v17 = vand.u32 4294901760, %v3819_v32 }
 0x57b   : > { %v5743_v15 = vpop.eup %5742  ;;  %v3288_v26 = vsub.f32 %v3286_v46, %v3287_v16 }
 0x57c   : > { %v3200_v29 = vmul.f32 %v5743_v15, %v5739_v11  ;;  %v3791_v11 = vsub.f32 %v6996_v44, %v3790_v45  ;;  %v3707_v15 = vand.u32 4294901760, %v3667_v43 }
 0x57d   : > { %v3289_v5 = vand.u32 4294901760, %v3288_v26  ;;  %v7075_v26 = vld [vmem:[%s7300_s4 + $0x68] sm:$0xff] }
 0x57e   : > { %v3206_v23 = vsel %vm2274_vm2, %v3200_v29, 0  ;;  %v3792_v12 = vand.u32 4294901760, %v3791_v11  ;;  %v3670_v29 = vld [vmem:[%s7300_s4 + $0x58] sm:$0xff]  ;;  %v3722_v8 = vand.u32 4294901760, %v7075_v26 }
 0x57f   : > { %v3274_v47 = vand.u32 4294901760, %v3206_v23  ;;  %v3716_v33 = vand.u32 4294901760, %v3670_v29 }
 0x580   : > { %v7115_v34 = vsub.f32 %v7075_v26, %v3722_v8 }
 0x581   : > { %v3275_v36 = vsub.f32 %v3206_v23, %v3274_v47  ;;  %v3806_v23 = vand.u32 4294901760, %v3805_v20  ;;  %v7102_v54 = vsub.f32 %v3670_v29, %v3716_v33 }
 0x583   : > { %v3276_v48 = vand.u32 4294901760, %v3275_v36 }
 0x585   : > { %v3277_v41 = vsub.f32 %v3275_v36, %v3276_v48 }
 0x587   : > { %v3278_v51 = vand.u32 4294901760, %v3277_v41 }
 0x589   : > { %4945 = vmatmul.mubr.f32.vlgmr.msra.gmra.mrb[4].mxu1 %v3278_v51  ;;  %v5546_v51 = vpack.c.bf16 %v3799_v27, %v3792_v12  ;;  %v7125_v12 = vpack.c.bf16 %v3716_v33, %v3713_v56  ;;  %v3847_v27 = vsub.f32 %v7087_v1, %v3846_v13 }
 0x58a   : > { %4948 = vmatpush3.msra.mxu1 %v3289_v5  ;;  %4949 = vmatprep.mubr.msk.f32.mxu1 %vm5755_vm0, %v7508_v24  ;;  %v7078_v5 = vsub.f32 %v3667_v43, %v3707_v15 }
 0x58b   : > { %4952 = vmatprep.subr.mxu1 %v7508_v24 }
 0x58c   : > { %v3832_v63 = vand.u32 4294901760, %v7078_v5 }
 0x58e   : > { %v3833_v10 = vsub.f32 %v7078_v5, %v3832_v63 }
 0x591   : > { %4950 = vmatmul.mubr.f32.vlgmr.msra.gmra.mrb[4].mxu1 %v3274_v47 }
 0x592   : > { %4953 = vmatpush3.msra.mxu1 %v3286_v46  ;;  %4954 = vmatprep.mubr.msk.f32.mxu1 %vm5755_vm0, %v7508_v24 }
 0x593   : > { %4957 = vmatprep.subr.mxu1 %v7508_v24 }
 0x599   : > { %4955 = vmatmul.mubr.f32.vlgmr.msra.gmra.mrb[4].mxu1 %v3275_v36  ;;  %v3710_v36 = vand.u32 4294901760, %v3668_v18 }
 0x59a   : > { %4958 = vmatpush3.msra.mxu1 %v3209_v30  ;;  %4959 = vmatprep.mubr.msk.f32.mxu1 %vm5755_vm0, %v7508_v24 }
 0x59b   : > { %4962 = vmatprep.subr.mxu1 %v7508_v24  ;;  %v7083_v62 = vsub.f32 %v3668_v18, %v3710_v36  ;;  %v7104_v14 = vpack.c.bf16 %v3710_v36, %v3707_v15  ;;  %v3834_v18 = vand.u32 4294901760, %v3833_v10 }
 0x59d   : > { %v3839_v21 = vand.u32 4294901760, %v7083_v62 }
 0x59f   : > { %v3840_v20 = vsub.f32 %v7083_v62, %v3839_v21 }
 0x5a1   : > { %4960 = vmatmul.mubr.f32.vlgmr.msra.gmra.mrb[4].mxu1 %v3276_v48  ;;  %v7070_v48 = vld [vmem:[%s7300_s4 + $0x60] sm:$0xff]  ;;  %v3841_v32 = vand.u32 4294901760, %v3840_v20 }
 0x5a2   : > { %4963 = vmatpush3.msra.mxu1 %v3287_v16  ;;  %4964 = vmatprep.mubr.msk.f32.mxu1 %vm5755_vm0, %v7508_v24  ;;  %v3826_v16 = vsub.f32 %v7039_v55, %v3825_v28  ;;  %v3719_v22 = vand.u32 4294901760, %v7070_v48 }
 0x5a3   : > { %4967 = vmatprep.subr.mxu1 %v7508_v24 }
 0x5a4   : > { %v3827_v0 = vand.u32 4294901760, %v3826_v16  ;;  %v7112_v11 = vsub.f32 %v7070_v48, %v3719_v22  ;;  %v5555_v48 = vpack.c.bf16 %v3841_v32, %v3834_v18 }
 0x5a6   : > { %v5552_v40 = vpack.c.bf16 %v3827_v0, %v3820_v17  ;;  %v3860_v9 = vand.u32 4294901760, %v7112_v11 }
 0x5a8   : > { %v3861_v16 = vsub.f32 %v7112_v11, %v3860_v9 }
 0x5a9   : > { %4965 = vmatmul.mubr.f32.vlgmr.msra.gmra.mrb[4].mxu1 %v3274_v47 }
 0x5aa   : > { %4968 = vmatpush3.msra.mxu1 %v3209_v30  ;;  %4969 = vmatprep.mubr.msk.f32.mxu1 %vm5755_vm0, %v7508_v24  ;;  %v7057_v30 = vpack.c.bf16 %v3698_v35, %v3695_v60  ;;  %v7094_v60 = vld [vmem:[%s7300_s4 + $0x70] sm:$0xff]  ;;  %v7099_v35 = vld [vmem:[%s7300_s4 + $0x78] sm:$0xff]  ;;  %v3862_v56 = vand.u32 4294901760, %v3861_v16 }
 0x5ab   : > { %5542 = vmatprep.subr.bf16.mxu1 %v7507_v7  ;;  %v3725_v43 = vand.u32 4294901760, %v7094_v60  ;;  %v3728_v3 = vand.u32 4294901760, %v7099_v35 }
 0x5ac   : > { %5526 = vmatpush3.bf16.msra.mxu0 %v7057_v30 }
 0x5ad   : > { %5527 = vmatprep.subr.bf16.mxu0 %v7507_v7  ;;  %v7137_v29 = vsub.f32 %v7094_v60, %v3725_v43  ;;  %v7169_v18 = vpack.c.bf16 %v3728_v3, %v3725_v43 }
 0x5b0   : > { %5529 = vmatpush3.bf16.msra.mxu0 %v7080_v42 }
 0x5b1   : > { %4970 = vmatmul.mubr.f32.vlgmr.msra.gmra.mrb[4].mxu1 %v3274_v47  ;;  %v3813_v47 = vand.u32 4294901760, %v3812_v38  ;;  %v3853_v38 = vand.u32 4294901760, %v7102_v54  ;;  %5530 = vmatprep.subr.bf16.mxu0 %v7507_v7 }
 0x5b2   : > { %5039 = vmatprep.mubr.msk.f32.mxu1 %vm5755_vm0, %v7508_v24  ;;  %5544 = vmatpush3.bf16.msra.mxu1 %v5543_v31  ;;  %v3867_v31 = vand.u32 4294901760, %v7115_v34 }
 0x5b3   : > { %5545 = vmatprep.subr.bf16.mxu1 %v7507_v7  ;;  %v5549_v50 = vpack.c.bf16 %v3813_v47, %v3806_v23  ;;  %v3854_v15 = vsub.f32 %v7102_v54, %v3853_v38  ;;  %v7140_v23 = vsub.f32 %v7099_v35, %v3728_v3  ;;  %v3848_v47 = vand.u32 4294901760, %v3847_v27 }
 0x5b4   : > { %5532 = vmatpush3.bf16.msra.mxu0 %v7104_v14  ;;  %v3868_v36 = vsub.f32 %v7115_v34, %v3867_v31 }
 0x5b5   : > { %5533 = vmatprep.subr.bf16.mxu0 %v7507_v7  ;;  %v3855_v26 = vand.u32 4294901760, %v3854_v15 }
 0x5b6   : > { %5547 = vmatpush3.bf16.msra.mxu1 %v5546_v51  ;;  %v3881_v51 = vand.u32 4294901760, %v7140_v23  ;;  %v3869_v0 = vand.u32 4294901760, %v3868_v36  ;;  %v5570_v36 = vpack.c.bf16 %v7003_v52, %v6996_v44  ;;  %v5630_v44 = vpack.c.bf16 %v3853_v38, %v3846_v13 }
 0x5b7   : > { %5548 = vmatprep.subr.bf16.mxu1 %v7507_v7  ;;  %v5558_v17 = vpack.c.bf16 %v3855_v26, %v3848_v47  ;;  %v5576_v26 = vpack.c.bf16 %v7039_v55, %v7028_v2  ;;  %v5633_v52 = vpack.c.bf16 %v3867_v31, %v3860_v9 }
 0x5b8   : > { %5535 = vmatpush3.bf16.msra.mxu0 %v7125_v12  ;;  %v3882_v60 = vsub.f32 %v7140_v23, %v3881_v51  ;;  %v5561_v35 = vpack.c.bf16 %v3869_v0, %v3862_v56  ;;  %v5579_v56 = vpack.c.bf16 %v7083_v62, %v7078_v5  ;;  %v5585_v0 = vpack.c.bf16 %v7115_v34, %v7112_v11 }
 0x5b9   : > { %5536 = vmatprep.subr.bf16.mxu0 %v7507_v7 }
 0x5ba   : > { %5550 = vmatpush3.bf16.msra.mxu1 %v5549_v50  ;;  %v3883_v10 = vand.u32 4294901760, %v3882_v60  ;;  %v5615_v60 = vpack.c.bf16 %v3783_v53, %v3776_v61  ;;  %v4387_v61 = vld [vmem:[%s7301_s5] ss:$0 sm:$0xff] }
 0x5bb   : > { %5551 = vmatprep.subr.bf16.mxu1 %v7507_v7 }
 0x5be   : > { %5553 = vmatpush3.bf16.msra.mxu1 %v5552_v40  ;;  %v7165_v40 = vpack.c.bf16 %v3722_v8, %v3719_v22 }
 0x5bf   : > { %5554 = vmatprep.subr.bf16.mxu1 %v7507_v7 }
 0x5c0   : > { %5538 = vmatpush3.bf16.msra.mxu0 %v7165_v40 }
 0x5c1   : > { %5539 = vmatprep.subr.bf16.mxu0 %v7507_v7 }
 0x5c2   : > { %5556 = vmatpush3.bf16.msra.mxu1 %v5555_v48  ;;  %v5573_v48 = vpack.c.bf16 %v7007_v49, %v7005_v39 }
 0x5c3   : > { %5557 = vmatprep.subr.bf16.mxu1 %v7507_v7 }
 0x5c4   : > { %5541 = vmatpush3.bf16.msra.mxu0 %v7169_v18 }
 0x5c5   : > { %5566 = vmatprep.subr.bf16.mxu0 %v7507_v7 }
 0x5c6   : > { %5559 = vmatpush3.bf16.msra.mxu1 %v5558_v17  ;;  %v5582_v17 = vpack.c.bf16 %v7102_v54, %v7087_v1 }
 0x5c7   : > { %5560 = vmatprep.subr.bf16.mxu1 %v7507_v7 }
 0x5ca   : > { %5562 = vmatpush3.bf16.msra.mxu1 %v5561_v35 }
 0x5cb   : > { %5563 = vmatprep.subr.bf16.mxu1 %v7507_v7 }
 0x611   : > { %v7062_v46 = vpop.f32.mrb[2].mxu1 }
 0x612   : > { %v4911_v41 = vpop.f32.mrb[3].mxu1 }
 0x613   : > { %v3874_v41 = vand.u32 4294901760, %v7137_v29 }
 0x615   : > { %v3875_v33 = vsub.f32 %v7137_v29, %v3874_v41  ;;  %v5636_v39 = vpack.c.bf16 %v3881_v51, %v3874_v41 }
 0x617   : > { %v3876_v50 = vand.u32 4294901760, %v3875_v33  ;;  %v5588_v33 = vpack.c.bf16 %v7140_v23, %v7137_v29 }
 0x619   : > { %v5564_v20 = vpack.c.bf16 %v3883_v10, %v3876_v50 }
 0x61b   : > { %5565 = vmatpush3.bf16.msra.mxu1 %v5564_v20 }
 0x61c   : > { %5590 = vmatprep.subr.bf16.mxu1 %v7507_v7 }
 0x684   : > { %v3650_v27 = vpop.f32.mrb[4].mxu1 }
 0x685   : > { %3655 = vrot.lane.b32.xlu0 %v3650_v27, %s5756_s27  ;;  %v4971_v32 = vpop.f32.mrb[5].mxu1 }
 0x6f7   : > { %v3656_v15 = vpop.permute.xlu0 %3655 }
 0x6f8   : > { %v3658_v47 = vsel %vm1820_vm1, %v7062_v46, %v3656_v15  ;;  %v5567_v46 = vpack.c.bf16 %v6994_v59, %v6992_v37  ;;  %v5621_v37 = vpack.c.bf16 %v3811_v58, %v3804_v25  ;;  %v5627_v59 = vpack.c.bf16 %v3839_v21, %v3832_v63  ;;  %v5744_v21 = vld [vmem:[%s5808_s26] sm:$0xff] }
 0x6f9   : > { %v7176_v22 = vand.u32 4294901760, %v3658_v47 }
 0x6fb   : > { %v3764_v8 = vsub.f32 %v3658_v47, %v7176_v22  ;;  %5040 = vmatmul.mubr.f32.vlgmr.msra.gmra.mrb[6].mxu1 %v7176_v22 }
 0x6fc   : > { %5592 = vmatpush3.bf16.msra.mxu1 %v6998_v6  ;;  %5109 = vmatprep.mubr.msk.f32.mxu1 %vm5755_vm0, %v7508_v24 }
 0x6fd   : > { %v3765_v43 = vand.u32 4294901760, %v3764_v8  ;;  %5593 = vmatprep.subr.bf16.mxu1 %v7507_v7 }
 0x6ff   : > { %v3766_v3 = vsub.f32 %v3764_v8, %v3765_v43 }
 0x700   : > { %5595 = vmatpush3.bf16.msra.mxu1 %v7009_v57 }
 0x701   : > { %5596 = vmatprep.subr.bf16.mxu1 %v7507_v7  ;;  %v3767_v16 = vand.u32 4294901760, %v3766_v3 }
 0x703   : > { %5005 = vmatmul.mubr.f32.vlgmr.msra.gmra.mrb[6].mxu0 %v3767_v16 }
 0x704   : > { %5568 = vmatpush3.bf16.msra.mxu0 %v5567_v46  ;;  %5598 = vmatpush3.bf16.msra.mxu1 %v7057_v30 }
 0x705   : > { %5569 = vmatprep.subr.bf16.mxu0 %v7507_v7  ;;  %5599 = vmatprep.subr.bf16.mxu1 %v7507_v7 }
 0x706   : > { %5074 = vmatprep.mubr.msk.f32.mxu0 %vm5755_vm0, %v7508_v24 }
 0x708   : > { %5571 = vmatpush3.bf16.msra.mxu0 %v5570_v36  ;;  %5601 = vmatpush3.bf16.msra.mxu1 %v7080_v42 }
 0x709   : > { %5572 = vmatprep.subr.bf16.mxu0 %v7507_v7  ;;  %5602 = vmatprep.subr.bf16.mxu1 %v7507_v7 }
 0x70c   : > { %5574 = vmatpush3.bf16.msra.mxu0 %v5573_v48  ;;  %5604 = vmatpush3.bf16.msra.mxu1 %v7104_v14 }
 0x70d   : > { %5575 = vmatprep.subr.bf16.mxu0 %v7507_v7  ;;  %5605 = vmatprep.subr.bf16.mxu1 %v7507_v7 }
 0x710   : > { %5577 = vmatpush3.bf16.msra.mxu0 %v5576_v26  ;;  %5607 = vmatpush3.bf16.msra.mxu1 %v7125_v12 }
 0x711   : > { %5578 = vmatprep.subr.bf16.mxu0 %v7507_v7  ;;  %5608 = vmatprep.subr.bf16.mxu1 %v7507_v7 }
 0x714   : > { %5580 = vmatpush3.bf16.msra.mxu0 %v5579_v56  ;;  %5610 = vmatpush3.bf16.msra.mxu1 %v7165_v40 }
 0x715   : > { %5581 = vmatprep.subr.bf16.mxu0 %v7507_v7  ;;  %5611 = vmatprep.subr.bf16.mxu1 %v7507_v7 }
 0x718   : > { %5583 = vmatpush3.bf16.msra.mxu0 %v5582_v17  ;;  %5613 = vmatpush3.bf16.msra.mxu1 %v7169_v18 }
 0x719   : > { %5584 = vmatprep.subr.bf16.mxu0 %v7507_v7  ;;  %5638 = vmatprep.subr.bf16.mxu1 %v7507_v7 }
 0x71b   : > { %5110 = vmatmul.mubr.f32.vlgmr.msra.gmra.mrb[8].mxu1 %v3765_v43 }
 0x71c   : > { %5586 = vmatpush3.bf16.msra.mxu0 %v5585_v0  ;;  %5640 = vmatpush3.bf16.msra.mxu1 %v6998_v6  ;;  %v5618_v6 = vpack.c.bf16 %v3797_v19, %v3790_v45 }
 0x71d   : > { %5587 = vmatprep.subr.bf16.mxu0 %v7507_v7  ;;  %5641 = vmatprep.subr.bf16.mxu1 %v7507_v7 }
 0x71e   : > { %5179 = vmatprep.mubr.msk.f32.mxu1 %vm5755_vm0, %v7508_v24 }
 0x720   : > { %5589 = vmatpush3.bf16.msra.mxu0 %v5588_v33  ;;  %5643 = vmatpush3.bf16.msra.mxu1 %v7009_v57 }
 0x721   : > { %5614 = vmatprep.subr.bf16.mxu0 %v7507_v7  ;;  %5644 = vmatprep.subr.bf16.mxu1 %v7507_v7 }
 0x723   : > { %5075 = vmatmul.mubr.f32.vlgmr.msra.gmra.mrb[8].mxu0 %v3764_v8 }
 0x724   : > { %5616 = vmatpush3.bf16.msra.mxu0 %v5615_v60  ;;  %5646 = vmatpush3.bf16.msra.mxu1 %v7057_v30 }
 0x725   : > { %5617 = vmatprep.subr.bf16.mxu0 %v7507_v7  ;;  %5647 = vmatprep.subr.bf16.mxu1 %v7507_v7 }
 0x726   : > { %5144 = vmatprep.mubr.msk.f32.mxu0 %vm5755_vm0, %v7508_v24  ;;  %v5624_v24 = vpack.c.bf16 %v3825_v28, %v3818_v4 }
 0x728   : > { %5619 = vmatpush3.bf16.msra.mxu0 %v5618_v6  ;;  %5649 = vmatpush3.bf16.msra.mxu1 %v7080_v42 }
 0x729   : > { %5620 = vmatprep.subr.bf16.mxu0 %v7507_v7  ;;  %5650 = vmatprep.subr.bf16.mxu1 %v7507_v7 }
 0x72c   : > { %5622 = vmatpush3.bf16.msra.mxu0 %v5621_v37  ;;  %5652 = vmatpush3.bf16.msra.mxu1 %v7104_v14 }
 0x72d   : > { %5623 = vmatprep.subr.bf16.mxu0 %v7507_v7  ;;  %5653 = vmatprep.subr.bf16.mxu1 %v7507_v7 }
 0x730   : > { %5625 = vmatpush3.bf16.msra.mxu0 %v5624_v24  ;;  %5655 = vmatpush3.bf16.msra.mxu1 %v7125_v12 }
 0x731   : > { %5626 = vmatprep.subr.bf16.mxu0 %v7507_v7  ;;  %5656 = vmatprep.subr.bf16.mxu1 %v7507_v7 }
 0x734   : > { %5628 = vmatpush3.bf16.msra.mxu0 %v5627_v59  ;;  %5658 = vmatpush3.bf16.msra.mxu1 %v7165_v40 }
 0x735   : > { %5629 = vmatprep.subr.bf16.mxu0 %v7507_v7  ;;  %5659 = vmatprep.subr.bf16.mxu1 %v7507_v7 }
 0x738   : > { %5631 = vmatpush3.bf16.msra.mxu0 %v5630_v44  ;;  %5661 = vmatpush3.bf16.msra.mxu1 %v7169_v18 }
 0x739   : > { %5632 = vmatprep.subr.bf16.mxu0 %v7507_v7 }
 0x73b   : > { %5180 = vmatmul.mubr.f32.vlgmr.msra.gmra.mrb[10].mxu1 %v7176_v22 }
 0x73c   : > { %5634 = vmatpush3.bf16.msra.mxu0 %v5633_v52 }
 0x73d   : > { %5635 = vmatprep.subr.bf16.mxu0 %v7507_v7 }
 0x740   : > { %5637 = vmatpush3.bf16.msra.mxu0 %v5636_v39 }
 0x743   : > { %5145 = vmatmul.mubr.f32.vlgmr.msra.gmra.mrb[10].mxu0 %v7176_v22 }
 0x7ce   : > { %v3920_v49 = vpop.f32.mrb[6].mxu1 }
 0x7cf   : > { %v5041_v57 = vpop.f32.mrb[7].mxu1 }
 0x7d6   : > { %v3769_v53 = vpop.f32.mrb[6].mxu0 }
 0x7d7   : > { %v3770_v45 = vadd.f32 %v4387_v61, %v3769_v53  ;;  %v5006_v19 = vpop.f32.mrb[7].mxu0 }
 0x7d9   : > { %v3921_v25 = vadd.f32 %v3920_v49, %v3770_v45 }
 0x7ee   : > { %v4113_v58 = vpop.f32.mrb[8].mxu1 }
 0x7ef   : > { %v5111_v2 = vpop.f32.mrb[9].mxu1 }
 0x7f6   : > { %v4024_v55 = vpop.f32.mrb[8].mxu0 }
 0x7f7   : > { %v4025_v4 = vadd.f32 %v4024_v55, %v3921_v25  ;;  %v5076_v7 = vpop.f32.mrb[9].mxu0 }
 0x7f9   : > { %v4114_v28 = vadd.f32 %v4113_v58, %v4025_v4 }
 0x80e   : > { %v4319_v30 = vpop.f32.mrb[10].mxu1 }
 0x80f   : > { %v5181_v5 = vpop.f32.mrb[11].mxu1 }
 0x816   : > { %v4232_v42 = vpop.f32.mrb[10].mxu0 }
 0x817   : > { %v4233_v62 = vadd.f32 %v4232_v42, %v4114_v28  ;;  %v5146_v63 = vpop.f32.mrb[11].mxu0 }
 0x819   : > { %v4320_v1 = vadd.f32 %v4319_v30, %v4233_v62 }
 0x81b   : > { %v4323_v54 = vadd.f32 %v5744_v21, %v4320_v1 }
 0x81d   : > { %4324 = vst [vmem:[%s246_s20] sm:$0xff] %v4323_v54 }
 0x81e PF: > { %s16_s21 = sadd.s32 1, %s5751_s21  }
 0x81f   : > { %p13_p4 = scmp.ge.s32.totalorder %s16_s21, 4  }
 0x821   :  { %15 = sbr.rel (!%p13_p4) target bundleno = 1 (0x1), region = 74 }

</bundles_post_ra>
